<compile_context>
chip_gen: v7x
topology: tpu7x:2x2x1
jax: 0.10.0
libtpu: 0.0.40
codegen_flags: <defaults>
</compile_context>

<pallas_src>
import jax
import jax.numpy as jnp
from jax import lax
from jax.experimental import pallas as pl
from jax.experimental.pallas import tpu as pltpu

KD = KH = KW = 3            # kernel_size=3, stride=1, padding=1
NTAPS = KD * KH * KW        # 27
W_HALO = 8                  # interior W offset inside the scratch (sublane aligned)


def _stage_padded_tile(x_ref, xlo_ref, xhi_ref, xpad_ref):
    """Stage the current D tile (+ depth halos, + zero padding) into VMEM scratch.

    Only the halo frame is zeroed each step -- the interior is fully
    overwritten, so the full-scratch zero pass of the previous version is gone.
    """
    i = pl.program_id(1)
    n_d = pl.num_programs(1)
    td, h, w, c_in = x_ref.shape[1], x_ref.shape[2], x_ref.shape[3], x_ref.shape[4]
    wpad = xpad_ref.shape[2]
    dt = xpad_ref.dtype

    # H/W frame (never dirtied by data writes, but re-zeroed each step so the
    # kernel stays correct under any grid partitioning / megacore sharding).
    xpad_ref[:, :, :W_HALO, :] = jnp.zeros((td + 2, h + 2, W_HALO, c_in), dt)
    xpad_ref[:, :, W_HALO + w:, :] = jnp.zeros(
        (td + 2, h + 2, wpad - W_HALO - w, c_in), dt)
    xpad_ref[:, 0:1, W_HALO:W_HALO + w, :] = jnp.zeros((td + 2, 1, w, c_in), dt)
    xpad_ref[:, h + 1:h + 2, W_HALO:W_HALO + w, :] = jnp.zeros((td + 2, 1, w, c_in), dt)

    # Interior of the current D tile (sublane-aligned store at W offset 8).
    xpad_ref[1:td + 1, 1:h + 1, W_HALO:W_HALO + w, :] = x_ref[0].astype(dt)

    # Depth halo planes: neighbour slabs inside the volume, zeros at the D edges.
    @pl.when(i > 0)
    def _():
        xpad_ref[0:1, 1:h + 1, W_HALO:W_HALO + w, :] = xlo_ref[0].astype(dt)

    @pl.when(i == 0)
    def _():
        xpad_ref[0:1, 1:h + 1, W_HALO:W_HALO + w, :] = jnp.zeros((1, h, w, c_in), dt)

    @pl.when(i < n_d - 1)
    def _():
        xpad_ref[td + 1:td + 2, 1:h + 1, W_HALO:W_HALO + w, :] = xhi_ref[0].astype(dt)

    @pl.when(i == n_d - 1)
    def _():
        xpad_ref[td + 1:td + 2, 1:h + 1, W_HALO:W_HALO + w, :] = jnp.zeros((1, h, w, c_in), dt)


def _dwsep_fused_kernel(x_ref, xlo_ref, xhi_ref, w_ref, o_ref, xpad_ref):
    """Fused path (small Cin): im2col + 3 accumulated MXU matmuls (one per kw).

    x_ref:    (1, TD, H, W, Cin)        bf16 input tile
    xlo_ref:  (1, 1,  H, W, Cin)        depth slab at d = i*TD - 1 (ignored at i==0)
    xhi_ref:  (1, 1,  H, W, Cin)        depth slab at d = i*TD + TD (ignored at last i)
    w_ref:    (3, 9*Cin, Cout_pad)      bf16 fused depthwise*pointwise weights, kw-major
    o_ref:    (1, TD, H, W, Cout)       f32 output tile (unpadded Cout)
    xpad_ref: (TD+2, H+2, W+16, Cin)    f32 halo scratch
    """
    td, h, w = x_ref.shape[1], x_ref.shape[2], x_ref.shape[3]
    c_in = x_ref.shape[4]
    c_out = o_ref.shape[4]

    _stage_padded_tile(x_ref, xlo_ref, xhi_ref, xpad_ref)
    xp = xpad_ref[...]

    out = None
    for kw in range(KW):
        off = W_HALO - 1 + kw
        cols = [xp[kd:kd + td, kh:kh + h, off:off + w, :]
                for kd in range(KD) for kh in range(KH)]
        patches = (jnp.concatenate(cols, axis=-1)
                   .reshape(td * h * w, KD * KH * c_in)
                   .astype(jnp.bfloat16))
        part = jnp.dot(patches, w_ref[kw], preferred_element_type=jnp.float32)
        out = part if out is None else out + part

    o_ref[0] = out[:, :c_out].reshape(td, h, w, c_out).astype(o_ref.dtype)


def _dwsep_unfused_kernel(x_ref, xlo_ref, xhi_ref, wdw_ref, wpw_ref, o_ref, xpad_ref):
    """Unfused path (large Cin): 27 VPU multiply-adds, then one K=Cin matmul.

    wdw_ref: (27, Cin)        f32 depthwise taps, (kd,kh,kw)-major
    wpw_ref: (Cin, Cout_pad)  bf16 pointwise weights
    """
    td, h, w = x_ref.shape[1], x_ref.shape[2], x_ref.shape[3]
    c_in = x_ref.shape[4]
    c_out = o_ref.shape[4]

    _stage_padded_tile(x_ref, xlo_ref, xhi_ref, xpad_ref)
    xp = xpad_ref[...]

    dw = jnp.zeros((td, h, w, c_in), jnp.float32)
    for kd in range(KD):
        for kh in range(KH):
            for kw in range(KW):
                t = (kd * KH + kh) * KW + kw
                w_t = wdw_ref[t:t + 1, :].reshape(1, 1, 1, c_in)
                off = W_HALO - 1 + kw
                dw = dw + xp[kd:kd + td, kh:kh + h, off:off + w, :] * w_t

    act = dw.reshape(td * h * w, c_in).astype(jnp.bfloat16)
    out = jnp.dot(act, wpw_ref[...], preferred_element_type=jnp.float32)
    o_ref[0] = out[:, :c_out].reshape(td, h, w, c_out).astype(o_ref.dtype)


def _round_up(x, m):
    return (x + m - 1) // m * m


def _vmem_budget_and_limit():
    """Generation-aware VMEM budget (for tile picking) and scoped limit."""
    try:
        cap = int(pltpu.get_tpu_info().vmem_capacity_bytes)
    except Exception:
        cap = 64 * 1024 * 1024                       # conservative (v7x-sized) fallback
    limit = min(cap * 3 // 4, 100 * 1024 * 1024)     # leave headroom below physical
    limit = max(limit, 32 * 1024 * 1024)
    budget = limit * 3 // 4
    return budget, limit


def _tile_vmem_bytes(td, h, w, c_in, c_out, c_out_pad, fused):
    """Estimated per-step VMEM footprint (includes weights, halos, temporaries)."""
    wpad = w + 2 * W_HALO
    m = td * h * w
    b = 0
    b += 2 * td * h * w * c_in * 2                       # input tile, dbl-buffered, bf16
    b += 2 * 2 * h * w * c_in * 2                        # two depth-halo slabs, dbl-buffered
    b += (td + 2) * (h + 2) * wpad * c_in * 4            # f32 halo scratch
    b += 2 * m * c_out * 4                               # output tile, dbl-buffered, f32
    b += 2 * m * c_out_pad * 4                           # matmul result + accumulator temps
    if fused:
        b += 2 * NTAPS * c_in * c_out_pad * 2            # fused weights, dbl-buffered, bf16
        b += 2 * m * KD * KH * c_in * 4                  # per-kw im2col patches + concat temps
    else:
        b += 2 * (NTAPS * c_in * 4 + c_in * c_out_pad * 2)  # dw + pw weights, dbl-buffered
        b += 2 * m * c_in * 4                            # depthwise accumulator + temp
    return b


def _pick_d_tile(n, d, h, w, c_in, c_out, c_out_pad, fused, budget_bytes):
    fitting = [td for td in range(1, d + 1)
               if d % td == 0
               and _tile_vmem_bytes(td, h, w, c_in, c_out, c_out_pad, fused) <= budget_bytes]
    if not fitting:
        return 1
    best = max(fitting)
    # v7x megacore balance: avoid a single-step grid when a >=2-step grid also fits.
    if n * (d // best) < 2:
        multi = [td for td in fitting if d // td >= 2]
        if multi:
            best = max(multi)
    return best


def depthwise_separable_conv3d(x_ncdhw, w_dw, w_pw, d_tile=None, fold_depthwise=None):
    """Depthwise-separable 3D conv (k=3, stride=1, pad=1, bias=False).

    x_ncdhw: (N, Cin, D, H, W); w_dw: (Cin, 1, 3, 3, 3); w_pw: (Cout, Cin, 1, 1, 1).
    """
    n, c_in, d, h, w = x_ncdhw.shape
    c_out = w_pw.shape[0]
    c_out_pad = _round_up(c_out, 128)   # matmul N dim only; HBM output stays unpadded

    if fold_depthwise is None:
        # Folding inflates MXU MACs/voxel from (27*Cin + Cin*Cout) to 27*Cin*Cout
        # and the weight block to 27*Cin*Cout_pad -- only worth it for small Cin.
        fold_depthwise = c_in <= 16

    # Glue: NCDHW -> NDHWC (channels on the lane axis), bf16 for the MXU / DMA.
    x = jnp.transpose(x_ncdhw, (0, 2, 3, 4, 1)).astype(jnp.bfloat16)

    w_dw_k = jnp.transpose(w_dw[:, 0], (1, 2, 3, 0)).astype(jnp.float32)      # (3,3,3,Cin)
    w_pw_k = jnp.transpose(w_pw[:, :, 0, 0, 0], (1, 0)).astype(jnp.float32)   # (Cin, Cout)
    w_pw_pad = jnp.pad(w_pw_k, ((0, 0), (0, c_out_pad - c_out)))              # (Cin, Coutp)

    budget, vmem_limit = _vmem_budget_and_limit()
    if d_tile is None:
        td = _pick_d_tile(n, d, h, w, c_in, c_out, c_out_pad, fold_depthwise, budget)
    else:
        if d % d_tile:
            # TODO(synk): support a ragged last D tile instead of refusing.
            raise ValueError(f"d_tile={d_tile} must divide D={d}")
        td = int(d_tile)
    n_d = d // td

    x_spec = pl.BlockSpec((1, td, h, w, c_in), lambda b, i: (b, i, 0, 0, 0))
    lo_spec = pl.BlockSpec((1, 1, h, w, c_in),
                           lambda b, i: (b, jnp.maximum(i * td - 1, 0), 0, 0, 0))
    hi_spec = pl.BlockSpec((1, 1, h, w, c_in),
                           lambda b, i: (b, jnp.minimum(i * td + td, d - 1), 0, 0, 0))
    out_spec = pl.BlockSpec((1, td, h, w, c_out), lambda b, i: (b, i, 0, 0, 0))
    scratch = [pltpu.VMEM((td + 2, h + 2, w + 2 * W_HALO, c_in), jnp.float32)]
    cparams = pltpu.CompilerParams(
        dimension_semantics=("parallel", "parallel"),
        vmem_limit_bytes=vmem_limit)
    out_shape = jax.ShapeDtypeStruct((n, d, h, w, c_out), jnp.float32)

    if fold_depthwise:
        # W_eff[kw, (kd, kh, cin), cout] = w_dw[cin, 0, kd, kh, kw] * w_pw[cout, cin]
        w_eff = w_dw_k[..., None] * w_pw_pad[None, None, None]         # (3,3,3,Cin,Coutp)
        w_eff = jnp.transpose(w_eff, (2, 0, 1, 3, 4)).reshape(
            KW, KD * KH * c_in, c_out_pad).astype(jnp.bfloat16)
        out = pl.pallas_call(
            _dwsep_fused_kernel,
            out_shape=out_shape,
            grid=(n, n_d),
            in_specs=[x_spec, lo_spec, hi_spec,
                      pl.BlockSpec((KW, KD * KH * c_in, c_out_pad),
                                   lambda b, i: (0, 0, 0))],
            out_specs=out_spec,
            scratch_shapes=scratch,
            compiler_params=cparams,
        )(x, x, x, w_eff)
    else:
        w_dw_flat = w_dw_k.reshape(NTAPS, c_in)                        # f32, (kd,kh,kw)-major
        w_pw_bf = w_pw_pad.astype(jnp.bfloat16)
        out = pl.pallas_call(
            _dwsep_unfused_kernel,
            out_shape=out_shape,
            grid=(n, n_d),
            in_specs=[x_spec, lo_spec, hi_spec,
                      pl.BlockSpec((NTAPS, c_in), lambda b, i: (0, 0)),
                      pl.BlockSpec((c_in, c_out_pad), lambda b, i: (0, 0))],
            out_specs=out_spec,
            scratch_shapes=scratch,
            compiler_params=cparams,
        )(x, x, x, w_dw_flat, w_pw_bf)

    # Glue: back to the PyTorch NCDHW layout (no padding slice needed anymore).
    return jnp.transpose(out, (0, 4, 1, 2, 3)).astype(x_ncdhw.dtype)


def _reference(x_ncdhw, w_dw, w_pw):
    """Pure-JAX f32 reference (matches PyTorch Conv3d semantics)."""
    c_in = x_ncdhw.shape[1]
    dn = lax.conv_dimension_numbers(x_ncdhw.shape, w_dw.shape,
                                    ("NCDHW", "OIDHW", "NCDHW"))
    dw = lax.conv_general_dilated(x_ncdhw, w_dw, window_strides=(1, 1, 1),
                                  padding=((1, 1), (1, 1), (1, 1)),
                                  dimension_numbers=dn,
                                  feature_group_count=c_in)
    pw = lax.conv_general_dilated(dw, w_pw, window_strides=(1, 1, 1),
                                  padding=((0, 0),) * 3,
                                  dimension_numbers=dn)
    return pw


if __name__ == "__main__":
    key = jax.random.PRNGKey(0)
    k1, k2, k3 = jax.random.split(key, 3)

    # Small, forward-consistent shapes: N=2, Cin=4, Cout=8, D=H=W=8.
    N, C_IN, C_OUT, D, H, W = 2, 4, 8, 8, 8, 8
    x = jax.random.normal(k1, (N, C_IN, D, H, W), jnp.float32)
    # PyTorch shapes: depthwise (Cin,1,3,3,3), pointwise (Cout,Cin,1,1,1); bias=False.
    w_dw = 0.1 * jax.random.normal(k2, (C_IN, 1, KD, KH, KW), jnp.float32)
    w_pw = 0.1 * jax.random.normal(k3, (C_OUT, C_IN, 1, 1, 1), jnp.float32)

    ref = _reference(x, w_dw, w_pw)

    conv = jax.jit(depthwise_separable_conv3d,
                   static_argnames=("d_tile", "fold_depthwise"))
    # d_tile=4 exercises the halo'd D-tiling path; None exercises the auto picker.
    # fold_depthwise True/False exercises both the fused and unfused kernels.
    for dt, fold in ((4, True), (None, True), (4, False), (None, False)):
        out = jax.block_until_ready(conv(x, w_dw, w_pw, d_tile=dt, fold_depthwise=fold))
        assert out.shape == ref.shape == (N, C_OUT, D, H, W)
        max_err = float(jnp.max(jnp.abs(out - ref)))
        # bf16 MXU operands with an f32 accumulator: loosened vs the f32 1e-3 check.
        if max_err > 2e-2:
            raise AssertionError(
                f"d_tile={dt}, fold={fold}: mismatch vs reference, max abs err = {max_err}")

    print("KERNEL_OK")
</pallas_src>

<mosaic_0001>
module attributes {stable_mosaic.version = 11 : i64} {
  func.func @_dwsep_fused_kernel(%arg0: i32, %arg1: i32, %arg2: memref<1x4x8x8x4xbf16, #tpu.memory_space<vmem>>, %arg3: memref<1x1x8x8x4xbf16, #tpu.memory_space<vmem>>, %arg4: memref<1x1x8x8x4xbf16, #tpu.memory_space<vmem>>, %arg5: memref<3x36x128xbf16, #tpu.memory_space<vmem>>, %arg6: memref<1x4x8x8x8xf32, #tpu.memory_space<vmem>>, %arg7: memref<6x10x24x4xf32, #tpu.memory_space<vmem>>) attributes {dimension_semantics = [#tpu.dimension_semantics<parallel>, #tpu.dimension_semantics<parallel>], iteration_bounds = array<i64: 2, 2>, scalar_prefetch = 0 : i64, scratch_operands = 1 : i64, tpu.core_type = #tpu.core_type<tc>, window_params = [{transform_indices = @transform_0, window_bounds = array<i64: 1, 4, 8, 8, 4>}, {transform_indices = @transform_1, window_bounds = array<i64: 1, 1, 8, 8, 4>}, {transform_indices = @transform_2, window_bounds = array<i64: 1, 1, 8, 8, 4>}, {pipeline_mode = #tpu.pipeline_mode<synchronous>, transform_indices = @transform_3, window_bounds = array<i64: 3, 36, 128>}, {transform_indices = @transform_4, window_bounds = array<i64: 1, 4, 8, 8, 8>}]} {
    %cst = arith.constant 0.000000e+00 : f32
    %0 = vector.broadcast %cst : f32 to vector<6x10x8x4xf32>
    %c0 = arith.constant 0 : index
    %c0_0 = arith.constant 0 : index
    %c0_1 = arith.constant 0 : index
    %c0_2 = arith.constant 0 : index
    %1 = vector.load %arg7[%c0, %c0_0, %c0_1, %c0_2] : memref<6x10x24x4xf32, #tpu.memory_space<vmem>>, vector<6x10x8x4xf32>
    tpu.vector_store %arg7[%c0, %c0_0, %c0_1, %c0_2], %0 {strides = array<i32>} : memref<6x10x24x4xf32, #tpu.memory_space<vmem>>, vector<6x10x8x4xf32>,
    %cst_3 = arith.constant 0.000000e+00 : f32
    %2 = vector.broadcast %cst_3 : f32 to vector<6x10x8x4xf32>
    %c0_4 = arith.constant 0 : index
    %c0_5 = arith.constant 0 : index
    %c16 = arith.constant 16 : index
    %c0_6 = arith.constant 0 : index
    %3 = vector.load %arg7[%c0_4, %c0_5, %c16, %c0_6] : memref<6x10x24x4xf32, #tpu.memory_space<vmem>>, vector<6x10x8x4xf32>
    tpu.vector_store %arg7[%c0_4, %c0_5, %c16, %c0_6], %2 {strides = array<i32>} : memref<6x10x24x4xf32, #tpu.memory_space<vmem>>, vector<6x10x8x4xf32>,
    %cst_7 = arith.constant 0.000000e+00 : f32
    %4 = vector.broadcast %cst_7 : f32 to vector<6x1x8x4xf32>
    %c0_8 = arith.constant 0 : index
    %c0_9 = arith.constant 0 : index
    %c8 = arith.constant 8 : index
    %c0_10 = arith.constant 0 : index
    %5 = vector.load %arg7[%c0_8, %c0_9, %c8, %c0_10] : memref<6x10x24x4xf32, #tpu.memory_space<vmem>>, vector<6x1x8x4xf32>
    tpu.vector_store %arg7[%c0_8, %c0_9, %c8, %c0_10], %4 {strides = array<i32>} : memref<6x10x24x4xf32, #tpu.memory_space<vmem>>, vector<6x1x8x4xf32>,
    %cst_11 = arith.constant 0.000000e+00 : f32
    %6 = vector.broadcast %cst_11 : f32 to vector<6x1x8x4xf32>
    %c0_12 = arith.constant 0 : index
    %c9 = arith.constant 9 : index
    %c8_13 = arith.constant 8 : index
    %c0_14 = arith.constant 0 : index
    %7 = vector.load %arg7[%c0_12, %c9, %c8_13, %c0_14] : memref<6x10x24x4xf32, #tpu.memory_space<vmem>>, vector<6x1x8x4xf32>
    tpu.vector_store %arg7[%c0_12, %c9, %c8_13, %c0_14], %6 {strides = array<i32>} : memref<6x10x24x4xf32, #tpu.memory_space<vmem>>, vector<6x1x8x4xf32>,
    %c0_15 = arith.constant 0 : index
    %c0_16 = arith.constant 0 : index
    %c0_17 = arith.constant 0 : index
    %c0_18 = arith.constant 0 : index
    %c0_19 = arith.constant 0 : index
    %8 = vector.load %arg2[%c0_15, %c0_16, %c0_17, %c0_18, %c0_19] : memref<1x4x8x8x4xbf16, #tpu.memory_space<vmem>>, vector<1x4x8x8x4xbf16>
    %9 = vector.shape_cast %8 : vector<1x4x8x8x4xbf16> to vector<4x8x8x4xbf16>
    %10 = arith.extf %9 : vector<4x8x8x4xbf16> to vector<4x8x8x4xf32>
    %c1 = arith.constant 1 : index
    %c1_20 = arith.constant 1 : index
    %c8_21 = arith.constant 8 : index
    %c0_22 = arith.constant 0 : index
    %11 = vector.load %arg7[%c1, %c1_20, %c8_21, %c0_22] : memref<6x10x24x4xf32, #tpu.memory_space<vmem>>, vector<4x8x8x4xf32>
    tpu.vector_store %arg7[%c1, %c1_20, %c8_21, %c0_22], %10 {strides = array<i32>} : memref<6x10x24x4xf32, #tpu.memory_space<vmem>>, vector<4x8x8x4xf32>,
    %c0_i32 = arith.constant 0 : i32
    %12 = arith.cmpi sgt, %arg1, %c0_i32 : i32
    %13 = arith.extui %12 : i1 to i32
    %c0_i32_23 = arith.constant 0 : i32
    %14 = arith.cmpi ne, %13, %c0_i32_23 : i32
    scf.if %14 {
      %c0_49 = arith.constant 0 : index
      %c0_50 = arith.constant 0 : index
      %c0_51 = arith.constant 0 : index
      %c0_52 = arith.constant 0 : index
      %c0_53 = arith.constant 0 : index
      %77 = vector.load %arg3[%c0_49, %c0_50, %c0_51, %c0_52, %c0_53] : memref<1x1x8x8x4xbf16, #tpu.memory_space<vmem>>, vector<1x1x8x8x4xbf16>
      %78 = vector.shape_cast %77 : vector<1x1x8x8x4xbf16> to vector<1x8x8x4xbf16>
      %79 = arith.extf %78 : vector<1x8x8x4xbf16> to vector<1x8x8x4xf32>
      %c0_54 = arith.constant 0 : index
      %c1_55 = arith.constant 1 : index
      %c8_56 = arith.constant 8 : index
      %c0_57 = arith.constant 0 : index
      %80 = vector.load %arg7[%c0_54, %c1_55, %c8_56, %c0_57] : memref<6x10x24x4xf32, #tpu.memory_space<vmem>>, vector<1x8x8x4xf32>
      tpu.vector_store %arg7[%c0_54, %c1_55, %c8_56, %c0_57], %79 {strides = array<i32>} : memref<6x10x24x4xf32, #tpu.memory_space<vmem>>, vector<1x8x8x4xf32>,
    } else {
    }
    %c0_i32_24 = arith.constant 0 : i32
    %15 = arith.cmpi eq, %arg1, %c0_i32_24 : i32
    %16 = arith.extui %15 : i1 to i32
    %c0_i32_25 = arith.constant 0 : i32
    %17 = arith.cmpi ne, %16, %c0_i32_25 : i32
    scf.if %17 {
      %cst_49 = arith.constant 0.000000e+00 : f32
      %77 = vector.broadcast %cst_49 : f32 to vector<1x8x8x4xf32>
      %c0_50 = arith.constant 0 : index
      %c1_51 = arith.constant 1 : index
      %c8_52 = arith.constant 8 : index
      %c0_53 = arith.constant 0 : index
      %78 = vector.load %arg7[%c0_50, %c1_51, %c8_52, %c0_53] : memref<6x10x24x4xf32, #tpu.memory_space<vmem>>, vector<1x8x8x4xf32>
      tpu.vector_store %arg7[%c0_50, %c1_51, %c8_52, %c0_53], %77 {strides = array<i32>} : memref<6x10x24x4xf32, #tpu.memory_space<vmem>>, vector<1x8x8x4xf32>,
    } else {
    }
    %c1_i32 = arith.constant 1 : i32
    %18 = arith.cmpi slt, %arg1, %c1_i32 : i32
    %19 = arith.extui %18 : i1 to i32
    %c0_i32_26 = arith.constant 0 : i32
    %20 = arith.cmpi ne, %19, %c0_i32_26 : i32
    scf.if %20 {
      %c0_49 = arith.constant 0 : index
      %c0_50 = arith.constant 0 : index
      %c0_51 = arith.constant 0 : index
      %c0_52 = arith.constant 0 : index
      %c0_53 = arith.constant 0 : index
      %77 = vector.load %arg4[%c0_49, %c0_50, %c0_51, %c0_52, %c0_53] : memref<1x1x8x8x4xbf16, #tpu.memory_space<vmem>>, vector<1x1x8x8x4xbf16>
      %78 = vector.shape_cast %77 : vector<1x1x8x8x4xbf16> to vector<1x8x8x4xbf16>
      %79 = arith.extf %78 : vector<1x8x8x4xbf16> to vector<1x8x8x4xf32>
      %c5 = arith.constant 5 : index
      %c1_54 = arith.constant 1 : index
      %c8_55 = arith.constant 8 : index
      %c0_56 = arith.constant 0 : index
      %80 = vector.load %arg7[%c5, %c1_54, %c8_55, %c0_56] : memref<6x10x24x4xf32, #tpu.memory_space<vmem>>, vector<1x8x8x4xf32>
      tpu.vector_store %arg7[%c5, %c1_54, %c8_55, %c0_56], %79 {strides = array<i32>} : memref<6x10x24x4xf32, #tpu.memory_space<vmem>>, vector<1x8x8x4xf32>,
    } else {
    }
    %c1_i32_27 = arith.constant 1 : i32
    %21 = arith.cmpi eq, %arg1, %c1_i32_27 : i32
    %22 = arith.extui %21 : i1 to i32
    %c0_i32_28 = arith.constant 0 : i32
    %23 = arith.cmpi ne, %22, %c0_i32_28 : i32
    scf.if %23 {
      %cst_49 = arith.constant 0.000000e+00 : f32
      %77 = vector.broadcast %cst_49 : f32 to vector<1x8x8x4xf32>
      %c5 = arith.constant 5 : index
      %c1_50 = arith.constant 1 : index
      %c8_51 = arith.constant 8 : index
      %c0_52 = arith.constant 0 : index
      %78 = vector.load %arg7[%c5, %c1_50, %c8_51, %c0_52] : memref<6x10x24x4xf32, #tpu.memory_space<vmem>>, vector<1x8x8x4xf32>
      tpu.vector_store %arg7[%c5, %c1_50, %c8_51, %c0_52], %77 {strides = array<i32>} : memref<6x10x24x4xf32, #tpu.memory_space<vmem>>, vector<1x8x8x4xf32>,
    } else {
    }
    %c0_29 = arith.constant 0 : index
    %c0_30 = arith.constant 0 : index
    %c0_31 = arith.constant 0 : index
    %c0_32 = arith.constant 0 : index
    %24 = vector.load %arg7[%c0_29, %c0_30, %c0_31, %c0_32] : memref<6x10x24x4xf32, #tpu.memory_space<vmem>>, vector<6x10x24x4xf32>
    %25 = vector.extract_strided_slice %24 {offsets = [0, 0, 7, 0], sizes = [4, 8, 8, 4], strides = [1, 1, 1, 1]} : vector<6x10x24x4xf32> to vector<4x8x8x4xf32>
    %26 = vector.extract_strided_slice %24 {offsets = [0, 1, 7, 0], sizes = [4, 8, 8, 4], strides = [1, 1, 1, 1]} : vector<6x10x24x4xf32> to vector<4x8x8x4xf32>
    %27 = vector.extract_strided_slice %24 {offsets = [0, 2, 7, 0], sizes = [4, 8, 8, 4], strides = [1, 1, 1, 1]} : vector<6x10x24x4xf32> to vector<4x8x8x4xf32>
    %28 = vector.extract_strided_slice %24 {offsets = [1, 0, 7, 0], sizes = [4, 8, 8, 4], strides = [1, 1, 1, 1]} : vector<6x10x24x4xf32> to vector<4x8x8x4xf32>
    %29 = vector.extract_strided_slice %24 {offsets = [1, 1, 7, 0], sizes = [4, 8, 8, 4], strides = [1, 1, 1, 1]} : vector<6x10x24x4xf32> to vector<4x8x8x4xf32>
    %30 = vector.extract_strided_slice %24 {offsets = [1, 2, 7, 0], sizes = [4, 8, 8, 4], strides = [1, 1, 1, 1]} : vector<6x10x24x4xf32> to vector<4x8x8x4xf32>
    %31 = vector.extract_strided_slice %24 {offsets = [2, 0, 7, 0], sizes = [4, 8, 8, 4], strides = [1, 1, 1, 1]} : vector<6x10x24x4xf32> to vector<4x8x8x4xf32>
    %32 = vector.extract_strided_slice %24 {offsets = [2, 1, 7, 0], sizes = [4, 8, 8, 4], strides = [1, 1, 1, 1]} : vector<6x10x24x4xf32> to vector<4x8x8x4xf32>
    %33 = vector.extract_strided_slice %24 {offsets = [2, 2, 7, 0], sizes = [4, 8, 8, 4], strides = [1, 1, 1, 1]} : vector<6x10x24x4xf32> to vector<4x8x8x4xf32>
    %34 = tpu.concatenate %25, %26, %27, %28, %29, %30, %31, %32, %33 in 3 : vector<4x8x8x4xf32>, vector<4x8x8x4xf32>, vector<4x8x8x4xf32>, vector<4x8x8x4xf32>, vector<4x8x8x4xf32>, vector<4x8x8x4xf32>, vector<4x8x8x4xf32>, vector<4x8x8x4xf32>, vector<4x8x8x4xf32> -> vector<4x8x8x36xf32>
    %35 = vector.shape_cast %34 : vector<4x8x8x36xf32> to vector<256x36xf32>
    %36 = arith.truncf %35 : vector<256x36xf32> to vector<256x36xbf16>
    %c0_33 = arith.constant 0 : index
    %c0_34 = arith.constant 0 : index
    %c0_35 = arith.constant 0 : index
    %37 = vector.load %arg5[%c0_33, %c0_34, %c0_35] : memref<3x36x128xbf16, #tpu.memory_space<vmem>>, vector<1x36x128xbf16>
    %38 = vector.shape_cast %37 : vector<1x36x128xbf16> to vector<36x128xbf16>
    %cst_36 = arith.constant dense<0.000000e+00> : vector<256x128xf32>
    %39 = tpu.matmul %36, %38, %cst_36 {dimension_numbers = #tpu.dot_dimension_numbers<[1], [0], [0], [1], [0, 0, 1, 1], [], []>} : vector<256x36xbf16>, vector<36x128xbf16>, vector<256x128xf32> -> vector<256x128xf32>
    %40 = vector.extract_strided_slice %24 {offsets = [0, 0, 8, 0], sizes = [4, 8, 8, 4], strides = [1, 1, 1, 1]} : vector<6x10x24x4xf32> to vector<4x8x8x4xf32>
    %41 = vector.extract_strided_slice %24 {offsets = [0, 1, 8, 0], sizes = [4, 8, 8, 4], strides = [1, 1, 1, 1]} : vector<6x10x24x4xf32> to vector<4x8x8x4xf32>
    %42 = vector.extract_strided_slice %24 {offsets = [0, 2, 8, 0], sizes = [4, 8, 8, 4], strides = [1, 1, 1, 1]} : vector<6x10x24x4xf32> to vector<4x8x8x4xf32>
    %43 = vector.extract_strided_slice %24 {offsets = [1, 0, 8, 0], sizes = [4, 8, 8, 4], strides = [1, 1, 1, 1]} : vector<6x10x24x4xf32> to vector<4x8x8x4xf32>
    %44 = vector.extract_strided_slice %24 {offsets = [1, 1, 8, 0], sizes = [4, 8, 8, 4], strides = [1, 1, 1, 1]} : vector<6x10x24x4xf32> to vector<4x8x8x4xf32>
    %45 = vector.extract_strided_slice %24 {offsets = [1, 2, 8, 0], sizes = [4, 8, 8, 4], strides = [1, 1, 1, 1]} : vector<6x10x24x4xf32> to vector<4x8x8x4xf32>
    %46 = vector.extract_strided_slice %24 {offsets = [2, 0, 8, 0], sizes = [4, 8, 8, 4], strides = [1, 1, 1, 1]} : vector<6x10x24x4xf32> to vector<4x8x8x4xf32>
    %47 = vector.extract_strided_slice %24 {offsets = [2, 1, 8, 0], sizes = [4, 8, 8, 4], strides = [1, 1, 1, 1]} : vector<6x10x24x4xf32> to vector<4x8x8x4xf32>
    %48 = vector.extract_strided_slice %24 {offsets = [2, 2, 8, 0], sizes = [4, 8, 8, 4], strides = [1, 1, 1, 1]} : vector<6x10x24x4xf32> to vector<4x8x8x4xf32>
    %49 = tpu.concatenate %40, %41, %42, %43, %44, %45, %46, %47, %48 in 3 : vector<4x8x8x4xf32>, vector<4x8x8x4xf32>, vector<4x8x8x4xf32>, vector<4x8x8x4xf32>, vector<4x8x8x4xf32>, vector<4x8x8x4xf32>, vector<4x8x8x4xf32>, vector<4x8x8x4xf32>, vector<4x8x8x4xf32> -> vector<4x8x8x36xf32>
    %50 = vector.shape_cast %49 : vector<4x8x8x36xf32> to vector<256x36xf32>
    %51 = arith.truncf %50 : vector<256x36xf32> to vector<256x36xbf16>
    %c1_37 = arith.constant 1 : index
    %c0_38 = arith.constant 0 : index
    %c0_39 = arith.constant 0 : index
    %52 = vector.load %arg5[%c1_37, %c0_38, %c0_39] : memref<3x36x128xbf16, #tpu.memory_space<vmem>>, vector<1x36x128xbf16>
    %53 = vector.shape_cast %52 : vector<1x36x128xbf16> to vector<36x128xbf16>
    %cst_40 = arith.constant dense<0.000000e+00> : vector<256x128xf32>
    %54 = tpu.matmul %51, %53, %cst_40 {dimension_numbers = #tpu.dot_dimension_numbers<[1], [0], [0], [1], [0, 0, 1, 1], [], []>} : vector<256x36xbf16>, vector<36x128xbf16>, vector<256x128xf32> -> vector<256x128xf32>
    %55 = arith.addf %39, %54 : vector<256x128xf32>
    %56 = vector.extract_strided_slice %24 {offsets = [0, 0, 9, 0], sizes = [4, 8, 8, 4], strides = [1, 1, 1, 1]} : vector<6x10x24x4xf32> to vector<4x8x8x4xf32>
    %57 = vector.extract_strided_slice %24 {offsets = [0, 1, 9, 0], sizes = [4, 8, 8, 4], strides = [1, 1, 1, 1]} : vector<6x10x24x4xf32> to vector<4x8x8x4xf32>
    %58 = vector.extract_strided_slice %24 {offsets = [0, 2, 9, 0], sizes = [4, 8, 8, 4], strides = [1, 1, 1, 1]} : vector<6x10x24x4xf32> to vector<4x8x8x4xf32>
    %59 = vector.extract_strided_slice %24 {offsets = [1, 0, 9, 0], sizes = [4, 8, 8, 4], strides = [1, 1, 1, 1]} : vector<6x10x24x4xf32> to vector<4x8x8x4xf32>
    %60 = vector.extract_strided_slice %24 {offsets = [1, 1, 9, 0], sizes = [4, 8, 8, 4], strides = [1, 1, 1, 1]} : vector<6x10x24x4xf32> to vector<4x8x8x4xf32>
    %61 = vector.extract_strided_slice %24 {offsets = [1, 2, 9, 0], sizes = [4, 8, 8, 4], strides = [1, 1, 1, 1]} : vector<6x10x24x4xf32> to vector<4x8x8x4xf32>
    %62 = vector.extract_strided_slice %24 {offsets = [2, 0, 9, 0], sizes = [4, 8, 8, 4], strides = [1, 1, 1, 1]} : vector<6x10x24x4xf32> to vector<4x8x8x4xf32>
    %63 = vector.extract_strided_slice %24 {offsets = [2, 1, 9, 0], sizes = [4, 8, 8, 4], strides = [1, 1, 1, 1]} : vector<6x10x24x4xf32> to vector<4x8x8x4xf32>
    %64 = vector.extract_strided_slice %24 {offsets = [2, 2, 9, 0], sizes = [4, 8, 8, 4], strides = [1, 1, 1, 1]} : vector<6x10x24x4xf32> to vector<4x8x8x4xf32>
    %65 = tpu.concatenate %56, %57, %58, %59, %60, %61, %62, %63, %64 in 3 : vector<4x8x8x4xf32>, vector<4x8x8x4xf32>, vector<4x8x8x4xf32>, vector<4x8x8x4xf32>, vector<4x8x8x4xf32>, vector<4x8x8x4xf32>, vector<4x8x8x4xf32>, vector<4x8x8x4xf32>, vector<4x8x8x4xf32> -> vector<4x8x8x36xf32>
    %66 = vector.shape_cast %65 : vector<4x8x8x36xf32> to vector<256x36xf32>
    %67 = arith.truncf %66 : vector<256x36xf32> to vector<256x36xbf16>
    %c2 = arith.constant 2 : index
    %c0_41 = arith.constant 0 : index
    %c0_42 = arith.constant 0 : index
    %68 = vector.load %arg5[%c2, %c0_41, %c0_42] : memref<3x36x128xbf16, #tpu.memory_space<vmem>>, vector<1x36x128xbf16>
    %69 = vector.shape_cast %68 : vector<1x36x128xbf16> to vector<36x128xbf16>
    %cst_43 = arith.constant dense<0.000000e+00> : vector<256x128xf32>
    %70 = tpu.matmul %67, %69, %cst_43 {dimension_numbers = #tpu.dot_dimension_numbers<[1], [0], [0], [1], [0, 0, 1, 1], [], []>} : vector<256x36xbf16>, vector<36x128xbf16>, vector<256x128xf32> -> vector<256x128xf32>
    %71 = arith.addf %55, %70 : vector<256x128xf32>
    %72 = vector.extract_strided_slice %71 {offsets = [0, 0], sizes = [256, 8], strides = [1, 1]} : vector<256x128xf32> to vector<256x8xf32>
    %73 = vector.shape_cast %72 : vector<256x8xf32> to vector<4x8x8x8xf32>
    %c0_44 = arith.constant 0 : index
    %c0_45 = arith.constant 0 : index
    %c0_46 = arith.constant 0 : index
    %c0_47 = arith.constant 0 : index
    %c0_48 = arith.constant 0 : index
    %74 = vector.load %arg6[%c0_44, %c0_45, %c0_46, %c0_47, %c0_48] : memref<1x4x8x8x8xf32, #tpu.memory_space<vmem>>, vector<1x4x8x8x8xf32>
    %75 = vector.shape_cast %74 : vector<1x4x8x8x8xf32> to vector<4x8x8x8xf32>
    %76 = vector.shape_cast %73 : vector<4x8x8x8xf32> to vector<1x4x8x8x8xf32>
    tpu.vector_store %arg6[%c0_44, %c0_45, %c0_46, %c0_47, %c0_48], %76 {strides = array<i32>} : memref<1x4x8x8x8xf32, #tpu.memory_space<vmem>>, vector<1x4x8x8x8xf32>,
    return
  }
  func.func @transform_0(%arg0: i32, %arg1: i32) -> (i32, i32, i32, i32, i32) {
    %c0_i32 = arith.constant 0 : i32
    %c0_i32_0 = arith.constant 0 : i32
    %c0_i32_1 = arith.constant 0 : i32
    %c0_i32_2 = arith.constant 0 : i32
    return %arg0, %arg1, %c0_i32, %c0_i32_0, %c0_i32_1 : i32, i32, i32, i32, i32
  }
  func.func @transform_1(%arg0: i32, %arg1: i32) -> (i32, i32, i32, i32, i32) {
    %c4_i32 = arith.constant 4 : i32
    %0 = arith.muli %arg1, %c4_i32 : i32
    %c1_i32 = arith.constant 1 : i32
    %1 = arith.subi %0, %c1_i32 : i32
    %c0_i32 = arith.constant 0 : i32
    %2 = arith.maxsi %1, %c0_i32 : i32
    %c0_i32_0 = arith.constant 0 : i32
    %c0_i32_1 = arith.constant 0 : i32
    %c0_i32_2 = arith.constant 0 : i32
    %c0_i32_3 = arith.constant 0 : i32
    return %arg0, %2, %c0_i32_0, %c0_i32_1, %c0_i32_2 : i32, i32, i32, i32, i32
  }
  func.func @transform_2(%arg0: i32, %arg1: i32) -> (i32, i32, i32, i32, i32) {
    %c4_i32 = arith.constant 4 : i32
    %0 = arith.muli %arg1, %c4_i32 : i32
    %c4_i32_0 = arith.constant 4 : i32
    %1 = arith.addi %0, %c4_i32_0 : i32
    %c7_i32 = arith.constant 7 : i32
    %2 = arith.minsi %1, %c7_i32 : i32
    %c0_i32 = arith.constant 0 : i32
    %c0_i32_1 = arith.constant 0 : i32
    %c0_i32_2 = arith.constant 0 : i32
    %c0_i32_3 = arith.constant 0 : i32
    return %arg0, %2, %c0_i32, %c0_i32_1, %c0_i32_2 : i32, i32, i32, i32, i32
  }
  func.func @transform_3(%arg0: i32, %arg1: i32) -> (i32, i32, i32) {
    %c0_i32 = arith.constant 0 : i32
    %c0_i32_0 = arith.constant 0 : i32
    %c0_i32_1 = arith.constant 0 : i32
    %c0_i32_2 = arith.constant 0 : i32
    return %c0_i32, %c0_i32_0, %c0_i32_1 : i32, i32, i32
  }
  func.func @transform_4(%arg0: i32, %arg1: i32) -> (i32, i32, i32, i32, i32) {
    %c0_i32 = arith.constant 0 : i32
    %c0_i32_0 = arith.constant 0 : i32
    %c0_i32_1 = arith.constant 0 : i32
    %c0_i32_2 = arith.constant 0 : i32
    return %arg0, %arg1, %c0_i32, %c0_i32_0, %c0_i32_1 : i32, i32, i32, i32, i32
  }
}

</mosaic_0001>

<bundles_post_ra>
// kernel: depthwise_separable_conv3d.1
= control target key start
LH: loop header
LB: loop body
LE: loop exit
PB: predicated region body
PF: predicated region fallthrough
CT: control target
= control target key end

     0   :  { %s8122_s15 = smov 0   ;;  %s8124_s16 = smov 0   ;;  %s13673_s0 = inlined_call_operand.vmem [shape: bf16[2,8,8,8,4], index: 0, kind: input, shape index: {}, may-alias: {0,1,2}]   ;;  %s13674_s1 = inlined_call_operand.vmem [shape: bf16[2,8,8,8,4], index: 1, kind: input, shape index: {}, may-alias: {0,1,2}]   ;;  %s13675_s2 = inlined_call_operand.vmem [shape: bf16[2,8,8,8,4], index: 2, kind: input, shape index: {}, may-alias: {0,1,2}]   ;;  %s13676_s3 = inlined_call_operand.vmem [shape: bf16[3,36,128], index: 3, kind: input, shape index: {}]   ;;  %s13677_s4 = inlined_call_operand.vmem [shape: f32[2,8,8,8,8], index: 4, kind: output, shape index: {}]  }
   0x1   :  { %s8126_s17 = smov 0   ;;  %s8128_s18 = smov 0  }
   0x2   :  { %s8130_s19 = smov 0  }
   0x3 LB: > { %s23_s20 = sadd.s32 1, %s8076_s17  ;;  %s26_s21 = sadd.s32 1, %s8080_s18  ;;  %s8084_s19 = sphi %s8130_s19, %s14_s19   ;;  %s8080_s18 = sphi %s8128_s18, %s15138_s18   ;;  %s8076_s17 = sphi %s8126_s17, %s15137_s17   ;;  %s8072_s16 = sphi %s8124_s16, %s15136_s16   ;;  %s8068_s15 = sphi %s8122_s15, %s15135_s15  }
   0x4   : > { %p24_p0 = scmp.ge.s32.totalorder %s23_s20, 2  ;;  %p5435_p1 = scmp.ge.s32.totalorder %s8084_s19, 1 }
   0x5   : > { %p248_p2 = scmp.lt.s32.totalorder %s8084_s19, 5 }
   0x6   : > { %s15140_s20 = smov (%p24_p0, %s23_s20), 0  ;;  %s15142_s21 = smov (!%p24_p0, %s26_s21), %s8080_s18 }
   0x7   : > { %p249_p3 = pnand %p5435_p1, %p248_p2  ;;  %p28_p4 = scmp.ge.s32.totalorder %s15142_s21, 2 }
   0x9   : > { %s15144_s21 = smov (%p28_p4, %s15142_s21), 0  ;;  %252 = sbr.rel (%p249_p3) target bundleno = 1278 (0x4fe), region = 36 }
  0x10   : > { %vm367_vm0 = vcmask 31744   ;;  %s8157_s22 = sshll.u32 %s8068_s15, 2  ;;  %p311_p5 = scmp.lt.s32.totalorder %s8072_s16, 1  ;;  %v8086_v0 = vmov 0.0  }
  0x11   : > { %368 = vst.msk [vmem:[#allocation2] sm:$0xff] %vm367_vm0, %v8086_v0  ;;  %369 = vst.msk [vmem:[#allocation2 + $0x18] sm:$0xff] %vm367_vm0, %v8086_v0  ;;  %p313_p6 = scmp.lt.s32.totalorder %s8157_s22, 7  ;;  %s5441_s23 = sadd.s32 4294967295, %s8157_s22 }
  0x12   : > { %370 = vst.msk [vmem:[#allocation2 + $0x30] sm:$0xff] %vm367_vm0, %v8086_v0  ;;  %371 = vst.msk [vmem:[#allocation2 + $0x48] sm:$0xff] %vm367_vm0, %v8086_v0  ;;  %s15146_s16 = smov (!%p311_p5, %s8072_s16), 1  ;;  %p323_p7 = scmp.gt.s32.totalorder %s5441_s23, 0 }
  0x13   : > { %372 = vst.msk [vmem:[#allocation2 + $0x60] sm:$0xff] %vm367_vm0, %v8086_v0  ;;  %373 = vst.msk [vmem:[#allocation2 + $0x78] sm:$0xff] %vm367_vm0, %v8086_v0  ;;  %s314_s24 = scalar_select %p313_p6, %s8157_s22, 7 }
  0x14   : > { %374 = vst.msk [vmem:[#allocation2 + $0x90] sm:$0xff] %vm367_vm0, %v8086_v0  ;;  %375 = vst.msk [vmem:[#allocation2 + $0xa8] sm:$0xff] %vm367_vm0, %v8086_v0  ;;  %s8430_s25 = sshll.u32 %s15146_s16, 6  ;;  %p5442_p8 = scmp.lt.s32.totalorder %s5441_s23, 7 }
  0x15   : > { %376 = vst.msk [vmem:[#allocation2 + $0xc0] sm:$0xff] %vm367_vm0, %v8086_v0  ;;  %377 = vst.msk [vmem:[#allocation2 + $0xd8] sm:$0xff] %vm367_vm0, %v8086_v0  ;;  %s5437_s26 = sshll.u32 %s314_s24, 3  ;;  %s339_s28 = sadd.s32 4, %s8157_s22 }
  0x16   : > { %378 = vst.msk [vmem:[#allocation2 + $0xf0] sm:$0xff] %vm367_vm0, %v8086_v0  ;;  %379 = vst.msk [vmem:[#allocation2 + $0x108] sm:$0xff] %vm367_vm0, %v8086_v0  ;;  %s8433_s27 = sadd.s32 %s8430_s25, %s5437_s26  ;;  %p8437_p9 = scmp.lt.s32.totalorder %s339_s28, 7 }
  0x17   : > { %380 = vst.msk [vmem:[#allocation2 + $0x120] sm:$0xff] %vm367_vm0, %v8086_v0  ;;  %381 = vst.msk [vmem:[#allocation2 + $0x138] sm:$0xff] %vm367_vm0, %v8086_v0  ;;  %s5439_s29 = sshll.u32 %s8433_s27, 2  ;;  %s5460_s8 = sshll.u32 %s8433_s27, 3 }
  0x18   : > { %382 = vst.msk [vmem:[#allocation2 + $0x150] sm:$0xff] %vm367_vm0, %v8086_v0  ;;  %383 = vst.msk [vmem:[#allocation2 + $0x168] sm:$0xff] %vm367_vm0, %v8086_v0  ;;  %s8444_s7 = scalar_lea.vmem %s13673_s0, %s5439_s29  ;;  %s15148_s28 = smov (!%p8437_p9, %s339_s28), 7 }
  0x19   : > { %384 = vst.msk [vmem:[#allocation2 + $0x180] sm:$0xff] %vm367_vm0, %v8086_v0  ;;  %385 = vst.msk [vmem:[#allocation2 + $0x198] sm:$0xff] %vm367_vm0, %v8086_v0  ;;  %s324_s9 = scalar_select %p323_p7, %s5441_s23, 0  ;;  %v5537_v1 = vld [vmem:[%s8444_s7] sm:$0xff]   ;;  %v5632_v2 = vld [vmem:[%s8444_s7 + $0x8] sm:$0xff]  }
  0x1a   : > { %386 = vst.msk [vmem:[#allocation2 + $0x1b0] sm:$0xff] %vm367_vm0, %v8086_v0  ;;  %387 = vst.msk [vmem:[#allocation2 + $0x1c8] sm:$0xff] %vm367_vm0, %v8086_v0  ;;  %v5633_v3 = vld [vmem:[%s8444_s7 + $0x10] sm:$0xff]   ;;  %v5538_v4 = vunpack.c.l.bf16 %v5537_v1  ;;  %v5539_v5 = vunpack.c.h.bf16 %v5537_v1  ;;  %v5542_v6 = vunpack.c.l.bf16 %v5632_v2  ;;  %v5543_v7 = vunpack.c.h.bf16 %v5632_v2  ;;  %v5634_v8 = vld [vmem:[%s8444_s7 + $0x18] sm:$0xff]   ;;  %s15152_s28 = smov (!%p8437_p9, %s15148_s28), 7  ;;  %s8479_s13 = scalar_lea.vmem %s13677_s4, %s5460_s8 }
  0x1b   : > { %388 = vst.msk [vmem:[#allocation2 + $0x1e0] sm:$0xff] %vm367_vm0, %v8086_v0  ;;  %389 = vst.msk [vmem:[#allocation2 + $0x1f8] sm:$0xff] %vm367_vm0, %v8086_v0  ;;  %v5635_v9 = vld [vmem:[%s8444_s7 + $0x20] sm:$0xff]   ;;  %v5636_v10 = vld [vmem:[%s8444_s7 + $0x28] sm:$0xff]   ;;  %s15150_s9 = smov (!%p5442_p8, %s324_s9), 7  ;;  %v5546_v11 = vunpack.c.l.bf16 %v5633_v3  ;;  %v5547_v12 = vunpack.c.h.bf16 %v5633_v3  ;;  %v5550_v13 = vunpack.c.l.bf16 %v5634_v8  ;;  %v5551_v14 = vunpack.c.h.bf16 %v5634_v8  ;;  %s5454_s16 = sshll.u32 %s15152_s28, 3 }
  0x1c   : > { %390 = vst.msk [vmem:[#allocation2 + $0x210] sm:$0xff] %vm367_vm0, %v8086_v0  ;;  %391 = vst.msk [vmem:[#allocation2 + $0x228] sm:$0xff] %vm367_vm0, %v8086_v0  ;;  %v5637_v15 = vld [vmem:[%s8444_s7 + $0x30] sm:$0xff]   ;;  %v5638_v16 = vld [vmem:[%s8444_s7 + $0x38] sm:$0xff]   ;;  %v5554_v18 = vunpack.c.l.bf16 %v5635_v9  ;;  %v5555_v19 = vunpack.c.h.bf16 %v5635_v9  ;;  %v5558_v20 = vunpack.c.l.bf16 %v5636_v10  ;;  %v5559_v21 = vunpack.c.h.bf16 %v5636_v10  ;;  %s5447_s10 = sshll.u32 %s15150_s9, 3  ;;  %s348_s23 = sadd.s32 %s5454_s16, %s8430_s25 }
  0x1d   : > { %392 = vst.msk [vmem:[#allocation2 + $0x240] sm:$0xff] %vm367_vm0, %v8086_v0  ;;  %393 = vst.msk [vmem:[#allocation2 + $0x258] sm:$0xff] %vm367_vm0, %v8086_v0  ;;  %v5639_v17 = vld [vmem:[%s8444_s7 + $0x40] sm:$0xff]   ;;  %v5640_v22 = vld [vmem:[%s8444_s7 + $0x48] sm:$0xff]   ;;  %v5562_v25 = vunpack.c.l.bf16 %v5637_v15  ;;  %v5563_v26 = vunpack.c.h.bf16 %v5637_v15  ;;  %v5566_v27 = vunpack.c.l.bf16 %v5638_v16  ;;  %v5567_v28 = vunpack.c.h.bf16 %v5638_v16  ;;  %s331_s14 = sadd.s32 %s5447_s10, %s8430_s25  ;;  %s5456_s28 = sshll.u32 %s348_s23, 2 }
  0x1e   : > { %394 = vst.msk [vmem:[#allocation2 + $0x270] sm:$0xff] %vm367_vm0, %v8086_v0  ;;  %395 = vst.msk [vmem:[#allocation2 + $0x288] sm:$0xff] %vm367_vm0, %v8086_v0  ;;  %v5641_v23 = vld [vmem:[%s8444_s7 + $0x50] sm:$0xff]   ;;  %v5642_v24 = vld [vmem:[%s8444_s7 + $0x58] sm:$0xff]   ;;  %v5570_v31 = vunpack.c.l.bf16 %v5639_v17  ;;  %v5571_v32 = vunpack.c.h.bf16 %v5639_v17  ;;  %v5574_v33 = vunpack.c.l.bf16 %v5640_v22  ;;  %v5575_v34 = vunpack.c.h.bf16 %v5640_v22  ;;  %s5449_s22 = sshll.u32 %s331_s14, 2  ;;  %s8511_s30 = scalar_lea.vmem %s13675_s2, %s5456_s28 }
  0x1f   : > { %396 = vst.msk [vmem:[#allocation2 + $0x2a0] sm:$0xff] %vm367_vm0, %v8086_v0  ;;  %397 = vst.msk [vmem:[#allocation2 + $0x2b8] sm:$0xff] %vm367_vm0, %v8086_v0  ;;  %v5643_v29 = vld [vmem:[%s8444_s7 + $0x60] sm:$0xff]   ;;  %v5644_v30 = vld [vmem:[%s8444_s7 + $0x68] sm:$0xff]   ;;  %v5578_v37 = vunpack.c.l.bf16 %v5641_v23  ;;  %v5579_v38 = vunpack.c.h.bf16 %v5641_v23  ;;  %v5582_v39 = vunpack.c.l.bf16 %v5642_v24  ;;  %v5583_v40 = vunpack.c.h.bf16 %v5642_v24  ;;  %s8502_s27 = scalar_lea.vmem %s13674_s1, %s5449_s22  ;;  %p5461_p10 = scmp.le.s32.totalorder %s8068_s15, 0 }
  0x20   : > { %398 = vst.msk [vmem:[#allocation2 + $0x2d0] sm:$0xff] %vm367_vm0, %v8086_v0  ;;  %399 = vst.msk [vmem:[#allocation2 + $0x2e8] sm:$0xff] %vm367_vm0, %v8086_v0  ;;  %v5645_v35 = vld [vmem:[%s8444_s7 + $0x70] sm:$0xff]   ;;  %v5646_v36 = vld [vmem:[%s8444_s7 + $0x78] sm:$0xff]   ;;  %v5586_v41 = vunpack.c.l.bf16 %v5643_v29  ;;  %v5587_v42 = vunpack.c.h.bf16 %v5643_v29  ;;  %v5590_v43 = vunpack.c.l.bf16 %v5644_v30  ;;  %v5591_v44 = vunpack.c.h.bf16 %v5644_v30 }
  0x21   : > { %400 = vst.msk [vmem:[#allocation2 + $0x300] sm:$0xff] %vm367_vm0, %v8086_v0  ;;  %401 = vst.msk [vmem:[#allocation2 + $0x318] sm:$0xff] %vm367_vm0, %v8086_v0  ;;  %v5594_v45 = vunpack.c.l.bf16 %v5645_v35  ;;  %v5595_v46 = vunpack.c.h.bf16 %v5645_v35  ;;  %v5598_v47 = vunpack.c.l.bf16 %v5646_v36  ;;  %v5599_v48 = vunpack.c.h.bf16 %v5646_v36  ;;  %v5601_v49 = vld [vmem:[%s8502_s27] sm:$0xff] (!%p5461_p10)   ;;  %v5647_v50 = vld [vmem:[%s8502_s27 + $0x8] sm:$0xff] (!%p5461_p10)  }
  0x22   : > { %402 = vst.msk [vmem:[#allocation2 + $0x330] sm:$0xff] %vm367_vm0, %v8086_v0  ;;  %403 = vst.msk [vmem:[#allocation2 + $0x348] sm:$0xff] %vm367_vm0, %v8086_v0  ;;  %v5648_v51 = vld [vmem:[%s8502_s27 + $0x10] sm:$0xff] (!%p5461_p10)   ;;  %v5602_v52 = vunpack.c.l.bf16 (!%p5461_p10), %v5601_v49  ;;  %v5603_v53 = vunpack.c.h.bf16 (!%p5461_p10), %v5601_v49  ;;  %v5606_v54 = vunpack.c.l.bf16 (!%p5461_p10), %v5647_v50  ;;  %v5607_v55 = vunpack.c.h.bf16 (!%p5461_p10), %v5647_v50  ;;  %v5649_v56 = vld [vmem:[%s8502_s27 + $0x18] sm:$0xff] (!%p5461_p10)  }
  0x23   : > { %404 = vst.msk [vmem:[#allocation2 + $0x360] sm:$0xff] %vm367_vm0, %v8086_v0  ;;  %405 = vst.msk [vmem:[#allocation2 + $0x378] sm:$0xff] %vm367_vm0, %v8086_v0  ;;  %v5610_v57 = vunpack.c.l.bf16 (!%p5461_p10), %v5648_v51  ;;  %v5611_v58 = vunpack.c.h.bf16 (!%p5461_p10), %v5648_v51  ;;  %v5614_v59 = vunpack.c.l.bf16 (!%p5461_p10), %v5649_v56  ;;  %v5615_v60 = vunpack.c.h.bf16 (!%p5461_p10), %v5649_v56 }
  0x24   : > { %406 = vst.msk [vmem:[#allocation2 + $0x390] sm:$0xff] %vm367_vm0, %v8086_v0  ;;  %407 = vst.msk [vmem:[#allocation2 + $0x3a8] sm:$0xff] %vm367_vm0, %v8086_v0 }
  0x25   : > { %408 = vst.msk [vmem:[#allocation2 + $0x3c0] sm:$0xff] %vm367_vm0, %v8086_v0  ;;  %409 = vst.msk [vmem:[#allocation2 + $0x3d8] sm:$0xff] %vm367_vm0, %v8086_v0 }
  0x26   : > { %410 = vst.msk [vmem:[#allocation2 + $0x3f0] sm:$0xff] %vm367_vm0, %v8086_v0  ;;  %411 = vst.msk [vmem:[#allocation2 + $0x408] sm:$0xff] %vm367_vm0, %v8086_v0 }
  0x27   : > { %412 = vst.msk [vmem:[#allocation2 + $0x420] sm:$0xff] %vm367_vm0, %v8086_v0  ;;  %413 = vst.msk [vmem:[#allocation2 + $0x438] sm:$0xff] %vm367_vm0, %v8086_v0 }
  0x28   : > { %414 = vst.msk [vmem:[#allocation2 + $0x450] sm:$0xff] %vm367_vm0, %v8086_v0  ;;  %415 = vst.msk [vmem:[#allocation2 + $0x468] sm:$0xff] %vm367_vm0, %v8086_v0 }
  0x29   : > { %416 = vst.msk [vmem:[#allocation2 + $0x480] sm:$0xff] %vm367_vm0, %v8086_v0  ;;  %417 = vst.msk [vmem:[#allocation2 + $0x498] sm:$0xff] %vm367_vm0, %v8086_v0 }
  0x2a   : > { %418 = vst.msk [vmem:[#allocation2 + $0x4b0] sm:$0xff] %vm367_vm0, %v8086_v0  ;;  %419 = vst.msk [vmem:[#allocation2 + $0x4c8] sm:$0xff] %vm367_vm0, %v8086_v0 }
  0x2b   : > { %420 = vst.msk [vmem:[#allocation2 + $0x4e0] sm:$0xff] %vm367_vm0, %v8086_v0  ;;  %421 = vst.msk [vmem:[#allocation2 + $0x4f8] sm:$0xff] %vm367_vm0, %v8086_v0 }
  0x2c   : > { %422 = vst.msk [vmem:[#allocation2 + $0x510] sm:$0xff] %vm367_vm0, %v8086_v0  ;;  %423 = vst.msk [vmem:[#allocation2 + $0x528] sm:$0xff] %vm367_vm0, %v8086_v0 }
  0x2d   : > { %424 = vst.msk [vmem:[#allocation2 + $0x540] sm:$0xff] %vm367_vm0, %v8086_v0  ;;  %425 = vst.msk [vmem:[#allocation2 + $0x558] sm:$0xff] %vm367_vm0, %v8086_v0 }
  0x2e   : > { %426 = vst.msk [vmem:[#allocation2 + $0x570] sm:$0xff] %vm367_vm0, %v8086_v0  ;;  %427 = vst.msk [vmem:[#allocation2 + $0x588] sm:$0xff] %vm367_vm0, %v8086_v0 }
  0x2f   : > { %428 = vst.msk [vmem:[#allocation2 + $0x10] sm:$0xff] %vm367_vm0, %v8086_v0  ;;  %429 = vst.msk [vmem:[#allocation2 + $0x28] sm:$0xff] %vm367_vm0, %v8086_v0 }
  0x30   : > { %430 = vst.msk [vmem:[#allocation2 + $0x40] sm:$0xff] %vm367_vm0, %v8086_v0  ;;  %431 = vst.msk [vmem:[#allocation2 + $0x58] sm:$0xff] %vm367_vm0, %v8086_v0 }
  0x31   : > { %432 = vst.msk [vmem:[#allocation2 + $0x70] sm:$0xff] %vm367_vm0, %v8086_v0  ;;  %433 = vst.msk [vmem:[#allocation2 + $0x88] sm:$0xff] %vm367_vm0, %v8086_v0 }
  0x32   : > { %434 = vst.msk [vmem:[#allocation2 + $0xa0] sm:$0xff] %vm367_vm0, %v8086_v0  ;;  %435 = vst.msk [vmem:[#allocation2 + $0xb8] sm:$0xff] %vm367_vm0, %v8086_v0 }
  0x33   : > { %436 = vst.msk [vmem:[#allocation2 + $0xd0] sm:$0xff] %vm367_vm0, %v8086_v0  ;;  %437 = vst.msk [vmem:[#allocation2 + $0xe8] sm:$0xff] %vm367_vm0, %v8086_v0 }
  0x34   : > { %438 = vst.msk [vmem:[#allocation2 + $0x100] sm:$0xff] %vm367_vm0, %v8086_v0  ;;  %439 = vst.msk [vmem:[#allocation2 + $0x118] sm:$0xff] %vm367_vm0, %v8086_v0 }
  0x35   : > { %440 = vst.msk [vmem:[#allocation2 + $0x130] sm:$0xff] %vm367_vm0, %v8086_v0  ;;  %441 = vst.msk [vmem:[#allocation2 + $0x148] sm:$0xff] %vm367_vm0, %v8086_v0 }
  0x36   : > { %442 = vst.msk [vmem:[#allocation2 + $0x160] sm:$0xff] %vm367_vm0, %v8086_v0  ;;  %443 = vst.msk [vmem:[#allocation2 + $0x178] sm:$0xff] %vm367_vm0, %v8086_v0 }
  0x37   : > { %444 = vst.msk [vmem:[#allocation2 + $0x190] sm:$0xff] %vm367_vm0, %v8086_v0  ;;  %445 = vst.msk [vmem:[#allocation2 + $0x1a8] sm:$0xff] %vm367_vm0, %v8086_v0 }
  0x38   : > { %446 = vst.msk [vmem:[#allocation2 + $0x1c0] sm:$0xff] %vm367_vm0, %v8086_v0  ;;  %447 = vst.msk [vmem:[#allocation2 + $0x1d8] sm:$0xff] %vm367_vm0, %v8086_v0 }
  0x39   : > { %448 = vst.msk [vmem:[#allocation2 + $0x1f0] sm:$0xff] %vm367_vm0, %v8086_v0  ;;  %449 = vst.msk [vmem:[#allocation2 + $0x208] sm:$0xff] %vm367_vm0, %v8086_v0 }
  0x3a   : > { %450 = vst.msk [vmem:[#allocation2 + $0x220] sm:$0xff] %vm367_vm0, %v8086_v0  ;;  %451 = vst.msk [vmem:[#allocation2 + $0x238] sm:$0xff] %vm367_vm0, %v8086_v0 }
  0x3b   : > { %452 = vst.msk [vmem:[#allocation2 + $0x250] sm:$0xff] %vm367_vm0, %v8086_v0  ;;  %453 = vst.msk [vmem:[#allocation2 + $0x268] sm:$0xff] %vm367_vm0, %v8086_v0 }
  0x3c   : > { %454 = vst.msk [vmem:[#allocation2 + $0x280] sm:$0xff] %vm367_vm0, %v8086_v0  ;;  %455 = vst.msk [vmem:[#allocation2 + $0x298] sm:$0xff] %vm367_vm0, %v8086_v0 }
  0x3d   : > { %456 = vst.msk [vmem:[#allocation2 + $0x2b0] sm:$0xff] %vm367_vm0, %v8086_v0  ;;  %457 = vst.msk [vmem:[#allocation2 + $0x2c8] sm:$0xff] %vm367_vm0, %v8086_v0 }
  0x3e   : > { %458 = vst.msk [vmem:[#allocation2 + $0x2e0] sm:$0xff] %vm367_vm0, %v8086_v0  ;;  %459 = vst.msk [vmem:[#allocation2 + $0x2f8] sm:$0xff] %vm367_vm0, %v8086_v0 }
  0x3f   : > { %460 = vst.msk [vmem:[#allocation2 + $0x310] sm:$0xff] %vm367_vm0, %v8086_v0  ;;  %461 = vst.msk [vmem:[#allocation2 + $0x328] sm:$0xff] %vm367_vm0, %v8086_v0 }
  0x40   : > { %462 = vst.msk [vmem:[#allocation2 + $0x340] sm:$0xff] %vm367_vm0, %v8086_v0  ;;  %463 = vst.msk [vmem:[#allocation2 + $0x358] sm:$0xff] %vm367_vm0, %v8086_v0 }
  0x41   : > { %464 = vst.msk [vmem:[#allocation2 + $0x370] sm:$0xff] %vm367_vm0, %v8086_v0  ;;  %465 = vst.msk [vmem:[#allocation2 + $0x388] sm:$0xff] %vm367_vm0, %v8086_v0 }
  0x42   : > { %466 = vst.msk [vmem:[#allocation2 + $0x3a0] sm:$0xff] %vm367_vm0, %v8086_v0  ;;  %467 = vst.msk [vmem:[#allocation2 + $0x3b8] sm:$0xff] %vm367_vm0, %v8086_v0 }
  0x43   : > { %468 = vst.msk [vmem:[#allocation2 + $0x3d0] sm:$0xff] %vm367_vm0, %v8086_v0  ;;  %469 = vst.msk [vmem:[#allocation2 + $0x3e8] sm:$0xff] %vm367_vm0, %v8086_v0 }
  0x44   : > { %470 = vst.msk [vmem:[#allocation2 + $0x400] sm:$0xff] %vm367_vm0, %v8086_v0  ;;  %471 = vst.msk [vmem:[#allocation2 + $0x418] sm:$0xff] %vm367_vm0, %v8086_v0 }
  0x45   : > { %472 = vst.msk [vmem:[#allocation2 + $0x430] sm:$0xff] %vm367_vm0, %v8086_v0  ;;  %473 = vst.msk [vmem:[#allocation2 + $0x448] sm:$0xff] %vm367_vm0, %v8086_v0 }
  0x46   : > { %474 = vst.msk [vmem:[#allocation2 + $0x460] sm:$0xff] %vm367_vm0, %v8086_v0  ;;  %475 = vst.msk [vmem:[#allocation2 + $0x478] sm:$0xff] %vm367_vm0, %v8086_v0 }
  0x47   : > { %476 = vst.msk [vmem:[#allocation2 + $0x490] sm:$0xff] %vm367_vm0, %v8086_v0  ;;  %477 = vst.msk [vmem:[#allocation2 + $0x4a8] sm:$0xff] %vm367_vm0, %v8086_v0 }
  0x48   : > { %478 = vst.msk [vmem:[#allocation2 + $0x4c0] sm:$0xff] %vm367_vm0, %v8086_v0  ;;  %479 = vst.msk [vmem:[#allocation2 + $0x4d8] sm:$0xff] %vm367_vm0, %v8086_v0 }
  0x49   : > { %480 = vst.msk [vmem:[#allocation2 + $0x4f0] sm:$0xff] %vm367_vm0, %v8086_v0  ;;  %481 = vst.msk [vmem:[#allocation2 + $0x508] sm:$0xff] %vm367_vm0, %v8086_v0 }
  0x4a   : > { %482 = vst.msk [vmem:[#allocation2 + $0x520] sm:$0xff] %vm367_vm0, %v8086_v0  ;;  %483 = vst.msk [vmem:[#allocation2 + $0x538] sm:$0xff] %vm367_vm0, %v8086_v0 }
  0x4b   : > { %484 = vst.msk [vmem:[#allocation2 + $0x550] sm:$0xff] %vm367_vm0, %v8086_v0  ;;  %485 = vst.msk [vmem:[#allocation2 + $0x568] sm:$0xff] %vm367_vm0, %v8086_v0 }
  0x4c   : > { %486 = vst.msk [vmem:[#allocation2 + $0x580] sm:$0xff] %vm367_vm0, %v8086_v0  ;;  %487 = vst.msk [vmem:[#allocation2 + $0x598] sm:$0xff] %vm367_vm0, %v8086_v0 }
  0x4d   : > { %488 = vst.msk [vmem:[#allocation2 + $0x8] sm:$0xff] %vm367_vm0, %v8086_v0  ;;  %489 = vst.msk [vmem:[#allocation2 + $0xf8] sm:$0xff] %vm367_vm0, %v8086_v0 }
  0x4e   : > { %490 = vst.msk [vmem:[#allocation2 + $0x1e8] sm:$0xff] %vm367_vm0, %v8086_v0  ;;  %491 = vst.msk [vmem:[#allocation2 + $0x2d8] sm:$0xff] %vm367_vm0, %v8086_v0 }
  0x4f   : > { %492 = vst.msk [vmem:[#allocation2 + $0x3c8] sm:$0xff] %vm367_vm0, %v8086_v0  ;;  %493 = vst.msk [vmem:[#allocation2 + $0x4b8] sm:$0xff] %vm367_vm0, %v8086_v0 }
  0x50   : > { %495 = vst.msk [vmem:[#allocation2 + $0xe0] sm:$0xff] %vm367_vm0, %v8086_v0  ;;  %496 = vst.msk [vmem:[#allocation2 + $0x1d0] sm:$0xff] %vm367_vm0, %v8086_v0 }
  0x51   : > { %497 = vst.msk [vmem:[#allocation2 + $0x2c0] sm:$0xff] %vm367_vm0, %v8086_v0  ;;  %498 = vst.msk [vmem:[#allocation2 + $0x3b0] sm:$0xff] %vm367_vm0, %v8086_v0 }
  0x52   : > { %499 = vst.msk [vmem:[#allocation2 + $0x4a0] sm:$0xff] %vm367_vm0, %v8086_v0  ;;  %500 = vst.msk [vmem:[#allocation2 + $0x590] sm:$0xff] %vm367_vm0, %v8086_v0 }
  0x53   : > { %566 = vst.msk [vmem:[#allocation2 + $0x110] sm:$0xff] %vm367_vm0, %v5538_v4  ;;  %567 = vst.msk [vmem:[#allocation2 + $0x128] sm:$0xff] %vm367_vm0, %v5539_v5 }
  0x54   : > { %568 = vst.msk [vmem:[#allocation2 + $0x140] sm:$0xff] %vm367_vm0, %v5542_v6  ;;  %569 = vst.msk [vmem:[#allocation2 + $0x158] sm:$0xff] %vm367_vm0, %v5543_v7 }
  0x55   : > { %570 = vst.msk [vmem:[#allocation2 + $0x170] sm:$0xff] %vm367_vm0, %v5546_v11  ;;  %571 = vst.msk [vmem:[#allocation2 + $0x188] sm:$0xff] %vm367_vm0, %v5547_v12 }
  0x56   : > { %572 = vst.msk [vmem:[#allocation2 + $0x1a0] sm:$0xff] %vm367_vm0, %v5550_v13  ;;  %573 = vst.msk [vmem:[#allocation2 + $0x1b8] sm:$0xff] %vm367_vm0, %v5551_v14 }
  0x57   : > { %574 = vst.msk [vmem:[#allocation2 + $0x200] sm:$0xff] %vm367_vm0, %v5554_v18  ;;  %575 = vst.msk [vmem:[#allocation2 + $0x218] sm:$0xff] %vm367_vm0, %v5555_v19 }
  0x58   : > { %576 = vst.msk [vmem:[#allocation2 + $0x230] sm:$0xff] %vm367_vm0, %v5558_v20  ;;  %577 = vst.msk [vmem:[#allocation2 + $0x248] sm:$0xff] %vm367_vm0, %v5559_v21 }
  0x59   : > { %578 = vst.msk [vmem:[#allocation2 + $0x260] sm:$0xff] %vm367_vm0, %v5562_v25  ;;  %579 = vst.msk [vmem:[#allocation2 + $0x278] sm:$0xff] %vm367_vm0, %v5563_v26 }
  0x5a   : > { %580 = vst.msk [vmem:[#allocation2 + $0x290] sm:$0xff] %vm367_vm0, %v5566_v27  ;;  %581 = vst.msk [vmem:[#allocation2 + $0x2a8] sm:$0xff] %vm367_vm0, %v5567_v28 }
  0x5b   : > { %582 = vst.msk [vmem:[#allocation2 + $0x2f0] sm:$0xff] %vm367_vm0, %v5570_v31  ;;  %583 = vst.msk [vmem:[#allocation2 + $0x308] sm:$0xff] %vm367_vm0, %v5571_v32 }
  0x5c   : > { %584 = vst.msk [vmem:[#allocation2 + $0x320] sm:$0xff] %vm367_vm0, %v5574_v33  ;;  %585 = vst.msk [vmem:[#allocation2 + $0x338] sm:$0xff] %vm367_vm0, %v5575_v34  ;;  %601 = sbr.rel (%p5461_p10) target bundleno = 103 (0x67), region = 40 }
  0x5d   : > { %586 = vst.msk [vmem:[#allocation2 + $0x350] sm:$0xff] %vm367_vm0, %v5578_v37  ;;  %587 = vst.msk [vmem:[#allocation2 + $0x368] sm:$0xff] %vm367_vm0, %v5579_v38 }
  0x5e   : > { %588 = vst.msk [vmem:[#allocation2 + $0x380] sm:$0xff] %vm367_vm0, %v5582_v39  ;;  %589 = vst.msk [vmem:[#allocation2 + $0x398] sm:$0xff] %vm367_vm0, %v5583_v40 }
  0x5f   : > { %590 = vst.msk [vmem:[#allocation2 + $0x3e0] sm:$0xff] %vm367_vm0, %v5586_v41  ;;  %591 = vst.msk [vmem:[#allocation2 + $0x3f8] sm:$0xff] %vm367_vm0, %v5587_v42 }
  0x60   : > { %592 = vst.msk [vmem:[#allocation2 + $0x410] sm:$0xff] %vm367_vm0, %v5590_v43  ;;  %593 = vst.msk [vmem:[#allocation2 + $0x428] sm:$0xff] %vm367_vm0, %v5591_v44 }
  0x61   : > { %594 = vst.msk [vmem:[#allocation2 + $0x440] sm:$0xff] %vm367_vm0, %v5594_v45  ;;  %595 = vst.msk [vmem:[#allocation2 + $0x458] sm:$0xff] %vm367_vm0, %v5595_v46 }
  0x62   : > { %596 = vst.msk [vmem:[#allocation2 + $0x470] sm:$0xff] %vm367_vm0, %v5598_v47  ;;  %597 = vst.msk [vmem:[#allocation2 + $0x488] sm:$0xff] %vm367_vm0, %v5599_v48 }
  0x63   : > { %619 = vst.msk [vmem:[#allocation2 + $0x20] sm:$0xff] %vm367_vm0, %v5602_v52  ;;  %620 = vst.msk [vmem:[#allocation2 + $0x38] sm:$0xff] %vm367_vm0, %v5603_v53 }
  0x64   : > { %621 = vst.msk [vmem:[#allocation2 + $0x50] sm:$0xff] %vm367_vm0, %v5606_v54  ;;  %622 = vst.msk [vmem:[#allocation2 + $0x68] sm:$0xff] %vm367_vm0, %v5607_v55 }
  0x65   : > { %623 = vst.msk [vmem:[#allocation2 + $0x80] sm:$0xff] %vm367_vm0, %v5610_v57  ;;  %624 = vst.msk [vmem:[#allocation2 + $0x98] sm:$0xff] %vm367_vm0, %v5611_v58 }
  0x66   : > { %625 = vst.msk [vmem:[#allocation2 + $0xb0] sm:$0xff] %vm367_vm0, %v5614_v59  ;;  %626 = vst.msk [vmem:[#allocation2 + $0xc8] sm:$0xff] %vm367_vm0, %v5615_v60 }
  0x67 PF: > { %p5462_p11 = scmp.ne.s32.totalorder %s8068_s15, 0 }
  0x68   : > { %v8087_v61 = vmov (!%p5462_p11), 0.0  }
  0x69   : > { %630 = sbr.rel (%p5462_p11) target bundleno = 112 (0x70), region = 44  ;;  %632 = vst.msk [vmem:[#allocation2 + $0x20] sm:$0xff] (!%p5462_p11), %vm367_vm0, %v8087_v61  ;;  %633 = vst.msk [vmem:[#allocation2 + $0x38] sm:$0xff] (!%p5462_p11), %vm367_vm0, %v8087_v61 }
  0x6a   : > { %634 = vst.msk [vmem:[#allocation2 + $0x50] sm:$0xff] (!%p5462_p11), %vm367_vm0, %v8087_v61  ;;  %635 = vst.msk [vmem:[#allocation2 + $0x68] sm:$0xff] (!%p5462_p11), %vm367_vm0, %v8087_v61 }
  0x6b   : > { %636 = vst.msk [vmem:[#allocation2 + $0x80] sm:$0xff] (!%p5462_p11), %vm367_vm0, %v8087_v61  ;;  %637 = vst.msk [vmem:[#allocation2 + $0x98] sm:$0xff] (!%p5462_p11), %vm367_vm0, %v8087_v61 }
  0x6c   : > { %638 = vst.msk [vmem:[#allocation2 + $0xb0] sm:$0xff] (!%p5462_p11), %vm367_vm0, %v8087_v61  ;;  %639 = vst.msk [vmem:[#allocation2 + $0xc8] sm:$0xff] (!%p5462_p11), %vm367_vm0, %v8087_v61 }
  0x70 PF: > { %p5463_p12 = scmp.ge.s32.totalorder %s8068_s15, 1 }
  0x71   : > { %v5617_v62 = vld [vmem:[%s8511_s30] sm:$0xff] (!%p5463_p12)   ;;  %v5650_v63 = vld [vmem:[%s8511_s30 + $0x8] sm:$0xff] (!%p5463_p12)   ;;  %v5651_v0 = vld [vmem:[%s8511_s30 + $0x10] sm:$0xff] (!%p5463_p12)  }
  0x72   : > { %643 = sbr.rel (%p5463_p12) target bundleno = 121 (0x79), region = 48  ;;  %v5618_v1 = vunpack.c.l.bf16 (!%p5463_p12), %v5617_v62  ;;  %v5619_v2 = vunpack.c.h.bf16 (!%p5463_p12), %v5617_v62  ;;  %v5622_v3 = vunpack.c.l.bf16 (!%p5463_p12), %v5650_v63  ;;  %v5623_v4 = vunpack.c.h.bf16 (!%p5463_p12), %v5650_v63  ;;  %v5652_v5 = vld [vmem:[%s8511_s30 + $0x18] sm:$0xff] (!%p5463_p12)  }
  0x73   : > { %v5626_v6 = vunpack.c.l.bf16 (!%p5463_p12), %v5651_v0  ;;  %v5627_v7 = vunpack.c.h.bf16 (!%p5463_p12), %v5651_v0  ;;  %v5630_v8 = vunpack.c.l.bf16 (!%p5463_p12), %v5652_v5  ;;  %v5631_v9 = vunpack.c.h.bf16 (!%p5463_p12), %v5652_v5 }
  0x74   : > { %661 = vst.msk [vmem:[#allocation2 + $0x4d0] sm:$0xff] (!%p5463_p12), %vm367_vm0, %v5618_v1  ;;  %662 = vst.msk [vmem:[#allocation2 + $0x4e8] sm:$0xff] (!%p5463_p12), %vm367_vm0, %v5619_v2 }
  0x75   : > { %663 = vst.msk [vmem:[#allocation2 + $0x500] sm:$0xff] (!%p5463_p12), %vm367_vm0, %v5622_v3  ;;  %664 = vst.msk [vmem:[#allocation2 + $0x518] sm:$0xff] (!%p5463_p12), %vm367_vm0, %v5623_v4 }
  0x76   : > { %665 = vst.msk [vmem:[#allocation2 + $0x530] sm:$0xff] (!%p5463_p12), %vm367_vm0, %v5626_v6  ;;  %666 = vst.msk [vmem:[#allocation2 + $0x548] sm:$0xff] (!%p5463_p12), %vm367_vm0, %v5627_v7 }
  0x77   : > { %667 = vst.msk [vmem:[#allocation2 + $0x560] sm:$0xff] (!%p5463_p12), %vm367_vm0, %v5630_v8  ;;  %668 = vst.msk [vmem:[#allocation2 + $0x578] sm:$0xff] (!%p5463_p12), %vm367_vm0, %v5631_v9 }
  0x79 PF: > { %p5464_p13 = scmp.ne.s32.totalorder %s8068_s15, 1 }
  0x7a   : > { %v8088_v10 = vmov (!%p5464_p13), 0.0  }
  0x7b   : > { %672 = sbr.rel (%p5464_p13) target bundleno = 130 (0x82), region = 52  ;;  %674 = vst.msk [vmem:[#allocation2 + $0x4d0] sm:$0xff] (!%p5464_p13), %vm367_vm0, %v8088_v10  ;;  %675 = vst.msk [vmem:[#allocation2 + $0x4e8] sm:$0xff] (!%p5464_p13), %vm367_vm0, %v8088_v10 }
  0x7c   : > { %676 = vst.msk [vmem:[#allocation2 + $0x500] sm:$0xff] (!%p5464_p13), %vm367_vm0, %v8088_v10  ;;  %677 = vst.msk [vmem:[#allocation2 + $0x518] sm:$0xff] (!%p5464_p13), %vm367_vm0, %v8088_v10 }
  0x7d   : > { %678 = vst.msk [vmem:[#allocation2 + $0x530] sm:$0xff] (!%p5464_p13), %vm367_vm0, %v8088_v10  ;;  %679 = vst.msk [vmem:[#allocation2 + $0x548] sm:$0xff] (!%p5464_p13), %vm367_vm0, %v8088_v10 }
  0x7e   : > { %680 = vst.msk [vmem:[#allocation2 + $0x560] sm:$0xff] (!%p5464_p13), %vm367_vm0, %v8088_v10  ;;  %681 = vst.msk [vmem:[#allocation2 + $0x578] sm:$0xff] (!%p5464_p13), %vm367_vm0, %v8088_v10 }
  0x82 PF: > { %v691_v11 = vld [vmem:[#allocation2 + $0x48] sm:$0xff]  ;;  %v692_v12 = vld [vmem:[#allocation2 + $0x50] sm:$0xff]  ;;  %v685_v13 = vld [vmem:[#allocation2 + $0x18] sm:$0xff]  ;;  %s8089_s15 = smov 4   ;;  %s8090_s5 = smov 8   ;;  %vm2580_vm1 = vcmask 64512  }
  0x83   : > { %v8569_v14 = vpack.i.bf16 %v692_v12, %v691_v11  ;;  %v686_v15 = vld [vmem:[#allocation2 + $0x20] sm:$0xff]  ;;  %v695_v17 = vld [vmem:[#allocation2 + $0x68] sm:$0xff]  ;;  %v688_v19 = vld [vmem:[#allocation2 + $0x30] sm:$0xff]  ;;  %s8091_s6 = smov 12   ;;  %s8092_s7 = smov 16   ;;  %vm2645_vm2 = vcmask 97280  }
  0x84   : > { %v694_v16 = vld [vmem:[#allocation2 + $0x60] sm:$0xff]  ;;  %v5949_v18 = vpack.i.bf16 %v686_v15, %v685_v13  ;;  %v689_v20 = vld [vmem:[#allocation2 + $0x38] sm:$0xff]  ;;  %v700_v22 = vld [vmem:[#allocation2 + $0x90] sm:$0xff]  ;;  %s8093_s8 = smov 20   ;;  %s8094_s9 = smov 24   ;;  %vm2710_vm3 = vcmask 130048  }
  0x85   : > { %5960 = vrot.lane.b32.xlu1 %v8569_v14, %s8089_s15  ;;  %v8573_v21 = vpack.i.bf16 %v695_v17, %v694_v16  ;;  %v8576_v23 = vpack.i.bf16 %v689_v20, %v688_v19  ;;  %v701_v24 = vld [vmem:[#allocation2 + $0x98] sm:$0xff]  ;;  %v706_v25 = vld [vmem:[#allocation2 + $0xc0] sm:$0xff]  ;;  %v707_v26 = vld [vmem:[#allocation2 + $0xc8] sm:$0xff]  ;;  %s8095_s10 = smov 28   ;;  %vm3335_vm4 = vcmask 1041408   ;;  %s8096_s30 = smov 32  }
  0x86   : > { %5950 = vrot.lane.b32.xlu0 %v5949_v18, %s8089_s15  ;;  %v697_v27 = vld [vmem:[#allocation2 + $0x78] sm:$0xff]  ;;  %v698_v28 = vld [vmem:[#allocation2 + $0x80] sm:$0xff]  ;;  %v8578_v29 = vpack.i.bf16 %v707_v26, %v706_v25  ;;  %v8582_v30 = vpack.i.bf16 %v701_v24, %v700_v22  ;;  %v703_v32 = vld [vmem:[#allocation2 + $0xa8] sm:$0xff]  ;;  %vm2775_vm5 = vcmask 162816   ;;  %vm2840_vm6 = vcmask 195584  }
  0x87   : > { %v8586_v31 = vpack.i.bf16 %v698_v28, %v697_v27  ;;  %v704_v33 = vld [vmem:[#allocation2 + $0xb0] sm:$0xff]  ;;  %v718_v35 = vld [vmem:[#allocation2 + $0x120] sm:$0xff]  ;;  %v719_v36 = vld [vmem:[#allocation2 + $0x128] sm:$0xff]  ;;  %vm2905_vm7 = vcmask 228352   ;;  %vm2970_vm8 = vcmask 261120   ;;  %vm3286_vm9 = vcmask 293888  }
  0x88   : > { %v8592_v34 = vpack.i.bf16 %v704_v33, %v703_v32  ;;  %v715_v37 = vld [vmem:[#allocation2 + $0x108] sm:$0xff]  ;;  %v716_v38 = vld [vmem:[#allocation2 + $0x110] sm:$0xff]  ;;  %v8596_v39 = vpack.i.bf16 %v719_v36, %v718_v35  ;;  %v725_v42 = vld [vmem:[#allocation2 + $0x158] sm:$0xff]  ;;  %vm3099_vm10 = vcmask 1040384   ;;  %vm4842_vm11 = vcmask 1046528  }
  0x89   : > { %5965 = vrot.lane.b32.xlu1 %v8573_v21, %s8089_s15  ;;  %v8600_v40 = vpack.i.bf16 %v716_v38, %v715_v37  ;;  %v724_v41 = vld [vmem:[#allocation2 + $0x150] sm:$0xff]  ;;  %v721_v43 = vld [vmem:[#allocation2 + $0x138] sm:$0xff]  ;;  %v722_v44 = vld [vmem:[#allocation2 + $0x140] sm:$0xff] }
  0x8a   : > { %5955 = vrot.lane.b32.xlu0 %v8576_v23, %s8089_s15  ;;  %v8604_v45 = vpack.i.bf16 %v725_v42, %v724_v41  ;;  %v8608_v46 = vpack.i.bf16 %v722_v44, %v721_v43  ;;  %v730_v47 = vld [vmem:[#allocation2 + $0x180] sm:$0xff]  ;;  %v731_v48 = vld [vmem:[#allocation2 + $0x188] sm:$0xff]  ;;  %v728_v50 = vld [vmem:[#allocation2 + $0x170] sm:$0xff] }
  0x8b   : > { %v727_v49 = vld [vmem:[#allocation2 + $0x168] sm:$0xff]  ;;  %v740_v52 = vld [vmem:[#allocation2 + $0x1d0] sm:$0xff]  ;;  %v8612_v53 = vpack.i.bf16 %v731_v48, %v730_v47  ;;  %v737_v57 = vld [vmem:[#allocation2 + $0x1b8] sm:$0xff] }
  0x8c   : > { %v739_v51 = vld [vmem:[#allocation2 + $0x1c8] sm:$0xff]  ;;  %v8618_v55 = vpack.i.bf16 %v728_v50, %v727_v49  ;;  %v736_v56 = vld [vmem:[#allocation2 + $0x1b0] sm:$0xff]  ;;  %v733_v58 = vld [vmem:[#allocation2 + $0x198] sm:$0xff] }
  0x8d   : > { %5975 = vrot.lane.b32.xlu1 %v8582_v30, %s8089_s15  ;;  %v8614_v54 = vpack.i.bf16 %v740_v52, %v739_v51  ;;  %v734_v59 = vld [vmem:[#allocation2 + $0x1a0] sm:$0xff]  ;;  %v748_v60 = vld [vmem:[#allocation2 + $0x210] sm:$0xff]  ;;  %v749_v61 = vld [vmem:[#allocation2 + $0x218] sm:$0xff]  ;;  %v8622_v62 = vpack.i.bf16 %v737_v57, %v736_v56 }
  0x8e   : > { %5970 = vrot.lane.b32.xlu0 %v8586_v31, %s8089_s15  ;;  %v745_v63 = vld [vmem:[#allocation2 + $0x1f8] sm:$0xff]  ;;  %v746_v0 = vld [vmem:[#allocation2 + $0x200] sm:$0xff]  ;;  %v8626_v1 = vpack.i.bf16 %v734_v59, %v733_v58  ;;  %v8630_v2 = vpack.i.bf16 %v749_v61, %v748_v60  ;;  %v755_v5 = vld [vmem:[#allocation2 + $0x248] sm:$0xff] }
  0x8f   : > { %v8634_v3 = vpack.i.bf16 %v746_v0, %v745_v63  ;;  %v754_v4 = vld [vmem:[#allocation2 + $0x240] sm:$0xff]  ;;  %v751_v6 = vld [vmem:[#allocation2 + $0x228] sm:$0xff]  ;;  %v752_v7 = vld [vmem:[#allocation2 + $0x230] sm:$0xff] }
  0x90   : > { %v8638_v8 = vpack.i.bf16 %v755_v5, %v754_v4  ;;  %v8642_v9 = vpack.i.bf16 %v752_v7, %v751_v6  ;;  %v760_v10 = vld [vmem:[#allocation2 + $0x270] sm:$0xff]  ;;  %v761_v11 = vld [vmem:[#allocation2 + $0x278] sm:$0xff]  ;;  %v758_v13 = vld [vmem:[#allocation2 + $0x260] sm:$0xff] }
  0x91   : > { %5985 = vrot.lane.b32.xlu1 %v8578_v29, %s8089_s15  ;;  %v757_v12 = vld [vmem:[#allocation2 + $0x258] sm:$0xff]  ;;  %v8646_v15 = vpack.i.bf16 %v761_v11, %v760_v10  ;;  %v766_v17 = vld [vmem:[#allocation2 + $0x2a0] sm:$0xff]  ;;  %v767_v18 = vld [vmem:[#allocation2 + $0x2a8] sm:$0xff] }
  0x92   : > { %5980 = vrot.lane.b32.xlu0 %v8592_v34, %s8089_s15  ;;  %v8650_v16 = vpack.i.bf16 %v758_v13, %v757_v12  ;;  %v763_v19 = vld [vmem:[#allocation2 + $0x288] sm:$0xff]  ;;  %v764_v20 = vld [vmem:[#allocation2 + $0x290] sm:$0xff]  ;;  %v8654_v22 = vpack.i.bf16 %v767_v18, %v766_v17  ;;  %v778_v25 = vld [vmem:[#allocation2 + $0x300] sm:$0xff] }
  0x93   : > { %v8658_v24 = vpack.i.bf16 %v764_v20, %v763_v19  ;;  %v779_v26 = vld [vmem:[#allocation2 + $0x308] sm:$0xff]  ;;  %v776_v28 = vld [vmem:[#allocation2 + $0x2f0] sm:$0xff]  ;;  %v785_v36 = vld [vmem:[#allocation2 + $0x338] sm:$0xff] }
  0x94   : > { %v775_v27 = vld [vmem:[#allocation2 + $0x2e8] sm:$0xff]  ;;  %v8662_v32 = vpack.i.bf16 %v779_v26, %v778_v25  ;;  %v784_v35 = vld [vmem:[#allocation2 + $0x330] sm:$0xff]  ;;  %v781_v37 = vld [vmem:[#allocation2 + $0x318] sm:$0xff] }
  0x95   : > { %5995 = vrot.lane.b32.xlu1 %v8596_v39, %s8089_s15  ;;  %v8666_v33 = vpack.i.bf16 %v776_v28, %v775_v27  ;;  %v782_v38 = vld [vmem:[#allocation2 + $0x320] sm:$0xff]  ;;  %v8670_v41 = vpack.i.bf16 %v785_v36, %v784_v35  ;;  %v791_v44 = vld [vmem:[#allocation2 + $0x368] sm:$0xff]  ;;  %v788_v50 = vld [vmem:[#allocation2 + $0x350] sm:$0xff] }
  0x96   : > { %5990 = vrot.lane.b32.xlu0 %v8600_v40, %s8089_s15  ;;  %v790_v42 = vld [vmem:[#allocation2 + $0x360] sm:$0xff]  ;;  %v8674_v43 = vpack.i.bf16 %v782_v38, %v781_v37  ;;  %v803_v48 = vld [vmem:[#allocation2 + $0x3c8] sm:$0xff]  ;;  %v796_v57 = vld [vmem:[#allocation2 + $0x390] sm:$0xff] }
  0x97   : > { %v802_v47 = vld [vmem:[#allocation2 + $0x3c0] sm:$0xff]  ;;  %v787_v49 = vld [vmem:[#allocation2 + $0x348] sm:$0xff]  ;;  %v8680_v52 = vpack.i.bf16 %v791_v44, %v790_v42  ;;  %v797_v58 = vld [vmem:[#allocation2 + $0x398] sm:$0xff] }
  0x98   : > { %v8676_v51 = vpack.i.bf16 %v803_v48, %v802_v47  ;;  %v8684_v56 = vpack.i.bf16 %v788_v50, %v787_v49  ;;  %v793_v59 = vld [vmem:[#allocation2 + $0x378] sm:$0xff]  ;;  %v794_v60 = vld [vmem:[#allocation2 + $0x380] sm:$0xff]  ;;  %v8688_v61 = vpack.i.bf16 %v797_v58, %v796_v57  ;;  %v8771_v12 = vld [vmem:[#allocation2 + $0xf0] sm:$0xff] }
  0x99   : > { %6005 = vrot.lane.b32.xlu1 %v8604_v45, %s8089_s15  ;;  %v8692_v63 = vpack.i.bf16 %v794_v60, %v793_v59  ;;  %v709_v0 = vld [vmem:[#allocation2 + $0xd8] sm:$0xff]  ;;  %v710_v4 = vld [vmem:[#allocation2 + $0xe0] sm:$0xff]  ;;  %v8810_v37 = vld [vmem:[#allocation2 + $0x1e8] sm:$0xff] }
  0x9a   : > { %6000 = vrot.lane.b32.xlu0 %v8608_v46, %s8089_s15  ;;  %14032 = vst [vmem:[#allocation3_spill] sm:$0xff] %v8676_v51  ;;  %v6144_v5 = vpack.i.bf16 %v710_v4, %v709_v0  ;;  %v8773_v13 = vld [vmem:[#allocation2 + $0xf8] sm:$0xff]  ;;  %v8808_v36 = vld [vmem:[#allocation2 + $0x1e0] sm:$0xff]  ;;  %14034 = vst [vmem:[#allocation5_spill] sm:$0xff] %v8810_v37 }
  0x9b   : > { %v6269_v18 = vpack.i.bf16 %v8773_v13, %v8771_v12  ;;  %14033 = vst [vmem:[#allocation4_spill] sm:$0xff] %v8808_v36  ;;  %v8820_v42 = vpack.i.bf16 %v8810_v37, %v8808_v36  ;;  %v8848_v59 = vld [vmem:[#allocation2 + $0x2d0] sm:$0xff]  ;;  %v8850_v60 = vld [vmem:[#allocation2 + $0x2d8] sm:$0xff] }
  0x9c   : > { %14039 = vst [vmem:[#allocation10_spill] sm:$0xff] %v8848_v59  ;;  %14040 = vst [vmem:[#allocation11_spill] sm:$0xff] %v8850_v60  ;;  %v8860_v4 = vpack.i.bf16 %v8850_v60, %v8848_v59  ;;  %v805_v59 = vld [vmem:[#allocation2 + $0x3d8] sm:$0xff]  ;;  %v806_v60 = vld [vmem:[#allocation2 + $0x3e0] sm:$0xff] }
  0x9d   : > { %6015 = vrot.lane.b32.xlu1 %v8612_v53, %s8089_s15 }
  0x9e   : > { %6010 = vrot.lane.b32.xlu0 %v8618_v55, %s8089_s15 }
  0xa1   : > { %6025 = vrot.lane.b32.xlu1 %v8622_v62, %s8089_s15 }
  0xa2   : > { %6020 = vrot.lane.b32.xlu0 %v8626_v1, %s8089_s15 }
  0xa5   : > { %6035 = vrot.lane.b32.xlu1 %v8630_v2, %s8089_s15 }
  0xa6   : > { %6030 = vrot.lane.b32.xlu0 %v8634_v3, %s8089_s15 }
  0xa9   : > { %6045 = vrot.lane.b32.xlu1 %v8638_v8, %s8089_s15 }
  0xaa   : > { %6040 = vrot.lane.b32.xlu0 %v8642_v9, %s8089_s15 }
  0xad   : > { %6055 = vrot.lane.b32.xlu1 %v8646_v15, %s8089_s15 }
  0xae   : > { %6050 = vrot.lane.b32.xlu0 %v8650_v16, %s8089_s15 }
  0xb1   : > { %6065 = vrot.lane.b32.xlu1 %v8654_v22, %s8089_s15 }
  0xb2   : > { %6060 = vrot.lane.b32.xlu0 %v8658_v24, %s8089_s15 }
  0xb5   : > { %6075 = vrot.lane.b32.xlu1 %v8662_v32, %s8089_s15 }
  0xb6   : > { %6070 = vrot.lane.b32.xlu0 %v8666_v33, %s8089_s15 }
  0xb9   : > { %6085 = vrot.lane.b32.xlu1 %v8670_v41, %s8089_s15 }
  0xba   : > { %6080 = vrot.lane.b32.xlu0 %v8674_v43, %s8089_s15 }
  0xbd   : > { %6095 = vrot.lane.b32.xlu1 %v8680_v52, %s8089_s15 }
  0xbe   : > { %6090 = vrot.lane.b32.xlu0 %v8684_v56, %s8089_s15 }
  0xc1   : > { %6105 = vrot.lane.b32.xlu1 %v8688_v61, %s8089_s15 }
  0xc2   : > { %6100 = vrot.lane.b32.xlu0 %v8692_v63, %s8089_s15 }
  0xc5   : > { %6115 = vrot.lane.b32.xlu1 %v8569_v14, %s8090_s5  ;;  %v769_v14 = vld [vmem:[#allocation2 + $0x2b8] sm:$0xff] }
  0xc6   : > { %6110 = vrot.lane.b32.xlu0 %v8576_v23, %s8090_s5 }
  0xc9   : > { %6125 = vrot.lane.b32.xlu1 %v8586_v31, %s8090_s5  ;;  %v799_v31 = vld [vmem:[#allocation2 + $0x3a8] sm:$0xff] }
  0xca   : > { %6120 = vrot.lane.b32.xlu0 %v8573_v21, %s8090_s5  ;;  %v770_v21 = vld [vmem:[#allocation2 + $0x2c0] sm:$0xff] }
  0xcb   : > { %v8739_v23 = vpack.i.bf16 %v770_v21, %v769_v14 }
  0xcd   : > { %6135 = vrot.lane.b32.xlu1 %v8592_v34, %s8090_s5  ;;  %v800_v34 = vld [vmem:[#allocation2 + $0x3b0] sm:$0xff] }
  0xce   : > { %6130 = vrot.lane.b32.xlu0 %v8582_v30, %s8090_s5  ;;  %v8765_v10 = vpack.i.bf16 %v800_v34, %v799_v31 }
  0xd1   : > { %6145 = vrot.lane.b32.xlu1 %v6144_v5, %s8090_s5 }
  0xd2   : > { %6140 = vrot.lane.b32.xlu0 %v8578_v29, %s8090_s5 }
  0xd5   : > { %6155 = vrot.lane.b32.xlu1 %v8608_v46, %s8090_s5 }
  0xd6   : > { %6150 = vrot.lane.b32.xlu0 %v8596_v39, %s8090_s5 }
  0xd9   : > { %6165 = vrot.lane.b32.xlu1 %v8618_v55, %s8090_s5 }
  0xda   : > { %6160 = vrot.lane.b32.xlu0 %v8604_v45, %s8090_s5 }
  0xdd   : > { %6175 = vrot.lane.b32.xlu1 %v8626_v1, %s8090_s5 }
  0xde   : > { %6170 = vrot.lane.b32.xlu0 %v8612_v53, %s8090_s5 }
  0xe1   : > { %6185 = vrot.lane.b32.xlu1 %v8614_v54, %s8090_s5 }
  0xe2   : > { %6180 = vrot.lane.b32.xlu0 %v8622_v62, %s8090_s5 }
  0xe5   : > { %6195 = vrot.lane.b32.xlu1 %v8642_v9, %s8090_s5 }
  0xe6   : > { %6190 = vrot.lane.b32.xlu0 %v8630_v2, %s8090_s5 }
  0xe9   : > { %6205 = vrot.lane.b32.xlu1 %v8650_v16, %s8090_s5 }
  0xea   : > { %6200 = vrot.lane.b32.xlu0 %v8638_v8, %s8090_s5 }
  0xed   : > { %6215 = vrot.lane.b32.xlu1 %v8658_v24, %s8090_s5 }
  0xee   : > { %6210 = vrot.lane.b32.xlu0 %v8646_v15, %s8090_s5 }
  0xf1   : > { %6225 = vrot.lane.b32.xlu1 %v8739_v23, %s8090_s5 }
  0xf2   : > { %6220 = vrot.lane.b32.xlu0 %v8654_v22, %s8090_s5 }
  0xf5   : > { %6235 = vrot.lane.b32.xlu1 %v8674_v43, %s8090_s5 }
  0xf6   : > { %6230 = vrot.lane.b32.xlu0 %v8662_v32, %s8090_s5 }
  0xf7   : > { %v8751_v29 = vpop.permute.xlu1 %5960 }
  0xf8   : > { %v8753_v30 = vpop.permute.xlu0 %5950 }
  0xf9   : > { %6245 = vrot.lane.b32.xlu1 %v8684_v56, %s8090_s5 }
  0xfa   : > { %6240 = vrot.lane.b32.xlu0 %v8670_v41, %s8090_s5 }
  0xfb   : > { %v8759_v6 = vpop.permute.xlu1 %5965 }
  0xfc   : > { %v8761_v7 = vpop.permute.xlu0 %5955 }
  0xfd   : > { %6255 = vrot.lane.b32.xlu1 %v8692_v63, %s8090_s5 }
  0xfe   : > { %6250 = vrot.lane.b32.xlu0 %v8680_v52, %s8090_s5 }
  0xff   : > { %v8769_v11 = vpop.permute.xlu1 %5975 }
 0x100   : > { %v8775_v17 = vpop.permute.xlu0 %5970 }
 0x101   : > { %6265 = vrot.lane.b32.xlu1 %v8765_v10, %s8090_s5 }
 0x102   : > { %6260 = vrot.lane.b32.xlu0 %v8688_v61, %s8090_s5 }
 0x103   : > { %v8783_v19 = vpop.permute.xlu1 %5985 }
 0x104   : > { %v8785_v20 = vpop.permute.xlu0 %5980 }
 0x105   : > { %6275 = vrot.lane.b32.xlu1 %v8600_v40, %s8091_s6 }
 0x106   : > { %6270 = vrot.lane.b32.xlu0 %v6269_v18, %s8091_s6 }
 0x107   : > { %v8790_v25 = vpop.permute.xlu1 %5995 }
 0x108   : > { %v8792_v26 = vpop.permute.xlu0 %5990 }
 0x109   : > { %6285 = vrot.lane.b32.xlu1 %v8608_v46, %s8091_s6 }
 0x10a   : > { %6280 = vrot.lane.b32.xlu0 %v8596_v39, %s8091_s6 }
 0x10b   : > { %v8798_v27 = vpop.permute.xlu1 %6005 }
 0x10c   : > { %v8800_v28 = vpop.permute.xlu0 %6000 }
 0x10d   : > { %6295 = vrot.lane.b32.xlu1 %v8618_v55, %s8091_s6 }
 0x10e   : > { %6290 = vrot.lane.b32.xlu0 %v8604_v45, %s8091_s6 }
 0x10f   : > { %v8806_v35 = vpop.permute.xlu1 %6015 }
 0x110   : > { %v8812_v38 = vpop.permute.xlu0 %6010 }
 0x111   : > { %6305 = vrot.lane.b32.xlu1 %v8626_v1, %s8091_s6 }
 0x112   : > { %6300 = vrot.lane.b32.xlu0 %v8612_v53, %s8091_s6 }
 0x113   : > { %v8822_v44 = vpop.permute.xlu1 %6025 }
 0x114   : > { %v8824_v47 = vpop.permute.xlu0 %6020 }
 0x115   : > { %6315 = vrot.lane.b32.xlu1 %v8634_v3, %s8091_s6 }
 0x116   : > { %6310 = vrot.lane.b32.xlu0 %v8820_v42, %s8091_s6 }
 0x117   : > { %v8830_v48 = vpop.permute.xlu1 %6035 }
 0x118   : > { %v8832_v49 = vpop.permute.xlu0 %6030 }
 0x119   : > { %14035 = vst [vmem:[#allocation6_spill] sm:$0xff] %v8832_v49  ;;  %6325 = vrot.lane.b32.xlu1 %v8642_v9, %s8091_s6 }
 0x11a   : > { %6320 = vrot.lane.b32.xlu0 %v8630_v2, %s8091_s6 }
 0x11b   : > { %v8838_v50 = vpop.permute.xlu1 %6045 }
 0x11c   : > { %14036 = vst [vmem:[#allocation7_spill] sm:$0xff] %v8838_v50  ;;  %v8840_v57 = vpop.permute.xlu0 %6040 }
 0x11d   : > { %14037 = vst [vmem:[#allocation8_spill] sm:$0xff] %v8840_v57  ;;  %6335 = vrot.lane.b32.xlu1 %v8650_v16, %s8091_s6  ;;  %v814_v57 = vld [vmem:[#allocation2 + $0x420] sm:$0xff] }
 0x11e   : > { %6330 = vrot.lane.b32.xlu0 %v8638_v8, %s8091_s6 }
 0x11f   : > { %v8846_v58 = vpop.permute.xlu1 %6055 }
 0x120   : > { %14038 = vst [vmem:[#allocation9_spill] sm:$0xff] %v8846_v58  ;;  %v8852_v0 = vpop.permute.xlu0 %6050  ;;  %v809_v58 = vld [vmem:[#allocation2 + $0x3f8] sm:$0xff] }
 0x121   : > { %14041 = vst [vmem:[#allocation12_spill] sm:$0xff] %v8852_v0  ;;  %6345 = vrot.lane.b32.xlu1 %v8658_v24, %s8091_s6  ;;  %v808_v0 = vld [vmem:[#allocation2 + $0x3f0] sm:$0xff] }
 0x122   : > { %6340 = vrot.lane.b32.xlu0 %v8646_v15, %s8091_s6 }
 0x123   : > { %v8862_v5 = vpop.permute.xlu1 %6065 }
 0x124   : > { %14042 = vst [vmem:[#allocation13_spill] sm:$0xff] %v8862_v5  ;;  %v8864_v14 = vpop.permute.xlu0 %6060 }
 0x125   : > { %14043 = vst [vmem:[#allocation14_spill] sm:$0xff] %v8864_v14  ;;  %6355 = vrot.lane.b32.xlu1 %v8666_v33, %s8091_s6  ;;  %v8892_v14 = vpack.i.bf16 %v806_v60, %v805_v59  ;;  %v8906_v59 = vpack.i.bf16 %v809_v58, %v808_v0  ;;  %v817_v60 = vld [vmem:[#allocation2 + $0x438] sm:$0xff]  ;;  %v823_v58 = vld [vmem:[#allocation2 + $0x468] sm:$0xff]  ;;  %v824_v0 = vld [vmem:[#allocation2 + $0x470] sm:$0xff] }
 0x126   : > { %6350 = vrot.lane.b32.xlu0 %v8860_v4, %s8091_s6 }
 0x127   : > { %v8870_v21 = vpop.permute.xlu1 %6075 }
 0x128   : > { %14044 = vst [vmem:[#allocation15_spill] sm:$0xff] %v8870_v21  ;;  %v8872_v31 = vpop.permute.xlu0 %6070 }
 0x129   : > { %14045 = vst [vmem:[#allocation16_spill] sm:$0xff] %v8872_v31  ;;  %6365 = vrot.lane.b32.xlu1 %v8674_v43, %s8091_s6 }
 0x12a   : > { %6360 = vrot.lane.b32.xlu0 %v8662_v32, %s8091_s6 }
 0x12b   : > { %v8878_v34 = vpop.permute.xlu1 %6085 }
 0x12c   : > { %14046 = vst [vmem:[#allocation17_spill] sm:$0xff] %v8878_v34  ;;  %v8880_v18 = vpop.permute.xlu0 %6080  ;;  %v812_v34 = vld [vmem:[#allocation2 + $0x410] sm:$0xff] }
 0x12d   : > { %14047 = vst [vmem:[#allocation18_spill] sm:$0xff] %v8880_v18  ;;  %6375 = vrot.lane.b32.xlu1 %v8684_v56, %s8091_s6  ;;  %v811_v18 = vld [vmem:[#allocation2 + $0x408] sm:$0xff] }
 0x12e   : > { %6370 = vrot.lane.b32.xlu0 %v8670_v41, %s8091_s6 }
 0x12f   : > { %v8886_v21 = vpop.permute.xlu1 %6095 }
 0x130   : > { %14048 = vst [vmem:[#allocation19_spill] sm:$0xff] %v8886_v21  ;;  %v8888_v31 = vpop.permute.xlu0 %6090  ;;  %v818_v21 = vld [vmem:[#allocation2 + $0x440] sm:$0xff] }
 0x131   : > { %14049 = vst [vmem:[#allocation20_spill] sm:$0xff] %v8888_v31  ;;  %6385 = vrot.lane.b32.xlu1 %v8692_v63, %s8091_s6  ;;  %v8902_v31 = vpack.i.bf16 %v812_v34, %v811_v18 }
 0x132   : > { %6380 = vrot.lane.b32.xlu0 %v8680_v52, %s8091_s6 }
 0x133   : > { %v8896_v5 = vpop.permute.xlu1 %6105 }
 0x134   : > { %14050 = vst [vmem:[#allocation21_spill] sm:$0xff] %v8896_v5  ;;  %v8898_v36 = vpop.permute.xlu0 %6100  ;;  %v815_v5 = vld [vmem:[#allocation2 + $0x428] sm:$0xff] }
 0x135   : > { %14051 = vst [vmem:[#allocation22_spill] sm:$0xff] %v8898_v36  ;;  %6395 = vrot.lane.b32.xlu1 %v8892_v14, %s8091_s6  ;;  %v8914_v36 = vpack.i.bf16 %v818_v21, %v817_v60  ;;  %v8918_v34 = vpack.i.bf16 %v815_v5, %v814_v57 }
 0x136   : > { %6390 = vrot.lane.b32.xlu0 %v8676_v51, %s8091_s6  ;;  %v820_v51 = vld [vmem:[#allocation2 + $0x450] sm:$0xff] }
 0x137   : > { %v8908_v37 = vpop.permute.xlu1 %6115 }
 0x138   : > { %14052 = vst [vmem:[#allocation23_spill] sm:$0xff] %v8908_v37  ;;  %v8910_v50 = vpop.permute.xlu0 %6110  ;;  %v821_v37 = vld [vmem:[#allocation2 + $0x458] sm:$0xff] }
 0x139   : > { %14053 = vst [vmem:[#allocation24_spill] sm:$0xff] %v8910_v50  ;;  %6405 = vrot.lane.b32.xlu1 %v8902_v31, %s8091_s6  ;;  %v8926_v50 = vpack.i.bf16 %v824_v0, %v823_v58  ;;  %v8930_v21 = vpack.i.bf16 %v821_v37, %v820_v51 }
 0x13a   : > { %6400 = vrot.lane.b32.xlu0 %v8906_v59, %s8091_s6 }
 0x13b   : > { %v8920_v18 = vpop.permute.xlu1 %6125 }
 0x13c   : > { %v8922_v49 = vpop.permute.xlu0 %6120 }
 0x13d   : > { %14054 = vst [vmem:[#allocation25_spill] sm:$0xff] %v8922_v49  ;;  %6415 = vrot.lane.b32.xlu1 %v8914_v36, %s8091_s6 }
 0x13e   : > { %6410 = vrot.lane.b32.xlu0 %v8918_v34, %s8091_s6 }
 0x13f   : > { %v8932_v57 = vpop.permute.xlu1 %6135 }
 0x140   : > { %v8934_v5 = vpop.permute.xlu0 %6130 }
 0x141   : > { %6425 = vrot.lane.b32.xlu1 %v8926_v50, %s8091_s6 }
 0x142   : > { %6420 = vrot.lane.b32.xlu0 %v8930_v21, %s8091_s6 }
 0x143   : > { %v8940_v60 = vpop.permute.xlu1 %6145 }
 0x144   : > { %14055 = vst [vmem:[#allocation26_spill] sm:$0xff] %v8940_v60  ;;  %v8942_v49 = vpop.permute.xlu0 %6140 }
 0x145   : > { %14056 = vst [vmem:[#allocation27_spill] sm:$0xff] %v8942_v49  ;;  %6435 = vrot.lane.b32.xlu1 %v8596_v39, %s8092_s7 }
 0x146   : > { %6430 = vrot.lane.b32.xlu0 %v8600_v40, %s8092_s7 }
 0x147   : > { %v8948_v51 = vpop.permute.xlu1 %6155 }
 0x148   : > { %14057 = vst [vmem:[#allocation28_spill] sm:$0xff] %v8948_v51  ;;  %v8950_v37 = vpop.permute.xlu0 %6150 }
 0x149   : > { %14058 = vst [vmem:[#allocation29_spill] sm:$0xff] %v8950_v37  ;;  %6445 = vrot.lane.b32.xlu1 %v8604_v45, %s8092_s7 }
 0x14a   : > { %6440 = vrot.lane.b32.xlu0 %v8608_v46, %s8092_s7 }
 0x14b   : > { %v8956_v58 = vpop.permute.xlu1 %6165 }
 0x14c   : > { %14059 = vst [vmem:[#allocation30_spill] sm:$0xff] %v8956_v58  ;;  %v8958_v0 = vpop.permute.xlu0 %6160 }
 0x14d   : > { %14060 = vst [vmem:[#allocation31_spill] sm:$0xff] %v8958_v0  ;;  %6455 = vrot.lane.b32.xlu1 %v8612_v53, %s8092_s7 }
 0x14e   : > { %6450 = vrot.lane.b32.xlu0 %v8618_v55, %s8092_s7 }
 0x14f   : > { %v8964_v40 = vpop.permute.xlu1 %6175 }
 0x150   : > { %14061 = vst [vmem:[#allocation32_spill] sm:$0xff] %v8964_v40  ;;  %v8966_v51 = vpop.permute.xlu0 %6170 }
 0x151   : > { %14062 = vst [vmem:[#allocation33_spill] sm:$0xff] %v8966_v51  ;;  %6465 = vrot.lane.b32.xlu1 %v8622_v62, %s8092_s7 }
 0x152   : > { %6460 = vrot.lane.b32.xlu0 %v8626_v1, %s8092_s7 }
 0x153   : > { %v8972_v37 = vpop.permute.xlu1 %6185 }
 0x154   : > { %14063 = vst [vmem:[#allocation34_spill] sm:$0xff] %v8972_v37  ;;  %v8974_v58 = vpop.permute.xlu0 %6180 }
 0x155   : > { %14064 = vst [vmem:[#allocation35_spill] sm:$0xff] %v8974_v58  ;;  %6475 = vrot.lane.b32.xlu1 %v8630_v2, %s8092_s7 }
 0x156   : > { %6470 = vrot.lane.b32.xlu0 %v8634_v3, %s8092_s7 }
 0x157   : > { %v8980_v0 = vpop.permute.xlu1 %6195 }
 0x158   : > { %14065 = vst [vmem:[#allocation36_spill] sm:$0xff] %v8980_v0  ;;  %v8982_v40 = vpop.permute.xlu0 %6190 }
 0x159   : > { %14066 = vst [vmem:[#allocation37_spill] sm:$0xff] %v8982_v40  ;;  %6485 = vrot.lane.b32.xlu1 %v8638_v8, %s8092_s7 }
 0x15a   : > { %6480 = vrot.lane.b32.xlu0 %v8642_v9, %s8092_s7 }
 0x15b   : > { %v8988_v51 = vpop.permute.xlu1 %6205 }
 0x15c   : > { %14067 = vst [vmem:[#allocation38_spill] sm:$0xff] %v8988_v51  ;;  %v8990_v37 = vpop.permute.xlu0 %6200 }
 0x15d   : > { %14068 = vst [vmem:[#allocation39_spill] sm:$0xff] %v8990_v37  ;;  %6495 = vrot.lane.b32.xlu1 %v8646_v15, %s8092_s7 }
 0x15e   : > { %6490 = vrot.lane.b32.xlu0 %v8650_v16, %s8092_s7 }
 0x15f   : > { %v8996_v58 = vpop.permute.xlu1 %6215 }
 0x160   : > { %14069 = vst [vmem:[#allocation40_spill] sm:$0xff] %v8996_v58  ;;  %v8998_v0 = vpop.permute.xlu0 %6210 }
 0x161   : > { %14070 = vst [vmem:[#allocation41_spill] sm:$0xff] %v8998_v0  ;;  %6505 = vrot.lane.b32.xlu1 %v8654_v22, %s8092_s7 }
 0x162   : > { %6500 = vrot.lane.b32.xlu0 %v8658_v24, %s8092_s7 }
 0x163   : > { %v9004_v40 = vpop.permute.xlu1 %6225 }
 0x164   : > { %14071 = vst [vmem:[#allocation42_spill] sm:$0xff] %v9004_v40  ;;  %v9006_v51 = vpop.permute.xlu0 %6220 }
 0x165   : > { %14072 = vst [vmem:[#allocation43_spill] sm:$0xff] %v9006_v51  ;;  %6515 = vrot.lane.b32.xlu1 %v8662_v32, %s8092_s7 }
 0x166   : > { %6510 = vrot.lane.b32.xlu0 %v8666_v33, %s8092_s7 }
 0x167   : > { %v9012_v37 = vpop.permute.xlu1 %6235 }
 0x168   : > { %14073 = vst [vmem:[#allocation44_spill] sm:$0xff] %v9012_v37  ;;  %v9014_v58 = vpop.permute.xlu0 %6230 }
 0x169   : > { %14074 = vst [vmem:[#allocation45_spill] sm:$0xff] %v9014_v58  ;;  %6525 = vrot.lane.b32.xlu1 %v8670_v41, %s8092_s7 }
 0x16a   : > { %6520 = vrot.lane.b32.xlu0 %v8674_v43, %s8092_s7 }
 0x16b   : > { %v9020_v0 = vpop.permute.xlu1 %6245 }
 0x16c   : > { %14075 = vst [vmem:[#allocation46_spill] sm:$0xff] %v9020_v0  ;;  %v9022_v40 = vpop.permute.xlu0 %6240 }
 0x16d   : > { %14076 = vst [vmem:[#allocation47_spill] sm:$0xff] %v9022_v40  ;;  %6535 = vrot.lane.b32.xlu1 %v8680_v52, %s8092_s7 }
 0x16e   : > { %6530 = vrot.lane.b32.xlu0 %v8684_v56, %s8092_s7 }
 0x16f   : > { %v9028_v51 = vpop.permute.xlu1 %6255 }
 0x170   : > { %14077 = vst [vmem:[#allocation48_spill] sm:$0xff] %v9028_v51  ;;  %v9030_v37 = vpop.permute.xlu0 %6250 }
 0x171   : > { %14078 = vst [vmem:[#allocation49_spill] sm:$0xff] %v9030_v37  ;;  %6545 = vrot.lane.b32.xlu1 %v8688_v61, %s8092_s7  ;;  %v826_v37 = vld [vmem:[#allocation2 + $0x480] sm:$0xff] }
 0x172   : > { %6540 = vrot.lane.b32.xlu0 %v8692_v63, %s8092_s7 }
 0x173   : > { %v9036_v58 = vpop.permute.xlu1 %6265 }
 0x174   : > { %14079 = vst [vmem:[#allocation50_spill] sm:$0xff] %v9036_v58  ;;  %v9038_v0 = vpop.permute.xlu0 %6260  ;;  %v827_v58 = vld [vmem:[#allocation2 + $0x488] sm:$0xff] }
 0x175   : > { %14080 = vst [vmem:[#allocation51_spill] sm:$0xff] %v9038_v0  ;;  %6555 = vrot.lane.b32.xlu1 %v8906_v59, %s8092_s7  ;;  %v9058_v60 = vpack.i.bf16 %v827_v58, %v826_v37 }
 0x176   : > { %6550 = vrot.lane.b32.xlu0 %v8892_v14, %s8092_s7 }
 0x177   : > { %v9044_v40 = vpop.permute.xlu1 %6275 }
 0x178   : > { %14081 = vst [vmem:[#allocation52_spill] sm:$0xff] %v9044_v40  ;;  %v9046_v51 = vpop.permute.xlu0 %6270 }
 0x179   : > { %14082 = vst [vmem:[#allocation53_spill] sm:$0xff] %v9046_v51  ;;  %6565 = vrot.lane.b32.xlu1 %v8918_v34, %s8092_s7 }
 0x17a   : > { %6560 = vrot.lane.b32.xlu0 %v8902_v31, %s8092_s7 }
 0x17b   : > { %v9052_v49 = vpop.permute.xlu1 %6285 }
 0x17c   : > { %14083 = vst [vmem:[#allocation54_spill] sm:$0xff] %v9052_v49  ;;  %v9054_v0 = vpop.permute.xlu0 %6280 }
 0x17d   : > { %14084 = vst [vmem:[#allocation55_spill] sm:$0xff] %v9054_v0  ;;  %6575 = vrot.lane.b32.xlu1 %v8930_v21, %s8092_s7 }
 0x17e   : > { %6570 = vrot.lane.b32.xlu0 %v8914_v36, %s8092_s7 }
 0x17f   : > { %v9062_v51 = vpop.permute.xlu1 %6295 }
 0x180   : > { %14085 = vst [vmem:[#allocation56_spill] sm:$0xff] %v9062_v51  ;;  %v9064_v40 = vpop.permute.xlu0 %6290  ;;  %v9406_v51 = vld [vmem:[#allocation2 + $0x200] sm:$0xff] }
 0x181   : > { %14086 = vst [vmem:[#allocation57_spill] sm:$0xff] %v9064_v40  ;;  %6585 = vrot.lane.b32.xlu1 %v9058_v60, %s8092_s7 }
 0x182   : > { %6580 = vrot.lane.b32.xlu0 %v8926_v50, %s8092_s7 }
 0x183   : > { %v9070_v49 = vpop.permute.xlu1 %6305 }
 0x184   : > { %14087 = vst [vmem:[#allocation58_spill] sm:$0xff] %v9070_v49  ;;  %v9072_v0 = vpop.permute.xlu0 %6300 }
 0x185   : > { %14088 = vst [vmem:[#allocation59_spill] sm:$0xff] %v9072_v0  ;;  %6595 = vrot.lane.b32.xlu1 %v8608_v46, %s8093_s8 }
 0x186   : > { %6590 = vrot.lane.b32.xlu0 %v8596_v39, %s8093_s8 }
 0x187   : > { %v9078_v37 = vpop.permute.xlu1 %6315 }
 0x188   : > { %14089 = vst [vmem:[#allocation60_spill] sm:$0xff] %v9078_v37  ;;  %v9080_v58 = vpop.permute.xlu0 %6310 }
 0x189   : > { %14090 = vst [vmem:[#allocation61_spill] sm:$0xff] %v9080_v58  ;;  %6605 = vrot.lane.b32.xlu1 %v8618_v55, %s8093_s8 }
 0x18a   : > { %6600 = vrot.lane.b32.xlu0 %v8604_v45, %s8093_s8 }
 0x18b   : > { %v9086_v49 = vpop.permute.xlu1 %6325 }
 0x18c   : > { %14091 = vst [vmem:[#allocation62_spill] sm:$0xff] %v9086_v49  ;;  %v9088_v0 = vpop.permute.xlu0 %6320  ;;  %v7903_v49 = vld [vmem:[#allocation2 + $0x150] sm:$0xff] }
 0x18d   : > { %14092 = vst [vmem:[#allocation63_spill] sm:$0xff] %v9088_v0  ;;  %6615 = vrot.lane.b32.xlu1 %v8626_v1, %s8093_s8 }
 0x18e   : > { %6610 = vrot.lane.b32.xlu0 %v8612_v53, %s8093_s8 }
 0x18f   : > { %v9094_v39 = vpop.permute.xlu1 %6335 }
 0x190   : > { %14093 = vst [vmem:[#allocation64_spill] sm:$0xff] %v9094_v39  ;;  %v9096_v46 = vpop.permute.xlu0 %6330  ;;  %v7902_v39 = vld [vmem:[#allocation2 + $0x158] sm:$0xff] }
 0x191   : > { %14094 = vst [vmem:[#allocation65_spill] sm:$0xff] %v9096_v46  ;;  %6625 = vrot.lane.b32.xlu1 %v8614_v54, %s8093_s8 }
 0x192   : > { %6620 = vrot.lane.b32.xlu0 %v8622_v62, %s8093_s8 }
 0x193   : > { %v9102_v45 = vpop.permute.xlu1 %6345 }
 0x194   : > { %14095 = vst [vmem:[#allocation66_spill] sm:$0xff] %v9102_v45  ;;  %v9104_v55 = vpop.permute.xlu0 %6340  ;;  %v7889_v45 = vld [vmem:[#allocation2 + $0xa8] sm:$0xff] }
 0x195   : > { %14096 = vst [vmem:[#allocation67_spill] sm:$0xff] %v9104_v55  ;;  %6635 = vrot.lane.b32.xlu1 %v8642_v9, %s8093_s8 }
 0x196   : > { %6630 = vrot.lane.b32.xlu0 %v8630_v2, %s8093_s8 }
 0x197   : > { %v9110_v53 = vpop.permute.xlu1 %6355 }
 0x198   : > { %14097 = vst [vmem:[#allocation68_spill] sm:$0xff] %v9110_v53  ;;  %v9112_v1 = vpop.permute.xlu0 %6350 }
 0x199   : > { %14098 = vst [vmem:[#allocation69_spill] sm:$0xff] %v9112_v1  ;;  %6645 = vrot.lane.b32.xlu1 %v8650_v16, %s8093_s8 }
 0x19a   : > { %6640 = vrot.lane.b32.xlu0 %v8638_v8, %s8093_s8 }
 0x19b   : > { %v9118_v54 = vpop.permute.xlu1 %6365 }
 0x19c   : > { %14099 = vst [vmem:[#allocation70_spill] sm:$0xff] %v9118_v54  ;;  %v9120_v62 = vpop.permute.xlu0 %6360 }
 0x19d   : > { %14100 = vst [vmem:[#allocation71_spill] sm:$0xff] %v9120_v62  ;;  %6655 = vrot.lane.b32.xlu1 %v8658_v24, %s8093_s8 }
 0x19e   : > { %6650 = vrot.lane.b32.xlu0 %v8646_v15, %s8093_s8 }
 0x19f   : > { %v9126_v55 = vpop.permute.xlu1 %6375 }
 0x1a0   : > { %14101 = vst [vmem:[#allocation72_spill] sm:$0xff] %v9126_v55  ;;  %v9128_v53 = vpop.permute.xlu0 %6370 }
 0x1a1   : > { %14102 = vst [vmem:[#allocation73_spill] sm:$0xff] %v9128_v53  ;;  %6665 = vrot.lane.b32.xlu1 %v8739_v23, %s8093_s8 }
 0x1a2   : > { %6660 = vrot.lane.b32.xlu0 %v8654_v22, %s8093_s8 }
 0x1a3   : > { %v9134_v1 = vpop.permute.xlu1 %6385 }
 0x1a4   : > { %14103 = vst [vmem:[#allocation74_spill] sm:$0xff] %v9134_v1  ;;  %v9136_v54 = vpop.permute.xlu0 %6380 }
 0x1a5   : > { %14104 = vst [vmem:[#allocation75_spill] sm:$0xff] %v9136_v54  ;;  %6675 = vrot.lane.b32.xlu1 %v8674_v43, %s8093_s8 }
 0x1a6   : > { %6670 = vrot.lane.b32.xlu0 %v8662_v32, %s8093_s8 }
 0x1a7   : > { %v9142_v62 = vpop.permute.xlu1 %6395 }
 0x1a8   : > { %14105 = vst [vmem:[#allocation76_spill] sm:$0xff] %v9142_v62  ;;  %v9144_v55 = vpop.permute.xlu0 %6390 }
 0x1a9   : > { %14106 = vst [vmem:[#allocation77_spill] sm:$0xff] %v9144_v55  ;;  %6685 = vrot.lane.b32.xlu1 %v8684_v56, %s8093_s8 }
 0x1aa   : > { %6680 = vrot.lane.b32.xlu0 %v8670_v41, %s8093_s8 }
 0x1ab   : > { %v9150_v22 = vpop.permute.xlu1 %6405 }
 0x1ac   : > { %14107 = vst [vmem:[#allocation78_spill] sm:$0xff] %v9150_v22  ;;  %v9152_v23 = vpop.permute.xlu0 %6400  ;;  %v835_v22 = vld [vmem:[#allocation2 + $0x4c8] sm:$0xff] }
 0x1ad   : > { %14108 = vst [vmem:[#allocation79_spill] sm:$0xff] %v9152_v23  ;;  %6695 = vrot.lane.b32.xlu1 %v8692_v63, %s8093_s8  ;;  %v836_v23 = vld [vmem:[#allocation2 + $0x4d0] sm:$0xff] }
 0x1ae   : > { %6690 = vrot.lane.b32.xlu0 %v8680_v52, %s8093_s8  ;;  %v9170_v53 = vpack.i.bf16 %v836_v23, %v835_v22 }
 0x1af   : > { %v9158_v54 = vpop.permute.xlu1 %6415 }
 0x1b0   : > { %14109 = vst [vmem:[#allocation80_spill] sm:$0xff] %v9158_v54  ;;  %v9160_v62 = vpop.permute.xlu0 %6410  ;;  %14113 = vst [vmem:[#allocation84_spill] sm:$0xff] %v9170_v53 }
 0x1b1   : > { %14110 = vst [vmem:[#allocation81_spill] sm:$0xff] %v9160_v62  ;;  %6705 = vrot.lane.b32.xlu1 %v8765_v10, %s8093_s8 }
 0x1b2   : > { %6700 = vrot.lane.b32.xlu0 %v8688_v61, %s8093_s8  ;;  %v829_v61 = vld [vmem:[#allocation2 + $0x498] sm:$0xff] }
 0x1b3   : > { %v9166_v55 = vpop.permute.xlu1 %6425 }
 0x1b4   : > { %14111 = vst [vmem:[#allocation82_spill] sm:$0xff] %v9166_v55  ;;  %v9168_v1 = vpop.permute.xlu0 %6420 }
 0x1b5   : > { %14112 = vst [vmem:[#allocation83_spill] sm:$0xff] %v9168_v1  ;;  %6715 = vrot.lane.b32.xlu1 %v8902_v31, %s8093_s8  ;;  %v830_v1 = vld [vmem:[#allocation2 + $0x4a0] sm:$0xff] }
 0x1b6   : > { %6710 = vrot.lane.b32.xlu0 %v8906_v59, %s8093_s8  ;;  %v6744_v55 = vpack.i.bf16 %v830_v1, %v829_v61 }
 0x1b7   : > { %v9176_v52 = vpop.permute.xlu1 %6435 }
 0x1b8   : > { %14114 = vst [vmem:[#allocation85_spill] sm:$0xff] %v9176_v52  ;;  %v9178_v10 = vpop.permute.xlu0 %6430 }
 0x1b9   : > { %14115 = vst [vmem:[#allocation86_spill] sm:$0xff] %v9178_v10  ;;  %6725 = vrot.lane.b32.xlu1 %v8914_v36, %s8093_s8 }
 0x1ba   : > { %6720 = vrot.lane.b32.xlu0 %v8918_v34, %s8093_s8 }
 0x1bb   : > { %v9184_v22 = vpop.permute.xlu1 %6445 }
 0x1bc   : > { %14116 = vst [vmem:[#allocation87_spill] sm:$0xff] %v9184_v22  ;;  %v9186_v23 = vpop.permute.xlu0 %6440 }
 0x1bd   : > { %14117 = vst [vmem:[#allocation88_spill] sm:$0xff] %v9186_v23  ;;  %6735 = vrot.lane.b32.xlu1 %v8926_v50, %s8093_s8 }
 0x1be   : > { %6730 = vrot.lane.b32.xlu0 %v8930_v21, %s8093_s8 }
 0x1bf   : > { %v9192_v10 = vpop.permute.xlu1 %6455 }
 0x1c0   : > { %14118 = vst [vmem:[#allocation89_spill] sm:$0xff] %v9192_v10  ;;  %v9194_v52 = vpop.permute.xlu0 %6450  ;;  %v7878_v10 = vld [vmem:[#allocation2 + $0x30] sm:$0xff] }
 0x1c1   : > { %14119 = vst [vmem:[#allocation90_spill] sm:$0xff] %v9194_v52  ;;  %6745 = vrot.lane.b32.xlu1 %v6744_v55, %s8093_s8  ;;  %v5978_v52 = vunpack.i.h.bf16 %v8769_v11 }
 0x1c2   : > { %6740 = vrot.lane.b32.xlu0 %v9058_v60, %s8093_s8 }
 0x1c3   : > { %v9199_v62 = vpop.permute.xlu1 %6465 }
 0x1c4   : > { %14120 = vst [vmem:[#allocation91_spill] sm:$0xff] %v9199_v62  ;;  %v9201_v22 = vpop.permute.xlu0 %6460 }
 0x1c5   : > { %14121 = vst [vmem:[#allocation92_spill] sm:$0xff] %v9201_v22  ;;  %6755 = vrot.lane.b32.xlu1 %v8634_v3, %s8094_s9  ;;  %v5963_v22 = vunpack.i.h.bf16 %v8751_v29  ;;  %v5962_v3 = vunpack.i.l.bf16 %v8751_v29  ;;  %v5957_v29 = vunpack.i.l.bf16 %v8761_v7 }
 0x1c6   : > { %6750 = vrot.lane.b32.xlu0 %v8820_v42, %s8094_s9  ;;  %v5952_v42 = vunpack.i.l.bf16 %v8753_v30 }
 0x1c7   : > { %v9207_v1 = vpop.permute.xlu1 %6475  ;;  %v9238_v23 = vsel %vm367_vm0, %v7878_v10, %v5962_v3  ;;  %v7883_v3 = vld [vmem:[#allocation2 + $0x18] sm:$0xff] }
 0x1c8   : > { %14122 = vst [vmem:[#allocation93_spill] sm:$0xff] %v9207_v1  ;;  %v9209_v61 = vpop.permute.xlu0 %6470  ;;  %v682_v1 = vld [vmem:[#allocation2] sm:$0xff] }
 0x1c9   : > { %14123 = vst [vmem:[#allocation94_spill] sm:$0xff] %v9209_v61  ;;  %6765 = vrot.lane.b32.xlu1 %v8642_v9, %s8094_s9  ;;  %v5953_v61 = vunpack.i.h.bf16 %v8753_v30  ;;  %v5968_v9 = vunpack.i.h.bf16 %v8759_v6  ;;  %v9244_v54 = vsel %vm367_vm0, %v682_v1, %v5952_v42 }
 0x1ca   : > { %6760 = vrot.lane.b32.xlu0 %v8630_v2, %s8094_s9  ;;  %v5967_v2 = vunpack.i.l.bf16 %v8759_v6  ;;  %v7879_v6 = vld [vmem:[#allocation2 + $0x38] sm:$0xff] }
 0x1cb   : > { %v9215_v60 = vpop.permute.xlu1 %6485 }
 0x1cc   : > { %14124 = vst [vmem:[#allocation95_spill] sm:$0xff] %v9215_v60  ;;  %v9217_v55 = vpop.permute.xlu0 %6480  ;;  %v5958_v60 = vunpack.i.h.bf16 %v8761_v7 }
 0x1cd   : > { %14125 = vst [vmem:[#allocation96_spill] sm:$0xff] %v9217_v55  ;;  %6775 = vrot.lane.b32.xlu1 %v8650_v16, %s8094_s9  ;;  %v683_v55 = vld [vmem:[#allocation2 + $0x8] sm:$0xff]  ;;  %v5977_v16 = vunpack.i.l.bf16 %v8769_v11  ;;  %v7880_v11 = vld [vmem:[#allocation2 + $0x50] sm:$0xff] }
 0x1ce   : > { %6770 = vrot.lane.b32.xlu0 %v8638_v8, %s8094_s9  ;;  %v9241_v8 = vsel %vm367_vm0, %v7879_v6, %v5963_v22  ;;  %v9249_v7 = vsel %vm367_vm0, %v683_v55, %v5953_v61  ;;  %v7882_v22 = vld [vmem:[#allocation2 + $0x20] sm:$0xff]  ;;  %v5973_v61 = vunpack.i.h.bf16 %v8775_v17  ;;  %v5972_v55 = vunpack.i.l.bf16 %v8775_v17 }
 0x1cf   : > { %v9231_v62 = vpop.permute.xlu1 %6495  ;;  %v9260_v1 = vsel %vm367_vm0, %v7882_v22, %v5958_v60  ;;  %v5988_v60 = vunpack.i.h.bf16 %v8783_v19  ;;  %v5987_v6 = vunpack.i.l.bf16 %v8783_v19  ;;  %v5982_v17 = vunpack.i.l.bf16 %v8785_v20  ;;  %v7886_v19 = vld [vmem:[#allocation2 + $0x68] sm:$0xff] }
 0x1d0   : > { %14126 = vst [vmem:[#allocation97_spill] sm:$0xff] %v9231_v62  ;;  %v9235_v30 = vpop.permute.xlu0 %6490  ;;  %v7881_v62 = vld [vmem:[#allocation2 + $0x48] sm:$0xff]  ;;  %v5998_v22 = vunpack.i.h.bf16 %v8790_v25 }
 0x1d1   : > { %14127 = vst [vmem:[#allocation98_spill] sm:$0xff] %v9235_v30  ;;  %6785 = vrot.lane.b32.xlu1 %v8658_v24, %s8094_s9  ;;  %v9252_v30 = vsel %vm367_vm0, %v7880_v11, %v5968_v9  ;;  %v9255_v10 = vsel %vm367_vm0, %v7881_v62, %v5967_v2  ;;  %v9263_v24 = vsel %vm367_vm0, %v7883_v3, %v5957_v29  ;;  %v7884_v9 = vld [vmem:[#allocation2 + $0x80] sm:$0xff]  ;;  %v7885_v2 = vld [vmem:[#allocation2 + $0x78] sm:$0xff]  ;;  %v5983_v11 = vunpack.i.h.bf16 %v8785_v20 }
 0x1d2   : > { %6780 = vrot.lane.b32.xlu0 %v8646_v15, %s8094_s9  ;;  %v9270_v62 = vsel %vm367_vm0, %v7884_v9, %v5978_v52  ;;  %v9273_v15 = vsel %vm367_vm0, %v7885_v2, %v5977_v16  ;;  %v5997_v52 = vunpack.i.l.bf16 %v8790_v25  ;;  %v5993_v16 = vunpack.i.h.bf16 %v8792_v26  ;;  %v7887_v2 = vld [vmem:[#allocation2 + $0x60] sm:$0xff] }
 0x1d3   : > { %v9267_v42 = vpop.permute.xlu1 %6505  ;;  %v5992_v3 = vunpack.i.l.bf16 %v8792_v26  ;;  %v9290_v9 = vsel %vm367_vm0, %v7886_v19, %v5973_v61  ;;  %v9293_v20 = vsel %vm367_vm0, %v7887_v2, %v5972_v55  ;;  %v6003_v61 = vunpack.i.h.bf16 %v8800_v28  ;;  %v7890_v2 = vld [vmem:[#allocation2 + $0x98] sm:$0xff] }
 0x1d4   : > { %14128 = vst [vmem:[#allocation99_spill] sm:$0xff] %v9267_v42  ;;  %v9277_v29 = vpop.permute.xlu0 %6500  ;;  %v7888_v42 = vld [vmem:[#allocation2 + $0xb0] sm:$0xff]  ;;  %v6002_v19 = vunpack.i.l.bf16 %v8800_v28  ;;  %v9310_v46 = vsel %vm367_vm0, %v7890_v2, %v5983_v11 }
 0x1d5   : > { %14129 = vst [vmem:[#allocation100_spill] sm:$0xff] %v9277_v29  ;;  %6795 = vrot.lane.b32.xlu1 %v8666_v33, %s8094_s9  ;;  %v6008_v29 = vunpack.i.h.bf16 %v8798_v27  ;;  %v6007_v33 = vunpack.i.l.bf16 %v8798_v27  ;;  %v9300_v26 = vsel %vm367_vm0, %v7888_v42, %v5988_v60  ;;  %v7891_v27 = vld [vmem:[#allocation2 + $0x90] sm:$0xff]  ;;  %v9329_v11 = vsel %vm367_vm0, %v8771_v12, %v5992_v3  ;;  %v7897_v3 = vld [vmem:[#allocation2 + $0x120] sm:$0xff] }
 0x1d6   : > { %6790 = vrot.lane.b32.xlu0 %v8860_v4, %s8094_s9  ;;  %v9303_v4 = vsel %vm367_vm0, %v7889_v45, %v5987_v6  ;;  %v7892_v42 = vld [vmem:[#allocation2 + $0x110] sm:$0xff]  ;;  %v7893_v45 = vld [vmem:[#allocation2 + $0x108] sm:$0xff]  ;;  %v9325_v6 = vsel %vm367_vm0, %v8773_v13, %v5993_v16  ;;  %v6017_v13 = vunpack.i.l.bf16 %v8806_v35 }
 0x1d7   : > { %v9297_v25 = vpop.permute.xlu1 %6515  ;;  %v9316_v60 = vsel %vm367_vm0, %v7892_v42, %v5998_v22  ;;  %v9321_v28 = vsel %vm367_vm0, %v7893_v45, %v5997_v52  ;;  %v6018_v52 = vunpack.i.h.bf16 %v8806_v35  ;;  %v6012_v42 = vunpack.i.l.bf16 %v8812_v38 }
 0x1d8   : > { %14130 = vst [vmem:[#allocation101_spill] sm:$0xff] %v9297_v25  ;;  %v9307_v55 = vpop.permute.xlu0 %6510  ;;  %v9313_v25 = vsel %vm367_vm0, %v7891_v27, %v5982_v17  ;;  %v7894_v17 = vld [vmem:[#allocation2 + $0x140] sm:$0xff]  ;;  %v7896_v27 = vld [vmem:[#allocation2 + $0x128] sm:$0xff]  ;;  %v6028_v45 = vunpack.i.h.bf16 %v8822_v44  ;;  %v6027_v35 = vunpack.i.l.bf16 %v8822_v44 }
 0x1d9   : > { %14131 = vst [vmem:[#allocation102_spill] sm:$0xff] %v9307_v55  ;;  %6805 = vrot.lane.b32.xlu1 %v8674_v43, %s8094_s9  ;;  %v9334_v22 = vsel %vm367_vm0, %v7894_v17, %v6008_v29  ;;  %v7895_v43 = vld [vmem:[#allocation2 + $0x138] sm:$0xff]  ;;  %v9344_v12 = vsel %vm367_vm0, %v7896_v27, %v6003_v61  ;;  %v6013_v29 = vunpack.i.h.bf16 %v8812_v38  ;;  %v6023_v17 = vunpack.i.h.bf16 %v8824_v47  ;;  %v9363_v38 = vld [vmem:[#allocation2 + $0x360] sm:$0xff]  ;;  %v9365_v27 = vld [vmem:[#allocation2 + $0x368] sm:$0xff] }
 0x1da   : > { %6800 = vrot.lane.b32.xlu0 %v8662_v32, %s8094_s9  ;;  %v9337_v2 = vsel %vm367_vm0, %v7895_v43, %v6007_v33  ;;  %v9347_v32 = vsel %vm367_vm0, %v7897_v3, %v6002_v19  ;;  %v6022_v61 = vunpack.i.l.bf16 %v8824_v47  ;;  %v6038_v19 = vunpack.i.h.bf16 %v8830_v48  ;;  %v7900_v3 = vld [vmem:[#allocation2 + $0x170] sm:$0xff]  ;;  %v7901_v47 = vld [vmem:[#allocation2 + $0x168] sm:$0xff] }
 0x1db   : > { %v9341_v16 = vpop.permute.xlu1 %6525  ;;  %v6037_v43 = vunpack.i.l.bf16 %v8830_v48  ;;  %v9369_v44 = vpack.i.bf16 %v9365_v27, %v9363_v38  ;;  %v14135_v48 = vld [vmem:[#allocation6_spill] sm:$0xff]  ;;  %v9382_v0 = vsel %vm367_vm0, %v7902_v39, %v6013_v29  ;;  %v9385_v58 = vsel %vm367_vm0, %v7903_v49, %v6012_v42  ;;  %v14140_v39 = vld [vmem:[#allocation8_spill] sm:$0xff] }
 0x1dc   : > { %14132 = vst [vmem:[#allocation103_spill] sm:$0xff] %v9341_v16  ;;  %v9351_v33 = vpop.permute.xlu0 %6520  ;;  %v6033_v16 = vunpack.i.h.bf16 %v14135_v48  ;;  %v6043_v29 = vunpack.i.h.bf16 %v14140_v39  ;;  %v7906_v49 = vld [vmem:[#allocation2 + $0x188] sm:$0xff] }
 0x1dd   : > { %14133 = vst [vmem:[#allocation104_spill] sm:$0xff] %v9351_v33  ;;  %6815 = vrot.lane.b32.xlu1 %v8684_v56, %s8094_s9  ;;  %14134 = vst [vmem:[#allocation105_spill] sm:$0xff] %v9369_v44  ;;  %v9372_v56 = vsel %vm367_vm0, %v7900_v3, %v6018_v52  ;;  %v9375_v33 = vsel %vm367_vm0, %v7901_v47, %v6017_v13  ;;  %v14137_v52 = vld [vmem:[#allocation7_spill] sm:$0xff]  ;;  %v9401_v42 = vsel %vm367_vm0, %v7906_v49, %v6023_v17  ;;  %v14149_v49 = vld [vmem:[#allocation9_spill] sm:$0xff] }
 0x1de   : > { %6810 = vrot.lane.b32.xlu0 %v8670_v41, %s8094_s9  ;;  %v6032_v41 = vunpack.i.l.bf16 %v14135_v48  ;;  %v6048_v3 = vunpack.i.h.bf16 %v14137_v52  ;;  %v6047_v37 = vunpack.i.l.bf16 %v14137_v52  ;;  %v7904_v47 = vld [vmem:[#allocation2 + $0x1a0] sm:$0xff]  ;;  %v7905_v48 = vld [vmem:[#allocation2 + $0x198] sm:$0xff]  ;;  %14141 = vst [vmem:[#allocation8_spill] sm:$0xff] %v9401_v42  ;;  %v9432_v42 = vld [vmem:[#allocation2 + $0x230] sm:$0xff] }
 0x1df   : > { %v9379_v55 = vpop.permute.xlu1 %6535  ;;  %v9392_v40 = vsel %vm367_vm0, %v7904_v47, %v6028_v45  ;;  %v7907_v52 = vld [vmem:[#allocation2 + $0x180] sm:$0xff]  ;;  %v9410_v45 = vsel %vm367_vm0, %v9406_v51, %v6038_v19  ;;  %v6042_v19 = vunpack.i.l.bf16 %v14140_v39  ;;  %14151 = vst [vmem:[#allocation110_spill] sm:$0xff] %v9432_v42 }
 0x1e0   : > { %14136 = vst [vmem:[#allocation6_spill] sm:$0xff] %v9379_v55  ;;  %v9389_v13 = vpop.permute.xlu0 %6530  ;;  %14139 = vst [vmem:[#allocation106_spill] sm:$0xff] %v9392_v40  ;;  %v9395_v55 = vsel %vm367_vm0, %v7905_v48, %v6027_v35  ;;  %v9412_v35 = vld [vmem:[#allocation2 + $0x1f8] sm:$0xff] }
 0x1e1   : > { %14138 = vst [vmem:[#allocation7_spill] sm:$0xff] %v9389_v13  ;;  %6825 = vrot.lane.b32.xlu1 %v8692_v63, %s8094_s9  ;;  %v9404_v13 = vsel %vm367_vm0, %v7907_v52, %v6022_v61  ;;  %14143 = vst [vmem:[#allocation108_spill] sm:$0xff] %v9410_v45  ;;  %v9416_v47 = vsel %vm367_vm0, %v9412_v35, %v6037_v43  ;;  %v14145_v63 = vld [vmem:[#allocation5_spill] sm:$0xff]  ;;  %v14147_v61 = vld [vmem:[#allocation4_spill] sm:$0xff]  ;;  %v6058_v52 = vunpack.i.h.bf16 %v14149_v49 }
 0x1e2   : > { %14142 = vst [vmem:[#allocation107_spill] sm:$0xff] %v9404_v13  ;;  %14144 = vst [vmem:[#allocation109_spill] sm:$0xff] %v9416_v47  ;;  %6820 = vrot.lane.b32.xlu0 %v9369_v44, %s8094_s9  ;;  %v9422_v17 = vsel %vm367_vm0, %v14145_v63, %v6033_v16  ;;  %v9426_v48 = vsel %vm367_vm0, %v14147_v61, %v6032_v41  ;;  %v9436_v43 = vsel %vm367_vm0, %v9432_v42, %v6048_v3  ;;  %v9438_v44 = vld [vmem:[#allocation2 + $0x228] sm:$0xff]  ;;  %v9463_v13 = vld [vmem:[#allocation2 + $0x210] sm:$0xff] }
 0x1e3   : > { %14146 = vst [vmem:[#allocation5_spill] sm:$0xff] %v9422_v17  ;;  %14148 = vst [vmem:[#allocation4_spill] sm:$0xff] %v9426_v48  ;;  %v9430_v45 = vpop.permute.xlu1 %6545  ;;  %v9442_v16 = vsel %vm367_vm0, %v9438_v44, %v6047_v37  ;;  %v6057_v41 = vunpack.i.l.bf16 %v14149_v49  ;;  %v14155_v63 = vld [vmem:[#allocation12_spill] sm:$0xff]  ;;  %v9448_v17 = vld [vmem:[#allocation2 + $0x218] sm:$0xff] }
 0x1e4   : > { %14150 = vst [vmem:[#allocation9_spill] sm:$0xff] %v9430_v45  ;;  %14152 = vst [vmem:[#allocation111_spill] sm:$0xff] %v9436_v43  ;;  %v6053_v39 = vunpack.i.h.bf16 %v14155_v63  ;;  %v9446_v61 = vpop.permute.xlu0 %6540  ;;  %v9452_v45 = vsel %vm367_vm0, %v9448_v17, %v6043_v29  ;;  %v6052_v3 = vunpack.i.l.bf16 %v14155_v63  ;;  %v14158_v43 = vld [vmem:[#allocation13_spill] sm:$0xff]  ;;  %v14159_v49 = vld [vmem:[#allocation14_spill] sm:$0xff]  ;;  %v9467_v29 = vsel %vm367_vm0, %v9463_v13, %v6042_v19 }
 0x1e5   : > { %14153 = vst [vmem:[#allocation112_spill] sm:$0xff] %v9438_v44  ;;  %14154 = vst [vmem:[#allocation113_spill] sm:$0xff] %v9442_v16  ;;  %v6068_v48 = vunpack.i.h.bf16 %v14158_v43  ;;  %6835 = vrot.lane.b32.xlu1 %v8892_v14, %s8094_s9  ;;  %v6067_v37 = vunpack.i.l.bf16 %v14158_v43  ;;  %v6063_v16 = vunpack.i.h.bf16 %v14159_v49  ;;  %v6062_v47 = vunpack.i.l.bf16 %v14159_v49  ;;  %v9469_v63 = vld [vmem:[#allocation2 + $0x260] sm:$0xff]  ;;  %v9479_v44 = vld [vmem:[#allocation2 + $0x258] sm:$0xff] }
 0x1e6   : > { %14156 = vst [vmem:[#allocation12_spill] sm:$0xff] %v9446_v61  ;;  %14157 = vst [vmem:[#allocation114_spill] sm:$0xff] %v9452_v45  ;;  %v14160_v61 = vld [vmem:[#allocation3_spill] sm:$0xff]  ;;  %v9473_v14 = vsel %vm367_vm0, %v9469_v63, %v6058_v52  ;;  %v9485_v19 = vld [vmem:[#allocation2 + $0x248] sm:$0xff] }
 0x1e7   : > { %6830 = vrot.lane.b32.xlu0 %v14160_v61, %s8094_s9  ;;  %14161 = vst [vmem:[#allocation13_spill] sm:$0xff] %v9467_v29  ;;  %14162 = vst [vmem:[#allocation14_spill] sm:$0xff] %v9469_v63  ;;  %v14164_v43 = vld [vmem:[#allocation15_spill] sm:$0xff]  ;;  %v9477_v49 = vpop.permute.xlu1 %6555  ;;  %v9483_v61 = vsel %vm367_vm0, %v9479_v44, %v6057_v41  ;;  %v9489_v29 = vsel %vm367_vm0, %v9485_v19, %v6053_v39  ;;  %v14169_v52 = vld [vmem:[#allocation16_spill] sm:$0xff] }
 0x1e8   : > { %14163 = vst [vmem:[#allocation3_spill] sm:$0xff] %v9473_v14  ;;  %v6078_v45 = vunpack.i.h.bf16 %v14164_v43  ;;  %v6077_v42 = vunpack.i.l.bf16 %v14164_v43  ;;  %14165 = vst [vmem:[#allocation15_spill] sm:$0xff] %v9477_v49  ;;  %v6073_v14 = vunpack.i.h.bf16 %v14169_v52  ;;  %v6072_v63 = vunpack.i.l.bf16 %v14169_v52  ;;  %v9493_v40 = vpop.permute.xlu0 %6550  ;;  %v9495_v43 = vld [vmem:[#allocation2 + $0x240] sm:$0xff]  ;;  %v9501_v41 = vld [vmem:[#allocation2 + $0x290] sm:$0xff] }
 0x1e9   : > { %14166 = vst [vmem:[#allocation115_spill] sm:$0xff] %v9479_v44  ;;  %14167 = vst [vmem:[#allocation116_spill] sm:$0xff] %v9483_v61  ;;  %v9499_v49 = vsel %vm367_vm0, %v9495_v43, %v6052_v3  ;;  %v9505_v61 = vsel %vm367_vm0, %v9501_v41, %v6068_v48  ;;  %v14174_v39 = vld [vmem:[#allocation17_spill] sm:$0xff]  ;;  %6845 = vrot.lane.b32.xlu1 %v8902_v31, %s8094_s9  ;;  %v9510_v52 = vld [vmem:[#allocation2 + $0x288] sm:$0xff] }
 0x1ea   : > { %14168 = vst [vmem:[#allocation117_spill] sm:$0xff] %v9489_v29  ;;  %14170 = vst [vmem:[#allocation16_spill] sm:$0xff] %v9493_v40  ;;  %v6088_v29 = vunpack.i.h.bf16 %v14174_v39  ;;  %v9514_v40 = vsel %vm367_vm0, %v9510_v52, %v6067_v37  ;;  %v9516_v3 = vld [vmem:[#allocation2 + $0x278] sm:$0xff]  ;;  %v9522_v48 = vld [vmem:[#allocation2 + $0x270] sm:$0xff] }
 0x1eb   : > { %14171 = vst [vmem:[#allocation118_spill] sm:$0xff] %v9499_v49  ;;  %14172 = vst [vmem:[#allocation119_spill] sm:$0xff] %v9501_v41  ;;  %v9520_v49 = vsel %vm367_vm0, %v9516_v3, %v6063_v16  ;;  %6840 = vrot.lane.b32.xlu0 %v8906_v59, %s8094_s9  ;;  %v9530_v31 = vld [vmem:[#allocation2 + $0x2f0] sm:$0xff]  ;;  %v14185_v41 = vld [vmem:[#allocation18_spill] sm:$0xff] }
 0x1ec   : > { %14173 = vst [vmem:[#allocation120_spill] sm:$0xff] %v9505_v61  ;;  %14175 = vst [vmem:[#allocation17_spill] sm:$0xff] %v9510_v52  ;;  %v9526_v61 = vsel %vm367_vm0, %v9522_v48, %v6062_v47  ;;  %v9534_v37 = vsel %vm367_vm0, %v9530_v31, %v6078_v45  ;;  %v6083_v47 = vunpack.i.h.bf16 %v14185_v41  ;;  %v14187_v52 = vld [vmem:[#allocation11_spill] sm:$0xff]  ;;  %v14189_v44 = vld [vmem:[#allocation10_spill] sm:$0xff] }
 0x1ed   : > { %14176 = vst [vmem:[#allocation121_spill] sm:$0xff] %v9514_v40  ;;  %14177 = vst [vmem:[#allocation122_spill] sm:$0xff] %v9516_v3  ;;  %v9536_v40 = vld [vmem:[#allocation2 + $0x2e8] sm:$0xff]  ;;  %v9548_v59 = vsel %vm367_vm0, %v14187_v52, %v6073_v14  ;;  %v9552_v45 = vsel %vm367_vm0, %v14189_v44, %v6072_v63  ;;  %6855 = vrot.lane.b32.xlu1 %v8914_v36, %s8094_s9  ;;  %v14196_v63 = vld [vmem:[#allocation21_spill] sm:$0xff] }
 0x1ee   : > { %14178 = vst [vmem:[#allocation123_spill] sm:$0xff] %v9520_v49  ;;  %14179 = vst [vmem:[#allocation124_spill] sm:$0xff] %v9522_v48  ;;  %v9540_v16 = vsel %vm367_vm0, %v9536_v40, %v6077_v42  ;;  %v6087_v49 = vunpack.i.l.bf16 %v14174_v39  ;;  %v9556_v42 = vpop.permute.xlu0 %6560  ;;  %v14195_v14 = vld [vmem:[#allocation20_spill] sm:$0xff] }
 0x1ef   : > { %14180 = vst [vmem:[#allocation125_spill] sm:$0xff] %v9526_v61  ;;  %14181 = vst [vmem:[#allocation126_spill] sm:$0xff] %v9530_v31  ;;  %v9544_v61 = vpop.permute.xlu1 %6565  ;;  %v6082_v31 = vunpack.i.l.bf16 %v14185_v41  ;;  %v6093_v52 = vunpack.i.h.bf16 %v14195_v14  ;;  %v6092_v44 = vunpack.i.l.bf16 %v14195_v14  ;;  %v6108_v41 = vunpack.i.h.bf16 %v14196_v63  ;;  %6850 = vrot.lane.b32.xlu0 %v8918_v34, %s8094_s9  ;;  %v14201_v14 = vld [vmem:[#allocation22_spill] sm:$0xff] }
 0x1f0   : > { %14182 = vst [vmem:[#allocation127_spill] sm:$0xff] %v9534_v37  ;;  %14183 = vst [vmem:[#allocation128_spill] sm:$0xff] %v9536_v40  ;;  %v14191_v37 = vld [vmem:[#allocation19_spill] sm:$0xff]  ;;  %v833_v34 = vld [vmem:[#allocation2 + $0x4b8] sm:$0xff] }
 0x1f1   : > { %14184 = vst [vmem:[#allocation129_spill] sm:$0xff] %v9540_v16  ;;  %14186 = vst [vmem:[#allocation18_spill] sm:$0xff] %v9544_v61  ;;  %v6098_v3 = vunpack.i.h.bf16 %v14191_v37  ;;  %v9558_v40 = vld [vmem:[#allocation2 + $0x320] sm:$0xff]  ;;  %v6097_v61 = vunpack.i.l.bf16 %v14191_v37  ;;  %v9579_v37 = vld [vmem:[#allocation2 + $0x308] sm:$0xff]  ;;  %6865 = vrot.lane.b32.xlu1 %v8926_v50, %s8094_s9 }
 0x1f2   : > { %14188 = vst [vmem:[#allocation11_spill] sm:$0xff] %v9548_v59  ;;  %14190 = vst [vmem:[#allocation10_spill] sm:$0xff] %v9552_v45  ;;  %v9562_v39 = vsel %vm367_vm0, %v9558_v40, %v6088_v29  ;;  %v6107_v59 = vunpack.i.l.bf16 %v14196_v63  ;;  %v9583_v36 = vsel %vm367_vm0, %v9579_v37, %v6083_v47  ;;  %v832_v45 = vld [vmem:[#allocation2 + $0x4b0] sm:$0xff]  ;;  %v9589_v16 = vld [vmem:[#allocation2 + $0x300] sm:$0xff] }
 0x1f3   : > { %14192 = vst [vmem:[#allocation19_spill] sm:$0xff] %v9556_v42  ;;  %14193 = vst [vmem:[#allocation130_spill] sm:$0xff] %v9558_v40  ;;  %v9573_v42 = vld [vmem:[#allocation2 + $0x318] sm:$0xff]  ;;  %v6103_v40 = vunpack.i.h.bf16 %v14201_v14  ;;  %v9587_v63 = vpop.permute.xlu1 %6575  ;;  %6860 = vrot.lane.b32.xlu0 %v8930_v21, %s8094_s9  ;;  %v6869_v50 = vpack.i.bf16 %v833_v34, %v832_v45 }
 0x1f4   : > { %14194 = vst [vmem:[#allocation131_spill] sm:$0xff] %v9562_v39  ;;  %14197 = vst [vmem:[#allocation20_spill] sm:$0xff] %v9573_v42  ;;  %v9577_v29 = vsel %vm367_vm0, %v9573_v42, %v6087_v49  ;;  %v6102_v39 = vunpack.i.l.bf16 %v14201_v14  ;;  %v9593_v49 = vsel %vm367_vm0, %v9589_v16, %v6082_v31  ;;  %v9595_v42 = vld [vmem:[#allocation2 + $0x350] sm:$0xff]  ;;  %v9611_v31 = vld [vmem:[#allocation2 + $0x338] sm:$0xff] }
 0x1f5   : > { %14198 = vst [vmem:[#allocation21_spill] sm:$0xff] %v9577_v29  ;;  %14199 = vst [vmem:[#allocation132_spill] sm:$0xff] %v9579_v37  ;;  %v9599_v47 = vsel %vm367_vm0, %v9595_v42, %v6098_v3  ;;  %v9603_v37 = vpop.permute.xlu0 %6570  ;;  %v14211_v3 = vld [vmem:[#allocation24_spill] sm:$0xff]  ;;  %6875 = vrot.lane.b32.xlu1 %v9170_v53, %s8094_s9 }
 0x1f6   : > { %14200 = vst [vmem:[#allocation133_spill] sm:$0xff] %v9583_v36  ;;  %14202 = vst [vmem:[#allocation22_spill] sm:$0xff] %v9587_v63  ;;  %v14206_v36 = vld [vmem:[#allocation23_spill] sm:$0xff]  ;;  %v9605_v63 = vld [vmem:[#allocation2 + $0x348] sm:$0xff] }
 0x1f7   : > { %14203 = vst [vmem:[#allocation134_spill] sm:$0xff] %v9593_v49  ;;  %14204 = vst [vmem:[#allocation135_spill] sm:$0xff] %v9595_v42  ;;  %v6118_v29 = vunpack.i.h.bf16 %v14206_v36  ;;  %v6117_v14 = vunpack.i.l.bf16 %v14206_v36  ;;  %v9609_v48 = vsel %vm367_vm0, %v9605_v63, %v6097_v61  ;;  %v9615_v49 = vsel %vm367_vm0, %v9611_v31, %v6093_v52  ;;  %v9620_v36 = vld [vmem:[#allocation2 + $0x330] sm:$0xff]  ;;  %6870 = vrot.lane.b32.xlu0 %v6869_v50, %s8094_s9  ;;  %v845_v50 = vld [vmem:[#allocation2 + $0x518] sm:$0xff] }
 0x1f8   : > { %14205 = vst [vmem:[#allocation136_spill] sm:$0xff] %v9599_v47  ;;  %14207 = vst [vmem:[#allocation23_spill] sm:$0xff] %v9603_v37  ;;  %v6112_v42 = vunpack.i.l.bf16 %v14211_v3  ;;  %v9624_v37 = vsel %vm367_vm0, %v9620_v36, %v6092_v44  ;;  %v9626_v47 = vld [vmem:[#allocation2 + $0x380] sm:$0xff]  ;;  %v9642_v44 = vsel %vm367_vm0, %v9365_v27, %v6103_v40  ;;  %v6128_v27 = vunpack.i.h.bf16 %v8920_v18 }
 0x1f9   : > { %14208 = vst [vmem:[#allocation137_spill] sm:$0xff] %v9605_v63  ;;  %14209 = vst [vmem:[#allocation138_spill] sm:$0xff] %v9611_v31  ;;  %v9630_v61 = vsel %vm367_vm0, %v9626_v47, %v6108_v41  ;;  %v9632_v63 = vld [vmem:[#allocation2 + $0x378] sm:$0xff]  ;;  %v842_v31 = vld [vmem:[#allocation2 + $0x500] sm:$0xff]  ;;  %v9646_v41 = vsel %vm367_vm0, %v9363_v38, %v6102_v39  ;;  %v9654_v21 = vsel %vm2580_vm1, %v9263_v24, %v6117_v14  ;;  %v9662_v39 = vpop.permute.xlu0 %6580 }
 0x1fa   : > { %14210 = vst [vmem:[#allocation139_spill] sm:$0xff] %v9615_v49  ;;  %14212 = vst [vmem:[#allocation24_spill] sm:$0xff] %v9626_v47  ;;  %v9636_v52 = vsel %vm367_vm0, %v9632_v63, %v6107_v59  ;;  %v841_v49 = vld [vmem:[#allocation2 + $0x4f8] sm:$0xff]  ;;  %v6113_v47 = vunpack.i.h.bf16 %v14211_v3  ;;  %v9650_v59 = vpop.permute.xlu1 %6585  ;;  %v9658_v40 = vsel %vm2580_vm1, %v9260_v1, %v6118_v29  ;;  %v14217_v38 = vld [vmem:[#allocation25_spill] sm:$0xff]  ;;  %v9666_v34 = vsel %vm2580_vm1, %v9244_v54, %v6112_v42 }
 0x1fb   : > { %14213 = vst [vmem:[#allocation140_spill] sm:$0xff] %v9630_v61  ;;  %14214 = vst [vmem:[#allocation141_spill] sm:$0xff] %v9632_v63  ;;  %v6127_v61 = vunpack.i.l.bf16 %v8920_v18  ;;  %v838_v63 = vld [vmem:[#allocation2 + $0x4e0] sm:$0xff]  ;;  %v6123_v45 = vunpack.i.h.bf16 %v14217_v38  ;;  %v6122_v3 = vunpack.i.l.bf16 %v14217_v38  ;;  %v9672_v24 = vpack.i.bf16 %v842_v31, %v841_v49  ;;  %v847_v54 = vld [vmem:[#allocation2 + $0x528] sm:$0xff] }
 0x1fc   : > { %14215 = vst [vmem:[#allocation142_spill] sm:$0xff] %v9636_v52  ;;  %14216 = vst [vmem:[#allocation143_spill] sm:$0xff] %v9650_v59  ;;  %v839_v52 = vld [vmem:[#allocation2 + $0x4e8] sm:$0xff]  ;;  %v6137_v59 = vunpack.i.l.bf16 %v8932_v57  ;;  %v6138_v1 = vunpack.i.h.bf16 %v8932_v57  ;;  %v6133_v18 = vunpack.i.h.bf16 %v8934_v5  ;;  %v6132_v29 = vunpack.i.l.bf16 %v8934_v5  ;;  %v848_v42 = vld [vmem:[#allocation2 + $0x530] sm:$0xff] }
 0x1fd   : > { %14218 = vst [vmem:[#allocation25_spill] sm:$0xff] %v9662_v39  ;;  %14219 = vst [vmem:[#allocation144_spill] sm:$0xff] %v9672_v24  ;;  %v9678_v14 = vpack.i.bf16 %v839_v52, %v838_v63  ;;  %v9682_v38 = vsel %vm2580_vm1, %v9249_v7, %v6113_v47  ;;  %v9686_v49 = vsel %vm2580_vm1, %v9255_v10, %v6127_v61  ;;  %v14221_v31 = vld [vmem:[#allocation26_spill] sm:$0xff]  ;;  %v844_v5 = vld [vmem:[#allocation2 + $0x510] sm:$0xff]  ;;  %v9702_v61 = vpop.permute.xlu0 %6590  ;;  %6885 = vrot.lane.b32.xlu1 %v9672_v24, %s8094_s9 }
 0x1fe   : > { %v6148_v57 = vunpack.i.h.bf16 %v14221_v31  ;;  %v6147_v39 = vunpack.i.l.bf16 %v14221_v31  ;;  %v9690_v53 = vpop.permute.xlu1 %6595  ;;  %v9694_v63 = vsel %vm2580_vm1, %v9252_v30, %v6128_v27  ;;  %v9698_v7 = vsel %vm2580_vm1, %v9241_v8, %v6123_v45  ;;  %v14223_v47 = vld [vmem:[#allocation27_spill] sm:$0xff]  ;;  %v14225_v30 = vld [vmem:[#allocation28_spill] sm:$0xff] }
 0x1ff   : > { %14220 = vst [vmem:[#allocation145_spill] sm:$0xff] %v9678_v14  ;;  %14222 = vst [vmem:[#allocation26_spill] sm:$0xff] %v9690_v53  ;;  %v6143_v52 = vunpack.i.h.bf16 %v14223_v47  ;;  %v6142_v10 = vunpack.i.l.bf16 %v14223_v47  ;;  %v9706_v31 = vsel %vm2580_vm1, %v9238_v23, %v6122_v3  ;;  %v9710_v53 = vsel %vm2580_vm1, %v9273_v15, %v6137_v59  ;;  %6880 = vrot.lane.b32.xlu0 %v9678_v14, %s8094_s9  ;;  %v853_v59 = vld [vmem:[#allocation2 + $0x558] sm:$0xff]  ;;  %v854_v3 = vld [vmem:[#allocation2 + $0x560] sm:$0xff] }
 0x200   : > { %14224 = vst [vmem:[#allocation27_spill] sm:$0xff] %v9702_v61  ;;  %v6157_v27 = vunpack.i.l.bf16 %v14225_v30  ;;  %v9715_v8 = vpack.i.bf16 %v848_v42, %v847_v54  ;;  %v9719_v45 = vsel %vm2580_vm1, %v9270_v62, %v6138_v1  ;;  %v9723_v47 = vsel %vm2580_vm1, %v9293_v20, %v6132_v29  ;;  %v14228_v1 = vld [vmem:[#allocation29_spill] sm:$0xff]  ;;  %v850_v29 = vld [vmem:[#allocation2 + $0x540] sm:$0xff]  ;;  %v851_v42 = vld [vmem:[#allocation2 + $0x548] sm:$0xff] }
 0x201   : > { %v9727_v23 = vsel %vm2580_vm1, %v9290_v9, %v6133_v18  ;;  %v9731_v15 = vpack.i.bf16 %v845_v50, %v844_v5  ;;  %v9735_v54 = vsel %vm2580_vm1, %v9303_v4, %v6147_v39  ;;  %v9739_v62 = vsel %vm2580_vm1, %v9300_v26, %v6148_v57  ;;  %v14230_v26 = vld [vmem:[#allocation30_spill] sm:$0xff]  ;;  %v9755_v50 = vpop.permute.xlu0 %6600  ;;  %v14232_v61 = vld [vmem:[#allocation31_spill] sm:$0xff] }
 0x202   : > { %14226 = vst [vmem:[#allocation28_spill] sm:$0xff] %v9715_v8  ;;  %v6158_v20 = vunpack.i.h.bf16 %v14225_v30  ;;  %v6152_v9 = vunpack.i.l.bf16 %v14228_v1  ;;  %v9743_v18 = vpop.permute.xlu1 %6605  ;;  %v9747_v5 = vsel %vm2580_vm1, %v9313_v25, %v6142_v10  ;;  %v9751_v4 = vsel %vm2580_vm1, %v9310_v46, %v6143_v52  ;;  %14231 = vst [vmem:[#allocation30_spill] sm:$0xff] %v9755_v50  ;;  %6895 = vrot.lane.b32.xlu1 %v9715_v8, %s8094_s9  ;;  %v14234_v52 = vld [vmem:[#allocation32_spill] sm:$0xff]  ;;  %v857_v8 = vld [vmem:[#allocation2 + $0x578] sm:$0xff] }
 0x203   : > { %14227 = vst [vmem:[#allocation146_spill] sm:$0xff] %v9731_v15  ;;  %14229 = vst [vmem:[#allocation29_spill] sm:$0xff] %v9743_v18  ;;  %v6153_v39 = vunpack.i.h.bf16 %v14228_v1  ;;  %v6167_v57 = vunpack.i.l.bf16 %v14230_v26  ;;  %v9759_v30 = vsel %vm2580_vm1, %v9321_v28, %v6157_v27  ;;  %v6168_v18 = vunpack.i.h.bf16 %v14230_v26  ;;  %6890 = vrot.lane.b32.xlu0 %v9731_v15, %s8094_s9  ;;  %v14286_v14 = vld [vmem:[#allocation118_spill] sm:$0xff] }
 0x204   : > { %v6162_v24 = vunpack.i.l.bf16 %v14232_v61  ;;  %v9765_v25 = vpack.i.bf16 %v854_v3, %v853_v59  ;;  %v6163_v46 = vunpack.i.h.bf16 %v14232_v61  ;;  %v6178_v10 = vunpack.i.h.bf16 %v14234_v52  ;;  %v14236_v59 = vld [vmem:[#allocation33_spill] sm:$0xff] }
 0x205   : > { %v6177_v1 = vunpack.i.l.bf16 %v14234_v52  ;;  %v9772_v28 = vpack.i.bf16 %v851_v42, %v850_v29  ;;  %v9776_v27 = vsel %vm2580_vm1, %v9316_v60, %v6158_v20  ;;  %v9780_v26 = vsel %vm2580_vm1, %v9329_v11, %v6152_v9  ;;  %v856_v52 = vld [vmem:[#allocation2 + $0x570] sm:$0xff]  ;;  %v14238_v20 = vld [vmem:[#allocation34_spill] sm:$0xff]  ;;  %v9795_v11 = vpop.permute.xlu0 %6610 }
 0x206   : > { %14233 = vst [vmem:[#allocation31_spill] sm:$0xff] %v9765_v25  ;;  %v6173_v3 = vunpack.i.h.bf16 %v14236_v59  ;;  %v6172_v61 = vunpack.i.l.bf16 %v14236_v59  ;;  %v9784_v50 = vpop.permute.xlu1 %6615  ;;  %v9788_v29 = vsel %vm2580_vm1, %v9325_v6, %v6153_v39  ;;  %v9792_v60 = vsel %vm2580_vm1, %v9337_v2, %v6167_v57  ;;  %14239 = vst [vmem:[#allocation34_spill] sm:$0xff] %v9795_v11  ;;  %6905 = vrot.lane.b32.xlu1 %v9765_v25, %s8094_s9  ;;  %v14244_v57 = vld [vmem:[#allocation36_spill] sm:$0xff] }
 0x207   : > { %14235 = vst [vmem:[#allocation32_spill] sm:$0xff] %v9772_v28  ;;  %14237 = vst [vmem:[#allocation33_spill] sm:$0xff] %v9784_v50  ;;  %v6187_v42 = vunpack.i.l.bf16 %v14238_v20  ;;  %v9797_v9 = vpack.i.bf16 %v857_v8, %v856_v52  ;;  %v9801_v59 = vsel %vm2580_vm1, %v9334_v22, %v6168_v18  ;;  %v9805_v50 = vsel %vm2580_vm1, %v9347_v32, %v6162_v24  ;;  %v14255_v11 = vld [vmem:[#allocation8_spill] sm:$0xff] }
 0x208   : > { %v6188_v6 = vunpack.i.h.bf16 %v14238_v20  ;;  %v9812_v2 = vpack.i.bf16 %v9448_v17, %v9463_v13  ;;  %v9816_v8 = vsel %vm2580_vm1, %v9344_v12, %v6163_v46  ;;  %v9820_v22 = vsel %vm2580_vm1, %v9375_v33, %v6177_v1  ;;  %6900 = vrot.lane.b32.xlu0 %v9772_v28, %s8094_s9  ;;  %v14242_v33 = vld [vmem:[#allocation35_spill] sm:$0xff]  ;;  %v14265_v28 = vld [vmem:[#allocation5_spill] sm:$0xff] }
 0x209   : > { %14240 = vst [vmem:[#allocation147_spill] sm:$0xff] %v9797_v9  ;;  %v9824_v32 = vsel %vm2580_vm1, %v9372_v56, %v6178_v10  ;;  %v6909_v24 = vpack.i.bf16 %v9406_v51, %v9412_v35  ;;  %v9832_v13 = vsel %vm2580_vm1, %v9385_v58, %v6172_v61  ;;  %v9836_v12 = vsel %vm2580_vm1, %v9382_v0, %v6173_v3  ;;  %v14245_v58 = vld [vmem:[#allocation37_spill] sm:$0xff]  ;;  %v9849_v10 = vpop.permute.xlu0 %6620  ;;  %v14247_v0 = vld [vmem:[#allocation106_spill] sm:$0xff] }
 0x20a   : > { %14241 = vst [vmem:[#allocation148_spill] sm:$0xff] %v9812_v2  ;;  %v6183_v17 = vunpack.i.h.bf16 %v14242_v33  ;;  %v6182_v18 = vunpack.i.l.bf16 %v14242_v33  ;;  %v9840_v56 = vpop.permute.xlu1 %6625  ;;  %v9844_v39 = vsel %vm2580_vm1, %v9395_v55, %v6187_v42  ;;  %v6198_v51 = vunpack.i.h.bf16 %v14244_v57  ;;  %14246 = vst [vmem:[#allocation36_spill] sm:$0xff] %v9849_v10  ;;  %v14248_v61 = vld [vmem:[#allocation38_spill] sm:$0xff]  ;;  %6915 = vrot.lane.b32.xlu1 %v9812_v2, %s8095_s10  ;;  %v14250_v42 = vld [vmem:[#allocation39_spill] sm:$0xff] }
 0x20b   : > { %14243 = vst [vmem:[#allocation35_spill] sm:$0xff] %v9840_v56  ;;  %v6197_v35 = vunpack.i.l.bf16 %v14244_v57  ;;  %v6192_v46 = vunpack.i.l.bf16 %v14245_v58  ;;  %v9853_v1 = vsel %vm2580_vm1, %v14247_v0, %v6188_v6  ;;  %v6193_v3 = vunpack.i.h.bf16 %v14245_v58  ;;  %v14251_v6 = vld [vmem:[#allocation112_spill] sm:$0xff]  ;;  %v14252_v58 = vld [vmem:[#allocation110_spill] sm:$0xff]  ;;  %v14254_v10 = vld [vmem:[#allocation107_spill] sm:$0xff] }
 0x20c   : > { %v6207_v52 = vunpack.i.l.bf16 %v14248_v61  ;;  %v9861_v55 = vpack.i.bf16 %v9485_v19, %v9495_v43  ;;  %v6208_v20 = vunpack.i.h.bf16 %v14248_v61  ;;  %v6203_v33 = vunpack.i.h.bf16 %v14250_v42  ;;  %6910 = vrot.lane.b32.xlu0 %v6909_v24, %s8095_s10  ;;  %v14256_v43 = vld [vmem:[#allocation40_spill] sm:$0xff] }
 0x20d   : > { %v6202_v57 = vunpack.i.l.bf16 %v14250_v42  ;;  %v9869_v0 = vpack.i.bf16 %v14252_v58, %v14251_v6  ;;  %v9873_v56 = vsel %vm2580_vm1, %v14254_v10, %v6182_v18  ;;  %v9877_v19 = vsel %vm2580_vm1, %v14255_v11, %v6183_v17  ;;  %v14258_v42 = vld [vmem:[#allocation109_spill] sm:$0xff]  ;;  %v14259_v6 = vld [vmem:[#allocation108_spill] sm:$0xff]  ;;  %v9896_v9 = vpop.permute.xlu0 %6630 }
 0x20e   : > { %14249 = vst [vmem:[#allocation37_spill] sm:$0xff] %v9861_v55  ;;  %v6218_v61 = vunpack.i.h.bf16 %v14256_v43  ;;  %v6217_v2 = vunpack.i.l.bf16 %v14256_v43  ;;  %v9881_v25 = vpop.permute.xlu1 %6635  ;;  %v9885_v24 = vsel %vm2580_vm1, %v14258_v42, %v6197_v35  ;;  %v9889_v58 = vsel %vm2580_vm1, %v14259_v6, %v6198_v51  ;;  %v14261_v18 = vld [vmem:[#allocation4_spill] sm:$0xff]  ;;  %v14263_v11 = vld [vmem:[#allocation41_spill] sm:$0xff]  ;;  %14264 = vst [vmem:[#allocation110_spill] sm:$0xff] %v9896_v9  ;;  %6925 = vrot.lane.b32.xlu1 %v9861_v55, %s8095_s10 }
 0x20f   : > { %14253 = vst [vmem:[#allocation106_spill] sm:$0xff] %v9869_v0  ;;  %14257 = vst [vmem:[#allocation38_spill] sm:$0xff] %v9881_v25  ;;  %v9893_v10 = vsel %vm2580_vm1, %v14261_v18, %v6192_v46  ;;  %v6212_v17 = vunpack.i.l.bf16 %v14263_v11  ;;  %v9900_v43 = vsel %vm2580_vm1, %v14265_v28, %v6193_v3  ;;  %v14267_v25 = vld [vmem:[#allocation113_spill] sm:$0xff]  ;;  %v6213_v42 = vunpack.i.h.bf16 %v14263_v11  ;;  %v14269_v51 = vld [vmem:[#allocation124_spill] sm:$0xff] }
 0x210   : > { %14260 = vst [vmem:[#allocation39_spill] sm:$0xff] %v9889_v58  ;;  %14262 = vst [vmem:[#allocation112_spill] sm:$0xff] %v9893_v10  ;;  %v9904_v35 = vsel %vm2580_vm1, %v14267_v25, %v6207_v52  ;;  %v14270_v46 = vld [vmem:[#allocation122_spill] sm:$0xff]  ;;  %v14271_v18 = vld [vmem:[#allocation111_spill] sm:$0xff]  ;;  %6920 = vrot.lane.b32.xlu0 %v9869_v0, %s8095_s10 }
 0x211   : > { %14266 = vst [vmem:[#allocation107_spill] sm:$0xff] %v9900_v43  ;;  %14268 = vst [vmem:[#allocation8_spill] sm:$0xff] %v9904_v35  ;;  %v6934_v6 = vpack.i.bf16 %v14270_v46, %v14269_v51  ;;  %v9913_v15 = vsel %vm2580_vm1, %v14271_v18, %v6208_v20  ;;  %v14273_v9 = vld [vmem:[#allocation13_spill] sm:$0xff]  ;;  %v14275_v3 = vld [vmem:[#allocation114_spill] sm:$0xff]  ;;  %v9943_v0 = vsel %vm2580_vm1, %v14286_v14, %v6212_v17 }
 0x212   : > { %14272 = vst [vmem:[#allocation40_spill] sm:$0xff] %v9913_v15  ;;  %v9917_v28 = vsel %vm2580_vm1, %v14273_v9, %v6202_v57  ;;  %v9921_v25 = vsel %vm2580_vm1, %v14275_v3, %v6203_v33  ;;  %v14277_v52 = vld [vmem:[#allocation115_spill] sm:$0xff]  ;;  %v14278_v11 = vld [vmem:[#allocation14_spill] sm:$0xff]  ;;  %v14280_v51 = vld [vmem:[#allocation116_spill] sm:$0xff]  ;;  %v9939_v3 = vpop.permute.xlu1 %6645 }
 0x213   : > { %14274 = vst [vmem:[#allocation109_spill] sm:$0xff] %v9917_v28  ;;  %14276 = vst [vmem:[#allocation108_spill] sm:$0xff] %v9921_v25  ;;  %v9927_v55 = vpack.i.bf16 %v14278_v11, %v14277_v52  ;;  %v9931_v46 = vsel %vm2580_vm1, %v14280_v51, %v6217_v2  ;;  %v14282_v20 = vld [vmem:[#allocation3_spill] sm:$0xff]  ;;  %v14284_v9 = vld [vmem:[#allocation42_spill] sm:$0xff]  ;;  %6935 = vrot.lane.b32.xlu1 %v6934_v6, %s8095_s10 }
 0x214   : > { %14281 = vst [vmem:[#allocation41_spill] sm:$0xff] %v9931_v46  ;;  %v9935_v18 = vsel %vm2580_vm1, %v14282_v20, %v6218_v61  ;;  %v6228_v57 = vunpack.i.h.bf16 %v14284_v9  ;;  %v6227_v33 = vunpack.i.l.bf16 %v14284_v9  ;;  %14285 = vst [vmem:[#allocation113_spill] sm:$0xff] %v9939_v3  ;;  %v14288_v52 = vld [vmem:[#allocation43_spill] sm:$0xff]  ;;  %v14289_v2 = vld [vmem:[#allocation44_spill] sm:$0xff]  ;;  %v9948_v46 = vpop.permute.xlu0 %6640 }
 0x215   : > { %14279 = vst [vmem:[#allocation4_spill] sm:$0xff] %v9927_v55  ;;  %14283 = vst [vmem:[#allocation5_spill] sm:$0xff] %v9935_v18  ;;  %v6223_v11 = vunpack.i.h.bf16 %v14288_v52  ;;  %v6222_v25 = vunpack.i.l.bf16 %v14288_v52  ;;  %v6237_v51 = vunpack.i.l.bf16 %v14289_v2  ;;  %v14291_v61 = vld [vmem:[#allocation117_spill] sm:$0xff]  ;;  %v6238_v9 = vunpack.i.h.bf16 %v14289_v2  ;;  %v7934_v14 = vld [vmem:[#allocation2 + $0x2a0] sm:$0xff]  ;;  %6930 = vrot.lane.b32.xlu0 %v9927_v55, %s8095_s10 }
 0x216   : > { %14287 = vst [vmem:[#allocation124_spill] sm:$0xff] %v9943_v0  ;;  %14290 = vst [vmem:[#allocation122_spill] sm:$0xff] %v9948_v46  ;;  %v9952_v20 = vsel %vm2580_vm1, %v14291_v61, %v6213_v42  ;;  %v14293_v18 = vld [vmem:[#allocation45_spill] sm:$0xff]  ;;  %v7935_v17 = vld [vmem:[#allocation2 + $0x2a8] sm:$0xff] }
 0x217   : > { %14292 = vst [vmem:[#allocation111_spill] sm:$0xff] %v9952_v20  ;;  %v6232_v3 = vunpack.i.l.bf16 %v14293_v18  ;;  %v9957_v0 = vpack.i.bf16 %v7935_v17, %v7934_v14  ;;  %v6233_v52 = vunpack.i.h.bf16 %v14293_v18  ;;  %v14295_v28 = vld [vmem:[#allocation46_spill] sm:$0xff]  ;;  %v14296_v42 = vld [vmem:[#allocation17_spill] sm:$0xff]  ;;  %v14297_v2 = vld [vmem:[#allocation119_spill] sm:$0xff] }
 0x218   : > { %v6248_v15 = vunpack.i.h.bf16 %v14295_v28  ;;  %v6247_v46 = vunpack.i.l.bf16 %v14295_v28  ;;  %v6939_v61 = vpack.i.bf16 %v14297_v2, %v14296_v42  ;;  %v14298_v20 = vld [vmem:[#allocation121_spill] sm:$0xff]  ;;  %v14299_v35 = vld [vmem:[#allocation120_spill] sm:$0xff]  ;;  %v14301_v18 = vld [vmem:[#allocation47_spill] sm:$0xff]  ;;  %v9976_v28 = vpop.permute.xlu1 %6655  ;;  %v9991_v2 = vpop.permute.xlu0 %6650 }
 0x219   : > { %14294 = vst [vmem:[#allocation13_spill] sm:$0xff] %v9957_v0  ;;  %v9968_v6 = vsel %vm2580_vm1, %v14298_v20, %v6227_v33  ;;  %v9972_v14 = vsel %vm2580_vm1, %v14299_v35, %v6228_v57  ;;  %v6243_v17 = vunpack.i.h.bf16 %v14301_v18  ;;  %v6242_v43 = vunpack.i.l.bf16 %v14301_v18  ;;  %14302 = vst [vmem:[#allocation115_spill] sm:$0xff] %v9976_v28  ;;  %v14303_v10 = vld [vmem:[#allocation125_spill] sm:$0xff]  ;;  %v14304_v58 = vld [vmem:[#allocation123_spill] sm:$0xff]  ;;  %6945 = vrot.lane.b32.xlu1 %v9957_v0, %s8095_s10 }
 0x21a   : > { %14300 = vst [vmem:[#allocation114_spill] sm:$0xff] %v9972_v14  ;;  %v9980_v55 = vsel %vm2580_vm1, %v14303_v10, %v6222_v25  ;;  %v9984_v42 = vsel %vm2580_vm1, %v14304_v58, %v6223_v11  ;;  %v14305_v33 = vld [vmem:[#allocation129_spill] sm:$0xff]  ;;  %v14306_v35 = vld [vmem:[#allocation48_spill] sm:$0xff]  ;;  %14307 = vst [vmem:[#allocation14_spill] sm:$0xff] %v9991_v2  ;;  %6940 = vrot.lane.b32.xlu0 %v6939_v61, %s8095_s10 }
 0x21b   : > { %v9988_v20 = vsel %vm2580_vm1, %v14305_v33, %v6237_v51  ;;  %v6257_v57 = vunpack.i.l.bf16 %v14306_v35  ;;  %v14308_v14 = vld [vmem:[#allocation127_spill] sm:$0xff]  ;;  %v14310_v28 = vld [vmem:[#allocation10_spill] sm:$0xff]  ;;  %v6258_v25 = vunpack.i.h.bf16 %v14306_v35  ;;  %v14312_v58 = vld [vmem:[#allocation132_spill] sm:$0xff] }
 0x21c   : > { %v9995_v18 = vsel %vm2580_vm1, %v14308_v14, %v6238_v9  ;;  %v9999_v10 = vsel %vm2580_vm1, %v14310_v28, %v6232_v3  ;;  %v6954_v11 = vpack.i.bf16 %v14312_v58, %v9589_v16  ;;  %v14313_v51 = vld [vmem:[#allocation11_spill] sm:$0xff]  ;;  %v14315_v2 = vld [vmem:[#allocation21_spill] sm:$0xff]  ;;  %v14319_v28 = vld [vmem:[#allocation128_spill] sm:$0xff] }
 0x21d   : > { %14309 = vst [vmem:[#allocation116_spill] sm:$0xff] %v9995_v18  ;;  %14311 = vst [vmem:[#allocation3_spill] sm:$0xff] %v9999_v10  ;;  %v10008_v33 = vsel %vm2580_vm1, %v14313_v51, %v6233_v52  ;;  %v10012_v9 = vsel %vm2580_vm1, %v14315_v2, %v6247_v46  ;;  %v14317_v14 = vld [vmem:[#allocation131_spill] sm:$0xff]  ;;  %v14320_v35 = vld [vmem:[#allocation126_spill] sm:$0xff] }
 0x21e   : > { %14314 = vst [vmem:[#allocation42_spill] sm:$0xff] %v10008_v33  ;;  %14316 = vst [vmem:[#allocation118_spill] sm:$0xff] %v10012_v9  ;;  %v10016_v3 = vsel %vm2580_vm1, %v14317_v14, %v6248_v15  ;;  %v6949_v0 = vpack.i.bf16 %v14320_v35, %v14319_v28  ;;  %v14321_v10 = vld [vmem:[#allocation134_spill] sm:$0xff]  ;;  %v14323_v58 = vld [vmem:[#allocation133_spill] sm:$0xff]  ;;  %v10031_v9 = vpop.permute.xlu1 %6665  ;;  %v10035_v15 = vsel %vm2580_vm1, %v9609_v48, %v6257_v57  ;;  %v10040_v35 = vpop.permute.xlu0 %6660  ;;  %6955 = vrot.lane.b32.xlu1 %v6954_v11, %s8095_s10 }
 0x21f   : > { %14318 = vst [vmem:[#allocation43_spill] sm:$0xff] %v10016_v3  ;;  %v10023_v16 = vsel %vm2580_vm1, %v14321_v10, %v6242_v43  ;;  %v10027_v52 = vsel %vm2580_vm1, %v14323_v58, %v6243_v17  ;;  %v14325_v51 = vld [vmem:[#allocation49_spill] sm:$0xff]  ;;  %14326 = vst [vmem:[#allocation45_spill] sm:$0xff] %v10031_v9  ;;  %v14328_v61 = vld [vmem:[#allocation50_spill] sm:$0xff] }
 0x220   : > { %14322 = vst [vmem:[#allocation44_spill] sm:$0xff] %v10023_v16  ;;  %14324 = vst [vmem:[#allocation117_spill] sm:$0xff] %v10027_v52  ;;  %v6253_v46 = vunpack.i.h.bf16 %v14325_v51  ;;  %v6252_v2 = vunpack.i.l.bf16 %v14325_v51  ;;  %v6268_v14 = vunpack.i.h.bf16 %v14328_v61  ;;  %v6267_v28 = vunpack.i.l.bf16 %v14328_v61  ;;  %v14329_v43 = vld [vmem:[#allocation51_spill] sm:$0xff]  ;;  %v14331_v17 = vld [vmem:[#allocation136_spill] sm:$0xff]  ;;  %6950 = vrot.lane.b32.xlu0 %v6949_v0, %s8095_s10 }
 0x221   : > { %14327 = vst [vmem:[#allocation46_spill] sm:$0xff] %v10035_v15  ;;  %v6262_v10 = vunpack.i.l.bf16 %v14329_v43  ;;  %14330 = vst [vmem:[#allocation17_spill] sm:$0xff] %v10040_v35  ;;  %v10044_v58 = vsel %vm2580_vm1, %v14331_v17, %v6258_v25  ;;  %v6263_v51 = vunpack.i.h.bf16 %v14329_v43  ;;  %v14333_v52 = vld [vmem:[#allocation52_spill] sm:$0xff]  ;;  %v14334_v48 = vld [vmem:[#allocation138_spill] sm:$0xff] }
 0x222   : > { %14332 = vst [vmem:[#allocation119_spill] sm:$0xff] %v10044_v58  ;;  %v6277_v9 = vunpack.i.l.bf16 %v14333_v52  ;;  %v6964_v57 = vpack.i.bf16 %v14334_v48, %v9620_v36  ;;  %v6278_v15 = vunpack.i.h.bf16 %v14333_v52  ;;  %v14335_v61 = vld [vmem:[#allocation53_spill] sm:$0xff]  ;;  %v14336_v35 = vld [vmem:[#allocation20_spill] sm:$0xff]  ;;  %v14337_v25 = vld [vmem:[#allocation130_spill] sm:$0xff]  ;;  %v10059_v43 = vsel %vm2580_vm1, %v9624_v37, %v6252_v2  ;;  %v10067_v33 = vpop.permute.xlu1 %6675 }
 0x223   : > { %v6273_v16 = vunpack.i.h.bf16 %v14335_v61  ;;  %v6272_v3 = vunpack.i.l.bf16 %v14335_v61  ;;  %v6959_v17 = vpack.i.bf16 %v14337_v25, %v14336_v35  ;;  %v14338_v58 = vld [vmem:[#allocation139_spill] sm:$0xff]  ;;  %v14339_v36 = vld [vmem:[#allocation54_spill] sm:$0xff]  ;;  %14340 = vst [vmem:[#allocation121_spill] sm:$0xff] %v10067_v33  ;;  %v14342_v18 = vld [vmem:[#allocation140_spill] sm:$0xff]  ;;  %v10079_v37 = vsel %vm2580_vm1, %v9646_v41, %v6262_v10 }
 0x224   : > { %v10063_v11 = vsel %vm2580_vm1, %v14338_v58, %v6253_v46  ;;  %v6288_v48 = vunpack.i.h.bf16 %v14339_v36  ;;  %v6287_v52 = vunpack.i.l.bf16 %v14339_v36  ;;  %v14341_v61 = vld [vmem:[#allocation142_spill] sm:$0xff]  ;;  %v10075_v35 = vsel %vm2580_vm1, %v14342_v18, %v6268_v14  ;;  %v14343_v46 = vld [vmem:[#allocation55_spill] sm:$0xff]  ;;  %v10082_v58 = vpop.permute.xlu0 %6670  ;;  %6965 = vrot.lane.b32.xlu1 %v6964_v57, %s8095_s10 }
 0x225   : > { %v10071_v0 = vsel %vm2580_vm1, %v14341_v61, %v6267_v28  ;;  %v6282_v2 = vunpack.i.l.bf16 %v14343_v46  ;;  %14344 = vst [vmem:[#allocation120_spill] sm:$0xff] %v10082_v58  ;;  %v10086_v25 = vsel %vm2580_vm1, %v9642_v44, %v6263_v51  ;;  %v10090_v28 = vsel %vm2645_vm2, %v9654_v21, %v6277_v9  ;;  %6960 = vrot.lane.b32.xlu0 %v6959_v17, %s8095_s10  ;;  %v14345_v21 = vld [vmem:[#allocation137_spill] sm:$0xff]  ;;  %v14346_v9 = vld [vmem:[#allocation135_spill] sm:$0xff] }
 0x226   : > { %v6283_v36 = vunpack.i.h.bf16 %v14343_v46  ;;  %v10096_v41 = vsel %vm2645_vm2, %v9658_v40, %v6278_v15  ;;  %v10100_v18 = vsel %vm2645_vm2, %v9666_v34, %v6272_v3  ;;  %v10104_v44 = vsel %vm2645_vm2, %v9682_v38, %v6273_v16  ;;  %v14347_v15 = vld [vmem:[#allocation56_spill] sm:$0xff]  ;;  %v10119_v51 = vpop.permute.xlu1 %6685  ;;  %v14349_v16 = vld [vmem:[#allocation57_spill] sm:$0xff]  ;;  %v14353_v46 = vld [vmem:[#allocation59_spill] sm:$0xff] }
 0x227   : > { %v6969_v14 = vpack.i.bf16 %v14346_v9, %v14345_v21  ;;  %v10111_v10 = vsel %vm2645_vm2, %v9686_v49, %v6287_v52  ;;  %v10115_v40 = vsel %vm2645_vm2, %v9694_v63, %v6288_v48  ;;  %v6298_v34 = vunpack.i.h.bf16 %v14347_v15  ;;  %14348 = vst [vmem:[#allocation47_spill] sm:$0xff] %v10119_v51  ;;  %v14350_v49 = vld [vmem:[#allocation58_spill] sm:$0xff]  ;;  %v14354_v9 = vld [vmem:[#allocation105_spill] sm:$0xff]  ;;  %v14356_v51 = vld [vmem:[#allocation60_spill] sm:$0xff] }
 0x228   : > { %v6297_v3 = vunpack.i.l.bf16 %v14347_v15  ;;  %v10123_v38 = vsel %vm2645_vm2, %v9706_v31, %v6282_v2  ;;  %v6293_v57 = vunpack.i.h.bf16 %v14349_v16  ;;  %v6292_v17 = vunpack.i.l.bf16 %v14349_v16  ;;  %v10128_v61 = vpop.permute.xlu0 %6680  ;;  %6975 = vrot.lane.b32.xlu1 %v14354_v9, %s8095_s10  ;;  %v7936_v31 = vld [vmem:[#allocation2 + $0x390] sm:$0xff]  ;;  %v7937_v2 = vld [vmem:[#allocation2 + $0x398] sm:$0xff] }
 0x229   : > { %v6307_v52 = vunpack.i.l.bf16 %v14350_v49  ;;  %14351 = vst [vmem:[#allocation125_spill] sm:$0xff] %v10128_v61  ;;  %v10132_v63 = vsel %vm2645_vm2, %v9698_v7, %v6283_v36  ;;  %v6308_v48 = vunpack.i.h.bf16 %v14350_v49  ;;  %v6302_v21 = vunpack.i.l.bf16 %v14353_v46  ;;  %6970 = vrot.lane.b32.xlu0 %v6969_v14, %s8095_s10  ;;  %v14357_v7 = vld [vmem:[#allocation141_spill] sm:$0xff]  ;;  %v14358_v36 = vld [vmem:[#allocation24_spill] sm:$0xff] }
 0x22a   : > { %14352 = vst [vmem:[#allocation123_spill] sm:$0xff] %v10132_v63  ;;  %v10138_v15 = vpack.i.bf16 %v7937_v2, %v7936_v31  ;;  %v6303_v16 = vunpack.i.h.bf16 %v14353_v46  ;;  %v6318_v58 = vunpack.i.h.bf16 %v14356_v51  ;;  %v6317_v61 = vunpack.i.l.bf16 %v14356_v51  ;;  %v14359_v31 = vld [vmem:[#allocation61_spill] sm:$0xff]  ;;  %v10156_v63 = vpop.permute.xlu1 %6695 }
 0x22b   : > { %v6979_v49 = vpack.i.bf16 %v14358_v36, %v14357_v7  ;;  %v10148_v33 = vsel %vm2645_vm2, %v9710_v53, %v6297_v3  ;;  %v10152_v9 = vsel %vm2645_vm2, %v9719_v45, %v6298_v34  ;;  %v6313_v2 = vunpack.i.h.bf16 %v14359_v31  ;;  %14360 = vst [vmem:[#allocation48_spill] sm:$0xff] %v10156_v63  ;;  %v14361_v45 = vld [vmem:[#allocation62_spill] sm:$0xff] }
 0x22c   : > { %14355 = vst [vmem:[#allocation129_spill] sm:$0xff] %v10138_v15  ;;  %v6312_v46 = vunpack.i.l.bf16 %v14359_v31  ;;  %v10160_v14 = vsel %vm2645_vm2, %v9723_v47, %v6292_v17  ;;  %v10164_v51 = vsel %vm2645_vm2, %v9727_v23, %v6293_v57  ;;  %v10168_v53 = vsel %vm2645_vm2, %v9735_v54, %v6307_v52  ;;  %v10171_v3 = vpop.permute.xlu0 %6690  ;;  %6985 = vrot.lane.b32.xlu1 %v10138_v15, %s8095_s10  ;;  %v7938_v23 = vld [vmem:[#allocation2 + $0x3f0] sm:$0xff]  ;;  %v7939_v54 = vld [vmem:[#allocation2 + $0x3f8] sm:$0xff] }
 0x22d   : > { %v6327_v34 = vunpack.i.l.bf16 %v14361_v45  ;;  %14362 = vst [vmem:[#allocation127_spill] sm:$0xff] %v10171_v3  ;;  %v10175_v7 = vsel %vm2645_vm2, %v9739_v62, %v6308_v48  ;;  %v10179_v47 = vsel %vm2645_vm2, %v9747_v5, %v6302_v21  ;;  %v6328_v17 = vunpack.i.h.bf16 %v14361_v45  ;;  %6980 = vrot.lane.b32.xlu0 %v6979_v49, %s8095_s10  ;;  %v7940_v48 = vld [vmem:[#allocation2 + $0x3d8] sm:$0xff]  ;;  %v7941_v21 = vld [vmem:[#allocation2 + $0x3e0] sm:$0xff] }
 0x22e   : > { %v10184_v57 = vpack.i.bf16 %v7939_v54, %v7938_v23  ;;  %v10188_v52 = vsel %vm2645_vm2, %v9751_v4, %v6303_v16  ;;  %v10192_v62 = vsel %vm2645_vm2, %v9759_v30, %v6317_v61  ;;  %v10196_v5 = vsel %vm2645_vm2, %v9776_v27, %v6318_v58  ;;  %v14364_v16 = vld [vmem:[#allocation63_spill] sm:$0xff]  ;;  %v10209_v45 = vpop.permute.xlu1 %6705  ;;  %v14366_v58 = vld [vmem:[#allocation64_spill] sm:$0xff] }
 0x22f   : > { %v6989_v36 = vpack.i.bf16 %v7941_v21, %v7940_v48  ;;  %v10201_v31 = vsel %vm2645_vm2, %v9780_v26, %v6312_v46  ;;  %v10205_v4 = vsel %vm2645_vm2, %v9788_v29, %v6313_v2  ;;  %v6323_v30 = vunpack.i.h.bf16 %v14364_v16  ;;  %14365 = vst [vmem:[#allocation132_spill] sm:$0xff] %v10209_v45  ;;  %v14367_v26 = vld [vmem:[#allocation65_spill] sm:$0xff]  ;;  %v14370_v48 = vld [vmem:[#allocation66_spill] sm:$0xff]  ;;  %v14372_v45 = vld [vmem:[#allocation67_spill] sm:$0xff] }
 0x230   : > { %14363 = vst [vmem:[#allocation10_spill] sm:$0xff] %v10184_v57  ;;  %v6322_v61 = vunpack.i.l.bf16 %v14364_v16  ;;  %v10213_v27 = vsel %vm2645_vm2, %v9792_v60, %v6327_v34  ;;  %v6338_v49 = vunpack.i.h.bf16 %v14366_v58  ;;  %v6337_v23 = vunpack.i.l.bf16 %v14366_v58  ;;  %v10218_v54 = vpop.permute.xlu0 %6700  ;;  %6995 = vrot.lane.b32.xlu1 %v10184_v57, %s8095_s10  ;;  %v7942_v60 = vld [vmem:[#allocation2 + $0x420] sm:$0xff]  ;;  %v7943_v34 = vld [vmem:[#allocation2 + $0x428] sm:$0xff] }
 0x231   : > { %v6332_v46 = vunpack.i.l.bf16 %v14367_v26  ;;  %14368 = vst [vmem:[#allocation11_spill] sm:$0xff] %v10218_v54  ;;  %v10222_v29 = vsel %vm2645_vm2, %v9801_v59, %v6328_v17  ;;  %v6333_v2 = vunpack.i.h.bf16 %v14367_v26  ;;  %v6347_v21 = vunpack.i.l.bf16 %v14370_v48  ;;  %6990 = vrot.lane.b32.xlu0 %v6989_v36, %s8095_s10  ;;  %v7944_v59 = vld [vmem:[#allocation2 + $0x408] sm:$0xff]  ;;  %v7945_v17 = vld [vmem:[#allocation2 + $0x410] sm:$0xff] }
 0x232   : > { %14369 = vst [vmem:[#allocation21_spill] sm:$0xff] %v10222_v29  ;;  %v10228_v16 = vpack.i.bf16 %v7943_v34, %v7942_v60  ;;  %v6348_v58 = vunpack.i.h.bf16 %v14370_v48  ;;  %v6343_v3 = vunpack.i.h.bf16 %v14372_v45  ;;  %v6342_v54 = vunpack.i.l.bf16 %v14372_v45  ;;  %v14374_v57 = vld [vmem:[#allocation68_spill] sm:$0xff]  ;;  %v14375_v34 = vld [vmem:[#allocation69_spill] sm:$0xff]  ;;  %v10243_v29 = vpop.permute.xlu1 %6715 }
 0x233   : > { %v10234_v26 = vpack.i.bf16 %v7945_v17, %v7944_v59  ;;  %v10238_v63 = vsel %vm2645_vm2, %v9805_v50, %v6322_v61  ;;  %v6358_v15 = vunpack.i.h.bf16 %v14374_v57  ;;  %v6357_v60 = vunpack.i.l.bf16 %v14374_v57  ;;  %14376 = vst [vmem:[#allocation126_spill] sm:$0xff] %v10243_v29 }
 0x234   : > { %14371 = vst [vmem:[#allocation131_spill] sm:$0xff] %v10228_v16  ;;  %v6352_v48 = vunpack.i.l.bf16 %v14375_v34  ;;  %v10247_v45 = vsel %vm2645_vm2, %v9816_v8, %v6323_v30  ;;  %v10251_v36 = vsel %vm2645_vm2, %v9820_v22, %v6337_v23  ;;  %v10255_v50 = vsel %vm2645_vm2, %v9824_v32, %v6338_v49  ;;  %v10261_v57 = vpop.permute.xlu0 %6710  ;;  %7005 = vrot.lane.b32.xlu1 %v10228_v16, %s8095_s10  ;;  %v7946_v32 = vld [vmem:[#allocation2 + $0x450] sm:$0xff]  ;;  %v7947_v30 = vld [vmem:[#allocation2 + $0x458] sm:$0xff] }
 0x235   : > { %14373 = vst [vmem:[#allocation128_spill] sm:$0xff] %v10234_v26  ;;  %v10259_v61 = vsel %vm2645_vm2, %v9832_v13, %v6332_v46  ;;  %14377 = vst [vmem:[#allocation134_spill] sm:$0xff] %v10261_v57  ;;  %v10265_v59 = vsel %vm2645_vm2, %v9836_v12, %v6333_v2  ;;  %v10269_v8 = vsel %vm2645_vm2, %v9844_v39, %v6347_v21  ;;  %v6353_v22 = vunpack.i.h.bf16 %v14375_v34  ;;  %v7948_v23 = vld [vmem:[#allocation2 + $0x438] sm:$0xff]  ;;  %v7949_v46 = vld [vmem:[#allocation2 + $0x440] sm:$0xff] }
 0x236   : > { %v10274_v49 = vpack.i.bf16 %v7947_v30, %v7946_v32  ;;  %v10278_v13 = vsel %vm2645_vm2, %v9853_v1, %v6348_v58  ;;  %v10282_v12 = vsel %vm2645_vm2, %v9873_v56, %v6342_v54  ;;  %v10286_v39 = vsel %vm2645_vm2, %v9877_v19, %v6343_v3  ;;  %7000 = vrot.lane.b32.xlu0 %v10234_v26, %s8095_s10  ;;  %v14383_v1 = vld [vmem:[#allocation39_spill] sm:$0xff]  ;;  %v14385_v56 = vld [vmem:[#allocation112_spill] sm:$0xff]  ;;  %v14387_v19 = vld [vmem:[#allocation70_spill] sm:$0xff]  ;;  %v10305_v17 = vpop.permute.xlu1 %6725 }
 0x237   : > { %14379 = vst [vmem:[#allocation49_spill] sm:$0xff] %v10282_v12  ;;  %14380 = vst [vmem:[#allocation50_spill] sm:$0xff] %v10286_v39  ;;  %v10290_v2 = vpack.i.bf16 %v7949_v46, %v7948_v23  ;;  %v10294_v21 = vsel %vm2645_vm2, %v9885_v24, %v6357_v60  ;;  %v10298_v58 = vsel %vm2645_vm2, %v14383_v1, %v6358_v15  ;;  %v6367_v3 = vunpack.i.l.bf16 %v14387_v19  ;;  %v14389_v32 = vld [vmem:[#allocation71_spill] sm:$0xff]  ;;  %v14390_v24 = vld [vmem:[#allocation72_spill] sm:$0xff] }
 0x238   : > { %14378 = vst [vmem:[#allocation133_spill] sm:$0xff] %v10274_v49  ;;  %14382 = vst [vmem:[#allocation136_spill] sm:$0xff] %v10294_v21  ;;  %v10302_v54 = vsel %vm2645_vm2, %v14385_v56, %v6352_v48  ;;  %v6368_v34 = vunpack.i.h.bf16 %v14387_v19  ;;  %v6363_v30 = vunpack.i.h.bf16 %v14389_v32  ;;  %v6362_v23 = vunpack.i.l.bf16 %v14389_v32  ;;  %v10311_v46 = vpop.permute.xlu0 %6720  ;;  %v14392_v15 = vld [vmem:[#allocation107_spill] sm:$0xff]  ;;  %v14394_v56 = vld [vmem:[#allocation73_spill] sm:$0xff]  ;;  %7015 = vrot.lane.b32.xlu1 %v10274_v49, %s8095_s10 }
 0x239   : > { %14381 = vst [vmem:[#allocation51_spill] sm:$0xff] %v10290_v2  ;;  %14384 = vst [vmem:[#allocation52_spill] sm:$0xff] %v10298_v58  ;;  %v6377_v60 = vunpack.i.l.bf16 %v14390_v24  ;;  %v10315_v1 = vsel %vm2645_vm2, %v14392_v15, %v6353_v22  ;;  %v6378_v48 = vunpack.i.h.bf16 %v14390_v24  ;;  %v6372_v57 = vunpack.i.l.bf16 %v14394_v56  ;;  %v7950_v19 = vld [vmem:[#allocation2 + $0x480] sm:$0xff]  ;;  %v14396_v16 = vld [vmem:[#allocation74_spill] sm:$0xff] }
 0x23a   : > { %14386 = vst [vmem:[#allocation138_spill] sm:$0xff] %v10302_v54  ;;  %14388 = vst [vmem:[#allocation53_spill] sm:$0xff] %v10305_v17  ;;  %v7951_v17 = vld [vmem:[#allocation2 + $0x488] sm:$0xff]  ;;  %v6373_v32 = vunpack.i.h.bf16 %v14394_v56  ;;  %v6388_v26 = vunpack.i.h.bf16 %v14396_v16  ;;  %7010 = vrot.lane.b32.xlu0 %v10290_v2, %s8095_s10  ;;  %v7953_v24 = vld [vmem:[#allocation2 + $0x470] sm:$0xff]  ;;  %v10337_v21 = vpop.permute.xlu1 %6735 }
 0x23b   : > { %14391 = vst [vmem:[#allocation20_spill] sm:$0xff] %v10311_v46  ;;  %14393 = vst [vmem:[#allocation130_spill] sm:$0xff] %v10315_v1  ;;  %v10321_v29 = vpack.i.bf16 %v7951_v17, %v7950_v19  ;;  %v6387_v46 = vunpack.i.l.bf16 %v14396_v16  ;;  %v7952_v22 = vld [vmem:[#allocation2 + $0x468] sm:$0xff]  ;;  %v14400_v54 = vld [vmem:[#allocation75_spill] sm:$0xff] }
 0x23c   : > { %v10328_v15 = vpack.i.bf16 %v7953_v24, %v7952_v22  ;;  %v14398_v1 = vld [vmem:[#allocation8_spill] sm:$0xff]  ;;  %v6383_v17 = vunpack.i.h.bf16 %v14400_v54  ;;  %v6382_v19 = vunpack.i.l.bf16 %v14400_v54  ;;  %14402 = vst [vmem:[#allocation140_spill] sm:$0xff] %v10337_v21  ;;  %v14404_v2 = vld [vmem:[#allocation109_spill] sm:$0xff]  ;;  %v10355_v54 = vpop.permute.xlu0 %6730 }
 0x23d   : > { %14395 = vst [vmem:[#allocation139_spill] sm:$0xff] %v10321_v29  ;;  %v10332_v49 = vsel %vm2645_vm2, %v14398_v1, %v6367_v3  ;;  %v14401_v56 = vld [vmem:[#allocation76_spill] sm:$0xff]  ;;  %v10345_v22 = vsel %vm2645_vm2, %v14404_v2, %v6362_v23  ;;  %v14406_v1 = vld [vmem:[#allocation41_spill] sm:$0xff]  ;;  %14407 = vst [vmem:[#allocation55_spill] sm:$0xff] %v10355_v54  ;;  %7025 = vrot.lane.b32.xlu1 %v10321_v29, %s8095_s10 }
 0x23e   : > { %14397 = vst [vmem:[#allocation54_spill] sm:$0xff] %v10328_v15  ;;  %14399 = vst [vmem:[#allocation142_spill] sm:$0xff] %v10332_v49  ;;  %v6397_v58 = vunpack.i.l.bf16 %v14401_v56  ;;  %v14403_v16 = vld [vmem:[#allocation40_spill] sm:$0xff]  ;;  %v10353_v49 = vsel %vm2645_vm2, %v14406_v1, %v6377_v60  ;;  %v14408_v12 = vld [vmem:[#allocation5_spill] sm:$0xff]  ;;  %v6398_v2 = vunpack.i.h.bf16 %v14401_v56  ;;  %v10374_v60 = vsel %vm2645_vm2, %v9968_v6, %v6387_v46  ;;  %7020 = vrot.lane.b32.xlu0 %v10328_v15, %s8095_s10  ;;  %v10396_v46 = vpop.permute.xlu1 %6745 }
 0x23f   : > { %v10341_v39 = vsel %vm2645_vm2, %v14403_v16, %v6368_v34  ;;  %v14405_v24 = vld [vmem:[#allocation108_spill] sm:$0xff]  ;;  %v10359_v21 = vsel %vm2645_vm2, %v14408_v12, %v6378_v48  ;;  %14411 = vst [vmem:[#allocation137_spill] sm:$0xff] %v10374_v60  ;;  %v14414_v48 = vld [vmem:[#allocation77_spill] sm:$0xff]  ;;  %v10385_v56 = vsel %vm2645_vm2, %v9980_v55, %v6382_v19  ;;  %14418 = vst [vmem:[#allocation59_spill] sm:$0xff] %v10396_v46 }
 0x240   : > { %v10349_v3 = vsel %vm2645_vm2, %v14405_v24, %v6363_v30  ;;  %v14409_v34 = vld [vmem:[#allocation124_spill] sm:$0xff]  ;;  %v14410_v30 = vld [vmem:[#allocation111_spill] sm:$0xff]  ;;  %v14412_v24 = vld [vmem:[#allocation114_spill] sm:$0xff]  ;;  %14415 = vst [vmem:[#allocation56_spill] sm:$0xff] %v10385_v56  ;;  %v10393_v6 = vsel %vm2645_vm2, %v9988_v20, %v6397_v58  ;;  %v10402_v19 = vpop.permute.xlu0 %6740 }
 0x241   : > { %v10363_v16 = vsel %vm2645_vm2, %v14409_v34, %v6372_v57  ;;  %v10370_v23 = vsel %vm2645_vm2, %v14410_v30, %v6373_v32  ;;  %v10378_v12 = vsel %vm2645_vm2, %v14412_v24, %v6388_v26  ;;  %v6392_v57 = vunpack.i.l.bf16 %v14414_v48  ;;  %14417 = vst [vmem:[#allocation58_spill] sm:$0xff] %v10393_v6  ;;  %v14419_v1 = vld [vmem:[#allocation78_spill] sm:$0xff]  ;;  %v14420_v24 = vld [vmem:[#allocation79_spill] sm:$0xff]  ;;  %14421 = vst [vmem:[#allocation105_spill] sm:$0xff] %v10402_v19 }
 0x242   : > { %14413 = vst [vmem:[#allocation135_spill] sm:$0xff] %v10378_v12  ;;  %v10389_v32 = vsel %vm2645_vm2, %v9984_v42, %v6383_v17  ;;  %v6393_v26 = vunpack.i.h.bf16 %v14414_v48  ;;  %v6408_v34 = vunpack.i.h.bf16 %v14419_v1  ;;  %v6407_v30 = vunpack.i.l.bf16 %v14419_v1  ;;  %v7869_v42 = vld [vmem:[%s13676_s3 + $0x14] sm:$0xff]   ;;  %v14422_v20 = vld [vmem:[#allocation116_spill] sm:$0xff]  ;;  %v14426_v29 = vld [vmem:[#allocation3_spill] sm:$0xff] }
 0x243   : > { %14416 = vst [vmem:[#allocation57_spill] sm:$0xff] %v10389_v32  ;;  %v6403_v54 = vunpack.i.h.bf16 %v14420_v24  ;;  %v6402_v55 = vunpack.i.l.bf16 %v14420_v24  ;;  %v10409_v58 = vsel %vm2645_vm2, %v14422_v20, %v6398_v2  ;;  %v14424_v17 = vld [vmem:[#allocation80_spill] sm:$0xff]  ;;  %v14425_v1 = vld [vmem:[#allocation145_spill] sm:$0xff]  ;;  %v10417_v24 = vsel %vm2645_vm2, %v14426_v29, %v6392_v57  ;;  %5710 = vmatprep.subr.bf16.mxu1 %v7869_v42  ;;  %v14430_v2 = vld [vmem:[#allocation42_spill] sm:$0xff]  ;;  %v10430_v29 = vpop.permute.xlu1 %6755 }
 0x244   : > { %14423 = vst [vmem:[#allocation60_spill] sm:$0xff] %v10409_v58  ;;  %v6418_v48 = vunpack.i.h.bf16 %v14424_v17  ;;  %v6417_v46 = vunpack.i.l.bf16 %v14424_v17  ;;  %7035 = vrot.lane.b32.xlu1 %v14425_v1, %s8095_s10  ;;  %14427 = vst [vmem:[#allocation141_spill] sm:$0xff] %v10417_v24  ;;  %v14428_v19 = vld [vmem:[#allocation81_spill] sm:$0xff]  ;;  %v14429_v32 = vld [vmem:[#allocation84_spill] sm:$0xff]  ;;  %v10425_v20 = vsel %vm2645_vm2, %v14430_v2, %v6393_v26  ;;  %5711 = vmatpush3.bf16.msra.mxu1 %v7869_v42  ;;  %v10451_v42 = vpop.permute.xlu0 %6750 }
 0x245   : > { %v6413_v15 = vunpack.i.h.bf16 %v14428_v19  ;;  %v6412_v6 = vunpack.i.l.bf16 %v14428_v19  ;;  %7030 = vrot.lane.b32.xlu0 %v14429_v32, %s8095_s10  ;;  %14431 = vst [vmem:[#allocation24_spill] sm:$0xff] %v10425_v20  ;;  %v14432_v17 = vld [vmem:[#allocation82_spill] sm:$0xff]  ;;  %v14433_v56 = vld [vmem:[#allocation83_spill] sm:$0xff]  ;;  %14434 = vst [vmem:[#allocation61_spill] sm:$0xff] %v10430_v29 }
 0x246   : > { %v6428_v58 = vunpack.i.h.bf16 %v14432_v17  ;;  %v6427_v1 = vunpack.i.l.bf16 %v14432_v17  ;;  %v6422_v12 = vunpack.i.l.bf16 %v14433_v56  ;;  %v7870_v57 = vld [vmem:[%s13676_s3] sm:$0xff]   ;;  %v14435_v19 = vld [vmem:[#allocation118_spill] sm:$0xff]  ;;  %v14437_v2 = vld [vmem:[#allocation44_spill] sm:$0xff]  ;;  %14439 = vst [vmem:[#allocation62_spill] sm:$0xff] %v10451_v42 }
 0x247   : > { %v10437_v32 = vsel %vm2645_vm2, %v14435_v19, %v6407_v30  ;;  %v14436_v24 = vld [vmem:[#allocation43_spill] sm:$0xff]  ;;  %v10445_v17 = vsel %vm2645_vm2, %v14437_v2, %v6402_v55  ;;  %v14438_v20 = vld [vmem:[#allocation117_spill] sm:$0xff]  ;;  %v14440_v30 = vld [vmem:[#allocation46_spill] sm:$0xff]  ;;  %v6423_v55 = vunpack.i.h.bf16 %v14433_v56  ;;  %5748 = vmatprep.subr.bf16.mxu0 %v7870_v57 }
 0x248   : > { %v10441_v26 = vsel %vm2645_vm2, %v14436_v24, %v6408_v34  ;;  %v10449_v29 = vsel %vm2645_vm2, %v14438_v20, %v6403_v54  ;;  %v7871_v60 = vld [vmem:[%s13676_s3 + $0x1c] sm:$0xff]   ;;  %v10458_v19 = vsel %vm2645_vm2, %v14440_v30, %v6417_v46  ;;  %v10469_v54 = vsel %vm2645_vm2, %v10059_v43, %v6412_v6  ;;  %v14443_v46 = vld [vmem:[#allocation144_spill] sm:$0xff]  ;;  %v10489_v6 = vpop.permute.xlu1 %6765  ;;  %5749 = vmatpush3.bf16.msra.mxu0 %v7870_v57 }
 0x249   : > { %v14441_v34 = vld [vmem:[#allocation119_spill] sm:$0xff]  ;;  %v14442_v2 = vld [vmem:[#allocation146_spill] sm:$0xff]  ;;  %v10473_v20 = vsel %vm2645_vm2, %v10063_v11, %v6413_v15  ;;  %7040 = vrot.lane.b32.xlu0 %v14443_v46, %s8095_s10  ;;  %5712 = vmatprep.subr.bf16.mxu1 %v7871_v60  ;;  %v10483_v56 = vsel %vm2645_vm2, %v10075_v35, %v6428_v58  ;;  %v10487_v43 = vsel %vm2645_vm2, %v10079_v37, %v6422_v12  ;;  %v14448_v11 = vld [vmem:[#allocation85_spill] sm:$0xff] }
 0x24a   : > { %v10462_v24 = vsel %vm2645_vm2, %v14441_v34, %v6418_v48  ;;  %7045 = vrot.lane.b32.xlu1 %v14442_v2, %s8095_s10  ;;  %v10479_v48 = vsel %vm2645_vm2, %v10071_v0, %v6427_v1  ;;  %14445 = vst [vmem:[#allocation64_spill] sm:$0xff] %v10483_v56  ;;  %14446 = vst [vmem:[#allocation65_spill] sm:$0xff] %v10487_v43  ;;  %5713 = vmatpush3.bf16.msra.mxu1 %v7871_v60  ;;  %v6438_v15 = vunpack.i.h.bf16 %v14448_v11  ;;  %v14449_v34 = vld [vmem:[#allocation86_spill] sm:$0xff]  ;;  %v10495_v2 = vpop.permute.xlu0 %6760  ;;  %v7872_v35 = vld [vmem:[%s13676_s3 + $0x8] sm:$0xff]  }
 0x24b   : > { %14444 = vst [vmem:[#allocation63_spill] sm:$0xff] %v10479_v48  ;;  %14447 = vst [vmem:[#allocation66_spill] sm:$0xff] %v10489_v6  ;;  %v6437_v30 = vunpack.i.l.bf16 %v14448_v11  ;;  %v6433_v0 = vunpack.i.h.bf16 %v14449_v34  ;;  %v6432_v1 = vunpack.i.l.bf16 %v14449_v34  ;;  %v10502_v37 = vsel %vm2645_vm2, %v10086_v25, %v6423_v55  ;;  %v14452_v12 = vld [vmem:[#allocation87_spill] sm:$0xff]  ;;  %v14453_v46 = vld [vmem:[#allocation32_spill] sm:$0xff]  ;;  %5750 = vmatprep.subr.bf16.mxu0 %v7872_v35 }
 0x24c   : > { %14450 = vst [vmem:[#allocation67_spill] sm:$0xff] %v10495_v2  ;;  %14451 = vst [vmem:[#allocation68_spill] sm:$0xff] %v10502_v37  ;;  %v6448_v60 = vunpack.i.h.bf16 %v14452_v12  ;;  %v6447_v58 = vunpack.i.l.bf16 %v14452_v12  ;;  %v7873_v11 = vld [vmem:[%s13676_s3 + $0x24] ss:$0 sps:$4 sm:$0x33]   ;;  %v14454_v34 = vld [vmem:[#allocation88_spill] sm:$0xff]  ;;  %5751 = vmatpush3.bf16.msra.mxu0 %v7872_v35 }
 0x24d   : > { %v6443_v2 = vunpack.i.h.bf16 %v14454_v34  ;;  %v6442_v6 = vunpack.i.l.bf16 %v14454_v34  ;;  %v14455_v42 = vld [vmem:[#allocation28_spill] sm:$0xff]  ;;  %v14456_v25 = vld [vmem:[#allocation89_spill] sm:$0xff]  ;;  %v14457_v37 = vld [vmem:[#allocation90_spill] sm:$0xff]  ;;  %5894 = vmatprep.subr.msk.bf16.mxu1 %vm3335_vm4, %v7873_v11  ;;  %v3337_v56 = vsel %vm3335_vm4, %v7873_v11, 0  ;;  %v10524_v34 = vsel %vm2710_vm3, %v10090_v28, %v6437_v30 }
 0x24e   : > { %7055 = vrot.lane.b32.xlu1 %v14453_v46, %s8095_s10  ;;  %7050 = vrot.lane.b32.xlu0 %v14455_v42, %s8095_s10  ;;  %v6458_v55 = vunpack.i.h.bf16 %v14456_v25  ;;  %v6457_v12 = vunpack.i.l.bf16 %v14456_v25  ;;  %v6452_v43 = vunpack.i.l.bf16 %v14457_v37  ;;  %v10518_v46 = vpop.permute.xlu1 %6775  ;;  %v10528_v42 = vsel %vm2710_vm3, %v10096_v41, %v6438_v15  ;;  %v10538_v48 = vpop.permute.xlu0 %6770  ;;  %v7874_v28 = vld [vmem:[%s13676_s3 + $0x10] ss:$0 sps:$4 sm:$0x33]   ;;  %v14460_v15 = vld [vmem:[#allocation91_spill] sm:$0xff] }
 0x24f   : > { %14458 = vst [vmem:[#allocation69_spill] sm:$0xff] %v10518_v46  ;;  %v10532_v25 = vsel %vm2710_vm3, %v10100_v18, %v6432_v1  ;;  %v10536_v46 = vsel %vm2710_vm3, %v10104_v44, %v6433_v0  ;;  %14459 = vst [vmem:[#allocation39_spill] sm:$0xff] %v10538_v48  ;;  %5715 = vmatpush3.bf16.msra.mxu1 %v3337_v56  ;;  %v10545_v30 = vsel %vm2710_vm3, %v10111_v10, %v6447_v58  ;;  %v14461_v1 = vld [vmem:[#allocation147_spill] sm:$0xff] }
 0x250   : > { %v6453_v41 = vunpack.i.h.bf16 %v14457_v37  ;;  %v6467_v18 = vunpack.i.l.bf16 %v14460_v15  ;;  %5824 = vmatprep.subr.bf16.mxu1 %v7870_v57  ;;  %v10553_v44 = vsel %vm2710_vm3, %v10115_v40, %v6448_v60  ;;  %v10557_v56 = vsel %vm2710_vm3, %v10123_v38, %v6442_v6  ;;  %v14462_v10 = vld [vmem:[#allocation31_spill] sm:$0xff]  ;;  %5895 = vmatprep.subr.msk.bf16.mxu0 %vm3335_vm4, %v7874_v28  ;;  %v14465_v60 = vld [vmem:[#allocation92_spill] sm:$0xff] }
 0x251   : > { %v6468_v0 = vunpack.i.h.bf16 %v14460_v15  ;;  %v14463_v35 = vld [vmem:[#allocation123_spill] sm:$0xff]  ;;  %v10569_v57 = vsel %vm2710_vm3, %v10148_v33, %v6457_v12  ;;  %v10573_v40 = vsel %vm2710_vm3, %v10152_v9, %v6458_v55  ;;  %v10577_v38 = vsel %vm2710_vm3, %v10160_v14, %v6452_v43  ;;  %v14468_v43 = vld [vmem:[#allocation94_spill] sm:$0xff] }
 0x252   : > { %7065 = vrot.lane.b32.xlu1 %v14461_v1, %s8095_s10  ;;  %7060 = vrot.lane.b32.xlu0 %v14462_v10, %s8095_s10  ;;  %v10565_v37 = vsel %vm2710_vm3, %v14463_v35, %v6443_v2  ;;  %v10579_v6 = vpop.permute.xlu1 %6785  ;;  %v6463_v58 = vunpack.i.h.bf16 %v14465_v60  ;;  %v6462_v11 = vunpack.i.l.bf16 %v14465_v60  ;;  %v14466_v2 = vld [vmem:[#allocation93_spill] sm:$0xff]  ;;  %v10585_v33 = vpop.permute.xlu0 %6780  ;;  %v10589_v9 = vsel %vm2710_vm3, %v10164_v51, %v6453_v41  ;;  %v14469_v12 = vld [vmem:[#allocation106_spill] sm:$0xff] }
 0x253   : > { %14464 = vst [vmem:[#allocation112_spill] sm:$0xff] %v10579_v6  ;;  %v6478_v15 = vunpack.i.h.bf16 %v14466_v2  ;;  %v6477_v10 = vunpack.i.l.bf16 %v14466_v2  ;;  %14467 = vst [vmem:[#allocation70_spill] sm:$0xff] %v10585_v33  ;;  %v10593_v14 = vsel %vm2710_vm3, %v10168_v53, %v6467_v18  ;;  %v6472_v55 = vunpack.i.l.bf16 %v14468_v43  ;;  %v14470_v2 = vld [vmem:[#allocation148_spill] sm:$0xff]  ;;  %v14472_v53 = vld [vmem:[#allocation95_spill] sm:$0xff] }
 0x254   : > { %v10600_v35 = vsel %vm2710_vm3, %v10175_v7, %v6468_v0  ;;  %v6473_v60 = vunpack.i.h.bf16 %v14468_v43  ;;  %v10606_v51 = vsel %vm3335_vm4, %v7874_v28, 0  ;;  %v6488_v41 = vunpack.i.h.bf16 %v14472_v53  ;;  %v14473_v33 = vld [vmem:[#allocation96_spill] sm:$0xff]  ;;  %v14480_v1 = vld [vmem:[#allocation21_spill] sm:$0xff] }
 0x255   : > { %14471 = vst [vmem:[#allocation71_spill] sm:$0xff] %v10606_v51  ;;  %v6487_v18 = vunpack.i.l.bf16 %v14472_v53  ;;  %v6483_v6 = vunpack.i.h.bf16 %v14473_v33  ;;  %5753 = vmatpush3.bf16.msra.mxu0 %v10606_v51  ;;  %v10617_v7 = vsel %vm2710_vm3, %v10179_v47, %v6462_v11  ;;  %v10621_v28 = vsel %vm2710_vm3, %v10188_v52, %v6463_v58  ;;  %v14476_v47 = vld [vmem:[#allocation97_spill] sm:$0xff]  ;;  %v14477_v52 = vld [vmem:[#allocation4_spill] sm:$0xff] }
 0x256   : > { %7075 = vrot.lane.b32.xlu1 %v14469_v12, %s8096_s30  ;;  %7070 = vrot.lane.b32.xlu0 %v14470_v2, %s8096_s30  ;;  %v6482_v12 = vunpack.i.l.bf16 %v14473_v33  ;;  %v10612_v48 = vpop.permute.xlu1 %6795  ;;  %v10625_v0 = vsel %vm2710_vm3, %v10192_v62, %v6477_v10  ;;  %v10629_v43 = vsel %vm2710_vm3, %v10196_v5, %v6478_v15  ;;  %v10631_v33 = vpop.permute.xlu0 %6790  ;;  %v10635_v2 = vsel %vm2710_vm3, %v10201_v31, %v6472_v55  ;;  %v7954_v58 = vld [vmem:[#allocation2 + $0x288] sm:$0xff]  ;;  %v7955_v62 = vld [vmem:[#allocation2 + $0x290] sm:$0xff]  ;;  %v14478_v15 = vld [vmem:[#allocation98_spill] sm:$0xff] }
 0x257   : > { %14474 = vst [vmem:[#allocation72_spill] sm:$0xff] %v10612_v48  ;;  %14475 = vst [vmem:[#allocation107_spill] sm:$0xff] %v10631_v33  ;;  %v6498_v11 = vunpack.i.h.bf16 %v14476_v47  ;;  %v6497_v53 = vunpack.i.l.bf16 %v14476_v47  ;;  %v7094_v10 = vpack.i.bf16 %v7955_v62, %v7954_v58  ;;  %v10643_v5 = vsel %vm2710_vm3, %v10205_v4, %v6473_v60  ;;  %v14479_v31 = vld [vmem:[#allocation37_spill] sm:$0xff]  ;;  %v7957_v48 = vld [vmem:[#allocation2 + $0x278] sm:$0xff] }
 0x258   : > { %v6493_v51 = vunpack.i.h.bf16 %v14478_v15  ;;  %v6492_v33 = vunpack.i.l.bf16 %v14478_v15  ;;  %v7956_v55 = vld [vmem:[#allocation2 + $0x270] sm:$0xff]  ;;  %v10655_v58 = vsel %vm2710_vm3, %v14480_v1, %v6488_v41  ;;  %v10659_v4 = vsel %vm2710_vm3, %v10238_v63, %v6482_v12  ;;  %v14482_v15 = vld [vmem:[#allocation99_spill] sm:$0xff] }
 0x259   : > { %v7089_v47 = vpack.i.bf16 %v7957_v48, %v7956_v55  ;;  %v10663_v60 = vsel %vm2710_vm3, %v10247_v45, %v6483_v6  ;;  %v6508_v48 = vunpack.i.h.bf16 %v14482_v15  ;;  %v10675_v63 = vsel %vm2710_vm3, %v10251_v36, %v6497_v53  ;;  %v7958_v6 = vld [vmem:[#allocation2 + $0x2b8] sm:$0xff]  ;;  %v7959_v41 = vld [vmem:[#allocation2 + $0x2c0] sm:$0xff] }
 0x25a   : > { %7085 = vrot.lane.b32.xlu1 %v14477_v52, %s8096_s30  ;;  %7080 = vrot.lane.b32.xlu0 %v14479_v31, %s8096_s30  ;;  %v10651_v52 = vsel %vm2710_vm3, %v10213_v27, %v6487_v18  ;;  %v10665_v62 = vpop.permute.xlu1 %6805  ;;  %v6507_v31 = vunpack.i.l.bf16 %v14482_v15  ;;  %v14483_v27 = vld [vmem:[#allocation100_spill] sm:$0xff]  ;;  %v10671_v1 = vpop.permute.xlu0 %6800  ;;  %14485 = vst [vmem:[#allocation8_spill] sm:$0xff] %v10675_v63  ;;  %v10679_v45 = vsel %vm2710_vm3, %v10255_v50, %v6498_v11  ;;  %v14490_v50 = vld [vmem:[#allocation102_spill] sm:$0xff] }
 0x25b   : > { %14481 = vst [vmem:[#allocation73_spill] sm:$0xff] %v10665_v62  ;;  %v6503_v18 = vunpack.i.h.bf16 %v14483_v27  ;;  %v6502_v55 = vunpack.i.l.bf16 %v14483_v27  ;;  %14484 = vst [vmem:[#allocation74_spill] sm:$0xff] %v10671_v1  ;;  %v7104_v12 = vpack.i.bf16 %v7959_v41, %v7958_v6  ;;  %v10684_v15 = vsel %vm2710_vm3, %v10259_v61, %v6492_v33  ;;  %v14489_v1 = vld [vmem:[#allocation101_spill] sm:$0xff]  ;;  %v7960_v6 = vld [vmem:[#allocation2 + $0x318] sm:$0xff] }
 0x25c   : > { %14486 = vst [vmem:[#allocation75_spill] sm:$0xff] %v10679_v45  ;;  %14487 = vst [vmem:[#allocation76_spill] sm:$0xff] %v10684_v15  ;;  %v10688_v27 = vsel %vm2710_vm3, %v10265_v59, %v6493_v51  ;;  %v6518_v36 = vunpack.i.h.bf16 %v14489_v1  ;;  %v6517_v53 = vunpack.i.l.bf16 %v14489_v1  ;;  %v6513_v11 = vunpack.i.h.bf16 %v14490_v50  ;;  %v7961_v41 = vld [vmem:[#allocation2 + $0x320] sm:$0xff]  ;;  %v7963_v15 = vld [vmem:[#allocation2 + $0x308] sm:$0xff] }
 0x25d   : > { %14488 = vst [vmem:[#allocation40_spill] sm:$0xff] %v10688_v27  ;;  %v7114_v61 = vpack.i.bf16 %v7961_v41, %v7960_v6  ;;  %v7962_v33 = vld [vmem:[#allocation2 + $0x300] sm:$0xff]  ;;  %v10699_v59 = vsel %vm2710_vm3, %v10269_v8, %v6507_v31  ;;  %v10703_v51 = vsel %vm2710_vm3, %v10278_v13, %v6508_v48  ;;  %v14500_v8 = vld [vmem:[#allocation104_spill] sm:$0xff]  ;;  %v14508_v27 = vld [vmem:[#allocation130_spill] sm:$0xff] }
 0x25e   : > { %7095 = vrot.lane.b32.xlu1 %v7094_v10, %s8096_s30  ;;  %7090 = vrot.lane.b32.xlu0 %v7089_v47, %s8096_s30  ;;  %v6512_v10 = vunpack.i.l.bf16 %v14490_v50  ;;  %v10695_v62 = vpop.permute.xlu1 %6815  ;;  %v7109_v45 = vpack.i.bf16 %v7963_v15, %v7962_v33  ;;  %14492 = vst [vmem:[#allocation108_spill] sm:$0xff] %v10699_v59  ;;  %14493 = vst [vmem:[#allocation41_spill] sm:$0xff] %v10703_v51  ;;  %v14494_v47 = vld [vmem:[#allocation49_spill] sm:$0xff]  ;;  %v14496_v50 = vld [vmem:[#allocation50_spill] sm:$0xff]  ;;  %v10713_v6 = vpop.permute.xlu0 %6810  ;;  %v6523_v31 = vunpack.i.h.bf16 %v14500_v8  ;;  %v6522_v59 = vunpack.i.l.bf16 %v14500_v8 }
 0x25f   : > { %14491 = vst [vmem:[#allocation109_spill] sm:$0xff] %v10695_v62  ;;  %v10707_v1 = vsel %vm2710_vm3, %v14494_v47, %v6502_v55  ;;  %v10711_v62 = vsel %vm2710_vm3, %v14496_v50, %v6503_v18  ;;  %14498 = vst [vmem:[#allocation111_spill] sm:$0xff] %v10713_v6  ;;  %v14499_v41 = vld [vmem:[#allocation103_spill] sm:$0xff]  ;;  %v14501_v13 = vld [vmem:[#allocation136_spill] sm:$0xff] }
 0x260   : > { %14495 = vst [vmem:[#allocation5_spill] sm:$0xff] %v10707_v1  ;;  %14497 = vst [vmem:[#allocation124_spill] sm:$0xff] %v10711_v62  ;;  %v6528_v15 = vunpack.i.h.bf16 %v14499_v41  ;;  %v6527_v33 = vunpack.i.l.bf16 %v14499_v41  ;;  %v10722_v48 = vsel %vm2710_vm3, %v14501_v13, %v6517_v53  ;;  %v14503_v55 = vld [vmem:[#allocation52_spill] sm:$0xff]  ;;  %v14505_v47 = vld [vmem:[#allocation13_spill] sm:$0xff]  ;;  %v10736_v53 = vsel %vm2710_vm3, %v14508_v27, %v6513_v11 }
 0x261   : > { %14502 = vst [vmem:[#allocation114_spill] sm:$0xff] %v10722_v48  ;;  %v10726_v18 = vsel %vm2710_vm3, %v14503_v55, %v6518_v36  ;;  %v7964_v50 = vld [vmem:[#allocation2 + $0x348] sm:$0xff]  ;;  %v7965_v6 = vld [vmem:[#allocation2 + $0x350] sm:$0xff]  ;;  %v7967_v1 = vld [vmem:[#allocation2 + $0x338] sm:$0xff] }
 0x262   : > { %7105 = vrot.lane.b32.xlu1 %v7104_v12, %s8096_s30  ;;  %14504 = vst [vmem:[#allocation77_spill] sm:$0xff] %v10726_v18  ;;  %7100 = vrot.lane.b32.xlu0 %v14505_v47, %s8096_s30  ;;  %v7124_v41 = vpack.i.bf16 %v7965_v6, %v7964_v50  ;;  %v7966_v62 = vld [vmem:[#allocation2 + $0x330] sm:$0xff]  ;;  %v14506_v8 = vld [vmem:[#allocation138_spill] sm:$0xff]  ;;  %v10740_v18 = vpop.permute.xlu1 %6825  ;;  %v14511_v47 = vld [vmem:[#allocation7_spill] sm:$0xff]  ;;  %v10744_v50 = vpop.permute.xlu0 %6820 }
 0x263   : > { %v7119_v51 = vpack.i.bf16 %v7967_v1, %v7966_v62  ;;  %v10732_v12 = vsel %vm2710_vm3, %v14506_v8, %v6512_v10  ;;  %v14509_v13 = vld [vmem:[#allocation6_spill] sm:$0xff]  ;;  %14510 = vst [vmem:[#allocation79_spill] sm:$0xff] %v10740_v18  ;;  %v6533_v48 = vunpack.i.h.bf16 %v14511_v47  ;;  %v6532_v6 = vunpack.i.l.bf16 %v14511_v47  ;;  %14512 = vst [vmem:[#allocation116_spill] sm:$0xff] %v10744_v50  ;;  %v7969_v1 = vld [vmem:[#allocation2 + $0x380] sm:$0xff] }
 0x264   : > { %14507 = vst [vmem:[#allocation78_spill] sm:$0xff] %v10732_v12  ;;  %v6538_v36 = vunpack.i.h.bf16 %v14509_v13  ;;  %v6537_v55 = vunpack.i.l.bf16 %v14509_v13  ;;  %v7968_v62 = vld [vmem:[#allocation2 + $0x378] sm:$0xff]  ;;  %v7970_v8 = vld [vmem:[#allocation2 + $0x360] sm:$0xff]  ;;  %v7971_v12 = vld [vmem:[#allocation2 + $0x368] sm:$0xff]  ;;  %v10752_v13 = vsel %vm2710_vm3, %v10341_v39, %v6528_v15  ;;  %v10756_v18 = vsel %vm2710_vm3, %v10345_v22, %v6522_v59 }
 0x265   : > { %v7134_v10 = vpack.i.bf16 %v7969_v1, %v7968_v62  ;;  %v7129_v63 = vpack.i.bf16 %v7971_v12, %v7970_v8  ;;  %v14513_v27 = vld [vmem:[#allocation142_spill] sm:$0xff]  ;;  %v10760_v47 = vsel %vm2710_vm3, %v10349_v3, %v6523_v31  ;;  %v14514_v62 = vld [vmem:[#allocation9_spill] sm:$0xff]  ;;  %v10780_v31 = vsel %vm2710_vm3, %v10363_v16, %v6532_v6  ;;  %v14522_v6 = vld [vmem:[#allocation135_spill] sm:$0xff] }
 0x266   : > { %v10748_v11 = vsel %vm2710_vm3, %v14513_v27, %v6527_v33  ;;  %7115 = vrot.lane.b32.xlu1 %v7114_v61, %s8096_s30  ;;  %v6548_v12 = vunpack.i.h.bf16 %v14514_v62  ;;  %v6547_v1 = vunpack.i.l.bf16 %v14514_v62  ;;  %v14515_v33 = vld [vmem:[#allocation12_spill] sm:$0xff]  ;;  %7110 = vrot.lane.b32.xlu0 %v7109_v45, %s8096_s30  ;;  %v10770_v39 = vsel %vm2710_vm3, %v10353_v49, %v6537_v55  ;;  %v10776_v3 = vpop.permute.xlu1 %6835  ;;  %v7973_v59 = vld [vmem:[#allocation2 + $0x3b0] sm:$0xff]  ;;  %v14517_v62 = vld [vmem:[#allocation15_spill] sm:$0xff] }
 0x267   : > { %v6543_v8 = vunpack.i.h.bf16 %v14515_v33  ;;  %v6542_v27 = vunpack.i.l.bf16 %v14515_v33  ;;  %v10774_v22 = vsel %vm2710_vm3, %v10359_v21, %v6538_v36  ;;  %14516 = vst [vmem:[#allocation80_spill] sm:$0xff] %v10776_v3  ;;  %v7972_v61 = vld [vmem:[#allocation2 + $0x3a8] sm:$0xff]  ;;  %v10784_v45 = vsel %vm2710_vm3, %v10370_v23, %v6533_v48  ;;  %v10788_v33 = vpop.permute.xlu0 %6830 }
 0x268   : > { %v7144_v15 = vpack.i.bf16 %v7973_v59, %v7972_v61  ;;  %v6558_v49 = vunpack.i.h.bf16 %v14517_v62  ;;  %v6557_v55 = vunpack.i.l.bf16 %v14517_v62  ;;  %14518 = vst [vmem:[#allocation145_spill] sm:$0xff] %v10788_v33  ;;  %v14519_v21 = vld [vmem:[#allocation16_spill] sm:$0xff]  ;;  %v14520_v61 = vld [vmem:[#allocation137_spill] sm:$0xff]  ;;  %v10799_v23 = vsel %vm2710_vm3, %v14522_v6, %v6548_v12  ;;  %v14531_v12 = vld [vmem:[#allocation58_spill] sm:$0xff] }
 0x269   : > { %v6553_v36 = vunpack.i.h.bf16 %v14519_v21  ;;  %v6552_v3 = vunpack.i.l.bf16 %v14519_v21  ;;  %v10795_v16 = vsel %vm2710_vm3, %v14520_v61, %v6547_v1  ;;  %14523 = vst [vmem:[#allocation81_spill] sm:$0xff] %v10799_v23  ;;  %v14524_v48 = vld [vmem:[#allocation56_spill] sm:$0xff]  ;;  %v14526_v62 = vld [vmem:[#allocation57_spill] sm:$0xff]  ;;  %v14528_v21 = vld [vmem:[#allocation18_spill] sm:$0xff] }
 0x26a   : > { %7125 = vrot.lane.b32.xlu1 %v7124_v41, %s8096_s30  ;;  %14521 = vst [vmem:[#allocation3_spill] sm:$0xff] %v10795_v16  ;;  %v10803_v59 = vsel %vm2710_vm3, %v14524_v48, %v6542_v27  ;;  %v10807_v33 = vsel %vm2710_vm3, %v14526_v62, %v6543_v8  ;;  %7120 = vrot.lane.b32.xlu0 %v7119_v51, %s8096_s30  ;;  %v6568_v41 = vunpack.i.h.bf16 %v14528_v21  ;;  %v6567_v50 = vunpack.i.l.bf16 %v14528_v21  ;;  %v14529_v1 = vld [vmem:[#allocation19_spill] sm:$0xff]  ;;  %v10813_v16 = vpop.permute.xlu1 %6845  ;;  %v14532_v27 = vld [vmem:[#allocation60_spill] sm:$0xff]  ;;  %v14534_v62 = vld [vmem:[#allocation141_spill] sm:$0xff] }
 0x26b   : > { %14525 = vst [vmem:[#allocation84_spill] sm:$0xff] %v10803_v59  ;;  %14527 = vst [vmem:[#allocation42_spill] sm:$0xff] %v10807_v33  ;;  %v6562_v61 = vunpack.i.l.bf16 %v14529_v1  ;;  %v10817_v6 = vsel %vm2710_vm3, %v14531_v12, %v6557_v55  ;;  %v10821_v48 = vsel %vm2710_vm3, %v14532_v27, %v6558_v49  ;;  %v6563_v8 = vunpack.i.h.bf16 %v14529_v1  ;;  %v10824_v51 = vpop.permute.xlu0 %6840  ;;  %v14535_v33 = vld [vmem:[#allocation24_spill] sm:$0xff]  ;;  %v14538_v49 = vld [vmem:[#allocation23_spill] sm:$0xff] }
 0x26c   : > { %14530 = vst [vmem:[#allocation82_spill] sm:$0xff] %v10813_v16  ;;  %14533 = vst [vmem:[#allocation83_spill] sm:$0xff] %v10824_v51  ;;  %v10828_v21 = vsel %vm2710_vm3, %v14534_v62, %v6552_v3  ;;  %v10832_v59 = vsel %vm2710_vm3, %v14535_v33, %v6553_v36  ;;  %v14537_v16 = vld [vmem:[#allocation22_spill] sm:$0xff]  ;;  %v6573_v12 = vunpack.i.h.bf16 %v14538_v49  ;;  %v6572_v1 = vunpack.i.l.bf16 %v14538_v49 }
 0x26d   : > { %14536 = vst [vmem:[#allocation118_spill] sm:$0xff] %v10832_v59  ;;  %v6578_v23 = vunpack.i.h.bf16 %v14537_v16  ;;  %v6577_v55 = vunpack.i.l.bf16 %v14537_v16  ;;  %v10842_v3 = vsel %vm2710_vm3, %v10437_v32, %v6567_v50  ;;  %v10846_v33 = vsel %vm2710_vm3, %v10441_v26, %v6568_v41  ;;  %v14542_v16 = vld [vmem:[#allocation143_spill] sm:$0xff]  ;;  %v14545_v32 = vld [vmem:[#allocation25_spill] sm:$0xff] }
 0x26e   : > { %7135 = vrot.lane.b32.xlu1 %v7134_v10, %s8096_s30  ;;  %7130 = vrot.lane.b32.xlu0 %v7129_v63, %s8096_s30  ;;  %14539 = vst [vmem:[#allocation43_spill] sm:$0xff] %v10842_v3  ;;  %14540 = vst [vmem:[#allocation44_spill] sm:$0xff] %v10846_v33  ;;  %v10850_v36 = vsel %vm2710_vm3, %v10445_v17, %v6562_v61  ;;  %v6587_v10 = vunpack.i.l.bf16 %v14542_v16  ;;  %v10853_v27 = vpop.permute.xlu1 %6855  ;;  %v10857_v62 = vsel %vm2710_vm3, %v10449_v29, %v6563_v8  ;;  %v10873_v29 = vld [vmem:[#allocation2 + $0x498] sm:$0xff]  ;;  %v10875_v61 = vld [vmem:[#allocation2 + $0x4a0] sm:$0xff] }
 0x26f   : > { %14541 = vst [vmem:[#allocation117_spill] sm:$0xff] %v10850_v36  ;;  %14543 = vst [vmem:[#allocation46_spill] sm:$0xff] %v10853_v27  ;;  %v6588_v63 = vunpack.i.h.bf16 %v14542_v16  ;;  %v6583_v50 = vunpack.i.h.bf16 %v14545_v32  ;;  %v6582_v49 = vunpack.i.l.bf16 %v14545_v32  ;;  %v10862_v26 = vpop.permute.xlu0 %6850  ;;  %v10866_v17 = vsel %vm2710_vm3, %v10458_v19, %v6577_v55  ;;  %v14551_v55 = vld [vmem:[#allocation26_spill] sm:$0xff]  ;;  %v14553_v32 = vld [vmem:[#allocation63_spill] sm:$0xff] }
 0x270   : > { %14544 = vst [vmem:[#allocation119_spill] sm:$0xff] %v10857_v62  ;;  %14546 = vst [vmem:[#allocation146_spill] sm:$0xff] %v10862_v26  ;;  %v10870_v41 = vsel %vm2710_vm3, %v10462_v24, %v6578_v23  ;;  %v10881_v16 = vsel %vm2710_vm3, %v10469_v54, %v6572_v1  ;;  %v10885_v19 = vsel %vm2710_vm3, %v10473_v20, %v6573_v12  ;;  %v6598_v24 = vunpack.i.h.bf16 %v14551_v55  ;;  %v14555_v8 = vld [vmem:[#allocation27_spill] sm:$0xff]  ;;  %v10898_v54 = vld [vmem:[#allocation2 + $0x4f8] sm:$0xff] }
 0x271   : > { %14547 = vst [vmem:[#allocation144_spill] sm:$0xff] %v10866_v17  ;;  %14548 = vst [vmem:[#allocation85_spill] sm:$0xff] %v10870_v41  ;;  %v6597_v23 = vunpack.i.l.bf16 %v14551_v55  ;;  %v10893_v26 = vsel %vm2710_vm3, %v14553_v32, %v6587_v10  ;;  %v6592_v27 = vunpack.i.l.bf16 %v14555_v8  ;;  %v10900_v1 = vld [vmem:[#allocation2 + $0x500] sm:$0xff]  ;;  %v10906_v55 = vld [vmem:[#allocation2 + $0x4e8] sm:$0xff]  ;;  %v6593_v20 = vunpack.i.h.bf16 %v14555_v8 }
 0x272   : > { %7145 = vrot.lane.b32.xlu1 %v7144_v15, %s8096_s30  ;;  %14549 = vst [vmem:[#allocation86_spill] sm:$0xff] %v10881_v16  ;;  %14550 = vst [vmem:[#allocation87_spill] sm:$0xff] %v10885_v19  ;;  %v14552_v15 = vld [vmem:[#allocation129_spill] sm:$0xff]  ;;  %v10896_v51 = vpop.permute.xlu1 %6865  ;;  %v10904_v12 = vld [vmem:[#allocation2 + $0x4e0] sm:$0xff]  ;;  %v10942_v8 = vsel %vm2775_vm5, %v10528_v42, %v6598_v24 }
 0x273   : > { %7140 = vrot.lane.b32.xlu0 %v14552_v15, %s8096_s30  ;;  %14554 = vst [vmem:[#allocation32_spill] sm:$0xff] %v10893_v26  ;;  %14556 = vst [vmem:[#allocation88_spill] sm:$0xff] %v10896_v51  ;;  %v14557_v10 = vld [vmem:[#allocation64_spill] sm:$0xff]  ;;  %v14559_v26 = vld [vmem:[#allocation65_spill] sm:$0xff]  ;;  %v10923_v41 = vpop.permute.xlu0 %6860 }
 0x274   : > { %v10912_v32 = vsel %vm2710_vm3, %v14557_v10, %v6588_v63  ;;  %v10916_v51 = vsel %vm2710_vm3, %v14559_v26, %v6582_v49  ;;  %v14561_v19 = vld [vmem:[#allocation68_spill] sm:$0xff]  ;;  %14563 = vst [vmem:[#allocation91_spill] sm:$0xff] %v10923_v41  ;;  %v14564_v17 = vld [vmem:[#allocation29_spill] sm:$0xff]  ;;  %v14565_v36 = vld [vmem:[#allocation30_spill] sm:$0xff]  ;;  %v10938_v26 = vsel %vm2775_vm5, %v10524_v34, %v6597_v23  ;;  %v10955_v34 = vsel %vm2775_vm5, %v10532_v25, %v6592_v27 }
 0x275   : > { %14558 = vst [vmem:[#allocation28_spill] sm:$0xff] %v10912_v32  ;;  %14560 = vst [vmem:[#allocation89_spill] sm:$0xff] %v10916_v51  ;;  %v10920_v16 = vsel %vm2710_vm3, %v14561_v19, %v6583_v50  ;;  %v6608_v62 = vunpack.i.h.bf16 %v14564_v17  ;;  %v6607_v15 = vunpack.i.l.bf16 %v14564_v17  ;;  %v6602_v33 = vunpack.i.l.bf16 %v14565_v36  ;;  %v14566_v63 = vld [vmem:[#allocation128_spill] sm:$0xff]  ;;  %v10932_v49 = vld [vmem:[#allocation2 + $0x530] sm:$0xff] }
 0x276   : > { %14562 = vst [vmem:[#allocation90_spill] sm:$0xff] %v10920_v16  ;;  %7155 = vrot.lane.b32.xlu1 %v14566_v63, %s8096_s30  ;;  %v10930_v10 = vld [vmem:[#allocation2 + $0x528] sm:$0xff]  ;;  %14567 = vst [vmem:[#allocation31_spill] sm:$0xff] %v10938_v26  ;;  %v6603_v17 = vunpack.i.h.bf16 %v14565_v36  ;;  %v14569_v19 = vld [vmem:[#allocation10_spill] sm:$0xff] }
 0x277   : > { %14568 = vst [vmem:[#allocation123_spill] sm:$0xff] %v10942_v8  ;;  %7150 = vrot.lane.b32.xlu0 %v14569_v19, %s8096_s30  ;;  %v10947_v63 = vld [vmem:[#allocation2 + $0x510] sm:$0xff]  ;;  %v10949_v51 = vld [vmem:[#allocation2 + $0x518] sm:$0xff]  ;;  %14570 = vst [vmem:[#allocation92_spill] sm:$0xff] %v10955_v34  ;;  %v10960_v8 = vpop.permute.xlu1 %6875  ;;  %v10964_v19 = vsel %vm2775_vm5, %v10536_v46, %v6593_v20  ;;  %v10967_v16 = vpop.permute.xlu0 %6870  ;;  %v10995_v27 = vsel %vm2775_vm5, %v10557_v56, %v6602_v33 }
 0x278   : > { %v14571_v23 = vld [vmem:[#allocation33_spill] sm:$0xff]  ;;  %v14572_v24 = vld [vmem:[#allocation34_spill] sm:$0xff]  ;;  %14573 = vst [vmem:[#allocation93_spill] sm:$0xff] %v10960_v8  ;;  %14574 = vst [vmem:[#allocation94_spill] sm:$0xff] %v10964_v19  ;;  %v11004_v59 = vsel %vm2775_vm5, %v10565_v37, %v6603_v17 }
 0x279   : > { %v6618_v41 = vunpack.i.h.bf16 %v14571_v23  ;;  %v6617_v42 = vunpack.i.l.bf16 %v14571_v23  ;;  %v6612_v36 = vunpack.i.l.bf16 %v14572_v24  ;;  %v6613_v26 = vunpack.i.h.bf16 %v14572_v24  ;;  %14575 = vst [vmem:[#allocation106_spill] sm:$0xff] %v10967_v16  ;;  %v10969_v50 = vld [vmem:[#allocation2 + $0x558] sm:$0xff]  ;;  %v10971_v25 = vld [vmem:[#allocation2 + $0x560] sm:$0xff]  ;;  %v10977_v34 = vld [vmem:[#allocation2 + $0x548] sm:$0xff] }
 0x27a   : > { %v10975_v23 = vld [vmem:[#allocation2 + $0x540] sm:$0xff]  ;;  %v10981_v46 = vld [vmem:[#allocation2 + $0x588] sm:$0xff]  ;;  %v10983_v20 = vld [vmem:[#allocation2 + $0x590] sm:$0xff]  ;;  %v10987_v24 = vsel %vm2775_vm5, %v10545_v30, %v6607_v15  ;;  %v10991_v16 = vsel %vm2775_vm5, %v10553_v44, %v6608_v62  ;;  %14578 = vst [vmem:[#allocation96_spill] sm:$0xff] %v10995_v27 }
 0x27b   : > { %14576 = vst [vmem:[#allocation148_spill] sm:$0xff] %v10987_v24  ;;  %14577 = vst [vmem:[#allocation95_spill] sm:$0xff] %v10991_v16  ;;  %v14579_v19 = vld [vmem:[#allocation35_spill] sm:$0xff]  ;;  %v11000_v3 = vld [vmem:[#allocation2 + $0x58] sm:$0xff]  ;;  %v11019_v16 = vsel %vm2775_vm5, %v10569_v57, %v6617_v42  ;;  %v11023_v37 = vsel %vm2775_vm5, %v10573_v40, %v6618_v41  ;;  %v11027_v17 = vsel %vm2775_vm5, %v10577_v38, %v6612_v36  ;;  %v11040_v41 = vpop.permute.xlu0 %6880 }
 0x27c   : > { %v6627_v32 = vunpack.i.l.bf16 %v14579_v19  ;;  %v14580_v8 = vld [vmem:[#allocation51_spill] sm:$0xff]  ;;  %14581 = vst [vmem:[#allocation97_spill] sm:$0xff] %v11004_v59  ;;  %v6628_v30 = vunpack.i.h.bf16 %v14579_v19  ;;  %v14582_v15 = vld [vmem:[#allocation36_spill] sm:$0xff]  ;;  %v11011_v33 = vld [vmem:[#allocation2 + $0x70] sm:$0xff]  ;;  %v11029_v19 = vpop.permute.xlu1 %6885 }
 0x27d   : > { %7165 = vrot.lane.b32.xlu1 %v14580_v8, %s8096_s30  ;;  %v6623_v44 = vunpack.i.h.bf16 %v14582_v15  ;;  %v6622_v62 = vunpack.i.l.bf16 %v14582_v15  ;;  %v14583_v56 = vld [vmem:[#allocation131_spill] sm:$0xff]  ;;  %v11013_v27 = vld [vmem:[#allocation2 + $0x28] sm:$0xff]  ;;  %14584 = vst [vmem:[#allocation4_spill] sm:$0xff] %v11019_v16  ;;  %14585 = vst [vmem:[#allocation98_spill] sm:$0xff] %v11023_v37 }
 0x27e   : > { %7160 = vrot.lane.b32.xlu0 %v14583_v56, %s8096_s30  ;;  %v11015_v8 = vld [vmem:[#allocation2 + $0x40] sm:$0xff]  ;;  %14586 = vst [vmem:[#allocation37_spill] sm:$0xff] %v11027_v17  ;;  %14587 = vst [vmem:[#allocation21_spill] sm:$0xff] %v11029_v19  ;;  %v11035_v56 = vsel %vm2775_vm5, %v10589_v9, %v6613_v26  ;;  %v14589_v59 = vld [vmem:[#allocation38_spill] sm:$0xff]  ;;  %v11048_v36 = vsel %vm2775_vm5, %v10593_v14, %v6627_v32 }
 0x27f   : > { %14588 = vst [vmem:[#allocation99_spill] sm:$0xff] %v11035_v56  ;;  %v6638_v57 = vunpack.i.h.bf16 %v14589_v59  ;;  %v6637_v42 = vunpack.i.l.bf16 %v14589_v59  ;;  %v14590_v16 = vld [vmem:[#allocation110_spill] sm:$0xff]  ;;  %14591 = vst [vmem:[#allocation100_spill] sm:$0xff] %v11040_v41  ;;  %v11044_v38 = vld [vmem:[#allocation2 + $0xd0] sm:$0xff]  ;;  %v11063_v56 = vsel %vm2775_vm5, %v10600_v35, %v6628_v30  ;;  %v11067_v14 = vsel %vm2775_vm5, %v10617_v7, %v6622_v62 }
 0x280   : > { %v6632_v40 = vunpack.i.l.bf16 %v14590_v16  ;;  %v11042_v37 = vld [vmem:[#allocation2 + $0xb8] sm:$0xff]  ;;  %14592 = vst [vmem:[#allocation101_spill] sm:$0xff] %v11048_v36  ;;  %v6633_v15 = vunpack.i.h.bf16 %v14590_v16  ;;  %v11057_v41 = vld [vmem:[#allocation2 + $0x88] sm:$0xff]  ;;  %v11059_v19 = vld [vmem:[#allocation2 + $0xa0] sm:$0xff]  ;;  %v11071_v16 = vsel %vm2775_vm5, %v10621_v28, %v6623_v44 }
 0x281   : > { %v14593_v9 = vld [vmem:[#allocation54_spill] sm:$0xff]  ;;  %14594 = vst [vmem:[#allocation102_spill] sm:$0xff] %v11063_v56  ;;  %14595 = vst [vmem:[#allocation49_spill] sm:$0xff] %v11067_v14  ;;  %v14597_v32 = vld [vmem:[#allocation113_spill] sm:$0xff]  ;;  %v11081_v56 = vpop.permute.xlu1 %6895 }
 0x282   : > { %7175 = vrot.lane.b32.xlu1 %v14593_v9, %s8096_s30  ;;  %14596 = vst [vmem:[#allocation50_spill] sm:$0xff] %v11071_v16  ;;  %v6647_v9 = vunpack.i.l.bf16 %v14597_v32  ;;  %v14598_v26 = vld [vmem:[#allocation133_spill] sm:$0xff]  ;;  %v11076_v59 = vld [vmem:[#allocation2 + $0x148] sm:$0xff]  ;;  %v6648_v36 = vunpack.i.h.bf16 %v14597_v32  ;;  %v14599_v17 = vld [vmem:[#allocation122_spill] sm:$0xff]  ;;  %v11097_v32 = vsel %vm2775_vm5, %v10629_v43, %v6638_v57  ;;  %v11109_v16 = vsel %vm2775_vm5, %v10643_v5, %v6633_v15 }
 0x283   : > { %7170 = vrot.lane.b32.xlu0 %v14598_v26, %s8096_s30  ;;  %v6643_v35 = vunpack.i.h.bf16 %v14599_v17  ;;  %v6642_v30 = vunpack.i.l.bf16 %v14599_v17  ;;  %14600 = vst [vmem:[#allocation103_spill] sm:$0xff] %v11081_v56  ;;  %v11085_v28 = vld [vmem:[#allocation2 + $0x160] sm:$0xff]  ;;  %v11087_v44 = vld [vmem:[#allocation2 + $0x118] sm:$0xff]  ;;  %v11089_v62 = vld [vmem:[#allocation2 + $0x130] sm:$0xff]  ;;  %v11093_v26 = vsel %vm2775_vm5, %v10625_v0, %v6637_v42  ;;  %v11101_v17 = vsel %vm2775_vm5, %v10635_v2, %v6632_v40  ;;  %v11103_v56 = vpop.permute.xlu0 %6890 }
 0x284   : > { %14601 = vst [vmem:[#allocation104_spill] sm:$0xff] %v11087_v44  ;;  %14602 = vst [vmem:[#allocation136_spill] sm:$0xff] %v11093_v26  ;;  %v14607_v14 = vld [vmem:[#allocation115_spill] sm:$0xff]  ;;  %v14608_v26 = vld [vmem:[#allocation14_spill] sm:$0xff]  ;;  %v14609_v2 = vpack.i.bf16 %v10875_v61, %v10873_v29  ;;  %v11124_v7 = vsel %vm2775_vm5, %v10651_v52, %v6647_v9  ;;  %v11135_v29 = vpack.i.bf16 %v11089_v62, %v11087_v44 }
 0x285   : > { %14603 = vst [vmem:[#allocation52_spill] sm:$0xff] %v11097_v32  ;;  %14604 = vst [vmem:[#allocation13_spill] sm:$0xff] %v11101_v17  ;;  %v6658_v0 = vunpack.i.h.bf16 %v14607_v14  ;;  %v6657_v42 = vunpack.i.l.bf16 %v14607_v14  ;;  %v6652_v43 = vunpack.i.l.bf16 %v14608_v26  ;;  %v11118_v57 = vld [vmem:[#allocation2 + $0x1a8] sm:$0xff]  ;;  %v11120_v40 = vld [vmem:[#allocation2 + $0x1c0] sm:$0xff]  ;;  %v6653_v5 = vunpack.i.h.bf16 %v14608_v26 }
 0x286   : > { %14605 = vst [vmem:[#allocation138_spill] sm:$0xff] %v11103_v56  ;;  %14606 = vst [vmem:[#allocation130_spill] sm:$0xff] %v11109_v16  ;;  %7185 = vrot.lane.b32.xlu1 %v14609_v2, %s8096_s30  ;;  %v14612_v15 = vld [vmem:[#allocation139_spill] sm:$0xff]  ;;  %v11131_v14 = vpack.i.bf16 %v11085_v28, %v11076_v59  ;;  %v11137_v61 = vld [vmem:[#allocation2 + $0x178] sm:$0xff]  ;;  %v11143_v52 = vsel %vm2775_vm5, %v10655_v58, %v6648_v36  ;;  %v11147_v9 = vsel %vm2775_vm5, %v10659_v4, %v6642_v30 }
 0x287   : > { %14610 = vst [vmem:[#allocation6_spill] sm:$0xff] %v11120_v40  ;;  %14611 = vst [vmem:[#allocation7_spill] sm:$0xff] %v11124_v7  ;;  %7180 = vrot.lane.b32.xlu0 %v14612_v15, %s8096_s30  ;;  %v11139_v2 = vld [vmem:[#allocation2 + $0x190] sm:$0xff]  ;;  %v11151_v26 = vsel %vm2775_vm5, %v10663_v60, %v6643_v35  ;;  %v11154_v7 = vpop.permute.xlu1 %6905  ;;  %v11156_v16 = vld [vmem:[#allocation2 + $0x238] sm:$0xff]  ;;  %v11161_v36 = vpop.permute.xlu0 %6900  ;;  %v14629_v4 = vpack.i.bf16 %v10900_v1, %v10898_v54  ;;  %v14634_v54 = vpack.i.bf16 %v10906_v55, %v10904_v12 }
 0x288   : > { %14613 = vst [vmem:[#allocation142_spill] sm:$0xff] %v11131_v14  ;;  %14614 = vst [vmem:[#allocation9_spill] sm:$0xff] %v11135_v29  ;;  %v14618_v15 = vld [vmem:[#allocation45_spill] sm:$0xff]  ;;  %v11167_v60 = vld [vmem:[#allocation2 + $0x208] sm:$0xff] }
 0x289   : > { %14615 = vst [vmem:[#allocation12_spill] sm:$0xff] %v11143_v52  ;;  %14616 = vst [vmem:[#allocation15_spill] sm:$0xff] %v11147_v9  ;;  %v6667_v56 = vunpack.i.l.bf16 %v14618_v15  ;;  %v6668_v17 = vunpack.i.h.bf16 %v14618_v15  ;;  %v14620_v32 = vld [vmem:[#allocation17_spill] sm:$0xff]  ;;  %v11169_v35 = vld [vmem:[#allocation2 + $0x220] sm:$0xff] }
 0x28a   : > { %14617 = vst [vmem:[#allocation16_spill] sm:$0xff] %v11151_v26  ;;  %14619 = vst [vmem:[#allocation137_spill] sm:$0xff] %v11154_v7  ;;  %v6663_v44 = vunpack.i.h.bf16 %v14620_v32  ;;  %v6662_v58 = vunpack.i.l.bf16 %v14620_v32  ;;  %v11165_v30 = vld [vmem:[#allocation2 + $0x250] sm:$0xff]  ;;  %v14623_v7 = vld [vmem:[#allocation8_spill] sm:$0xff]  ;;  %7195 = vrot.lane.b32.xlu1 %v14629_v4, %s8096_s30  ;;  %v11219_v12 = vpack.i.bf16 %v11169_v35, %v11167_v60 }
 0x28b   : > { %14621 = vst [vmem:[#allocation135_spill] sm:$0xff] %v11161_v36  ;;  %14622 = vst [vmem:[#allocation56_spill] sm:$0xff] %v11167_v60  ;;  %v11173_v26 = vsel %vm2775_vm5, %v14623_v7, %v6657_v42  ;;  %v14625_v15 = vld [vmem:[#allocation75_spill] sm:$0xff]  ;;  %v14627_v32 = vld [vmem:[#allocation76_spill] sm:$0xff]  ;;  %7190 = vrot.lane.b32.xlu0 %v14634_v54, %s8096_s30 }
 0x28c   : > { %14624 = vst [vmem:[#allocation57_spill] sm:$0xff] %v11173_v26  ;;  %v11177_v9 = vsel %vm2775_vm5, %v14625_v15, %v6658_v0  ;;  %v11181_v36 = vsel %vm2775_vm5, %v14627_v32, %v6652_v43  ;;  %v11189_v24 = vld [vmem:[#allocation2 + $0x298] sm:$0xff]  ;;  %v14630_v7 = vld [vmem:[#allocation40_spill] sm:$0xff]  ;;  %v14632_v0 = vld [vmem:[#allocation121_spill] sm:$0xff] }
 0x28d   : > { %14626 = vst [vmem:[#allocation18_spill] sm:$0xff] %v11177_v9  ;;  %14628 = vst [vmem:[#allocation19_spill] sm:$0xff] %v11181_v36  ;;  %v11193_v42 = vsel %vm2775_vm5, %v14630_v7, %v6653_v5  ;;  %v6678_v15 = vunpack.i.h.bf16 %v14632_v0  ;;  %v6677_v9 = vunpack.i.l.bf16 %v14632_v0  ;;  %v14633_v43 = vld [vmem:[#allocation120_spill] sm:$0xff]  ;;  %v11202_v1 = vld [vmem:[#allocation2 + $0x2b0] sm:$0xff]  ;;  %v11213_v0 = vpop.permute.xlu1 %6915 }
 0x28e   : > { %14631 = vst [vmem:[#allocation58_spill] sm:$0xff] %v11193_v42  ;;  %v6672_v32 = vunpack.i.l.bf16 %v14633_v43  ;;  %14635 = vst [vmem:[#allocation60_spill] sm:$0xff] %v11202_v1  ;;  %v11204_v4 = vld [vmem:[#allocation2 + $0x268] sm:$0xff]  ;;  %v11206_v52 = vld [vmem:[#allocation2 + $0x280] sm:$0xff]  ;;  %v6673_v7 = vunpack.i.h.bf16 %v14633_v43 }
 0x28f   : > { %v14636_v36 = vld [vmem:[#allocation108_spill] sm:$0xff]  ;;  %14638 = vst [vmem:[#allocation24_spill] sm:$0xff] %v11213_v0  ;;  %14639 = vst [vmem:[#allocation22_spill] sm:$0xff] %v11219_v12  ;;  %v14640_v55 = vld [vmem:[#allocation41_spill] sm:$0xff] }
 0x290   : > { %v11210_v5 = vsel %vm2775_vm5, %v14636_v36, %v6667_v56  ;;  %v11223_v54 = vsel %vm2775_vm5, %v14640_v55, %v6668_v17  ;;  %v14641_v26 = vld [vmem:[#allocation5_spill] sm:$0xff]  ;;  %v14643_v56 = vld [vmem:[#allocation124_spill] sm:$0xff]  ;;  %v14645_v43 = vld [vmem:[#allocation47_spill] sm:$0xff]  ;;  %v14648_v17 = vpack.i.bf16 %v10932_v49, %v10930_v10 }
 0x291   : > { %14637 = vst [vmem:[#allocation141_spill] sm:$0xff] %v11210_v5  ;;  %v11227_v29 = vsel %vm2775_vm5, %v14641_v26, %v6662_v58  ;;  %v11231_v36 = vsel %vm2775_vm5, %v14643_v56, %v6663_v44  ;;  %v6687_v0 = vunpack.i.l.bf16 %v14645_v43  ;;  %v11234_v5 = vpop.permute.xlu0 %6910  ;;  %v11236_v42 = vld [vmem:[#allocation2 + $0x328] sm:$0xff]  ;;  %v6688_v60 = vunpack.i.h.bf16 %v14645_v43  ;;  %v14647_v12 = vld [vmem:[#allocation125_spill] sm:$0xff]  ;;  %v11248_v58 = vld [vmem:[#allocation2 + $0x340] sm:$0xff] }
 0x292   : > { %14642 = vst [vmem:[#allocation23_spill] sm:$0xff] %v11227_v29  ;;  %14644 = vst [vmem:[#allocation143_spill] sm:$0xff] %v11231_v36  ;;  %v6682_v14 = vunpack.i.l.bf16 %v14647_v12  ;;  %7205 = vrot.lane.b32.xlu1 %v14648_v17, %s8096_s30  ;;  %v11250_v55 = vld [vmem:[#allocation2 + $0x2f8] sm:$0xff]  ;;  %v11252_v56 = vld [vmem:[#allocation2 + $0x310] sm:$0xff]  ;;  %v6683_v44 = vunpack.i.h.bf16 %v14647_v12  ;;  %v14654_v26 = vpack.i.bf16 %v10949_v51, %v10947_v63  ;;  %v11273_v29 = vsel %vm2775_vm5, %v10736_v53, %v6673_v7 }
 0x293   : > { %14646 = vst [vmem:[#allocation25_spill] sm:$0xff] %v11234_v5  ;;  %v14649_v43 = vld [vmem:[#allocation114_spill] sm:$0xff]  ;;  %v14651_v36 = vld [vmem:[#allocation77_spill] sm:$0xff]  ;;  %v11282_v12 = vld [vmem:[#allocation2 + $0x3a0] sm:$0xff]  ;;  %v11286_v51 = vsel %vm2775_vm5, %v10748_v11, %v6687_v0 }
 0x294   : > { %v11256_v5 = vsel %vm2775_vm5, %v14649_v43, %v6677_v9  ;;  %v11260_v10 = vsel %vm2775_vm5, %v14651_v36, %v6678_v15  ;;  %v14653_v49 = vld [vmem:[#allocation78_spill] sm:$0xff]  ;;  %7200 = vrot.lane.b32.xlu0 %v14654_v26, %s8096_s30  ;;  %v14655_v9 = vld [vmem:[#allocation48_spill] sm:$0xff]  ;;  %v14656_v36 = vld [vmem:[#allocation127_spill] sm:$0xff]  ;;  %14658 = vst [vmem:[#allocation27_spill] sm:$0xff] %v11286_v51  ;;  %v11305_v11 = vsel %vm2775_vm5, %v10756_v18, %v6682_v14 }
 0x295   : > { %14650 = vst [vmem:[#allocation26_spill] sm:$0xff] %v11256_v5  ;;  %14652 = vst [vmem:[#allocation129_spill] sm:$0xff] %v11260_v10  ;;  %v11264_v17 = vsel %vm2775_vm5, %v14653_v49, %v6672_v32  ;;  %v6698_v43 = vunpack.i.h.bf16 %v14655_v9  ;;  %v6697_v15 = vunpack.i.l.bf16 %v14655_v9  ;;  %v6692_v10 = vunpack.i.l.bf16 %v14656_v36  ;;  %v11278_v5 = vpop.permute.xlu1 %6925  ;;  %v11280_v32 = vld [vmem:[#allocation2 + $0x388] sm:$0xff]  ;;  %v11289_v53 = vpop.permute.xlu0 %6920  ;;  %v11295_v49 = vld [vmem:[#allocation2 + $0x358] sm:$0xff] }
 0x296   : > { %14657 = vst [vmem:[#allocation63_spill] sm:$0xff] %v11278_v5  ;;  %v6693_v63 = vunpack.i.h.bf16 %v14656_v36  ;;  %14659 = vst [vmem:[#allocation64_spill] sm:$0xff] %v11289_v53  ;;  %v11297_v9 = vld [vmem:[#allocation2 + $0x370] sm:$0xff]  ;;  %v11301_v5 = vsel %vm2775_vm5, %v10752_v13, %v6688_v60  ;;  %v14660_v0 = vld [vmem:[#allocation132_spill] sm:$0xff]  ;;  %v14661_v26 = vpack.i.bf16 %v10971_v25, %v10969_v50  ;;  %v11315_v7 = vsel %vm2775_vm5, %v10760_v47, %v6683_v44 }
 0x297   : > { %v6708_v36 = vunpack.i.h.bf16 %v14660_v0  ;;  %v6707_v53 = vunpack.i.l.bf16 %v14660_v0  ;;  %v14662_v51 = vld [vmem:[#allocation11_spill] sm:$0xff]  ;;  %v14663_v18 = vpack.i.bf16 %v10977_v34, %v10975_v23  ;;  %v11327_v50 = vsel %vm2775_vm5, %v10770_v39, %v6697_v15  ;;  %v11350_v0 = vld [vmem:[#allocation2 + $0xe8] sm:$0xff] }
 0x298   : > { %7215 = vrot.lane.b32.xlu1 %v14661_v26, %s8096_s30  ;;  %v6703_v13 = vunpack.i.h.bf16 %v14662_v51  ;;  %v6702_v60 = vunpack.i.l.bf16 %v14662_v51  ;;  %v11331_v47 = vsel %vm2775_vm5, %v10774_v22, %v6698_v43  ;;  %v11335_v25 = vsel %vm2775_vm5, %v10780_v31, %v6692_v10  ;;  %v14665_v51 = vld [vmem:[#allocation126_spill] sm:$0xff]  ;;  %14668 = vst [vmem:[#allocation29_spill] sm:$0xff] %v11350_v0  ;;  %v14669_v31 = vld [vmem:[#allocation3_spill] sm:$0xff]  ;;  %v14672_v14 = vld [vmem:[#allocation84_spill] sm:$0xff] }
 0x299   : > { %7210 = vrot.lane.b32.xlu0 %v14663_v18, %s8096_s30  ;;  %v11337_v44 = vpop.permute.xlu1 %6935  ;;  %v11343_v23 = vsel %vm2775_vm5, %v10784_v45, %v6693_v63  ;;  %v6718_v39 = vunpack.i.h.bf16 %v14665_v51  ;;  %v6717_v15 = vunpack.i.l.bf16 %v14665_v51  ;;  %v14666_v26 = vld [vmem:[#allocation134_spill] sm:$0xff]  ;;  %v11348_v43 = vpop.permute.xlu0 %6930  ;;  %v11354_v10 = vsel %vm2775_vm5, %v14669_v31, %v6707_v53  ;;  %v14670_v18 = vld [vmem:[#allocation81_spill] sm:$0xff]  ;;  %v14681_v0 = vld [vmem:[#allocation55_spill] sm:$0xff] }
 0x29a   : > { %14664 = vst [vmem:[#allocation65_spill] sm:$0xff] %v11337_v44  ;;  %v6712_v22 = vunpack.i.l.bf16 %v14666_v26  ;;  %14667 = vst [vmem:[#allocation68_spill] sm:$0xff] %v11348_v43  ;;  %v11358_v34 = vsel %vm2775_vm5, %v14670_v18, %v6708_v36  ;;  %v14671_v45 = vpack.i.bf16 %v10983_v20, %v10981_v46  ;;  %v11370_v43 = vsel %vm2775_vm5, %v14672_v14, %v6702_v60  ;;  %v14673_v53 = vld [vmem:[#allocation42_spill] sm:$0xff]  ;;  %v14674_v18 = vld [vmem:[#allocation53_spill] sm:$0xff] }
 0x29b   : > { %v11374_v31 = vsel %vm2775_vm5, %v14673_v53, %v6703_v13  ;;  %v6713_v36 = vunpack.i.h.bf16 %v14666_v26  ;;  %v6727_v44 = vunpack.i.l.bf16 %v14674_v18  ;;  %v14675_v46 = vld [vmem:[#allocation147_spill] sm:$0xff]  ;;  %v6728_v20 = vunpack.i.h.bf16 %v14674_v18 }
 0x29c   : > { %7225 = vrot.lane.b32.xlu1 %v14671_v45, %s8096_s30  ;;  %v14676_v45 = vld [vmem:[#allocation20_spill] sm:$0xff]  ;;  %v11389_v14 = vsel %vm2775_vm5, %v10817_v6, %v6717_v15  ;;  %v11393_v26 = vsel %vm2775_vm5, %v10821_v48, %v6718_v39  ;;  %v11397_v53 = vsel %vm2775_vm5, %v10828_v21, %v6712_v22  ;;  %v6733_v6 = vunpack.i.h.bf16 %v14681_v0  ;;  %v11411_v21 = vld [vmem:[#allocation2 + $0x1d8] sm:$0xff] }
 0x29d   : > { %7220 = vrot.lane.b32.xlu0 %v14675_v46, %s8096_s30  ;;  %v6723_v63 = vunpack.i.h.bf16 %v14676_v45  ;;  %v6722_v51 = vunpack.i.l.bf16 %v14676_v45  ;;  %v11383_v60 = vpop.permute.xlu1 %6945  ;;  %14678 = vst [vmem:[#allocation128_spill] sm:$0xff] %v11397_v53  ;;  %v11399_v18 = vpop.permute.xlu0 %6940  ;;  %v14680_v45 = vld [vmem:[#allocation140_spill] sm:$0xff]  ;;  %v6732_v15 = vunpack.i.l.bf16 %v14681_v0  ;;  %v14682_v48 = vpack.i.bf16 %v11011_v33, %v11000_v3  ;;  %14683 = vst [vmem:[#allocation33_spill] sm:$0xff] %v11411_v21  ;;  %v14684_v39 = vld [vmem:[#allocation118_spill] sm:$0xff] }
 0x29e   : > { %14677 = vst [vmem:[#allocation30_spill] sm:$0xff] %v11383_v60  ;;  %14679 = vst [vmem:[#allocation10_spill] sm:$0xff] %v11399_v18  ;;  %v6738_v60 = vunpack.i.h.bf16 %v14680_v45  ;;  %v6737_v13 = vunpack.i.l.bf16 %v14680_v45  ;;  %v11415_v22 = vsel %vm2775_vm5, %v14684_v39, %v6713_v36  ;;  %v14685_v46 = vld [vmem:[#allocation43_spill] sm:$0xff]  ;;  %v14687_v45 = vpack.i.bf16 %v11015_v8, %v11013_v27  ;;  %v14690_v53 = vld [vmem:[#allocation44_spill] sm:$0xff] }
 0x29f   : > { %v11419_v18 = vsel %vm2775_vm5, %v14685_v46, %v6727_v44  ;;  %v11427_v0 = vpack.i.bf16 %v11137_v61, %v11085_v28  ;;  %v11435_v36 = vsel %vm2775_vm5, %v14690_v53, %v6728_v20  ;;  %v14691_v39 = vld [vmem:[#allocation117_spill] sm:$0xff]  ;;  %v14692_v46 = vld [vmem:[#allocation119_spill] sm:$0xff]  ;;  %v14699_v53 = vld [vmem:[#allocation144_spill] sm:$0xff]  ;;  %v14707_v20 = vpack.i.bf16 %v11044_v38, %v11042_v37 }
 0x2a0   : > { %7235 = vrot.lane.b32.xlu1 %v14682_v48, %s8089_s15  ;;  %14686 = vst [vmem:[#allocation34_spill] sm:$0xff] %v11419_v18  ;;  %v11431_v48 = vpack.i.bf16 %v11076_v59, %v11089_v62  ;;  %v11439_v44 = vsel %vm2775_vm5, %v14691_v39, %v6722_v51  ;;  %v11443_v27 = vsel %vm2775_vm5, %v14692_v46, %v6723_v63  ;;  %v14696_v59 = vld [vmem:[#allocation105_spill] sm:$0xff] }
 0x2a1   : > { %7230 = vrot.lane.b32.xlu0 %v14687_v45, %s8089_s15  ;;  %14688 = vst [vmem:[#allocation35_spill] sm:$0xff] %v11427_v0  ;;  %14693 = vst [vmem:[#allocation36_spill] sm:$0xff] %v11443_v27  ;;  %v14694_v45 = vld [vmem:[#allocation59_spill] sm:$0xff]  ;;  %v11446_v28 = vpop.permute.xlu1 %6955  ;;  %v6743_v62 = vunpack.i.h.bf16 %v14696_v59  ;;  %v11456_v51 = vpack.i.bf16 %v11118_v57, %v11139_v2  ;;  %v11460_v63 = vsel %vm2775_vm5, %v14699_v53, %v6737_v13  ;;  %v14701_v39 = vld [vmem:[#allocation85_spill] sm:$0xff] }
 0x2a2   : > { %14689 = vst [vmem:[#allocation51_spill] sm:$0xff] %v11431_v48  ;;  %v6747_v18 = vunpack.i.l.bf16 %v14694_v45  ;;  %14695 = vst [vmem:[#allocation131_spill] sm:$0xff] %v11446_v28  ;;  %v6748_v0 = vunpack.i.h.bf16 %v14694_v45  ;;  %v11450_v48 = vpop.permute.xlu0 %6950  ;;  %v11464_v46 = vsel %vm2775_vm5, %v14701_v39, %v6738_v60  ;;  %v14703_v45 = vld [vmem:[#allocation86_spill] sm:$0xff]  ;;  %v14709_v60 = vpack.i.bf16 %v11059_v19, %v11057_v41 }
 0x2a3   : > { %14697 = vst [vmem:[#allocation38_spill] sm:$0xff] %v11450_v48  ;;  %14698 = vst [vmem:[#allocation110_spill] sm:$0xff] %v11456_v51  ;;  %v11468_v28 = vsel %vm2775_vm5, %v14703_v45, %v6732_v15  ;;  %v14705_v48 = vld [vmem:[#allocation87_spill] sm:$0xff]  ;;  %v14708_v51 = vld [vmem:[#allocation61_spill] sm:$0xff]  ;;  %v11486_v15 = vpack.i.bf16 %v11204_v4, %v11165_v30 }
 0x2a4   : > { %14700 = vst [vmem:[#allocation54_spill] sm:$0xff] %v11460_v63  ;;  %14702 = vst [vmem:[#allocation113_spill] sm:$0xff] %v11464_v46  ;;  %v11472_v27 = vsel %vm2775_vm5, %v14705_v48, %v6733_v6  ;;  %7245 = vrot.lane.b32.xlu1 %v14707_v20, %s8089_s15  ;;  %v6758_v13 = vunpack.i.h.bf16 %v14708_v51  ;;  %v6757_v53 = vunpack.i.l.bf16 %v14708_v51  ;;  %v11490_v6 = vpack.i.bf16 %v11156_v16, %v11169_v35  ;;  %v11492_v48 = vld [vmem:[#allocation2 + $0x2c8] sm:$0xff]  ;;  %v14715_v45 = vld [vmem:[#allocation62_spill] sm:$0xff] }
 0x2a5   : > { %14704 = vst [vmem:[#allocation133_spill] sm:$0xff] %v11468_v28  ;;  %14706 = vst [vmem:[#allocation122_spill] sm:$0xff] %v11472_v27  ;;  %7240 = vrot.lane.b32.xlu0 %v14709_v60, %s8089_s15  ;;  %v14713_v20 = vld [vmem:[#allocation32_spill] sm:$0xff]  ;;  %v6753_v27 = vunpack.i.h.bf16 %v14715_v45  ;;  %v6752_v60 = vunpack.i.l.bf16 %v14715_v45  ;;  %v11501_v28 = vpop.permute.xlu1 %6965  ;;  %v14719_v35 = vld [vmem:[#allocation90_spill] sm:$0xff] }
 0x2a6   : > { %14710 = vst [vmem:[#allocation115_spill] sm:$0xff] %v11486_v15  ;;  %14711 = vst [vmem:[#allocation14_spill] sm:$0xff] %v11490_v6  ;;  %v11496_v39 = vsel %vm2775_vm5, %v14713_v20, %v6747_v18  ;;  %v14717_v46 = vld [vmem:[#allocation28_spill] sm:$0xff]  ;;  %v11509_v6 = vsel %vm2775_vm5, %v14719_v35, %v6743_v62  ;;  %v14721_v15 = vld [vmem:[#allocation66_spill] sm:$0xff]  ;;  %v11513_v20 = vpop.permute.xlu0 %6960  ;;  %v11523_v62 = vpack.i.bf16 %v11189_v24, %v11206_v52 }
 0x2a7   : > { %14712 = vst [vmem:[#allocation139_spill] sm:$0xff] %v11492_v48  ;;  %14714 = vst [vmem:[#allocation45_spill] sm:$0xff] %v11496_v39  ;;  %v11505_v63 = vsel %vm2775_vm5, %v14717_v46, %v6748_v0  ;;  %v6768_v21 = vunpack.i.h.bf16 %v14721_v15  ;;  %v6767_v18 = vunpack.i.l.bf16 %v14721_v15  ;;  %v14723_v51 = vld [vmem:[#allocation67_spill] sm:$0xff]  ;;  %v14724_v59 = vld [vmem:[#allocation142_spill] sm:$0xff] }
 0x2a8   : > { %14716 = vst [vmem:[#allocation17_spill] sm:$0xff] %v11501_v28  ;;  %14718 = vst [vmem:[#allocation8_spill] sm:$0xff] %v11505_v63  ;;  %v6763_v39 = vunpack.i.h.bf16 %v14723_v51  ;;  %v6762_v45 = vunpack.i.l.bf16 %v14723_v51  ;;  %7255 = vrot.lane.b32.xlu1 %v14724_v59, %s8089_s15  ;;  %v14726_v46 = vld [vmem:[#allocation31_spill] sm:$0xff]  ;;  %v14730_v63 = vld [vmem:[#allocation69_spill] sm:$0xff] }
 0x2a9   : > { %14720 = vst [vmem:[#allocation75_spill] sm:$0xff] %v11509_v6  ;;  %14722 = vst [vmem:[#allocation76_spill] sm:$0xff] %v11513_v20  ;;  %v11527_v35 = vsel %vm2840_vm6, %v14726_v46, %v6757_v53  ;;  %v14728_v15 = vld [vmem:[#allocation123_spill] sm:$0xff]  ;;  %v6778_v51 = vunpack.i.h.bf16 %v14730_v63  ;;  %v6777_v20 = vunpack.i.l.bf16 %v14730_v63  ;;  %v14731_v59 = vld [vmem:[#allocation9_spill] sm:$0xff] }
 0x2aa   : > { %14725 = vst [vmem:[#allocation40_spill] sm:$0xff] %v11523_v62  ;;  %14727 = vst [vmem:[#allocation121_spill] sm:$0xff] %v11527_v35  ;;  %v11531_v6 = vsel %vm2840_vm6, %v14728_v15, %v6758_v13  ;;  %7250 = vrot.lane.b32.xlu0 %v14731_v59, %s8089_s15  ;;  %v14732_v0 = vld [vmem:[#allocation92_spill] sm:$0xff]  ;;  %v14733_v62 = vld [vmem:[#allocation94_spill] sm:$0xff]  ;;  %v11547_v15 = vpop.permute.xlu1 %6975 }
 0x2ab   : > { %14729 = vst [vmem:[#allocation120_spill] sm:$0xff] %v11531_v6  ;;  %v11539_v48 = vsel %vm2840_vm6, %v14732_v0, %v6752_v60  ;;  %v11543_v28 = vsel %vm2840_vm6, %v14733_v62, %v6753_v27  ;;  %v14734_v53 = vld [vmem:[#allocation39_spill] sm:$0xff]  ;;  %14735 = vst [vmem:[#allocation108_spill] sm:$0xff] %v11547_v15  ;;  %v14736_v6 = vld [vmem:[#allocation148_spill] sm:$0xff]  ;;  %v11557_v60 = vpop.permute.xlu0 %6970  ;;  %v11561_v27 = vpack.i.bf16 %v11295_v49, %v11248_v58 }
 0x2ac   : > { %v6773_v46 = vunpack.i.h.bf16 %v14734_v53  ;;  %v6772_v13 = vunpack.i.l.bf16 %v14734_v53  ;;  %v11551_v63 = vsel %vm2840_vm6, %v14736_v6, %v6767_v18  ;;  %v14737_v35 = vld [vmem:[#allocation95_spill] sm:$0xff]  ;;  %14739 = vst [vmem:[#allocation5_spill] sm:$0xff] %v11557_v60  ;;  %v11565_v0 = vpack.i.bf16 %v11236_v42, %v11252_v56  ;;  %v14742_v62 = vld [vmem:[#allocation96_spill] sm:$0xff]  ;;  %v14744_v6 = vld [vmem:[#allocation97_spill] sm:$0xff] }
 0x2ad   : > { %v11555_v59 = vsel %vm2840_vm6, %v14737_v35, %v6768_v21  ;;  %14740 = vst [vmem:[#allocation124_spill] sm:$0xff] %v11561_v27  ;;  %v11569_v53 = vsel %vm2840_vm6, %v14742_v62, %v6762_v45  ;;  %v11573_v18 = vsel %vm2840_vm6, %v14744_v6, %v6763_v39  ;;  %v14746_v21 = vld [vmem:[#allocation112_spill] sm:$0xff]  ;;  %v14747_v27 = vpack.i.bf16 %v11120_v40, %v11118_v57  ;;  %v11581_v15 = vld [vmem:[#allocation2 + $0x3b8] sm:$0xff]  ;;  %v14755_v57 = vld [vmem:[#allocation37_spill] sm:$0xff] }
 0x2ae   : > { %14738 = vst [vmem:[#allocation41_spill] sm:$0xff] %v11555_v59  ;;  %14741 = vst [vmem:[#allocation47_spill] sm:$0xff] %v11565_v0  ;;  %v6788_v35 = vunpack.i.h.bf16 %v14746_v21  ;;  %v6787_v60 = vunpack.i.l.bf16 %v14746_v21  ;;  %v14749_v0 = vld [vmem:[#allocation4_spill] sm:$0xff]  ;;  %v14751_v45 = vld [vmem:[#allocation98_spill] sm:$0xff]  ;;  %v14754_v21 = vpack.i.bf16 %v11139_v2, %v11137_v61 }
 0x2af   : > { %14743 = vst [vmem:[#allocation125_spill] sm:$0xff] %v11569_v53  ;;  %14745 = vst [vmem:[#allocation114_spill] sm:$0xff] %v11573_v18  ;;  %7265 = vrot.lane.b32.xlu1 %v14747_v27, %s8089_s15  ;;  %v11585_v59 = vsel %vm2840_vm6, %v14749_v0, %v6777_v20  ;;  %v11589_v62 = vsel %vm2840_vm6, %v14751_v45, %v6778_v51  ;;  %v14753_v39 = vld [vmem:[#allocation70_spill] sm:$0xff]  ;;  %v11599_v27 = vsel %vm2840_vm6, %v14755_v57, %v6772_v13  ;;  %v14756_v53 = vld [vmem:[#allocation99_spill] sm:$0xff]  ;;  %v11613_v2 = vpop.permute.xlu0 %6980 }
 0x2b0   : > { %14748 = vst [vmem:[#allocation77_spill] sm:$0xff] %v11581_v15  ;;  %14750 = vst [vmem:[#allocation78_spill] sm:$0xff] %v11585_v59  ;;  %v6783_v6 = vunpack.i.h.bf16 %v14753_v39  ;;  %v6782_v18 = vunpack.i.l.bf16 %v14753_v39  ;;  %7260 = vrot.lane.b32.xlu0 %v14754_v21, %s8089_s15  ;;  %v11603_v20 = vsel %vm2840_vm6, %v14756_v53, %v6773_v46  ;;  %v14758_v0 = vld [vmem:[#allocation72_spill] sm:$0xff]  ;;  %v11609_v39 = vld [vmem:[#allocation2 + $0x100] sm:$0xff] }
 0x2b1   : > { %14752 = vst [vmem:[#allocation48_spill] sm:$0xff] %v11589_v62  ;;  %14757 = vst [vmem:[#allocation127_spill] sm:$0xff] %v11603_v20  ;;  %v6798_v51 = vunpack.i.h.bf16 %v14758_v0  ;;  %v6797_v45 = vunpack.i.l.bf16 %v14758_v0  ;;  %v11607_v62 = vpop.permute.xlu1 %6985  ;;  %v14761_v59 = vld [vmem:[#allocation107_spill] sm:$0xff]  ;;  %v14763_v53 = vld [vmem:[#allocation101_spill] sm:$0xff] }
 0x2b2   : > { %14759 = vst [vmem:[#allocation132_spill] sm:$0xff] %v11607_v62  ;;  %14760 = vst [vmem:[#allocation11_spill] sm:$0xff] %v11609_v39  ;;  %v6793_v40 = vunpack.i.h.bf16 %v14761_v59  ;;  %v6792_v61 = vunpack.i.l.bf16 %v14761_v59  ;;  %v11621_v21 = vsel %vm2840_vm6, %v14763_v53, %v6787_v60  ;;  %v14764_v57 = vld [vmem:[#allocation102_spill] sm:$0xff]  ;;  %v14766_v62 = vld [vmem:[#allocation73_spill] sm:$0xff] }
 0x2b3   : > { %14762 = vst [vmem:[#allocation126_spill] sm:$0xff] %v11613_v2  ;;  %v11625_v0 = vsel %vm2840_vm6, %v14764_v57, %v6788_v35  ;;  %v6808_v20 = vunpack.i.h.bf16 %v14766_v62  ;;  %v6807_v59 = vunpack.i.l.bf16 %v14766_v62  ;;  %v14767_v2 = vpack.i.bf16 %v11165_v30, %v11156_v16  ;;  %v14768_v13 = vld [vmem:[#allocation49_spill] sm:$0xff]  ;;  %v14769_v15 = vld [vmem:[#allocation50_spill] sm:$0xff]  ;;  %v14773_v62 = vld [vmem:[#allocation136_spill] sm:$0xff] }
 0x2b4   : > { %14765 = vst [vmem:[#allocation134_spill] sm:$0xff] %v11625_v0  ;;  %v11635_v46 = vsel %vm2840_vm6, %v14768_v13, %v6782_v18  ;;  %v11639_v60 = vsel %vm2840_vm6, %v14769_v15, %v6783_v6  ;;  %v14771_v35 = vld [vmem:[#allocation22_spill] sm:$0xff]  ;;  %v11647_v0 = vsel %vm2840_vm6, %v14773_v62, %v6797_v45  ;;  %v14774_v16 = vld [vmem:[#allocation52_spill] sm:$0xff]  ;;  %v14777_v6 = vld [vmem:[#allocation13_spill] sm:$0xff] }
 0x2b5   : > { %7275 = vrot.lane.b32.xlu1 %v14767_v2, %s8089_s15  ;;  %14770 = vst [vmem:[#allocation3_spill] sm:$0xff] %v11639_v60  ;;  %7270 = vrot.lane.b32.xlu0 %v14771_v35, %s8089_s15  ;;  %v11651_v30 = vsel %vm2840_vm6, %v14774_v16, %v6798_v51  ;;  %v14775_v18 = vld [vmem:[#allocation74_spill] sm:$0xff]  ;;  %v11655_v15 = vpop.permute.xlu1 %6995  ;;  %v11659_v35 = vsel %vm2840_vm6, %v14777_v6, %v6792_v61  ;;  %v14781_v45 = vld [vmem:[#allocation109_spill] sm:$0xff]  ;;  %v11667_v51 = vpop.permute.xlu0 %6990  ;;  %v14783_v16 = vld [vmem:[#allocation7_spill] sm:$0xff] }
 0x2b6   : > { %v6803_v2 = vunpack.i.h.bf16 %v14775_v18  ;;  %v6802_v13 = vunpack.i.l.bf16 %v14775_v18  ;;  %14776 = vst [vmem:[#allocation81_spill] sm:$0xff] %v11655_v15  ;;  %14778 = vst [vmem:[#allocation84_spill] sm:$0xff] %v11659_v35  ;;  %v14779_v60 = vld [vmem:[#allocation130_spill] sm:$0xff]  ;;  %v6818_v62 = vunpack.i.h.bf16 %v14781_v45  ;;  %v6817_v39 = vunpack.i.l.bf16 %v14781_v45  ;;  %v14785_v18 = vld [vmem:[#allocation12_spill] sm:$0xff] }
 0x2b7   : > { %v11663_v57 = vsel %vm2840_vm6, %v14779_v60, %v6793_v40  ;;  %14782 = vst [vmem:[#allocation53_spill] sm:$0xff] %v11667_v51  ;;  %v11671_v53 = vsel %vm2840_vm6, %v14783_v16, %v6807_v59  ;;  %v11675_v15 = vsel %vm2840_vm6, %v14785_v18, %v6808_v20  ;;  %v14787_v61 = vpack.i.bf16 %v11202_v1, %v11189_v24  ;;  %v744_v40 = vld [vmem:[#allocation2 + $0x1f0] sm:$0xff]  ;;  %v14788_v60 = vld [vmem:[#allocation111_spill] sm:$0xff]  ;;  %v14793_v24 = vld [vmem:[#allocation16_spill] sm:$0xff] }
 0x2b8   : > { %14780 = vst [vmem:[#allocation42_spill] sm:$0xff] %v11663_v57  ;;  %14784 = vst [vmem:[#allocation147_spill] sm:$0xff] %v11671_v53  ;;  %v6813_v6 = vunpack.i.h.bf16 %v14788_v60  ;;  %v6812_v45 = vunpack.i.l.bf16 %v14788_v60  ;;  %v14789_v57 = vld [vmem:[#allocation79_spill] sm:$0xff]  ;;  %v14790_v59 = vpack.i.bf16 %v11206_v52, %v11204_v4  ;;  %v11695_v18 = vsel %vm2840_vm6, %v14793_v24, %v6803_v2  ;;  %v14798_v52 = vld [vmem:[#allocation18_spill] sm:$0xff] }
 0x2b9   : > { %14786 = vst [vmem:[#allocation20_spill] sm:$0xff] %v11675_v15  ;;  %7285 = vrot.lane.b32.xlu1 %v14787_v61, %s8089_s15  ;;  %v6828_v51 = vunpack.i.h.bf16 %v14789_v57  ;;  %v6827_v35 = vunpack.i.l.bf16 %v14789_v57  ;;  %v14791_v20 = vld [vmem:[#allocation15_spill] sm:$0xff]  ;;  %14794 = vst [vmem:[#allocation55_spill] sm:$0xff] %v11695_v18  ;;  %v14795_v61 = vld [vmem:[#allocation116_spill] sm:$0xff]  ;;  %v11699_v15 = vpop.permute.xlu1 %7005  ;;  %v11707_v4 = vsel %vm2840_vm6, %v14798_v52, %v6818_v62 }
 0x2ba   : > { %7280 = vrot.lane.b32.xlu0 %v14790_v59, %s8089_s15  ;;  %v11691_v16 = vsel %vm2840_vm6, %v14791_v20, %v6802_v13  ;;  %v6823_v1 = vunpack.i.h.bf16 %v14795_v61  ;;  %v6822_v60 = vunpack.i.l.bf16 %v14795_v61  ;;  %14796 = vst [vmem:[#allocation118_spill] sm:$0xff] %v11699_v15  ;;  %v14797_v57 = vld [vmem:[#allocation57_spill] sm:$0xff]  ;;  %v11709_v13 = vpop.permute.xlu0 %7000  ;;  %v14800_v59 = vld [vmem:[#allocation56_spill] sm:$0xff]  ;;  %v14804_v62 = vld [vmem:[#allocation19_spill] sm:$0xff] }
 0x2bb   : > { %14792 = vst [vmem:[#allocation140_spill] sm:$0xff] %v11691_v16  ;;  %v11703_v53 = vsel %vm2840_vm6, %v14797_v57, %v6817_v39  ;;  %14799 = vst [vmem:[#allocation43_spill] sm:$0xff] %v11709_v13  ;;  %v11712_v20 = vpack.i.bf16 %v14800_v59, %v744_v40  ;;  %v14801_v2 = vld [vmem:[#allocation80_spill] sm:$0xff]  ;;  %v14802_v61 = vld [vmem:[#allocation145_spill] sm:$0xff]  ;;  %v14803_v39 = vpack.i.bf16 %v11248_v58, %v11236_v42 }
 0x2bc   : > { %v6838_v24 = vunpack.i.h.bf16 %v14801_v2  ;;  %v6837_v18 = vunpack.i.l.bf16 %v14801_v2  ;;  %v6833_v16 = vunpack.i.h.bf16 %v14802_v61  ;;  %v6832_v15 = vunpack.i.l.bf16 %v14802_v61  ;;  %v14805_v52 = vld [vmem:[#allocation58_spill] sm:$0xff]  ;;  %v14806_v59 = vld [vmem:[#allocation141_spill] sm:$0xff]  ;;  %v14808_v58 = vld [vmem:[#allocation23_spill] sm:$0xff] }
 0x2bd   : > { %7295 = vrot.lane.b32.xlu1 %v14803_v39, %s8089_s15  ;;  %v11724_v57 = vsel %vm2840_vm6, %v14804_v62, %v6812_v45  ;;  %v11728_v40 = vsel %vm2840_vm6, %v14805_v52, %v6813_v6  ;;  %v11732_v2 = vsel %vm2840_vm6, %v14806_v59, %v6827_v35  ;;  %v11736_v61 = vsel %vm2840_vm6, %v11223_v54, %v6828_v51  ;;  %v14809_v39 = vld [vmem:[#allocation143_spill] sm:$0xff]  ;;  %v14810_v62 = vld [vmem:[#allocation82_spill] sm:$0xff]  ;;  %v11752_v59 = vpop.permute.xlu1 %7015 }
 0x2be   : > { %v14807_v42 = vpack.i.bf16 %v11252_v56, %v11250_v55  ;;  %v11744_v45 = vsel %vm2840_vm6, %v14808_v58, %v6822_v60  ;;  %v11748_v6 = vsel %vm2840_vm6, %v14809_v39, %v6823_v1  ;;  %v6848_v35 = vunpack.i.h.bf16 %v14810_v62  ;;  %14811 = vst [vmem:[#allocation44_spill] sm:$0xff] %v11752_v59  ;;  %v11754_v54 = vld [vmem:[#allocation2 + $0x2e0] sm:$0xff]  ;;  %v14814_v60 = vld [vmem:[#allocation26_spill] sm:$0xff]  ;;  %v14816_v1 = vld [vmem:[#allocation129_spill] sm:$0xff] }
 0x2bf   : > { %v6847_v52 = vunpack.i.l.bf16 %v14810_v62  ;;  %v14812_v51 = vld [vmem:[#allocation83_spill] sm:$0xff]  ;;  %v11762_v58 = vsel %vm2840_vm6, %v14814_v60, %v6837_v18  ;;  %v11766_v39 = vsel %vm2840_vm6, %v14816_v1, %v6838_v24  ;;  %v11770_v62 = vsel %vm2840_vm6, %v11264_v17, %v6832_v15  ;;  %v14826_v1 = vld [vmem:[#allocation146_spill] sm:$0xff] }
 0x2c0   : > { %7290 = vrot.lane.b32.xlu0 %v14807_v42, %s8089_s15  ;;  %v6843_v13 = vunpack.i.h.bf16 %v14812_v51  ;;  %v6842_v56 = vunpack.i.l.bf16 %v14812_v51  ;;  %v11758_v42 = vpop.permute.xlu0 %7010  ;;  %14815 = vst [vmem:[#allocation119_spill] sm:$0xff] %v11762_v58  ;;  %14817 = vst [vmem:[#allocation59_spill] sm:$0xff] %v11766_v39  ;;  %v11774_v59 = vsel %vm2840_vm6, %v11273_v29, %v6833_v16  ;;  %v14820_v51 = vpack.i.bf16 %v11282_v12, %v11280_v32  ;;  %v14823_v15 = vld [vmem:[#allocation27_spill] sm:$0xff]  ;;  %v14890_v58 = vld [vmem:[#allocation38_spill] sm:$0xff] }
 0x2c1   : > { %14813 = vst [vmem:[#allocation117_spill] sm:$0xff] %v11758_v42  ;;  %14818 = vst [vmem:[#allocation144_spill] sm:$0xff] %v11770_v62  ;;  %v14821_v42 = vld [vmem:[#allocation46_spill] sm:$0xff]  ;;  %v14822_v24 = vpack.i.bf16 %v11297_v9, %v11295_v49  ;;  %v11790_v29 = vsel %vm2840_vm6, %v14823_v15, %v6847_v52  ;;  %v11794_v16 = vsel %vm2840_vm6, %v11301_v5, %v6848_v35  ;;  %v11798_v62 = vpop.permute.xlu1 %7025  ;;  %v14830_v52 = vld [vmem:[#allocation88_spill] sm:$0xff] }
 0x2c2   : > { %14819 = vst [vmem:[#allocation85_spill] sm:$0xff] %v11774_v59  ;;  %7305 = vrot.lane.b32.xlu1 %v14820_v51, %s8089_s15  ;;  %v6858_v18 = vunpack.i.h.bf16 %v14821_v42  ;;  %v6857_v60 = vunpack.i.l.bf16 %v14821_v42  ;;  %14824 = vst [vmem:[#allocation86_spill] sm:$0xff] %v11790_v29  ;;  %v6853_v51 = vunpack.i.h.bf16 %v14826_v1  ;;  %v6852_v42 = vunpack.i.l.bf16 %v14826_v1  ;;  %v14832_v35 = vld [vmem:[#allocation91_spill] sm:$0xff] }
 0x2c3   : > { %14825 = vst [vmem:[#allocation87_spill] sm:$0xff] %v11794_v16  ;;  %14827 = vst [vmem:[#allocation61_spill] sm:$0xff] %v11798_v62  ;;  %v11802_v49 = vsel %vm2840_vm6, %v11305_v11, %v6842_v56  ;;  %v6868_v15 = vunpack.i.h.bf16 %v14830_v52  ;;  %v6867_v17 = vunpack.i.l.bf16 %v14830_v52  ;;  %v6863_v29 = vunpack.i.h.bf16 %v14832_v35  ;;  %v14836_v56 = vld [vmem:[#allocation93_spill] sm:$0xff] }
 0x2c4   : > { %7300 = vrot.lane.b32.xlu0 %v14822_v24, %s8089_s15  ;;  %14828 = vst [vmem:[#allocation32_spill] sm:$0xff] %v11802_v49  ;;  %v11806_v24 = vsel %vm2840_vm6, %v11315_v7, %v6843_v13  ;;  %v11810_v5 = vpop.permute.xlu0 %7020  ;;  %v6862_v1 = vunpack.i.l.bf16 %v14832_v35  ;;  %v14833_v11 = vpack.i.bf16 %v11057_v41, %v11011_v33  ;;  %v11820_v7 = vsel %vm2840_vm6, %v11327_v50, %v6857_v60 }
 0x2c5   : > { %14829 = vst [vmem:[#allocation62_spill] sm:$0xff] %v11806_v24  ;;  %14831 = vst [vmem:[#allocation28_spill] sm:$0xff] %v11810_v5  ;;  %v11824_v13 = vsel %vm2840_vm6, %v11331_v47, %v6858_v18  ;;  %v6878_v52 = vunpack.i.h.bf16 %v14836_v56  ;;  %v6877_v49 = vunpack.i.l.bf16 %v14836_v56  ;;  %v14837_v35 = vpack.i.bf16 %v11000_v3, %v11015_v8  ;;  %v11840_v50 = vpop.permute.xlu1 %7035  ;;  %v14843_v3 = vld [vmem:[#allocation106_spill] sm:$0xff]  ;;  %v14854_v56 = vld [vmem:[#allocation24_spill] sm:$0xff] }
 0x2c6   : > { %7315 = vrot.lane.b32.xlu1 %v14833_v11, %s8090_s5  ;;  %14834 = vst [vmem:[#allocation90_spill] sm:$0xff] %v11820_v7  ;;  %14835 = vst [vmem:[#allocation66_spill] sm:$0xff] %v11824_v13  ;;  %v11834_v33 = vsel %vm2840_vm6, %v11335_v25, %v6852_v42  ;;  %v11838_v41 = vsel %vm2840_vm6, %v11343_v23, %v6853_v51  ;;  %v11844_v47 = vsel %vm2840_vm6, %v11354_v10, %v6867_v17  ;;  %v14847_v10 = vld [vmem:[#allocation29_spill] sm:$0xff] }
 0x2c7   : > { %14838 = vst [vmem:[#allocation67_spill] sm:$0xff] %v11834_v33  ;;  %14839 = vst [vmem:[#allocation31_spill] sm:$0xff] %v11838_v41  ;;  %v11848_v18 = vsel %vm2840_vm6, %v11358_v34, %v6868_v15  ;;  %v6873_v8 = vunpack.i.h.bf16 %v14843_v3  ;;  %v6872_v60 = vunpack.i.l.bf16 %v14843_v3  ;;  %v11856_v23 = vsel %vm2840_vm6, %v11370_v43, %v6862_v1  ;;  %v14851_v15 = vld [vmem:[#allocation21_spill] sm:$0xff] }
 0x2c8   : > { %7310 = vrot.lane.b32.xlu0 %v14837_v35, %s8090_s5  ;;  %14840 = vst [vmem:[#allocation123_spill] sm:$0xff] %v11840_v50  ;;  %14841 = vst [vmem:[#allocation69_spill] sm:$0xff] %v11844_v47  ;;  %v11852_v25 = vpop.permute.xlu0 %7030  ;;  %v11860_v51 = vsel %vm2840_vm6, %v11374_v31, %v6863_v29  ;;  %v14848_v17 = vpack.i.bf16 %v14847_v10, %v11044_v38  ;;  %v11868_v34 = vsel %vm2840_vm6, %v11389_v14, %v6877_v49  ;;  %v14853_v29 = vld [vmem:[#allocation100_spill] sm:$0xff]  ;;  %v14874_v33 = vld [vmem:[#allocation65_spill] sm:$0xff] }
 0x2c9   : > { %14842 = vst [vmem:[#allocation92_spill] sm:$0xff] %v11848_v18  ;;  %14844 = vst [vmem:[#allocation94_spill] sm:$0xff] %v11852_v25  ;;  %v11872_v42 = vsel %vm2840_vm6, %v11393_v26, %v6878_v52  ;;  %v6888_v43 = vunpack.i.h.bf16 %v14851_v15  ;;  %v6887_v1 = vunpack.i.l.bf16 %v14851_v15  ;;  %v14852_v31 = vpack.i.bf16 %v11042_v37, %v11059_v19  ;;  %v11884_v35 = vpop.permute.xlu1 %7045  ;;  %v14856_v26 = vld [vmem:[#allocation128_spill] sm:$0xff]  ;;  %v14859_v37 = vld [vmem:[#allocation25_spill] sm:$0xff] }
 0x2ca   : > { %14845 = vst [vmem:[#allocation39_spill] sm:$0xff] %v11856_v23  ;;  %14846 = vst [vmem:[#allocation148_spill] sm:$0xff] %v11860_v51  ;;  %7325 = vrot.lane.b32.xlu1 %v14848_v17, %s8090_s5  ;;  %v6883_v38 = vunpack.i.h.bf16 %v14853_v29  ;;  %v6882_v11 = vunpack.i.l.bf16 %v14853_v29  ;;  %v6918_v14 = vunpack.i.h.bf16 %v14854_v56  ;;  %v6917_v49 = vunpack.i.l.bf16 %v14854_v56  ;;  %v14861_v15 = vld [vmem:[#allocation63_spill] sm:$0xff]  ;;  %v14869_v23 = vld [vmem:[#allocation36_spill] sm:$0xff] }
 0x2cb   : > { %14849 = vst [vmem:[#allocation95_spill] sm:$0xff] %v11868_v34  ;;  %14850 = vst [vmem:[#allocation96_spill] sm:$0xff] %v11872_v42  ;;  %v11888_v52 = vsel %vm2840_vm6, %v14856_v26, %v6872_v60  ;;  %v11892_v3 = vsel %vm2840_vm6, %v11415_v22, %v6873_v8  ;;  %v6913_v19 = vunpack.i.h.bf16 %v14859_v37  ;;  %v6912_v10 = vunpack.i.l.bf16 %v14859_v37  ;;  %v14862_v56 = vld [vmem:[#allocation35_spill] sm:$0xff]  ;;  %v14863_v34 = vld [vmem:[#allocation34_spill] sm:$0xff] }
 0x2cc   : > { %7320 = vrot.lane.b32.xlu0 %v14852_v31, %s8090_s5  ;;  %14855 = vst [vmem:[#allocation97_spill] sm:$0xff] %v11884_v35  ;;  %14857 = vst [vmem:[#allocation112_spill] sm:$0xff] %v11888_v52  ;;  %v11896_v17 = vpop.permute.xlu0 %7040  ;;  %v6928_v31 = vunpack.i.h.bf16 %v14861_v15  ;;  %v6927_v29 = vunpack.i.l.bf16 %v14861_v15  ;;  %v11904_v60 = vsel %vm2840_vm6, %v14863_v34, %v6887_v1  ;;  %v11908_v22 = vsel %vm2840_vm6, %v11435_v36, %v6888_v43  ;;  %v14866_v8 = vld [vmem:[#allocation64_spill] sm:$0xff]  ;;  %v14867_v52 = vld [vmem:[#allocation51_spill] sm:$0xff] }
 0x2cd   : > { %14858 = vst [vmem:[#allocation4_spill] sm:$0xff] %v11892_v3  ;;  %14860 = vst [vmem:[#allocation98_spill] sm:$0xff] %v11896_v17  ;;  %v6923_v26 = vunpack.i.h.bf16 %v14866_v8  ;;  %v6922_v37 = vunpack.i.l.bf16 %v14866_v8  ;;  %v11916_v15 = vsel %vm2840_vm6, %v11439_v44, %v6882_v11  ;;  %v11920_v47 = vsel %vm2840_vm6, %v14869_v23, %v6883_v38  ;;  %v14871_v34 = vld [vmem:[#allocation121_spill] sm:$0xff]  ;;  %v11926_v36 = vpop.permute.xlu1 %7055  ;;  %v14873_v43 = vld [vmem:[#allocation120_spill] sm:$0xff] }
 0x2ce   : > { %7335 = vrot.lane.b32.xlu1 %v14862_v56, %s8090_s5  ;;  %14864 = vst [vmem:[#allocation70_spill] sm:$0xff] %v11904_v60  ;;  %14865 = vst [vmem:[#allocation37_spill] sm:$0xff] %v11908_v22  ;;  %v11924_v1 = vsel %vm2905_vm7, %v14871_v34, %v6917_v49  ;;  %v2909_v8 = vsel %vm2905_vm7, %v14873_v43, %v6918_v14  ;;  %v2906_v60 = vsel %vm2905_vm7, %v11539_v48, %v6912_v10  ;;  %v14876_v49 = vld [vmem:[#allocation41_spill] sm:$0xff]  ;;  %v14877_v14 = vld [vmem:[#allocation68_spill] sm:$0xff] }
 0x2cf   : > { %14868 = vst [vmem:[#allocation99_spill] sm:$0xff] %v11916_v15  ;;  %14870 = vst [vmem:[#allocation72_spill] sm:$0xff] %v11920_v47  ;;  %v6938_v44 = vunpack.i.h.bf16 %v14874_v33  ;;  %v6937_v11 = vunpack.i.l.bf16 %v14874_v33  ;;  %v2907_v23 = vsel %vm2905_vm7, %v11543_v28, %v6913_v19  ;;  %v11940_v38 = vsel %vm2905_vm7, %v11551_v63, %v6927_v29  ;;  %v14878_v10 = vld [vmem:[#allocation33_spill] sm:$0xff]  ;;  %v14879_v33 = vld [vmem:[#allocation6_spill] sm:$0xff] }
 0x2d0   : > { %7330 = vrot.lane.b32.xlu0 %v14867_v52, %s8090_s5  ;;  %14872 = vst [vmem:[#allocation107_spill] sm:$0xff] %v11926_v36  ;;  %v11934_v15 = vpop.permute.xlu0 %7050  ;;  %v11944_v34 = vsel %vm2905_vm7, %v14876_v49, %v6928_v31  ;;  %v6933_v43 = vunpack.i.h.bf16 %v14877_v14  ;;  %v6932_v48 = vunpack.i.l.bf16 %v14877_v14  ;;  %v14880_v7 = vpack.i.bf16 %v14878_v10, %v14879_v33  ;;  %v14882_v19 = vld [vmem:[#allocation114_spill] sm:$0xff]  ;;  %v14889_v22 = vld [vmem:[#allocation48_spill] sm:$0xff]  ;;  %v14898_v25 = vld [vmem:[#allocation3_spill] sm:$0xff] }
 0x2d1   : > { %14875 = vst [vmem:[#allocation101_spill] sm:$0xff] %v11934_v15  ;;  %v14881_v15 = vld [vmem:[#allocation125_spill] sm:$0xff]  ;;  %v11958_v63 = vsel %vm2905_vm7, %v14882_v19, %v6923_v26  ;;  %v14883_v29 = vld [vmem:[#allocation30_spill] sm:$0xff]  ;;  %v6953_v3 = vunpack.i.h.bf16 %v14890_v58  ;;  %v6952_v42 = vunpack.i.l.bf16 %v14890_v58  ;;  %v14901_v18 = vld [vmem:[#allocation147_spill] sm:$0xff] }
 0x2d2   : > { %7345 = vrot.lane.b32.xlu1 %v14880_v7, %s8090_s5  ;;  %v11954_v28 = vsel %vm2905_vm7, %v14881_v15, %v6922_v37  ;;  %v6948_v31 = vunpack.i.h.bf16 %v14883_v29  ;;  %v6947_v49 = vunpack.i.l.bf16 %v14883_v29  ;;  %v14884_v36 = vld [vmem:[#allocation110_spill] sm:$0xff]  ;;  %v14886_v7 = vld [vmem:[#allocation131_spill] sm:$0xff]  ;;  %v11968_v15 = vpop.permute.xlu1 %7065  ;;  %v11976_v29 = vsel %vm2905_vm7, %v14889_v22, %v6938_v44 }
 0x2d3   : > { %v14885_v14 = vld [vmem:[#allocation10_spill] sm:$0xff]  ;;  %v6958_v33 = vunpack.i.h.bf16 %v14886_v7  ;;  %v6957_v37 = vunpack.i.l.bf16 %v14886_v7  ;;  %14887 = vst [vmem:[#allocation102_spill] sm:$0xff] %v11968_v15  ;;  %v11984_v7 = vsel %vm2905_vm7, %v11599_v27, %v6932_v48  ;;  %v14892_v15 = vld [vmem:[#allocation127_spill] sm:$0xff]  ;;  %v14896_v27 = vld [vmem:[#allocation76_spill] sm:$0xff] }
 0x2d4   : > { %7340 = vrot.lane.b32.xlu0 %v14884_v36, %s8090_s5  ;;  %v6943_v47 = vunpack.i.h.bf16 %v14885_v14  ;;  %v6942_v10 = vunpack.i.l.bf16 %v14885_v14  ;;  %v14888_v26 = vld [vmem:[#allocation78_spill] sm:$0xff]  ;;  %v11980_v14 = vpop.permute.xlu0 %7060  ;;  %v11988_v17 = vsel %vm2905_vm7, %v14892_v15, %v6933_v43  ;;  %v14894_v22 = vld [vmem:[#allocation115_spill] sm:$0xff]  ;;  %v11996_v58 = vsel %vm2905_vm7, %v11621_v21, %v6947_v49 }
 0x2d5   : > { %v11972_v19 = vsel %vm2905_vm7, %v14888_v26, %v6937_v11  ;;  %14891 = vst [vmem:[#allocation73_spill] sm:$0xff] %v11980_v14  ;;  %v14893_v11 = vld [vmem:[#allocation17_spill] sm:$0xff]  ;;  %v14895_v44 = vld [vmem:[#allocation134_spill] sm:$0xff]  ;;  %v6963_v48 = vunpack.i.h.bf16 %v14896_v27  ;;  %v6962_v43 = vunpack.i.l.bf16 %v14896_v27  ;;  %v12016_v21 = vsel %vm2905_vm7, %v11647_v0, %v6957_v37  ;;  %v14902_v37 = vld [vmem:[#allocation20_spill] sm:$0xff] }
 0x2d6   : > { %v6968_v26 = vunpack.i.h.bf16 %v14893_v11  ;;  %v6967_v35 = vunpack.i.l.bf16 %v14893_v11  ;;  %7355 = vrot.lane.b32.xlu1 %v14894_v22, %s8090_s5  ;;  %v12000_v14 = vsel %vm2905_vm7, %v14895_v44, %v6948_v31  ;;  %v14897_v15 = vld [vmem:[#allocation14_spill] sm:$0xff]  ;;  %v12008_v11 = vsel %vm2905_vm7, %v11635_v46, %v6942_v10  ;;  %v7076_v49 = vpop.permute.xlu1 %7075  ;;  %v14899_v44 = vld [vmem:[#allocation84_spill] sm:$0xff] }
 0x2d7   : > { %v12012_v50 = vsel %vm2905_vm7, %v14898_v25, %v6943_v47  ;;  %v12020_v31 = vsel %vm2905_vm7, %v11651_v30, %v6958_v33  ;;  %v12024_v27 = vsel %vm2905_vm7, %v14899_v44, %v6952_v42  ;;  %v14900_v46 = vld [vmem:[#allocation42_spill] sm:$0xff]  ;;  %v7078_v47 = vunpack.i.h.bf16 %v7076_v49  ;;  %v14903_v42 = vld [vmem:[#allocation139_spill] sm:$0xff]  ;;  %v14904_v44 = vld [vmem:[#allocation60_spill] sm:$0xff] }
 0x2d8   : > { %7350 = vrot.lane.b32.xlu0 %v14897_v15, %s8090_s5  ;;  %v12028_v10 = vsel %vm2905_vm7, %v14900_v46, %v6953_v3  ;;  %v7077_v25 = vunpack.i.l.bf16 %v7076_v49  ;;  %v7071_v51 = vpop.permute.xlu0 %7070  ;;  %v12032_v0 = vsel %vm2905_vm7, %v14901_v18, %v6967_v35  ;;  %v12036_v30 = vsel %vm2905_vm7, %v14902_v37, %v6968_v26  ;;  %v14906_v3 = vld [vmem:[#allocation140_spill] sm:$0xff]  ;;  %v14907_v49 = vld [vmem:[#allocation55_spill] sm:$0xff] }
 0x2d9   : > { %v7073_v33 = vunpack.i.h.bf16 %v7071_v51  ;;  %v7072_v5 = vunpack.i.l.bf16 %v7071_v51  ;;  %v14905_v62 = vpack.i.bf16 %v14903_v42, %v14904_v44  ;;  %v12044_v46 = vsel %vm2905_vm7, %v14906_v3, %v6962_v43  ;;  %v14908_v18 = vld [vmem:[#allocation108_spill] sm:$0xff]  ;;  %v14912_v44 = vld [vmem:[#allocation5_spill] sm:$0xff] }
 0x2da   : > { %v12048_v41 = vsel %vm2905_vm7, %v14907_v49, %v6963_v48  ;;  %v6978_v35 = vunpack.i.h.bf16 %v14908_v18  ;;  %v14909_v26 = vld [vmem:[#allocation40_spill] sm:$0xff]  ;;  %v12054_v51 = vsel %vm2970_vm8, %v2909_v8, %v7078_v47  ;;  %v6977_v37 = vunpack.i.l.bf16 %v14908_v18  ;;  %v7086_v42 = vpop.permute.xlu1 %7085 }
 0x2db   : > { %7365 = vrot.lane.b32.xlu1 %v14905_v62, %s8090_s5  ;;  %14910 = vst [vmem:[#allocation49_spill] sm:$0xff] %v12054_v51  ;;  %v12058_v62 = vsel %vm2970_vm8, %v2907_v23, %v7073_v33  ;;  %v2971_v43 = vsel %vm2970_vm8, %v2906_v60, %v7072_v5  ;;  %v2973_v48 = vsel %vm2970_vm8, %v11924_v1, %v7077_v25  ;;  %v7088_v49 = vunpack.i.h.bf16 %v7086_v42  ;;  %v14913_v18 = vld [vmem:[#allocation124_spill] sm:$0xff]  ;;  %v14915_v25 = vld [vmem:[#allocation47_spill] sm:$0xff] }
 0x2dc   : > { %7360 = vrot.lane.b32.xlu0 %v14909_v26, %s8090_s5  ;;  %14911 = vst [vmem:[#allocation50_spill] sm:$0xff] %v12058_v62  ;;  %v7087_v13 = vunpack.i.l.bf16 %v7086_v42  ;;  %v7081_v24 = vpop.permute.xlu0 %7080  ;;  %v3249_v8 = vpack.c.bf16 %v12054_v51, %v12058_v62  ;;  %v3101_v23 = vrot.slane %v12058_v62, 7  ;;  %v3104_v5 = vrot.slane %v12054_v51, 7 }
 0x2dd   : > { %v7083_v47 = vunpack.i.h.bf16 %v7081_v24  ;;  %v7082_v16 = vunpack.i.l.bf16 %v7081_v24  ;;  %v12074_v1 = vsel %vm2970_vm8, %v11944_v34, %v7088_v49  ;;  %v3100_v24 = vrot.slane %v2971_v43, 7 }
 0x2de   : > { %v2977_v60 = vsel %vm2970_vm8, %v11940_v38, %v7087_v13  ;;  %14914 = vst [vmem:[#allocation136_spill] sm:$0xff] %v12074_v1  ;;  %5716 = vmatprep.mubr.msk.bf16.mxu1 %vm3286_vm9, %v3249_v8  ;;  %v3103_v33 = vrot.slane %v2973_v48, 7  ;;  %v12081_v42 = vsel %vm2905_vm7, %v11703_v53, %v6977_v37  ;;  %v6972_v3 = vunpack.i.l.bf16 %v14912_v44  ;;  %v7096_v38 = vpop.permute.xlu1 %7095 }
 0x2df   : > { %7375 = vrot.lane.b32.xlu1 %v14913_v18, %s8090_s5  ;;  %v3109_v51 = vrot.slane %v2977_v60, 7  ;;  %v2975_v13 = vsel %vm2970_vm8, %v11954_v28, %v7082_v16  ;;  %v3110_v34 = vrot.slane %v12074_v1, 7  ;;  %v12089_v49 = vsel %vm2970_vm8, %v11958_v63, %v7083_v47  ;;  %v14917_v60 = vld [vmem:[#allocation77_spill] sm:$0xff] }
 0x2e0   : > { %7370 = vrot.lane.b32.xlu0 %v14915_v25, %s8090_s5  ;;  %14916 = vst [vmem:[#allocation52_spill] sm:$0xff] %v12089_v49  ;;  %v7098_v8 = vunpack.i.h.bf16 %v7096_v38  ;;  %v7097_v43 = vunpack.i.l.bf16 %v7096_v38  ;;  %v7091_v48 = vpop.permute.xlu0 %7090  ;;  %v3106_v62 = vrot.slane %v2975_v13, 7  ;;  %v3107_v53 = vrot.slane %v12089_v49, 7 }
 0x2e1   : > { %v7093_v37 = vunpack.i.h.bf16 %v7091_v48  ;;  %v7092_v59 = vunpack.i.l.bf16 %v7091_v48  ;;  %v14918_v39 = vpack.i.bf16 %v14917_v60, %v11282_v12  ;;  %v3102_v63 = vsel %vm3099_vm10, %v3100_v24, %v3101_v23  ;;  %v14924_v60 = vld [vmem:[#allocation11_spill] sm:$0xff] }
 0x2e2   : > { %v2981_v16 = vsel %vm2970_vm8, %v11972_v19, %v7097_v43  ;;  %v12100_v28 = vsel %vm2970_vm8, %v11976_v29, %v7098_v8  ;;  %v3105_v47 = vsel %vm3099_vm10, %v3103_v33, %v3104_v5  ;;  %v14920_v13 = vpack.i.bf16 %v11280_v32, %v11297_v9  ;;  %v7106_v23 = vpop.permute.xlu1 %7105 }
 0x2e3   : > { %7385 = vrot.lane.b32.xlu1 %v14918_v39, %s8090_s5  ;;  %14919 = vst [vmem:[#allocation74_spill] sm:$0xff] %v12100_v28  ;;  %v12110_v12 = vsel %vm2905_vm7, %v11707_v4, %v6978_v35  ;;  %v12114_v39 = vsel %vm2905_vm7, %v11724_v57, %v6972_v3  ;;  %v3115_v19 = vrot.slane %v2981_v16, 7  ;;  %v2979_v29 = vsel %vm2970_vm8, %v11984_v7, %v7092_v59 }
 0x2e4   : > { %7380 = vrot.lane.b32.xlu0 %v14920_v13, %s8090_s5  ;;  %v3116_v5 = vrot.slane %v12100_v28, 7  ;;  %v12121_v24 = vsel %vm2970_vm8, %v11988_v17, %v7093_v37  ;;  %v3228_v32 = vpack.c.bf16 %v3105_v47, %v3102_v63  ;;  %v3250_v9 = vpack.c.bf16 %v12074_v1, %v12089_v49  ;;  %v7101_v4 = vpop.permute.xlu0 %7100  ;;  %v14923_v37 = vld [vmem:[#allocation104_spill] sm:$0xff] }
 0x2e5   : > { %14921 = vst [vmem:[#allocation13_spill] sm:$0xff] %v12121_v24  ;;  %v3112_v35 = vrot.slane %v2979_v29, 7  ;;  %v3113_v57 = vrot.slane %v12121_v24, 7  ;;  %v7108_v3 = vunpack.i.h.bf16 %v7106_v23  ;;  %v7107_v33 = vunpack.i.l.bf16 %v7106_v23  ;;  %v7988_v29 = vld [vmem:[%s13676_s3] sm:$0xff]   ;;  %v12482_v1 = vld [vmem:[#allocation2 + $0x208] sm:$0xff] }
 0x2e6   : > { %5754 = vmatprep.mubr.msk.bf16.mxu0 %vm3286_vm9, %v3228_v32  ;;  %5717 = vmatmul.mubr.msk.bf16.vlgmr.msra.gmra.mrb[0].mxu1 %vm3286_vm9, %v3250_v9  ;;  %v7103_v59 = vunpack.i.h.bf16 %v7101_v4  ;;  %v7102_v17 = vunpack.i.l.bf16 %v7101_v4  ;;  %v3108_v7 = vsel %vm3099_vm10, %v3106_v62, %v3107_v53  ;;  %v3111_v38 = vsel %vm3099_vm10, %v3109_v51, %v3110_v34  ;;  %v7116_v47 = vpop.permute.xlu1 %7115 }
 0x2e7   : > { %7395 = vrot.lane.b32.xlu1 %v14867_v52, %s8091_s6  ;;  %v2985_v8 = vsel %vm2970_vm8, %v11996_v58, %v7107_v33  ;;  %v12136_v43 = vsel %vm2970_vm8, %v12000_v14, %v7108_v3  ;;  %v3229_v48 = vpack.c.bf16 %v3111_v38, %v3108_v7  ;;  %v14925_v16 = vpack.i.bf16 %v14923_v37, %v14924_v60  ;;  %v14927_v58 = vld [vmem:[#allocation132_spill] sm:$0xff] }
 0x2e8   : > { %14922 = vst [vmem:[#allocation130_spill] sm:$0xff] %v12136_v43  ;;  %v3251_v63 = vpack.c.bf16 %v12100_v28, %v12121_v24  ;;  %v14926_v62 = vunpack.i.h.bf16 %v14912_v44  ;;  %v6988_v34 = vunpack.i.h.bf16 %v14927_v58  ;;  %v3121_v14 = vrot.slane %v2985_v8, 7  ;;  %v7111_v13 = vpop.permute.xlu0 %7110  ;;  %5827 = vmatpush3.bf16.msra.mxu1 %v7988_v29  ;;  %v7989_v33 = vld [vmem:[%s13676_s3 + $0x8] sm:$0xff]   ;;  %v14930_v8 = vld [vmem:[#allocation126_spill] sm:$0xff] }
 0x2e9   : > { %7390 = vrot.lane.b32.xlu0 %v14925_v16, %s8091_s6  ;;  %v2983_v53 = vsel %vm2970_vm8, %v12008_v11, %v7102_v17  ;;  %v3122_v23 = vrot.slane %v12136_v43, 7  ;;  %v12159_v44 = vsel %vm2970_vm8, %v12012_v50, %v7103_v59  ;;  %5755 = vmatmul.mubr.msk.bf16.vlgmr.msra.gmra.mrb[0].mxu0 %vm3286_vm9, %v3229_v48  ;;  %v7117_v32 = vunpack.i.l.bf16 %v7116_v47  ;;  %v12470_v24 = vld [vmem:[%s13676_s3 + $0x38] ss:$0 sps:$4 sm:$0x33]  }
 0x2ea   : > { %v12148_v51 = vsel %vm2905_vm7, %v11728_v40, %v14926_v62  ;;  %14928 = vst [vmem:[#allocation109_spill] sm:$0xff] %v12159_v44  ;;  %5720 = vmatprep.mubr.msk.bf16.mxu1 %vm3286_vm9, %v3251_v63  ;;  %v7118_v40 = vunpack.i.h.bf16 %v7116_v47  ;;  %v3118_v9 = vrot.slane %v2983_v53, 7  ;;  %v3119_v11 = vrot.slane %v12159_v44, 7  ;;  %5825 = vmatprep.subr.bf16.mxu1 %v7989_v33  ;;  %14985 = vst [vmem:[#allocation27_spill] sm:$0xff] %v12470_v24 }
 0x2eb   : > { %v7113_v4 = vunpack.i.h.bf16 %v7111_v13  ;;  %v7112_v3 = vunpack.i.l.bf16 %v7111_v13  ;;  %7405 = vrot.lane.b32.xlu1 %v14884_v36, %s8091_s6  ;;  %v2989_v50 = vsel %vm2970_vm8, %v12016_v21, %v7117_v32  ;;  %v3114_v17 = vsel %vm3099_vm10, %v3112_v35, %v3113_v57  ;;  %v7126_v36 = vpop.permute.xlu1 %7125  ;;  %v7990_v57 = vld [vmem:[%s13676_s3 + $0x10] ss:$0 sps:$4 sm:$0x33]  }
 0x2ec   : > { %v12173_v59 = vsel %vm2970_vm8, %v12020_v31, %v7118_v40  ;;  %v3117_v7 = vsel %vm3099_vm10, %v3115_v19, %v3116_v5  ;;  %v6987_v38 = vunpack.i.l.bf16 %v14927_v58  ;;  %v6983_v48 = vunpack.i.h.bf16 %v14930_v8  ;;  %v7121_v60 = vpop.permute.xlu0 %7120  ;;  %5828 = vmatpush3.bf16.msra.mxu1 %v7989_v33 }
 0x2ed   : > { %14929 = vst [vmem:[#allocation7_spill] sm:$0xff] %v12173_v59  ;;  %7400 = vrot.lane.b32.xlu0 %v14862_v56, %s8091_s6  ;;  %v3127_v37 = vrot.slane %v2989_v50, 7  ;;  %v2987_v21 = vsel %vm2970_vm8, %v12024_v27, %v7112_v3  ;;  %v3128_v31 = vrot.slane %v12173_v59, 7  ;;  %v12186_v35 = vsel %vm2970_vm8, %v12028_v10, %v7113_v4  ;;  %5896 = vmatprep.subr.msk.bf16.mxu1 %vm3335_vm4, %v7990_v57 }
 0x2ee   : > { %14931 = vst [vmem:[#allocation12_spill] sm:$0xff] %v12186_v35  ;;  %v3230_v19 = vpack.c.bf16 %v3117_v7, %v3114_v17  ;;  %v3252_v5 = vpack.c.bf16 %v12136_v43, %v12159_v44  ;;  %v3124_v16 = vrot.slane %v2987_v21, 7  ;;  %v3125_v27 = vrot.slane %v12186_v35, 7  ;;  %v7876_v43 = vld [vmem:[%s13676_s3 + $0x30] sm:$0xff]  }
 0x2ef   : > { %v7128_v63 = vunpack.i.h.bf16 %v7126_v36  ;;  %v7127_v47 = vunpack.i.l.bf16 %v7126_v36  ;;  %7415 = vrot.lane.b32.xlu1 %v14897_v15, %s8091_s6  ;;  %v7123_v10 = vunpack.i.h.bf16 %v7121_v60  ;;  %v7122_v62 = vunpack.i.l.bf16 %v7121_v60  ;;  %v7136_v29 = vpop.permute.xlu1 %7135 }
 0x2f0   : > { %5758 = vmatprep.mubr.msk.bf16.mxu0 %vm3286_vm9, %v3230_v19  ;;  %5721 = vmatmul.mubr.msk.bf16.gmra.mrb[4].mxu1 %vm3286_vm9, %v3252_v5  ;;  %v3120_v53 = vsel %vm3099_vm10, %v3118_v9, %v3119_v11  ;;  %v3123_v13 = vsel %vm3099_vm10, %v3121_v14, %v3122_v23  ;;  %v3253_v3 = vpack.c.bf16 %v12173_v59, %v12186_v35  ;;  %v7131_v33 = vpop.permute.xlu0 %7130  ;;  %v6982_v14 = vunpack.i.l.bf16 %v14930_v8  ;;  %v14933_v11 = vld [vmem:[#allocation71_spill] sm:$0xff] }
 0x2f1   : > { %v2993_v40 = vsel %vm2970_vm8, %v12032_v0, %v7127_v47  ;;  %v12205_v32 = vsel %vm2970_vm8, %v12036_v30, %v7128_v63  ;;  %v3231_v4 = vpack.c.bf16 %v3123_v13, %v3120_v53  ;;  %7410 = vrot.lane.b32.xlu0 %v11712_v20, %s8091_s6  ;;  %v2936_v9 = vsel %vm2905_vm7, %v11732_v2, %v6987_v38 }
 0x2f2   : > { %14932 = vst [vmem:[#allocation111_spill] sm:$0xff] %v12205_v32  ;;  %v3133_v23 = vrot.slane %v2993_v40, 7  ;;  %v2991_v0 = vsel %vm2970_vm8, %v12044_v46, %v7122_v62  ;;  %5829 = vmatpush3.bf16.msra.mxu1 %v14933_v11  ;;  %v3134_v30 = vrot.slane %v12205_v32, 7  ;;  %v12220_v50 = vsel %vm2970_vm8, %v12048_v41, %v7123_v10  ;;  %5724 = vmatprep.mubr.msk.bf16.mxu1 %vm3286_vm9, %v3253_v3  ;;  %v14939_v3 = vld [vmem:[#allocation81_spill] sm:$0xff] }
 0x2f3   : > { %14934 = vst [vmem:[#allocation79_spill] sm:$0xff] %v12220_v50  ;;  %5759 = vmatmul.mubr.msk.bf16.gmra.mrb[4].mxu0 %vm3286_vm9, %v3231_v4  ;;  %v7138_v17 = vunpack.i.h.bf16 %v7136_v29  ;;  %v7137_v2 = vunpack.i.l.bf16 %v7136_v29  ;;  %v3130_v7 = vrot.slane %v2991_v0, 7  ;;  %v3131_v36 = vrot.slane %v12220_v50, 7  ;;  %7425 = vrot.lane.b32.xlu1 %v14909_v26, %s8091_s6  ;;  %v7146_v46 = vpop.permute.xlu1 %7145  ;;  %v14941_v0 = vld [vmem:[#allocation103_spill] sm:$0xff] }
 0x2f4   : > { %v7133_v38 = vunpack.i.h.bf16 %v7131_v33  ;;  %v7132_v21 = vunpack.i.l.bf16 %v7131_v33  ;;  %v3126_v19 = vsel %vm3099_vm10, %v3124_v16, %v3125_v27  ;;  %v3129_v5 = vsel %vm3099_vm10, %v3127_v37, %v3128_v31  ;;  %v7141_v57 = vpop.permute.xlu0 %7140 }
 0x2f5   : > { %v2997_v60 = vsel %vm2970_vm8, %v12081_v42, %v7137_v2  ;;  %v12231_v41 = vsel %vm2970_vm8, %v12110_v12, %v7138_v17  ;;  %7420 = vrot.lane.b32.xlu0 %v14894_v22, %s8091_s6  ;;  %v2937_v26 = vsel %vm2905_vm7, %v11736_v61, %v6988_v34  ;;  %v2934_v42 = vsel %vm2905_vm7, %v11744_v45, %v6982_v14  ;;  %v14943_v2 = vld [vmem:[#allocation9_spill] sm:$0xff] }
 0x2f6   : > { %14935 = vst [vmem:[#allocation15_spill] sm:$0xff] %v12231_v41  ;;  %v3139_v63 = vrot.slane %v2997_v60, 7  ;;  %v2995_v12 = vsel %vm2970_vm8, %v12114_v39, %v7132_v21  ;;  %v3140_v16 = vrot.slane %v12231_v41, 7  ;;  %v12248_v37 = vsel %vm2970_vm8, %v12148_v51, %v7133_v38  ;;  %v12296_v38 = vld [vmem:[#allocation2 + $0x220] sm:$0xff] }
 0x2f7   : > { %14936 = vst [vmem:[#allocation16_spill] sm:$0xff] %v12248_v37  ;;  %v3232_v22 = vpack.c.bf16 %v3129_v5, %v3126_v19  ;;  %v3254_v58 = vpack.c.bf16 %v12205_v32, %v12220_v50  ;;  %v3136_v31 = vrot.slane %v2995_v12, 7  ;;  %v3137_v61 = vrot.slane %v12248_v37, 7  ;;  %7435 = vrot.lane.b32.xlu1 %v14915_v25, %s8091_s6  ;;  %v12255_v45 = vpop.permute.xlu1 %7155  ;;  %v14979_v32 = vld [vmem:[#allocation123_spill] sm:$0xff] }
 0x2f8   : > { %v7148_v34 = vunpack.i.h.bf16 %v7146_v46  ;;  %v7147_v27 = vunpack.i.l.bf16 %v7146_v46  ;;  %v7143_v39 = vunpack.i.h.bf16 %v7141_v57  ;;  %v7142_v51 = vunpack.i.l.bf16 %v7141_v57  ;;  %v12261_v62 = vpop.permute.xlu0 %7150  ;;  %v14945_v57 = vld [vmem:[#allocation59_spill] sm:$0xff] }
 0x2f9   : > { %5762 = vmatprep.mubr.msk.bf16.mxu0 %vm3286_vm9, %v3232_v22  ;;  %5725 = vmatmul.mubr.msk.bf16.gmra.mrb[8].mxu1 %vm3286_vm9, %v3254_v58  ;;  %v3132_v47 = vsel %vm3099_vm10, %v3130_v7, %v3131_v36  ;;  %v3135_v10 = vsel %vm3099_vm10, %v3133_v23, %v3134_v30  ;;  %v14938_v29 = vpack.i.bf16 %v11250_v55, %v11754_v54  ;;  %v6998_v33 = vunpack.i.h.bf16 %v14939_v3  ;;  %v7991_v36 = vld [vmem:[#allocation2 + $0x238] sm:$0xff] }
 0x2fa   : > { %v3001_v53 = vsel %vm2970_vm8, %v2936_v9, %v7147_v27  ;;  %v12265_v13 = vsel %vm2970_vm8, %v2937_v26, %v7148_v34  ;;  %v3233_v25 = vpack.c.bf16 %v3135_v10, %v3132_v47  ;;  %v3255_v40 = vpack.c.bf16 %v12231_v41, %v12248_v37  ;;  %v14940_v9 = vld [vmem:[#allocation53_spill] sm:$0xff]  ;;  %v14947_v22 = vld [vmem:[#allocation118_spill] sm:$0xff]  ;;  %v14948_v34 = vld [vmem:[#allocation43_spill] sm:$0xff] }
 0x2fb   : > { %14937 = vst [vmem:[#allocation116_spill] sm:$0xff] %v12265_v13  ;;  %7430 = vrot.lane.b32.xlu0 %v14938_v29, %s8091_s6  ;;  %v2935_v4 = vsel %vm2905_vm7, %v11748_v6, %v6983_v48  ;;  %v6993_v14 = vunpack.i.h.bf16 %v14940_v9  ;;  %v2999_v23 = vsel %vm2970_vm8, %v2934_v42, %v7142_v51  ;;  %v6898_v11 = vunpack.i.h.bf16 %v14941_v0  ;;  %v12288_v6 = vpop.permute.xlu1 %7165  ;;  %7445 = vrot.lane.b32.xlu1 %v14943_v2, %s8092_s7  ;;  %v14946_v42 = vld [vmem:[#allocation85_spill] sm:$0xff]  ;;  %v14977_v37 = vld [vmem:[#allocation92_spill] sm:$0xff] }
 0x2fc   : > { %v6897_v30 = vunpack.i.l.bf16 %v14941_v0  ;;  %v12283_v55 = vsel %vm2970_vm8, %v2935_v4, %v7143_v39  ;;  %5763 = vmatmul.mubr.msk.bf16.gmra.mrb[8].mxu0 %vm3286_vm9, %v3233_v25  ;;  %5728 = vmatprep.mubr.msk.bf16.mxu1 %vm3286_vm9, %v3255_v40  ;;  %v7158_v54 = vunpack.i.h.bf16 %v12255_v45  ;;  %v3145_v8 = vrot.slane %v3001_v53, 7  ;;  %v12294_v7 = vpop.permute.xlu0 %7160  ;;  %v7993_v25 = vld [vmem:[#allocation2 + $0x250] sm:$0xff]  ;;  %v14953_v40 = vld [vmem:[#allocation54_spill] sm:$0xff] }
 0x2fd   : > { %14942 = vst [vmem:[#allocation57_spill] sm:$0xff] %v12283_v55  ;;  %v3146_v48 = vrot.slane %v12265_v13, 7  ;;  %v7153_v17 = vunpack.i.h.bf16 %v12261_v62  ;;  %v12299_v21 = vpack.i.bf16 %v7991_v36, %v12296_v38  ;;  %v3142_v46 = vrot.slane %v2999_v23, 7 }
 0x2fe   : > { %v3143_v60 = vrot.slane %v12283_v55, 7  ;;  %v3138_v19 = vsel %vm3099_vm10, %v3136_v31, %v3137_v61  ;;  %v3141_v5 = vsel %vm3099_vm10, %v3139_v63, %v3140_v16  ;;  %v2941_v26 = vsel %vm2905_vm7, %v14945_v57, %v6998_v33  ;;  %v14951_v61 = vld [vmem:[#allocation138_spill] sm:$0xff] }
 0x2ff   : > { %14944 = vst [vmem:[#allocation18_spill] sm:$0xff] %v12299_v21  ;;  %7440 = vrot.lane.b32.xlu0 %v14913_v18, %s8091_s6  ;;  %v2939_v12 = vsel %vm2905_vm7, %v14946_v42, %v6993_v14  ;;  %v7008_v58 = vunpack.i.h.bf16 %v14947_v22  ;;  %v7003_v27 = vunpack.i.h.bf16 %v14948_v34  ;;  %v12313_v39 = vsel %vm2970_vm8, %v2941_v26, %v7158_v54  ;;  %v12320_v16 = vpop.permute.xlu1 %7175  ;;  %7455 = vrot.lane.b32.xlu1 %v14867_v52, %s8093_s8  ;;  %v14955_v52 = vld [vmem:[#allocation87_spill] sm:$0xff]  ;;  %v14956_v54 = vld [vmem:[#allocation44_spill] sm:$0xff]  ;;  %v14959_v57 = vld [vmem:[#allocation62_spill] sm:$0xff] }
 0x300   : > { %14949 = vst [vmem:[#allocation56_spill] sm:$0xff] %v12313_v39  ;;  %v12316_v31 = vsel %vm2970_vm8, %v2939_v12, %v7153_v17  ;;  %v3234_v63 = vpack.c.bf16 %v3141_v5, %v3138_v19  ;;  %v3256_v18 = vpack.c.bf16 %v12265_v13, %v12283_v55  ;;  %v6893_v51 = vunpack.i.h.bf16 %v14951_v61  ;;  %v12327_v53 = vpop.permute.xlu0 %7170  ;;  %v14958_v19 = vld [vmem:[#allocation113_spill] sm:$0xff]  ;;  %v7875_v42 = vld [vmem:[%s13676_s3 + $0x28] sm:$0xff]   ;;  %v14974_v13 = vld [vmem:[#allocation75_spill] sm:$0xff] }
 0x301   : > { %14950 = vst [vmem:[#allocation80_spill] sm:$0xff] %v12316_v31  ;;  %v6892_v47 = vunpack.i.l.bf16 %v14951_v61  ;;  %v7168_v10 = vunpack.i.h.bf16 %v12288_v6  ;;  %v12329_v29 = vpack.i.bf16 %v7993_v25, %v7991_v36  ;;  %v12333_v4 = vsel %vm2840_vm6, %v14953_v40, %v6897_v30  ;;  %v14957_v36 = vld [vmem:[#allocation142_spill] sm:$0xff]  ;;  %v14962_v12 = vld [vmem:[#allocation137_spill] sm:$0xff]  ;;  %5786 = vmatprep.subr.bf16.mxu0 %v7875_v42 }
 0x302   : > { %14954 = vst [vmem:[#allocation19_spill] sm:$0xff] %v12333_v4  ;;  %5766 = vmatprep.mubr.msk.bf16.mxu0 %vm3286_vm9, %v3234_v63  ;;  %5729 = vmatmul.mubr.msk.bf16.gmra.mrb[12].mxu1 %vm3286_vm9, %v3256_v18  ;;  %v7163_v33 = vunpack.i.h.bf16 %v12294_v7  ;;  %v3144_v14 = vsel %vm3099_vm10, %v3142_v46, %v3143_v60  ;;  %v3147_v23 = vsel %vm3099_vm10, %v3145_v8, %v3146_v48  ;;  %v7018_v17 = vunpack.i.h.bf16 %v14956_v54  ;;  %v14960_v8 = vld [vmem:[#allocation117_spill] sm:$0xff]  ;;  %v14963_v63 = vld [vmem:[#allocation135_spill] sm:$0xff] }
 0x303   : > { %14952 = vst [vmem:[#allocation145_spill] sm:$0xff] %v12329_v29  ;;  %v2945_v0 = vsel %vm2905_vm7, %v14955_v52, %v7008_v58  ;;  %v3235_v2 = vpack.c.bf16 %v3147_v23, %v3144_v14  ;;  %7450 = vrot.lane.b32.xlu0 %v14957_v36, %s8092_s7  ;;  %v3257_v30 = vpack.c.bf16 %v12313_v39, %v12316_v31  ;;  %v7013_v48 = vunpack.i.h.bf16 %v14960_v8  ;;  %v12357_v26 = vpop.permute.xlu1 %7185  ;;  %v14967_v14 = vld [vmem:[#allocation122_spill] sm:$0xff] }
 0x304   : > { %v12349_v5 = vsel %vm2840_vm6, %v14958_v19, %v6898_v11  ;;  %v2943_v46 = vsel %vm2905_vm7, %v14959_v57, %v7003_v27  ;;  %v12355_v60 = vsel %vm2970_vm8, %v2945_v0, %v7168_v10  ;;  %v6908_v58 = vunpack.i.h.bf16 %v14962_v12  ;;  %v12370_v61 = vpop.permute.xlu0 %7180  ;;  %v14965_v10 = vld [vmem:[#allocation133_spill] sm:$0xff]  ;;  %7465 = vrot.lane.b32.xlu1 %v11712_v20, %s8094_s9  ;;  %v14968_v36 = vld [vmem:[#allocation66_spill] sm:$0xff]  ;;  %v7996_v20 = vld [vmem:[#allocation2 + $0x268] sm:$0xff]  ;;  %5787 = vmatpush3.bf16.msra.mxu0 %v7875_v42 }
 0x305   : > { %14961 = vst [vmem:[#allocation58_spill] sm:$0xff] %v12355_v60  ;;  %v6903_v18 = vunpack.i.h.bf16 %v14963_v63  ;;  %v12365_v11 = vsel %vm2970_vm8, %v2943_v46, %v7163_v33  ;;  %5767 = vmatmul.mubr.msk.bf16.gmra.mrb[12].mxu0 %vm3286_vm9, %v3235_v2  ;;  %5732 = vmatprep.mubr.msk.bf16.mxu1 %vm3286_vm9, %v3257_v30  ;;  %v7178_v27 = vunpack.i.h.bf16 %v12320_v16  ;;  %v12374_v40 = vsel %vm2840_vm6, %v14965_v10, %v6892_v47  ;;  %v12383_v33 = vld [vmem:[#allocation2 + $0x178] sm:$0xff]  ;;  %v12385_v0 = vld [vmem:[#allocation2 + $0x190] sm:$0xff]  ;;  %v14969_v57 = vld [vmem:[#allocation31_spill] sm:$0xff] }
 0x306   : > { %14964 = vst [vmem:[#allocation141_spill] sm:$0xff] %v12365_v11  ;;  %14966 = vst [vmem:[#allocation23_spill] sm:$0xff] %v12374_v40  ;;  %v12378_v23 = vsel %vm2840_vm6, %v14967_v14, %v6893_v51  ;;  %v7173_v52 = vunpack.i.h.bf16 %v12327_v53  ;;  %v2949_v30 = vsel %vm2905_vm7, %v14968_v36, %v7018_v17  ;;  %v3258_v51 = vpack.c.bf16 %v12355_v60, %v12365_v11  ;;  %v14970_v10 = vld [vmem:[#allocation61_spill] sm:$0xff]  ;;  %v14971_v2 = vld [vmem:[#allocation28_spill] sm:$0xff] }
 0x307   : > { %7460 = vrot.lane.b32.xlu0 %v14862_v56, %s8093_s8  ;;  %v12396_v19 = vpack.i.bf16 %v7996_v20, %v7993_v25  ;;  %v2947_v46 = vsel %vm2905_vm7, %v14969_v57, %v7013_v48  ;;  %v7028_v14 = vunpack.i.h.bf16 %v14970_v10  ;;  %v7023_v47 = vunpack.i.h.bf16 %v14971_v2  ;;  %v12405_v17 = vpop.permute.xlu1 %7195  ;;  %v14973_v56 = vld [vmem:[#allocation8_spill] sm:$0xff]  ;;  %5788 = vmatprep.subr.bf16.mxu0 %v7876_v43 }
 0x308   : > { %v12403_v55 = vsel %vm2970_vm8, %v2949_v30, %v7178_v27  ;;  %v12409_v36 = vsel %vm2840_vm6, %v14973_v56, %v6908_v58  ;;  %v12413_v25 = vsel %vm2840_vm6, %v14974_v13, %v6903_v18  ;;  %v12416_v42 = vsel %vm2970_vm8, %v2947_v46, %v7173_v52  ;;  %v12419_v57 = vpop.permute.xlu0 %7190  ;;  %v14976_v30 = vld [vmem:[#allocation22_spill] sm:$0xff]  ;;  %v12425_v58 = vld [vmem:[#allocation2 + $0x1a8] sm:$0xff]  ;;  %v12429_v18 = vld [vmem:[#allocation2 + $0x1c0] sm:$0xff]  ;;  %5789 = vmatpush3.bf16.msra.mxu0 %v7876_v43 }
 0x309   : > { %14972 = vst [vmem:[#allocation143_spill] sm:$0xff] %v12403_v55  ;;  %14975 = vst [vmem:[#allocation82_spill] sm:$0xff] %v12416_v42  ;;  %v7188_v48 = vunpack.i.h.bf16 %v12357_v26  ;;  %7475 = vrot.lane.b32.xlu1 %v14976_v30, %s8095_s10  ;;  %v7183_v46 = vunpack.i.h.bf16 %v12370_v61  ;;  %v12438_v56 = vld [vmem:[#allocation2 + $0x1d8] sm:$0xff]  ;;  %v8000_v27 = vld [vmem:[#allocation2 + $0x280] sm:$0xff]  ;;  %v2953_v41 = vsel %vm2905_vm7, %v14977_v37, %v7028_v14  ;;  %v7038_v35 = vunpack.i.h.bf16 %v14979_v32  ;;  %5897 = vmatprep.subr.msk.bf16.mxu0 %vm3335_vm4, %v12470_v24 }
 0x30a   : > { %5733 = vmatmul.mubr.msk.bf16.gmra.mrb[16].mxu1 %vm3286_vm9, %v3258_v51  ;;  %v3259_v51 = vpack.c.bf16 %v12403_v55, %v12416_v42  ;;  %v12442_v13 = vpack.i.bf16 %v8000_v27, %v7996_v20  ;;  %v14978_v52 = vld [vmem:[#allocation148_spill] sm:$0xff]  ;;  %v7198_v37 = vunpack.i.h.bf16 %v12405_v17  ;;  %v8001_v14 = vld [vmem:[#allocation2 + $0x298] sm:$0xff] }
 0x30b   : > { %7470 = vrot.lane.b32.xlu0 %v14897_v15, %s8094_s9  ;;  %v2951_v50 = vsel %vm2905_vm7, %v14978_v52, %v7023_v47  ;;  %v14980_v15 = vld [vmem:[#allocation94_spill] sm:$0xff]  ;;  %v12450_v44 = vpop.permute.xlu1 %7205  ;;  %v12456_v30 = vsel %vm2970_vm8, %v2953_v41, %v7188_v48  ;;  %v12465_v52 = vpack.i.bf16 %v8001_v14, %v8000_v27  ;;  %v6997_v41 = vunpack.i.l.bf16 %v14939_v3  ;;  %v14986_v48 = vld [vmem:[#allocation97_spill] sm:$0xff]  ;;  %v8004_v63 = vld [vmem:[#allocation2 + $0x2c8] sm:$0xff] }
 0x30c   : > { %v7033_v59 = vunpack.i.h.bf16 %v14980_v15  ;;  %14981 = vst [vmem:[#allocation83_spill] sm:$0xff] %v12450_v44  ;;  %14982 = vst [vmem:[#allocation26_spill] sm:$0xff] %v12456_v30  ;;  %v12459_v20 = vsel %vm2970_vm8, %v2951_v50, %v7183_v46  ;;  %5736 = vmatprep.mubr.msk.bf16.mxu1 %vm3286_vm9, %v3259_v51  ;;  %v12463_v47 = vpop.permute.xlu0 %7200  ;;  %v7048_v28 = vunpack.i.h.bf16 %v14986_v48  ;;  %v14987_v50 = vld [vmem:[#allocation98_spill] sm:$0xff]  ;;  %v7193_v51 = vunpack.i.h.bf16 %v12419_v57  ;;  %v8002_v27 = vld [vmem:[#allocation2 + $0x2b0] sm:$0xff] }
 0x30d   : > { %14983 = vst [vmem:[#allocation129_spill] sm:$0xff] %v12459_v20  ;;  %14984 = vst [vmem:[#allocation46_spill] sm:$0xff] %v12463_v47  ;;  %v7043_v46 = vunpack.i.h.bf16 %v14987_v50  ;;  %7485 = vrot.lane.b32.xlu1 %v12299_v21, %s8096_s30  ;;  %v12480_v49 = vpack.i.bf16 %v8002_v27, %v8001_v14  ;;  %v12486_v12 = vpack.i.bf16 %v8004_v63, %v8002_v27  ;;  %v14988_v40 = vld [vmem:[#allocation96_spill] sm:$0xff]  ;;  %v7208_v14 = vunpack.i.h.bf16 %v12450_v44  ;;  %v14993_v3 = vld [vmem:[#allocation37_spill] sm:$0xff] }
 0x30e   : > { %v2957_v4 = vsel %vm2905_vm7, %v14988_v40, %v7038_v35  ;;  %v14989_v21 = vld [vmem:[#allocation4_spill] sm:$0xff]  ;;  %v6992_v63 = vunpack.i.l.bf16 %v14940_v9  ;;  %v14992_v40 = vld [vmem:[#allocation119_spill] sm:$0xff]  ;;  %v2961_v44 = vsel %vm2905_vm7, %v14993_v3, %v7048_v28 }
 0x30f   : > { %7480 = vrot.lane.b32.xlu0 %v12329_v29, %s8095_s10  ;;  %v2955_v50 = vsel %vm2905_vm7, %v14989_v21, %v7033_v59  ;;  %v3260_v29 = vpack.c.bf16 %v12456_v30, %v12459_v20  ;;  %v12495_v48 = vpop.permute.xlu1 %7215  ;;  %v12501_v43 = vsel %vm2970_vm8, %v2957_v4, %v7198_v37  ;;  %v7203_v59 = vunpack.i.h.bf16 %v12463_v47  ;;  %v14994_v20 = vld [vmem:[#allocation72_spill] sm:$0xff]  ;;  %v14995_v9 = vld [vmem:[#allocation107_spill] sm:$0xff]  ;;  %v14997_v37 = vld [vmem:[#allocation101_spill] sm:$0xff] }
 0x310   : > { %14990 = vst [vmem:[#allocation146_spill] sm:$0xff] %v12501_v43  ;;  %v12504_v35 = vsel %vm2970_vm8, %v2955_v50, %v7193_v51  ;;  %v12507_v21 = vpop.permute.xlu0 %7210  ;;  %v2940_v27 = vsel %vm2905_vm7, %v14992_v40, %v6997_v41  ;;  %v2959_v24 = vsel %vm2905_vm7, %v14994_v20, %v7043_v46  ;;  %v7058_v30 = vunpack.i.h.bf16 %v14995_v9  ;;  %v14999_v20 = vld [vmem:[#allocation102_spill] sm:$0xff] }
 0x311   : > { %14991 = vst [vmem:[#allocation88_spill] sm:$0xff] %v12504_v35  ;;  %v14996_v4 = vpack.i.bf16 %v12385_v0, %v12383_v33  ;;  %v7053_v50 = vunpack.i.h.bf16 %v14997_v37  ;;  %v7157_v51 = vunpack.i.l.bf16 %v12255_v45  ;;  %v7152_v41 = vunpack.i.l.bf16 %v12261_v62  ;;  %v15002_v45 = vld [vmem:[#allocation144_spill] sm:$0xff] }
 0x312   : > { %5737 = vmatmul.mubr.msk.bf16.gmra.mrb[20].mxu1 %vm3286_vm9, %v3260_v29  ;;  %v12525_v28 = vsel %vm2970_vm8, %v2961_v44, %v7208_v14  ;;  %v7068_v46 = vunpack.i.h.bf16 %v14999_v20  ;;  %v15000_v29 = vld [vmem:[#allocation73_spill] sm:$0xff]  ;;  %v12532_v40 = vsel %vm2970_vm8, %v2959_v24, %v7203_v59  ;;  %v3261_v33 = vpack.c.bf16 %v12501_v43, %v12504_v35 }
 0x313   : > { %7495 = vrot.lane.b32.xlu1 %v14996_v4, %s8092_s7  ;;  %14998 = vst [vmem:[#allocation91_spill] sm:$0xff] %v12525_v28  ;;  %7490 = vrot.lane.b32.xlu0 %v12396_v19, %s8096_s30  ;;  %v7063_v3 = vunpack.i.h.bf16 %v15000_v29  ;;  %15001 = vst [vmem:[#allocation93_spill] sm:$0xff] %v12532_v40  ;;  %v12536_v4 = vpop.permute.xlu1 %7225  ;;  %v2938_v62 = vsel %vm2905_vm7, %v15002_v45, %v6992_v63  ;;  %v7007_v44 = vunpack.i.l.bf16 %v14947_v22  ;;  %v7002_v14 = vunpack.i.l.bf16 %v14948_v34 }
 0x314   : > { %v7218_v47 = vunpack.i.h.bf16 %v12495_v48  ;;  %v12543_v20 = vpop.permute.xlu0 %7220  ;;  %v7017_v29 = vunpack.i.l.bf16 %v14956_v54  ;;  %v7012_v24 = vunpack.i.l.bf16 %v14960_v8  ;;  %5740 = vmatprep.mubr.msk.bf16.mxu1 %vm3286_vm9, %v3261_v33  ;;  %v7213_v59 = vunpack.i.h.bf16 %v12507_v21 }
 0x315   : > { %v15003_v63 = vpack.i.bf16 %v12425_v58, %v12385_v0  ;;  %v3262_v22 = vpack.c.bf16 %v12525_v28, %v12532_v40  ;;  %v3005_v34 = vsel %vm2970_vm8, %v2940_v27, %v7157_v51  ;;  %v3003_v45 = vsel %vm2970_vm8, %v2938_v62, %v7152_v41 }
 0x316   : > { %v15004_v54 = vpack.i.bf16 %v12429_v18, %v12425_v58  ;;  %v7228_v8 = vunpack.i.h.bf16 %v12536_v4  ;;  %v7223_v33 = vunpack.i.h.bf16 %v12543_v20  ;;  %v2965_v0 = vsel %vm2905_vm7, %v12349_v5, %v7058_v30 }
 0x317   : > { %7505 = vrot.lane.b32.xlu1 %v15003_v63, %s8093_s8  ;;  %v2963_v63 = vsel %vm2905_vm7, %v12378_v23, %v7053_v50  ;;  %v2969_v27 = vsel %vm2905_vm7, %v12409_v36, %v7068_v46  ;;  %v2967_v51 = vsel %vm2905_vm7, %v12413_v25, %v7063_v3  ;;  %v12571_v41 = vpop.permute.xlu1 %7235  ;;  %v7167_v58 = vunpack.i.l.bf16 %v12288_v6 }
 0x318   : > { %7500 = vrot.lane.b32.xlu0 %v15004_v54, %s8092_s7  ;;  %v7162_v62 = vunpack.i.l.bf16 %v12294_v7  ;;  %v12576_v54 = vsel %vm2970_vm8, %v2965_v0, %v7218_v47  ;;  %v12579_v5 = vsel %vm2970_vm8, %v2963_v63, %v7213_v59  ;;  %v12581_v30 = vpop.permute.xlu0 %7230  ;;  %v3151_v23 = vrot.slane %v3005_v34, 7  ;;  %v15010_v59 = vld [vmem:[#allocation86_spill] sm:$0xff]  ;;  %v15011_v34 = vld [vmem:[#allocation32_spill] sm:$0xff]  ;;  %v15013_v0 = vld [vmem:[#allocation67_spill] sm:$0xff] }
 0x319   : > { %15005 = vst [vmem:[#allocation106_spill] sm:$0xff] %v12576_v54  ;;  %15006 = vst [vmem:[#allocation29_spill] sm:$0xff] %v12579_v5  ;;  %v3152_v36 = vrot.slane %v12313_v39, 7  ;;  %v3148_v50 = vrot.slane %v3003_v45, 7  ;;  %v3149_v25 = vrot.slane %v12316_v31, 7  ;;  %v7177_v6 = vunpack.i.l.bf16 %v12320_v16 }
 0x31a   : > { %5741 = vmatmul.mubr.msk.bf16.gmra.mrb[24].mxu1 %vm3286_vm9, %v3262_v22  ;;  %v7172_v7 = vunpack.i.l.bf16 %v12327_v53  ;;  %v12591_v47 = vsel %vm2970_vm8, %v2969_v27, %v7228_v8  ;;  %v12594_v46 = vsel %vm2970_vm8, %v2967_v51, %v7223_v33  ;;  %v15009_v3 = vpack.i.bf16 %v12438_v56, %v12429_v18  ;;  %v15012_v8 = vld [vmem:[#allocation90_spill] sm:$0xff] }
 0x31b   : > { %7515 = vrot.lane.b32.xlu1 %v12396_v19, %s8094_s9  ;;  %15007 = vst [vmem:[#allocation21_spill] sm:$0xff] %v12591_v47  ;;  %15008 = vst [vmem:[#allocation100_spill] sm:$0xff] %v12594_v46  ;;  %v2944_v22 = vsel %vm2905_vm7, %v15010_v59, %v7007_v44  ;;  %v2942_v45 = vsel %vm2905_vm7, %v15011_v34, %v7002_v14  ;;  %v3263_v16 = vpack.c.bf16 %v12576_v54, %v12579_v5  ;;  %v12606_v53 = vpop.permute.xlu1 %7245 }
 0x31c   : > { %7510 = vrot.lane.b32.xlu0 %v15009_v3, %s8093_s8  ;;  %v2948_v33 = vsel %vm2905_vm7, %v15012_v8, %v7017_v29  ;;  %v2946_v63 = vsel %vm2905_vm7, %v15013_v0, %v7012_v24  ;;  %v3009_v18 = vsel %vm2970_vm8, %v2944_v22, %v7167_v58  ;;  %v3007_v56 = vsel %vm2970_vm8, %v2942_v45, %v7162_v62  ;;  %v12614_v27 = vpop.permute.xlu0 %7240  ;;  %v8006_v8 = vld [vmem:[#allocation2 + $0x2e0] sm:$0xff]  ;;  %v15014_v0 = vld [vmem:[#allocation69_spill] sm:$0xff] }
 0x31d   : > { %v7027_v44 = vunpack.i.l.bf16 %v14970_v10  ;;  %v7022_v14 = vunpack.i.l.bf16 %v14971_v2  ;;  %5744 = vmatprep.mubr.msk.bf16.mxu1 %vm3286_vm9, %v3263_v16  ;;  %v3264_v29 = vpack.c.bf16 %v12591_v47, %v12594_v46  ;;  %v3150_v24 = vsel %vm3099_vm10, %v3148_v50, %v3149_v25 }
 0x31e   : > { %v7037_v51 = vunpack.i.l.bf16 %v14979_v32  ;;  %v3013_v58 = vsel %vm2970_vm8, %v2948_v33, %v7177_v6  ;;  %v3011_v62 = vsel %vm2970_vm8, %v2946_v63, %v7172_v7  ;;  %v3153_v2 = vsel %vm3099_vm10, %v3151_v23, %v3152_v36 }
 0x31f   : > { %7525 = vrot.lane.b32.xlu1 %v12442_v13, %s8095_s10  ;;  %v7032_v10 = vunpack.i.l.bf16 %v14980_v15  ;;  %v3157_v3 = vrot.slane %v3009_v18, 7  ;;  %v3158_v59 = vrot.slane %v12355_v60, 7  ;;  %v3154_v22 = vrot.slane %v3007_v56, 7  ;;  %v12632_v34 = vpop.permute.xlu1 %7255  ;;  %v15015_v18 = vld [vmem:[#allocation39_spill] sm:$0xff] }
 0x320   : > { %7520 = vrot.lane.b32.xlu0 %v12465_v52, %s8094_s9  ;;  %v3155_v50 = vrot.slane %v12365_v11, 7  ;;  %v7187_v32 = vunpack.i.l.bf16 %v12357_v26  ;;  %v7182_v25 = vunpack.i.l.bf16 %v12370_v61  ;;  %v3236_v6 = vpack.c.bf16 %v3153_v2, %v3150_v24  ;;  %v12637_v7 = vpop.permute.xlu0 %7250  ;;  %v8005_v61 = vld [vmem:[#allocation2 + $0x2f8] sm:$0xff]  ;;  %v8017_v11 = vld [vmem:[#allocation2 + $0x28] sm:$0xff] }
 0x321   : > { %v3163_v45 = vrot.slane %v3013_v58, 7  ;;  %v3164_v23 = vrot.slane %v12403_v55, 7  ;;  %v3160_v36 = vrot.slane %v3011_v62, 7  ;;  %v3161_v15 = vrot.slane %v12416_v42, 7  ;;  %v15068_v55 = vld [vmem:[#allocation136_spill] sm:$0xff] }
 0x322   : > { %5745 = vmatmul.mubr.msk.bf16.gmra.mrb[28].mxu1 %vm3286_vm9, %v3264_v29  ;;  %v7197_v16 = vunpack.i.l.bf16 %v12405_v17  ;;  %v7192_v26 = vunpack.i.l.bf16 %v12419_v57  ;;  %v7564_v33 = vpack.i.bf16 %v8005_v61, %v8006_v8  ;;  %v2952_v63 = vsel %vm2905_vm7, %v15014_v0, %v7027_v44  ;;  %v15016_v29 = vld [vmem:[#allocation95_spill] sm:$0xff]  ;;  %v15017_v17 = vld [vmem:[#allocation112_spill] sm:$0xff]  ;;  %v15019_v0 = vld [vmem:[#allocation97_spill] sm:$0xff] }
 0x323   : > { %7535 = vrot.lane.b32.xlu1 %v12465_v52, %s8096_s30  ;;  %5770 = vmatprep.mubr.msk.bf16.mxu1 %vm3286_vm9, %v3236_v6  ;;  %v2950_v56 = vsel %vm2905_vm7, %v15015_v18, %v7022_v14  ;;  %v2956_v24 = vsel %vm2905_vm7, %v15016_v29, %v7037_v51  ;;  %v2954_v57 = vsel %vm2905_vm7, %v15017_v17, %v7032_v10  ;;  %v12657_v58 = vpop.permute.xlu1 %7265  ;;  %v7047_v14 = vunpack.i.l.bf16 %v15019_v0  ;;  %v15020_v18 = vld [vmem:[#allocation98_spill] sm:$0xff]  ;;  %v15029_v0 = vld [vmem:[#allocation145_spill] sm:$0xff] }
 0x324   : > { %7530 = vrot.lane.b32.xlu0 %v12480_v49, %s8095_s10  ;;  %15018 = vst [vmem:[#allocation24_spill] sm:$0xff] %v12657_v58  ;;  %v3159_v62 = vsel %vm3099_vm10, %v3157_v3, %v3158_v59  ;;  %v3156_v2 = vsel %vm3099_vm10, %v3154_v22, %v3155_v50  ;;  %v3017_v6 = vsel %vm2970_vm8, %v2952_v63, %v7187_v32  ;;  %v12663_v44 = vpop.permute.xlu0 %7260  ;;  %v7042_v42 = vunpack.i.l.bf16 %v15020_v18  ;;  %v8007_v18 = vld [vmem:[#allocation2 + $0x310] sm:$0xff] }
 0x325   : > { %v3015_v8 = vsel %vm2970_vm8, %v2950_v56, %v7182_v25  ;;  %v15021_v51 = vpack.i.bf16 %v12296_v38, %v12482_v1  ;;  %v3162_v10 = vsel %vm3099_vm10, %v3160_v36, %v3161_v15  ;;  %v3165_v3 = vsel %vm3099_vm10, %v3163_v45, %v3164_v23  ;;  %v15022_v56 = vld [vmem:[#allocation26_spill] sm:$0xff]  ;;  %v15024_v36 = vld [vmem:[#allocation129_spill] sm:$0xff]  ;;  %v15025_v23 = vld [vmem:[#allocation83_spill] sm:$0xff] }
 0x326   : > { %v7057_v59 = vunpack.i.l.bf16 %v14995_v9  ;;  %v7052_v22 = vunpack.i.l.bf16 %v14997_v37  ;;  %v3021_v50 = vsel %vm2970_vm8, %v2956_v24, %v7197_v16  ;;  %v3019_v32 = vsel %vm2970_vm8, %v2954_v57, %v7192_v26  ;;  %v15026_v15 = vld [vmem:[#allocation46_spill] sm:$0xff] }
 0x327   : > { %7545 = vrot.lane.b32.xlu1 %v15021_v51, %s8092_s7  ;;  %v3237_v25 = vpack.c.bf16 %v3159_v62, %v3156_v2  ;;  %v3169_v63 = vrot.slane %v3017_v6, 7  ;;  %v3170_v1 = vrot.slane %v15022_v56, 7  ;;  %v3166_v38 = vrot.slane %v3015_v8, 7  ;;  %v12680_v29 = vpop.permute.xlu1 %7275  ;;  %v15028_v2 = vld [vmem:[#allocation18_spill] sm:$0xff] }
 0x328   : > { %7540 = vrot.lane.b32.xlu0 %v12486_v12, %s8096_s30  ;;  %15023 = vst [vmem:[#allocation128_spill] sm:$0xff] %v12680_v29  ;;  %v3167_v45 = vrot.slane %v15024_v36, 7  ;;  %v7207_v9 = vunpack.i.l.bf16 %v15025_v23  ;;  %v7202_v37 = vunpack.i.l.bf16 %v15026_v15  ;;  %v3238_v17 = vpack.c.bf16 %v3165_v3, %v3162_v10  ;;  %v12685_v16 = vpop.permute.xlu0 %7270  ;;  %v15030_v10 = vld [vmem:[#allocation70_spill] sm:$0xff]  ;;  %v8008_v23 = vld [vmem:[#allocation2 + $0x328] sm:$0xff] }
 0x329   : > { %15027 = vst [vmem:[#allocation25_spill] sm:$0xff] %v12685_v16  ;;  %v3175_v26 = vrot.slane %v3021_v50, 7  ;;  %v3176_v24 = vrot.slane %v12501_v43, 7  ;;  %v3172_v57 = vrot.slane %v3019_v32, 7  ;;  %v3173_v62 = vrot.slane %v12504_v35, 7  ;;  %v15031_v50 = vld [vmem:[#allocation99_spill] sm:$0xff] }
 0x32a   : > { %5771 = vmatmul.mubr.msk.bf16.vlgmr.msra.gmra.mrb[16].mxu1 %vm3286_vm9, %v3237_v25  ;;  %v7217_v6 = vunpack.i.l.bf16 %v12495_v48  ;;  %v7212_v8 = vunpack.i.l.bf16 %v12507_v21  ;;  %v12697_v51 = vpack.i.bf16 %v8007_v18, %v8005_v61  ;;  %v2960_v3 = vsel %vm2905_vm7, %v15030_v10, %v7047_v14  ;;  %v15035_v10 = vld [vmem:[#allocation23_spill] sm:$0xff]  ;;  %v15070_v56 = vld [vmem:[#allocation74_spill] sm:$0xff] }
 0x32b   : > { %7555 = vrot.lane.b32.xlu1 %v15028_v2, %s8093_s8  ;;  %5774 = vmatprep.mubr.msk.bf16.mxu1 %vm3286_vm9, %v3238_v17  ;;  %v2958_v32 = vsel %vm2905_vm7, %v15031_v50, %v7042_v42  ;;  %v12703_v25 = vpop.permute.xlu1 %7285  ;;  %v12705_v48 = vpack.i.bf16 %v8008_v23, %v8007_v18  ;;  %v3025_v21 = vsel %vm2970_vm8, %v2960_v3, %v7207_v9  ;;  %v15036_v3 = vld [vmem:[#allocation102_spill] sm:$0xff]  ;;  %v15037_v50 = vld [vmem:[#allocation73_spill] sm:$0xff]  ;;  %v7238_v35 = vunpack.i.h.bf16 %v12571_v41 }
 0x32c   : > { %7550 = vrot.lane.b32.xlu0 %v15029_v0, %s8092_s7  ;;  %15032 = vst [vmem:[#allocation63_spill] sm:$0xff] %v12703_v25  ;;  %v3023_v15 = vsel %vm2970_vm8, %v2958_v32, %v7202_v37  ;;  %v3168_v17 = vsel %vm3099_vm10, %v3166_v38, %v3167_v45  ;;  %v3171_v61 = vsel %vm3099_vm10, %v3169_v63, %v3170_v1  ;;  %v12711_v2 = vpop.permute.xlu0 %7280  ;;  %v15034_v0 = vld [vmem:[#allocation19_spill] sm:$0xff]  ;;  %v7067_v37 = vunpack.i.l.bf16 %v15036_v3  ;;  %v8015_v36 = vld [vmem:[#allocation2 + $0x58] sm:$0xff] }
 0x32d   : > { %15033 = vst [vmem:[#allocation35_spill] sm:$0xff] %v12711_v2  ;;  %v2964_v14 = vsel %vm2905_vm7, %v15034_v0, %v7057_v59  ;;  %v2962_v42 = vsel %vm2905_vm7, %v15035_v10, %v7052_v22  ;;  %v3174_v18 = vsel %vm3099_vm10, %v3172_v57, %v3173_v62  ;;  %v3177_v9 = vsel %vm3099_vm10, %v3175_v26, %v3176_v24  ;;  %v15046_v3 = vld [vmem:[#allocation27_spill] sm:$0xff]  ;;  %v15072_v2 = vld [vmem:[#allocation130_spill] sm:$0xff] }
 0x32e   : > { %v7062_v38 = vunpack.i.l.bf16 %v15037_v50  ;;  %v3029_v63 = vsel %vm2970_vm8, %v2964_v14, %v7217_v6  ;;  %v3027_v1 = vsel %vm2970_vm8, %v2962_v42, %v7212_v8  ;;  %v3181_v59 = vrot.slane %v3025_v21, 7  ;;  %v15045_v42 = vld [vmem:[#allocation45_spill] sm:$0xff] }
 0x32f   : > { %7565 = vrot.lane.b32.xlu1 %v7564_v33, %s8094_s9  ;;  %v3182_v22 = vrot.slane %v12525_v28, 7  ;;  %v3178_v45 = vrot.slane %v3023_v15, 7  ;;  %v3239_v33 = vpack.c.bf16 %v3171_v61, %v3168_v17  ;;  %v12727_v32 = vpop.permute.xlu1 %7295  ;;  %v3179_v26 = vrot.slane %v12532_v40, 7  ;;  %v15040_v15 = vld [vmem:[#allocation105_spill] sm:$0xff] }
 0x330   : > { %7560 = vrot.lane.b32.xlu0 %v12396_v19, %s8093_s8  ;;  %15038 = vst [vmem:[#allocation34_spill] sm:$0xff] %v12727_v32  ;;  %v3188_v24 = vrot.slane %v12576_v54, 7  ;;  %v7227_v57 = vunpack.i.l.bf16 %v12536_v4  ;;  %v3240_v62 = vpack.c.bf16 %v3177_v9, %v3174_v18  ;;  %v3187_v8 = vrot.slane %v3029_v63, 7  ;;  %v15042_v61 = vld [vmem:[#allocation89_spill] sm:$0xff]  ;;  %v15047_v63 = vld [vmem:[#allocation135_spill] sm:$0xff] }
 0x331   : > { %v3184_v0 = vrot.slane %v3027_v1, 7  ;;  %v3185_v19 = vrot.slane %v12579_v5, 7  ;;  %v7222_v21 = vunpack.i.l.bf16 %v12543_v20  ;;  %v15041_v17 = vunpack.i.l.bf16 %v15040_v15  ;;  %v15043_v4 = vld [vmem:[#allocation137_spill] sm:$0xff]  ;;  %v8009_v20 = vld [vmem:[#allocation2 + $0x340] sm:$0xff] }
 0x332   : > { %v12732_v6 = vpop.permute.xlu0 %7290  ;;  %5775 = vmatmul.mubr.msk.bf16.gmra.mrb[20].mxu1 %vm3286_vm9, %v3239_v33  ;;  %v15044_v10 = vunpack.i.l.bf16 %v15043_v4  ;;  %v12750_v9 = vpack.i.bf16 %v8009_v20, %v8008_v23  ;;  %v5057_v50 = vsel %vm3335_vm4, %v15046_v3, 0  ;;  %v15048_v1 = vunpack.i.l.bf16 %v15047_v63  ;;  %v684_v32 = vld [vmem:[#allocation2 + $0x10] sm:$0xff] }
 0x333   : > { %15039 = vst [vmem:[#allocation64_spill] sm:$0xff] %v12732_v6  ;;  %7575 = vrot.lane.b32.xlu1 %v12697_v51, %s8095_s10  ;;  %v2836_v14 = vsel %vm2775_vm5, %v15042_v61, %v15041_v17  ;;  %5778 = vmatprep.mubr.msk.bf16.mxu1 %vm3286_vm9, %v3240_v62  ;;  %v3180_v4 = vsel %vm3099_vm10, %v3178_v45, %v3179_v26  ;;  %v7233_v43 = vunpack.i.h.bf16 %v12581_v30  ;;  %v7232_v40 = vunpack.i.l.bf16 %v12581_v30 }
 0x334   : > { %v2903_v18 = vsel %vm2840_vm6, %v15045_v42, %v15044_v10  ;;  %7570 = vrot.lane.b32.xlu0 %v12705_v48, %s8094_s9  ;;  %v2901_v33 = vsel %vm2840_vm6, %v2836_v14, %v15048_v1  ;;  %v12758_v17 = vpop.permute.xlu1 %7305  ;;  %5791 = vmatpush3.bf16.msra.mxu0 %v5057_v50  ;;  %v3183_v23 = vsel %vm3099_vm10, %v3181_v59, %v3182_v22  ;;  %v3194_v59 = vrot.slane %v12591_v47, 7  ;;  %v8011_v1 = vld [vmem:[#allocation2 + $0x370] sm:$0xff] }
 0x335   : > { %v2968_v15 = vsel %vm2905_vm7, %v2903_v18, %v7067_v37  ;;  %15049 = vst [vmem:[#allocation51_spill] sm:$0xff] %v12758_v17  ;;  %v2966_v62 = vsel %vm2905_vm7, %v2901_v33, %v7062_v38  ;;  %v3186_v37 = vsel %vm3099_vm10, %v3184_v0, %v3185_v19  ;;  %v3189_v14 = vsel %vm3099_vm10, %v3187_v8, %v3188_v24  ;;  %v8010_v38 = vld [vmem:[#allocation2 + $0x358] sm:$0xff]  ;;  %v831_v17 = vld [vmem:[#allocation2 + $0x4a8] sm:$0xff] }
 0x336   : > { %v3033_v61 = vsel %vm2970_vm8, %v2968_v15, %v7227_v57  ;;  %v12764_v10 = vpop.permute.xlu0 %7300  ;;  %v3031_v42 = vsel %vm2970_vm8, %v2966_v62, %v7222_v21  ;;  %v7589_v57 = vpack.i.bf16 %v8010_v38, %v8009_v20  ;;  %v3241_v45 = vpack.c.bf16 %v3183_v23, %v3180_v4  ;;  %v8012_v15 = vld [vmem:[#allocation2 + $0x388] sm:$0xff] }
 0x337   : > { %15050 = vst [vmem:[#allocation36_spill] sm:$0xff] %v12764_v10  ;;  %7585 = vrot.lane.b32.xlu1 %v12705_v48, %s8096_s30  ;;  %v3193_v18 = vrot.slane %v3033_v61, 7  ;;  %v3190_v22 = vrot.slane %v3031_v42, 7  ;;  %v3191_v21 = vrot.slane %v12594_v46, 7  ;;  %v3242_v3 = vpack.c.bf16 %v3189_v14, %v3186_v37  ;;  %v822_v46 = vld [vmem:[#allocation2 + $0x460] sm:$0xff] }
 0x338   : > { %7580 = vrot.lane.b32.xlu0 %v12750_v9, %s8095_s10  ;;  %v12773_v26 = vpop.permute.xlu1 %7315  ;;  %v7624_v33 = vpack.i.bf16 %v8011_v1, %v8010_v38  ;;  %v7619_v62 = vpack.i.bf16 %v8012_v15, %v8011_v1 }
 0x339   : > { %v3192_v8 = vsel %vm3099_vm10, %v3190_v22, %v3191_v21  ;;  %v3195_v0 = vsel %vm3099_vm10, %v3193_v18, %v3194_v59  ;;  %v804_v18 = vld [vmem:[#allocation2 + $0x3d0] sm:$0xff]  ;;  %v7318_v30 = vunpack.i.h.bf16 %v12773_v26 }
 0x33a   : > { %v12777_v50 = vpop.permute.xlu0 %7310  ;;  %5779 = vmatmul.mubr.msk.bf16.gmra.mrb[24].mxu1 %vm3286_vm9, %v3241_v45  ;;  %v3243_v20 = vpack.c.bf16 %v3195_v0, %v3192_v8  ;;  %v807_v45 = vld [vmem:[#allocation2 + $0x3e8] sm:$0xff] }
 0x33b   : > { %7595 = vrot.lane.b32.xlu1 %v12442_v13, %s8092_s7  ;;  %5782 = vmatprep.mubr.msk.bf16.mxu1 %vm3286_vm9, %v3242_v3  ;;  %v12827_v21 = vpack.i.bf16 %v807_v45, %v804_v18  ;;  %v810_v3 = vld [vmem:[#allocation2 + $0x400] sm:$0xff] }
 0x33c   : > { %7590 = vrot.lane.b32.xlu0 %v7589_v57, %s8096_s30  ;;  %v12784_v24 = vpop.permute.xlu1 %7325 }
 0x33e   : > { %v12788_v19 = vpop.permute.xlu0 %7320 }
 0x33f   : > { %7605 = vrot.lane.b32.xlu1 %v12465_v52, %s8093_s8 }
 0x340   : > { %7600 = vrot.lane.b32.xlu0 %v12480_v49, %s8092_s7  ;;  %v12794_v13 = vpop.permute.xlu1 %7335  ;;  %v8013_v49 = vld [vmem:[#allocation2 + $0x3a0] sm:$0xff] }
 0x341   : > { %v7629_v4 = vpack.i.bf16 %v8013_v49, %v8012_v15  ;;  %v816_v15 = vld [vmem:[#allocation2 + $0x430] sm:$0xff] }
 0x342   : > { %v12796_v63 = vpop.permute.xlu0 %7330  ;;  %5783 = vmatmul.mubr.msk.bf16.gmra.mrb[28].mxu1 %vm3286_vm9, %v3243_v20  ;;  %v12837_v20 = vpack.i.bf16 %v810_v3, %v807_v45 }
 0x343   : > { %7615 = vrot.lane.b32.xlu1 %v7589_v57, %s8094_s9 }
 0x344   : > { %7610 = vrot.lane.b32.xlu0 %v12486_v12, %s8093_s8  ;;  %v12802_v52 = vpop.permute.xlu1 %7345  ;;  %v8014_v12 = vld [vmem:[#allocation2 + $0x3b8] sm:$0xff] }
 0x345   : > { %15051 = vst [vmem:[#allocation121_spill] sm:$0xff] %v12802_v52  ;;  %v7639_v37 = vpack.i.bf16 %v8014_v12, %v8013_v49  ;;  %v819_v12 = vld [vmem:[#allocation2 + $0x448] sm:$0xff] }
 0x346   : > { %v12804_v61 = vpop.permute.xlu0 %7340  ;;  %v12860_v45 = vpack.i.bf16 %v819_v12, %v816_v15 }
 0x347   : > { %15052 = vst [vmem:[#allocation120_spill] sm:$0xff] %v12804_v61  ;;  %7625 = vrot.lane.b32.xlu1 %v7624_v33, %s8095_s10 }
 0x348   : > { %7620 = vrot.lane.b32.xlu0 %v7619_v62, %s8094_s9  ;;  %v12808_v23 = vpop.permute.xlu1 %7355 }
 0x349   : > { %15053 = vst [vmem:[#allocation65_spill] sm:$0xff] %v12808_v23 }
 0x34a   : > { %v12810_v42 = vpop.permute.xlu0 %7350 }
 0x34b   : > { %15054 = vst [vmem:[#allocation41_spill] sm:$0xff] %v12810_v42  ;;  %7635 = vrot.lane.b32.xlu1 %v7619_v62, %s8096_s30 }
 0x34c   : > { %7630 = vrot.lane.b32.xlu0 %v7629_v4, %s8095_s10 }
 0x34d   : > { %v12814_v14 = vpop.permute.xlu1 %7365 }
 0x34e   : > { %15055 = vst [vmem:[#allocation68_spill] sm:$0xff] %v12814_v14  ;;  %v12816_v38 = vpop.permute.xlu0 %7360  ;;  %v15071_v14 = vld [vmem:[#allocation13_spill] sm:$0xff] }
 0x34f   : > { %15056 = vst [vmem:[#allocation33_spill] sm:$0xff] %v12816_v38  ;;  %7645 = vrot.lane.b32.xlu1 %v12697_v51, %s8092_s7  ;;  %v813_v51 = vld [vmem:[#allocation2 + $0x418] sm:$0xff]  ;;  %v8016_v38 = vld [vmem:[#allocation2 + $0x40] sm:$0xff] }
 0x350   : > { %7640 = vrot.lane.b32.xlu0 %v7639_v37, %s8096_s30  ;;  %v12840_v1 = vpack.i.bf16 %v813_v51, %v810_v3  ;;  %v12850_v49 = vpack.i.bf16 %v816_v15, %v813_v51  ;;  %v825_v15 = vld [vmem:[#allocation2 + $0x478] sm:$0xff] }
 0x351   : > { %v12821_v59 = vpop.permute.xlu1 %7375 }
 0x352   : > { %15057 = vst [vmem:[#allocation6_spill] sm:$0xff] %v12821_v59  ;;  %v12823_v22 = vpop.permute.xlu0 %7370  ;;  %v15067_v59 = vld [vmem:[#allocation49_spill] sm:$0xff] }
 0x353   : > { %15058 = vst [vmem:[#allocation125_spill] sm:$0xff] %v12823_v22  ;;  %7655 = vrot.lane.b32.xlu1 %v12705_v48, %s8093_s8  ;;  %v7248_v22 = vunpack.i.h.bf16 %v12606_v53 }
 0x354   : > { %7650 = vrot.lane.b32.xlu0 %v12750_v9, %s8092_s7 }
 0x355   : > { %v12831_v8 = vpop.permute.xlu1 %7385 }
 0x356   : > { %15059 = vst [vmem:[#allocation114_spill] sm:$0xff] %v12831_v8  ;;  %v12833_v0 = vpop.permute.xlu0 %7380  ;;  %v828_v8 = vld [vmem:[#allocation2 + $0x490] sm:$0xff] }
 0x357   : > { %15060 = vst [vmem:[#allocation30_spill] sm:$0xff] %v12833_v0  ;;  %7665 = vrot.lane.b32.xlu1 %v12827_v21, %s8094_s9  ;;  %v12878_v0 = vpack.i.bf16 %v825_v15, %v822_v46 }
 0x358   : > { %7660 = vrot.lane.b32.xlu0 %v7589_v57, %s8093_s8 }
 0x359   : > { %v12842_v48 = vpop.permute.xlu1 %7395 }
 0x35a   : > { %v7397_v39 = vunpack.i.l.bf16 %v12842_v48 }
 0x35b   : > { %7675 = vrot.lane.b32.xlu1 %v12837_v20, %s8095_s10  ;;  %v12846_v9 = vpop.permute.xlu0 %7390 }
 0x35c   : > { %7670 = vrot.lane.b32.xlu0 %v12840_v1, %s8094_s9 }
 0x35d   : > { %v12852_v18 = vpop.permute.xlu1 %7405 }
 0x35f   : > { %7685 = vrot.lane.b32.xlu1 %v12840_v1, %s8096_s30  ;;  %v12856_v57 = vpop.permute.xlu0 %7400 }
 0x360   : > { %7680 = vrot.lane.b32.xlu0 %v12850_v49, %s8095_s10 }
 0x361   : > { %v12862_v3 = vpop.permute.xlu1 %7415 }
 0x363   : > { %7695 = vrot.lane.b32.xlu1 %v7619_v62, %s8091_s6  ;;  %v12867_v51 = vpop.permute.xlu0 %7410 }
 0x364   : > { %7690 = vrot.lane.b32.xlu0 %v12860_v45, %s8096_s30 }
 0x365   : > { %v12870_v5 = vpop.permute.xlu1 %7425 }
 0x366   : > { %15061 = vst [vmem:[#allocation110_spill] sm:$0xff] %v12870_v5 }
 0x367   : > { %7705 = vrot.lane.b32.xlu1 %v7629_v4, %s8092_s7  ;;  %v12873_v54 = vpop.permute.xlu0 %7420  ;;  %v12885_v4 = vpack.i.bf16 %v828_v8, %v825_v15  ;;  %v15066_v15 = vld [vmem:[#allocation50_spill] sm:$0xff] }
 0x368   : > { %7700 = vrot.lane.b32.xlu0 %v7624_v33, %s8092_s7  ;;  %15062 = vst [vmem:[#allocation10_spill] sm:$0xff] %v12873_v54 }
 0x369   : > { %v12876_v47 = vpop.permute.xlu1 %7435 }
 0x36a   : > { %15063 = vst [vmem:[#allocation131_spill] sm:$0xff] %v12876_v47  ;;  %v7392_v47 = vunpack.i.l.bf16 %v12846_v9 }
 0x36b   : > { %7715 = vrot.lane.b32.xlu1 %v7639_v37, %s8093_s8  ;;  %v12891_v37 = vpack.i.bf16 %v822_v46, %v819_v12  ;;  %v15069_v46 = vld [vmem:[#allocation52_spill] sm:$0xff]  ;;  %v4557_v12 = vsel %vm367_vm0, %v8015_v36, %v7238_v35  ;;  %v7313_v36 = vunpack.i.h.bf16 %v12777_v50  ;;  %v12941_v35 = vld [vmem:[#allocation2 + $0x4d8] sm:$0xff] }
 0x36c   : > { %7710 = vrot.lane.b32.xlu0 %v7619_v62, %s8093_s8  ;;  %v7237_v62 = vunpack.i.l.bf16 %v12571_v41  ;;  %v12906_v41 = vpack.i.bf16 %v831_v17, %v828_v8  ;;  %v4555_v17 = vsel %vm367_vm0, %v8017_v11, %v7233_v43  ;;  %v4554_v8 = vsel %vm367_vm0, %v684_v32, %v7232_v40  ;;  %v12930_v11 = vld [vmem:[#allocation2 + $0x4f0] sm:$0xff]  ;;  %v8018_v43 = vld [vmem:[#allocation2 + $0xb8] sm:$0xff]  ;;  %v12937_v32 = vld [vmem:[#allocation2 + $0x508] sm:$0xff] }
 0x36d   : > { %v12881_v10 = vpop.permute.xlu0 %7430  ;;  %v12889_v33 = vpop.permute.xlu1 %7445  ;;  %v12933_v40 = vsel %vm367_vm0, %v8018_v43, %v7248_v22  ;;  %v4587_v42 = vsel %vm2580_vm1, %v4555_v17, %v7313_v36  ;;  %v4589_v52 = vsel %vm2580_vm1, %v4557_v12, %v7318_v30 }
 0x36e   : > { %15064 = vst [vmem:[#allocation78_spill] sm:$0xff] %v12881_v10  ;;  %v4556_v25 = vsel %vm367_vm0, %v8016_v38, %v7237_v62  ;;  %v7312_v38 = vunpack.i.l.bf16 %v12777_v50  ;;  %v12939_v62 = vld [vmem:[#allocation2 + $0x4c0] sm:$0xff]  ;;  %v7393_v50 = vunpack.i.h.bf16 %v12846_v9  ;;  %v7448_v22 = vunpack.i.h.bf16 %v12889_v33 }
 0x36f   : > { %7725 = vrot.lane.b32.xlu1 %v12878_v0, %s8094_s9  ;;  %v7447_v43 = vunpack.i.l.bf16 %v12889_v33  ;;  %v12955_v9 = vpack.i.bf16 %v12937_v32, %v12930_v11 }
 0x370   : > { %7720 = vrot.lane.b32.xlu0 %v12860_v45, %s8094_s9  ;;  %v4586_v31 = vsel %vm2580_vm1, %v4554_v8, %v7312_v38  ;;  %v4619_v36 = vsel %vm2645_vm2, %v4587_v42, %v7393_v50 }
 0x371   : > { %v12897_v28 = vpop.permute.xlu0 %7440  ;;  %v12913_v6 = vpop.permute.xlu1 %7455  ;;  %v4618_v17 = vsel %vm2645_vm2, %v4586_v31, %v7392_v47  ;;  %v4651_v54 = vsel %vm2710_vm3, %v4619_v36, %v7448_v22 }
 0x372   : > { %15065 = vst [vmem:[#allocation48_spill] sm:$0xff] %v12897_v28  ;;  %v7317_v28 = vunpack.i.l.bf16 %v12773_v26  ;;  %v7398_v26 = vunpack.i.h.bf16 %v12842_v48  ;;  %v7458_v33 = vunpack.i.h.bf16 %v12913_v6  ;;  %v7457_v8 = vunpack.i.l.bf16 %v12913_v6 }
 0x373   : > { %7735 = vrot.lane.b32.xlu1 %v12885_v4, %s8095_s10  ;;  %v4650_v48 = vsel %vm2710_vm3, %v4618_v17, %v7447_v43 }
 0x374   : > { %7730 = vrot.lane.b32.xlu0 %v12891_v37, %s8095_s10  ;;  %v4588_v29 = vsel %vm2580_vm1, %v4556_v25, %v7317_v28  ;;  %v4621_v28 = vsel %vm2645_vm2, %v4589_v52, %v7398_v26  ;;  %v4682_v47 = vsel %vm2775_vm5, %v4650_v48, %v7457_v8  ;;  %v4683_v25 = vsel %vm2775_vm5, %v4651_v54, %v7458_v33  ;;  %v8019_v48 = vld [vmem:[#allocation2 + $0xa0] sm:$0xff] }
 0x375   : > { %v12923_v23 = vpop.permute.xlu0 %7450 }
 0x376   : > { %v7466_v60 = vpop.permute.xlu1 %7465  ;;  %v7453_v61 = vunpack.i.h.bf16 %v12923_v23 }
 0x377   : > { %7745 = vrot.lane.b32.xlu1 %v12906_v41, %s8096_s30  ;;  %v7468_v38 = vunpack.i.h.bf16 %v7466_v60  ;;  %v7467_v16 = vunpack.i.l.bf16 %v7466_v60  ;;  %v4620_v60 = vsel %vm2645_vm2, %v4588_v29, %v7397_v39 }
 0x378   : > { %7740 = vrot.lane.b32.xlu0 %v12878_v0, %s8096_s30  ;;  %v4653_v52 = vsel %vm2710_vm3, %v4621_v28, %v7453_v61 }
 0x379   : > { %v7461_v10 = vpop.permute.xlu0 %7460  ;;  %v4714_v42 = vsel %vm2840_vm6, %v4682_v47, %v7467_v16  ;;  %v846_v16 = vld [vmem:[#allocation2 + $0x520] sm:$0xff] }
 0x37a   : > { %v7463_v12 = vunpack.i.h.bf16 %v7461_v10 }
 0x37b   : > { %7755 = vrot.lane.b32.xlu1 %v12840_v1, %s8091_s6  ;;  %v7476_v5 = vpop.permute.xlu1 %7475 }
 0x37c   : > { %7750 = vrot.lane.b32.xlu0 %v12827_v21, %s8091_s6  ;;  %v7452_v21 = vunpack.i.l.bf16 %v12923_v23  ;;  %v7478_v58 = vunpack.i.h.bf16 %v7476_v5  ;;  %v7477_v31 = vunpack.i.l.bf16 %v7476_v5  ;;  %v4715_v23 = vsel %vm2840_vm6, %v4683_v25, %v7468_v38 }
 0x37d   : > { %v7471_v6 = vpop.permute.xlu0 %7470  ;;  %v7462_v5 = vunpack.i.l.bf16 %v7461_v10  ;;  %v4685_v17 = vsel %vm2775_vm5, %v4653_v52, %v7463_v12  ;;  %v15078_v52 = vunpack.i.l.bf16 %v12614_v27 }
 0x37e   : > { %v7473_v50 = vunpack.i.h.bf16 %v7471_v6  ;;  %v4652_v43 = vsel %vm2710_vm3, %v4620_v60, %v7452_v21  ;;  %v4746_v54 = vsel %vm2905_vm7, %v4714_v42, %v7477_v31  ;;  %v15074_v42 = vrot.slane %v15066_v15, 1 }
 0x37f   : > { %7765 = vrot.lane.b32.xlu1 %v12850_v49, %s8092_s7  ;;  %v7486_v30 = vpop.permute.xlu1 %7485  ;;  %v7472_v49 = vunpack.i.l.bf16 %v7471_v6  ;;  %v4684_v61 = vsel %vm2775_vm5, %v4652_v43, %v7462_v5  ;;  %v15073_v6 = vunpack.i.l.bf16 %v12606_v53  ;;  %v15075_v53 = vrot.slane %v15067_v59, 1  ;;  %v13011_v5 = vld [vmem:[#allocation2 + $0x538] sm:$0xff] }
 0x380   : > { %7760 = vrot.lane.b32.xlu0 %v12837_v20, %s8092_s7  ;;  %v7488_v22 = vunpack.i.h.bf16 %v7486_v30  ;;  %v7487_v39 = vunpack.i.l.bf16 %v7486_v30  ;;  %v4747_v20 = vsel %vm2905_vm7, %v4715_v23, %v7478_v58  ;;  %v4717_v60 = vsel %vm2840_vm6, %v4685_v17, %v7473_v50 }
 0x381   : > { %v7481_v29 = vpop.permute.xlu0 %7480  ;;  %v4560_v21 = vsel %vm367_vm0, %v8019_v48, %v15073_v6  ;;  %v4716_v31 = vsel %vm2840_vm6, %v4684_v61, %v7472_v49  ;;  %v7789_v15 = vpack.i.bf16 %v12930_v11, %v12941_v35  ;;  %v15077_v59 = vunpack.i.h.bf16 %v12614_v27 }
 0x382   : > { %v4778_v10 = vsel %vm2970_vm8, %v4746_v54, %v7487_v39  ;;  %v4779_v26 = vsel %vm2970_vm8, %v4747_v20, %v7488_v22  ;;  %v7483_v33 = vunpack.i.h.bf16 %v7481_v29  ;;  %v7482_v8 = vunpack.i.l.bf16 %v7481_v29  ;;  %v8020_v22 = vld [vmem:[#allocation2 + $0x88] sm:$0xff]  ;;  %v8021_v29 = vld [vmem:[#allocation2 + $0x70] sm:$0xff] }
 0x383   : > { %7775 = vrot.lane.b32.xlu1 %v12860_v45, %s8093_s8  ;;  %v4844_v36 = vrot.slane %v4778_v10, 1  ;;  %v4847_v38 = vrot.slane %v4779_v26, 1  ;;  %v4559_v39 = vsel %vm367_vm0, %v8020_v22, %v15077_v59  ;;  %v4558_v43 = vsel %vm367_vm0, %v8021_v29, %v15078_v52 }
 0x384   : > { %7770 = vrot.lane.b32.xlu0 %v12840_v1, %s8093_s8  ;;  %v7794_v1 = vpack.i.bf16 %v846_v16, %v12937_v32  ;;  %v4748_v30 = vsel %vm2905_vm7, %v4716_v31, %v7482_v8  ;;  %v4749_v50 = vsel %vm2905_vm7, %v4717_v60, %v7483_v33  ;;  %v15076_v32 = vpack.i.bf16 %v12941_v35, %v12939_v62 }
 0x385   : > { %v12995_v58 = vpop.permute.xlu1 %7495  ;;  %v7491_v28 = vpop.permute.xlu0 %7490  ;;  %v4845_v23 = vsel %vm4842_vm11, %v15074_v42, %v4844_v36  ;;  %v4848_v12 = vsel %vm4842_vm11, %v15075_v53, %v4847_v38  ;;  %v13031_v35 = vpack.i.bf16 %v13011_v5, %v846_v16  ;;  %v7323_v11 = vunpack.i.h.bf16 %v12788_v19 }
 0x386   : > { %v7493_v47 = vunpack.i.h.bf16 %v7491_v28  ;;  %v7492_v25 = vunpack.i.l.bf16 %v7491_v28  ;;  %v4971_v49 = vpack.c.bf16 %v4848_v12, %v4845_v23  ;;  %v7322_v8 = vunpack.i.l.bf16 %v12788_v19 }
 0x387   : > { %7785 = vrot.lane.b32.xlu1 %v12955_v9, %s8094_s9  ;;  %v15079_v27 = vrot.slane %v15069_v46, 1  ;;  %v15080_v17 = vrot.slane %v15068_v55, 1  ;;  %v7403_v38 = vunpack.i.h.bf16 %v12856_v57  ;;  %v7402_v16 = vunpack.i.l.bf16 %v12856_v57 }
 0x388   : > { %7780 = vrot.lane.b32.xlu0 %v15076_v32, %s8094_s9  ;;  %v4780_v54 = vsel %vm2970_vm8, %v4748_v30, %v7492_v25  ;;  %v4781_v20 = vsel %vm2970_vm8, %v4749_v50, %v7493_v47  ;;  %5792 = vmatprep.mubr.msk.bf16.mxu0 %vm3286_vm9, %v4971_v49  ;;  %v7328_v19 = vunpack.i.h.bf16 %v12784_v24  ;;  %v7327_v31 = vunpack.i.l.bf16 %v12784_v24 }
 0x389   : > { %v7506_v62 = vpop.permute.xlu1 %7505  ;;  %v4850_v10 = vrot.slane %v4780_v54, 1  ;;  %v4853_v26 = vrot.slane %v4781_v20, 1  ;;  %v7498_v46 = vunpack.i.h.bf16 %v12995_v58  ;;  %v7497_v60 = vunpack.i.l.bf16 %v12995_v58 }
 0x38a   : > { %v7501_v33 = vpop.permute.xlu0 %7500  ;;  %v7253_v55 = vunpack.i.h.bf16 %v12637_v7  ;;  %v4591_v47 = vsel %vm2580_vm1, %v4559_v39, %v7323_v11  ;;  %v7408_v57 = vunpack.i.h.bf16 %v12852_v18  ;;  %v7407_v24 = vunpack.i.l.bf16 %v12852_v18 }
 0x38b   : > { %7795 = vrot.lane.b32.xlu1 %v7794_v1, %s8095_s10  ;;  %v4851_v61 = vsel %vm4842_vm11, %v15079_v27, %v4850_v10  ;;  %v4854_v36 = vsel %vm4842_vm11, %v15080_v17, %v4853_v26  ;;  %v4590_v1 = vsel %vm2580_vm1, %v4558_v43, %v7322_v8  ;;  %v7508_v25 = vunpack.i.h.bf16 %v7506_v62 }
 0x38c   : > { %7790 = vrot.lane.b32.xlu0 %v7789_v15, %s8095_s10  ;;  %v4972_v48 = vpack.c.bf16 %v4854_v36, %v4851_v61  ;;  %v7507_v42 = vunpack.i.l.bf16 %v7506_v62  ;;  %v4622_v58 = vsel %vm2645_vm2, %v4590_v1, %v7402_v16  ;;  %v4623_v23 = vsel %vm2645_vm2, %v4591_v47, %v7403_v38  ;;  %v13082_v38 = vld [vmem:[#allocation2 + $0x550] sm:$0xff]  ;;  %v13084_v16 = vld [vmem:[#allocation2 + $0x568] sm:$0xff] }
 0x38d   : > { %v7516_v6 = vpop.permute.xlu1 %7515  ;;  %v4592_v50 = vsel %vm2580_vm1, %v4560_v21, %v7327_v31  ;;  %v4593_v32 = vsel %vm2580_vm1, %v12933_v40, %v7328_v19  ;;  %v4654_v49 = vsel %vm2710_vm3, %v4622_v58, %v7497_v60  ;;  %v4655_v18 = vsel %vm2710_vm3, %v4623_v23, %v7498_v46 }
 0x38e   : > { %v7511_v28 = vpop.permute.xlu0 %7510  ;;  %5793 = vmatmul.mubr.msk.bf16.vlgmr.msra.gmra.mrb[0].mxu0 %vm3286_vm9, %v4972_v48  ;;  %v7518_v53 = vunpack.i.h.bf16 %v7516_v6  ;;  %v7517_v12 = vunpack.i.l.bf16 %v7516_v6  ;;  %v7503_v22 = vunpack.i.h.bf16 %v7501_v33  ;;  %v7502_v59 = vunpack.i.l.bf16 %v7501_v33 }
 0x38f   : > { %7805 = vrot.lane.b32.xlu1 %v13031_v35, %s8096_s30  ;;  %v4624_v29 = vsel %vm2645_vm2, %v4592_v50, %v7407_v24  ;;  %v4625_v52 = vsel %vm2645_vm2, %v4593_v32, %v7408_v57  ;;  %v4686_v21 = vsel %vm2775_vm5, %v4654_v49, %v7507_v42  ;;  %v4687_v40 = vsel %vm2775_vm5, %v4655_v18, %v7508_v25  ;;  %v858_v18 = vld [vmem:[#allocation2 + $0x580] sm:$0xff] }
 0x390   : > { %7800 = vrot.lane.b32.xlu0 %v12955_v9, %s8096_s30  ;;  %v4718_v43 = vsel %vm2840_vm6, %v4686_v21, %v7517_v12  ;;  %v4719_v54 = vsel %vm2840_vm6, %v4687_v40, %v7518_v53  ;;  %v7513_v20 = vunpack.i.h.bf16 %v7511_v28  ;;  %v7512_v62 = vunpack.i.l.bf16 %v7511_v28  ;;  %v8023_v21 = vld [vmem:[#allocation2 + $0x130] sm:$0xff] }
 0x391   : > { %v7526_v30 = vpop.permute.xlu1 %7525  ;;  %v4657_v61 = vsel %vm2710_vm3, %v4625_v52, %v7503_v22  ;;  %v4656_v17 = vsel %vm2710_vm3, %v4624_v29, %v7502_v59  ;;  %v7252_v47 = vunpack.i.l.bf16 %v12637_v7  ;;  %v13099_v42 = vpack.i.bf16 %v13084_v16, %v13082_v38 }
 0x392   : > { %v7521_v15 = vpop.permute.xlu0 %7520  ;;  %v7528_v9 = vunpack.i.h.bf16 %v7526_v30  ;;  %v7527_v39 = vunpack.i.l.bf16 %v7526_v30  ;;  %v4688_v46 = vsel %vm2775_vm5, %v4656_v17, %v7512_v62  ;;  %v4689_v60 = vsel %vm2775_vm5, %v4657_v61, %v7513_v20  ;;  %v861_v62 = vld [vmem:[#allocation2 + $0x598] sm:$0xff] }
 0x393   : > { %7815 = vrot.lane.b32.xlu1 %v12878_v0, %s8091_s6  ;;  %v7523_v26 = vunpack.i.h.bf16 %v7521_v15  ;;  %v7522_v33 = vunpack.i.l.bf16 %v7521_v15  ;;  %v15081_v23 = vrot.slane %v15071_v14, 1  ;;  %v15082_v12 = vrot.slane %v15070_v56, 1  ;;  %v15083_v15 = vld [vmem:[#allocation109_spill] sm:$0xff] }
 0x394   : > { %7810 = vrot.lane.b32.xlu0 %v12860_v45, %s8091_s6  ;;  %v4750_v36 = vsel %vm2905_vm7, %v4718_v43, %v7527_v39  ;;  %v4751_v45 = vsel %vm2905_vm7, %v4719_v54, %v7528_v9  ;;  %v4861_v22 = vrot.slane %v15083_v15, 1  ;;  %v8022_v39 = vld [vmem:[#allocation2 + $0x148] sm:$0xff]  ;;  %v15085_v29 = vunpack.i.h.bf16 %v12632_v34 }
 0x395   : > { %v7536_v10 = vpop.permute.xlu1 %7535  ;;  %v4720_v57 = vsel %vm2840_vm6, %v4688_v46, %v7522_v33  ;;  %v4721_v24 = vsel %vm2840_vm6, %v4689_v60, %v7523_v26  ;;  %v15086_v40 = vunpack.i.l.bf16 %v12632_v34  ;;  %v7333_v33 = vunpack.i.h.bf16 %v12796_v63  ;;  %v15088_v46 = vld [vmem:[#allocation12_spill] sm:$0xff] }
 0x396   : > { %v7538_v11 = vunpack.i.h.bf16 %v7536_v10  ;;  %v7537_v8 = vunpack.i.l.bf16 %v7536_v10  ;;  %v7531_v27 = vpop.permute.xlu0 %7530  ;;  %v4565_v52 = vsel %vm367_vm0, %v8022_v39, %v15085_v29  ;;  %v8024_v10 = vld [vmem:[#allocation2 + $0x118] sm:$0xff]  ;;  %v7854_v34 = vpack.i.bf16 %v858_v18, %v13084_v16 }
 0x397   : > { %7825 = vrot.lane.b32.xlu1 %v12885_v4, %s8092_s7  ;;  %v7533_v19 = vunpack.i.h.bf16 %v7531_v27  ;;  %v7532_v31 = vunpack.i.l.bf16 %v7531_v27  ;;  %v4563_v26 = vsel %vm367_vm0, %v8024_v10, %v7253_v55  ;;  %v15087_v7 = vrot.slane %v15072_v2, 1 }
 0x398   : > { %v4782_v48 = vsel %vm2970_vm8, %v4750_v36, %v7537_v8  ;;  %v4783_v6 = vsel %vm2970_vm8, %v4751_v45, %v7538_v11  ;;  %7820 = vrot.lane.b32.xlu0 %v12891_v37, %s8092_s7  ;;  %v7332_v11 = vunpack.i.l.bf16 %v12796_v63  ;;  %v8025_v8 = vld [vmem:[#allocation2 + $0x100] sm:$0xff]  ;;  %v7849_v63 = vpack.i.bf16 %v13082_v38, %v13011_v5 }
 0x399   : > { %v4856_v28 = vrot.slane %v4782_v48, 1  ;;  %v4859_v1 = vrot.slane %v4783_v6, 1  ;;  %v13092_v4 = vpop.permute.xlu1 %7545  ;;  %v4752_v50 = vsel %vm2905_vm7, %v4720_v57, %v7532_v31  ;;  %v4753_v32 = vsel %vm2905_vm7, %v4721_v24, %v7533_v19 }
 0x39a   : > { %v7541_v25 = vpop.permute.xlu0 %7540  ;;  %v4562_v27 = vsel %vm367_vm0, %v8025_v8, %v7252_v47  ;;  %v7413_v17 = vunpack.i.h.bf16 %v12867_v51  ;;  %v7412_v36 = vunpack.i.l.bf16 %v12867_v51  ;;  %v7864_v48 = vpack.i.bf16 %v861_v62, %v858_v18 }
 0x39b   : > { %v7543_v37 = vunpack.i.h.bf16 %v7541_v25  ;;  %v7542_v58 = vunpack.i.l.bf16 %v7541_v25  ;;  %7835 = vrot.lane.b32.xlu1 %v12906_v41, %s8093_s8  ;;  %v4857_v53 = vsel %vm4842_vm11, %v15081_v23, %v4856_v28  ;;  %v4860_v30 = vsel %vm4842_vm11, %v15082_v12, %v4859_v1  ;;  %v15084_v41 = vld [vmem:[#allocation7_spill] sm:$0xff] }
 0x39c   : > { %7830 = vrot.lane.b32.xlu0 %v12878_v0, %s8093_s8  ;;  %v4973_v49 = vpack.c.bf16 %v4860_v30, %v4857_v53  ;;  %v4870_v59 = vrot.slane %v15084_v41, 1  ;;  %v4564_v0 = vsel %vm367_vm0, %v8023_v21, %v15086_v40  ;;  %v7338_v6 = vunpack.i.h.bf16 %v12794_v13 }
 0x39d   : > { %v4784_v14 = vsel %vm2970_vm8, %v4752_v50, %v7542_v58  ;;  %v4785_v9 = vsel %vm2970_vm8, %v4753_v32, %v7543_v37  ;;  %v7556_v56 = vpop.permute.xlu1 %7555  ;;  %v7548_v19 = vunpack.i.h.bf16 %v13092_v4  ;;  %v7547_v2 = vunpack.i.l.bf16 %v13092_v4 }
 0x39e   : > { %v4862_v43 = vrot.slane %v4784_v14, 1  ;;  %v4865_v54 = vrot.slane %v4785_v9, 1  ;;  %v13123_v20 = vpop.permute.xlu0 %7550  ;;  %5796 = vmatprep.mubr.msk.bf16.mxu0 %vm3286_vm9, %v4973_v49  ;;  %v4867_v60 = vrot.slane %v15088_v46, 1  ;;  %v4594_v5 = vsel %vm2580_vm1, %v4562_v27, %v7332_v11 }
 0x39f   : > { %7845 = vrot.lane.b32.xlu1 %v13099_v42, %s8094_s9  ;;  %v4595_v38 = vsel %vm2580_vm1, %v4563_v26, %v7333_v33  ;;  %v7418_v51 = vunpack.i.h.bf16 %v12862_v3  ;;  %v7417_v28 = vunpack.i.l.bf16 %v12862_v3  ;;  %v7557_v1 = vunpack.i.l.bf16 %v7556_v56 }
 0x3a0   : > { %7840 = vrot.lane.b32.xlu0 %v13031_v35, %s8094_s9  ;;  %v4863_v61 = vsel %vm4842_vm11, %v4861_v22, %v4862_v43  ;;  %v4866_v55 = vsel %vm4842_vm11, %v15087_v7, %v4865_v54  ;;  %v7337_v35 = vunpack.i.l.bf16 %v12794_v13  ;;  %v7558_v13 = vunpack.i.h.bf16 %v7556_v56 }
 0x3a1   : > { %v7566_v45 = vpop.permute.xlu1 %7565  ;;  %v4974_v16 = vpack.c.bf16 %v4866_v55, %v4863_v61  ;;  %v4626_v4 = vsel %vm2645_vm2, %v4594_v5, %v7412_v36  ;;  %v4627_v47 = vsel %vm2645_vm2, %v4595_v38, %v7413_v17  ;;  %v4597_v58 = vsel %vm2580_vm1, %v4565_v52, %v7338_v6 }
 0x3a2   : > { %v7561_v31 = vpop.permute.xlu0 %7560  ;;  %v7568_v57 = vunpack.i.h.bf16 %v7566_v45  ;;  %v7567_v24 = vunpack.i.l.bf16 %v7566_v45  ;;  %v4596_v37 = vsel %vm2580_vm1, %v4564_v0, %v7337_v35  ;;  %v4658_v23 = vsel %vm2710_vm3, %v4626_v4, %v7547_v2 }
 0x3a3   : > { %5797 = vmatmul.mubr.msk.bf16.gmra.mrb[4].mxu0 %vm3286_vm9, %v4974_v16  ;;  %7855 = vrot.lane.b32.xlu1 %v7854_v34, %s8095_s10  ;;  %v4659_v53 = vsel %vm2710_vm3, %v4627_v47, %v7548_v19  ;;  %v7553_v12 = vunpack.i.h.bf16 %v13123_v20  ;;  %v7552_v30 = vunpack.i.l.bf16 %v13123_v20  ;;  %v4628_v49 = vsel %vm2645_vm2, %v4596_v37, %v7417_v28  ;;  %v15090_v28 = vld [vmem:[#allocation79_spill] sm:$0xff] }
 0x3a4   : > { %7850 = vrot.lane.b32.xlu0 %v7849_v63, %s8095_s10  ;;  %v4629_v18 = vsel %vm2645_vm2, %v4597_v58, %v7418_v51  ;;  %v4690_v15 = vsel %vm2775_vm5, %v4658_v23, %v7557_v1  ;;  %v4691_v22 = vsel %vm2775_vm5, %v4659_v53, %v7558_v13  ;;  %v7563_v56 = vunpack.i.h.bf16 %v7561_v31  ;;  %v15091_v13 = vld [vmem:[#allocation15_spill] sm:$0xff]  ;;  %v15094_v23 = vld [vmem:[#allocation16_spill] sm:$0xff] }
 0x3a5   : > { %v7576_v25 = vpop.permute.xlu1 %7575  ;;  %v4722_v14 = vsel %vm2840_vm6, %v4690_v15, %v7567_v24  ;;  %v4723_v9 = vsel %vm2840_vm6, %v4691_v22, %v7568_v57  ;;  %v7562_v39 = vunpack.i.l.bf16 %v7561_v31  ;;  %v4661_v54 = vsel %vm2710_vm3, %v4629_v18, %v7553_v12  ;;  %v15089_v31 = vld [vmem:[#allocation111_spill] sm:$0xff]  ;;  %v15092_v57 = vld [vmem:[#allocation24_spill] sm:$0xff]  ;;  %v15095_v18 = vld [vmem:[#allocation10_spill] sm:$0xff] }
 0x3a6   : > { %v7571_v3 = vpop.permute.xlu0 %7570  ;;  %v7578_v50 = vunpack.i.h.bf16 %v7576_v25  ;;  %v7577_v32 = vunpack.i.l.bf16 %v7576_v25  ;;  %v4660_v20 = vsel %vm2710_vm3, %v4628_v49, %v7552_v30  ;;  %v4693_v8 = vsel %vm2775_vm5, %v4661_v54, %v7563_v56  ;;  %v15096_v56 = vld [vmem:[#allocation121_spill] sm:$0xff] }
 0x3a7   : > { %7865 = vrot.lane.b32.xlu1 %v7864_v48, %s8096_s30  ;;  %v7573_v52 = vunpack.i.h.bf16 %v7571_v3  ;;  %v7572_v21 = vunpack.i.l.bf16 %v7571_v3  ;;  %v4692_v34 = vsel %vm2775_vm5, %v4660_v20, %v7562_v39  ;;  %v7263_v6 = vunpack.i.h.bf16 %v12663_v44  ;;  %v8026_v3 = vld [vmem:[#allocation2 + $0x178] sm:$0xff]  ;;  %v8029_v54 = vld [vmem:[#allocation2 + $0x190] sm:$0xff] }
 0x3a8   : > { %7860 = vrot.lane.b32.xlu0 %v13099_v42, %s8096_s30  ;;  %v4754_v62 = vsel %vm2905_vm7, %v4722_v14, %v7577_v32  ;;  %v4755_v42 = vsel %vm2905_vm7, %v4723_v9, %v7578_v50  ;;  %v4876_v46 = vrot.slane %v15089_v31, 1  ;;  %v7262_v5 = vunpack.i.l.bf16 %v12663_v44  ;;  %v15093_v44 = vld [vmem:[#allocation120_spill] sm:$0xff]  ;;  %v8027_v32 = vld [vmem:[#allocation2 + $0x160] sm:$0xff] }
 0x3a9   : > { %v7586_v29 = vpop.permute.xlu1 %7585  ;;  %v4724_v55 = vsel %vm2840_vm6, %v4692_v34, %v7572_v21  ;;  %v4725_v63 = vsel %vm2840_vm6, %v4693_v8, %v7573_v52  ;;  %v4873_v41 = vrot.slane %v15090_v28, 1  ;;  %v7268_v24 = vunpack.i.h.bf16 %v15092_v57 }
 0x3aa   : > { %v7588_v40 = vunpack.i.h.bf16 %v7586_v29  ;;  %v7587_v0 = vunpack.i.l.bf16 %v7586_v29  ;;  %v7581_v43 = vpop.permute.xlu0 %7580  ;;  %v7267_v25 = vunpack.i.l.bf16 %v15092_v57  ;;  %v7343_v37 = vunpack.i.h.bf16 %v15093_v44 }
 0x3ab   : > { %v7583_v33 = vunpack.i.h.bf16 %v7581_v43  ;;  %v7582_v11 = vunpack.i.l.bf16 %v7581_v43  ;;  %v7342_v58 = vunpack.i.l.bf16 %v15093_v44  ;;  %v4879_v53 = vrot.slane %v15094_v23, 1 }
 0x3ac   : > { %v4786_v10 = vsel %vm2970_vm8, %v4754_v62, %v7587_v0  ;;  %v4787_v26 = vsel %vm2970_vm8, %v4755_v42, %v7588_v40  ;;  %v4567_v12 = vsel %vm367_vm0, %v8026_v3, %v7263_v6  ;;  %v4566_v49 = vsel %vm367_vm0, %v8027_v32, %v7262_v5  ;;  %v8028_v0 = vld [vmem:[#allocation2 + $0x1a8] sm:$0xff] }
 0x3ad   : > { %v4868_v27 = vrot.slane %v4786_v10, 1  ;;  %v4871_v61 = vrot.slane %v4787_v26, 1  ;;  %v13182_v7 = vpop.permute.xlu1 %7595  ;;  %v4756_v35 = vsel %vm2905_vm7, %v4724_v55, %v7582_v11  ;;  %v4757_v19 = vsel %vm2905_vm7, %v4725_v63, %v7583_v33  ;;  %v15097_v10 = vld [vmem:[#allocation110_spill] sm:$0xff] }
 0x3ae   : > { %v7591_v17 = vpop.permute.xlu0 %7590  ;;  %v7423_v15 = vunpack.i.h.bf16 %v15095_v18  ;;  %v7422_v22 = vunpack.i.l.bf16 %v15095_v18  ;;  %v7348_v39 = vunpack.i.h.bf16 %v15096_v56  ;;  %v7347_v29 = vunpack.i.l.bf16 %v15096_v56 }
 0x3af   : > { %v7593_v36 = vunpack.i.h.bf16 %v7591_v17  ;;  %v7592_v45 = vunpack.i.l.bf16 %v7591_v17  ;;  %v4869_v16 = vsel %vm4842_vm11, %v4867_v60, %v4868_v27  ;;  %v4872_v48 = vsel %vm4842_vm11, %v4870_v59, %v4871_v61 }
 0x3b0   : > { %v4975_v2 = vpack.c.bf16 %v4872_v48, %v4869_v16  ;;  %v4882_v59 = vrot.slane %v15091_v13, 1  ;;  %v7598_v52 = vunpack.i.h.bf16 %v13182_v7  ;;  %v7597_v21 = vunpack.i.l.bf16 %v13182_v7 }
 0x3b1   : > { %v4788_v38 = vsel %vm2970_vm8, %v4756_v35, %v7592_v45  ;;  %v4789_v51 = vsel %vm2970_vm8, %v4757_v19, %v7593_v36  ;;  %v7606_v60 = vpop.permute.xlu1 %7605  ;;  %v4569_v43 = vsel %vm367_vm0, %v8028_v0, %v7268_v24  ;;  %v4568_v20 = vsel %vm367_vm0, %v8029_v54, %v7267_v25 }
 0x3b2   : > { %v4874_v1 = vrot.slane %v4788_v38, 1  ;;  %v4877_v4 = vrot.slane %v4789_v51, 1  ;;  %v13199_v47 = vpop.permute.xlu0 %7600  ;;  %5800 = vmatprep.mubr.msk.bf16.mxu0 %vm3286_vm9, %v4975_v2  ;;  %v4598_v62 = vsel %vm2580_vm1, %v4566_v49, %v7342_v58  ;;  %v4599_v42 = vsel %vm2580_vm1, %v4567_v12, %v7343_v37 }
 0x3b3   : > { %v7428_v26 = vunpack.i.h.bf16 %v15097_v10  ;;  %v7427_v33 = vunpack.i.l.bf16 %v15097_v10  ;;  %v7608_v11 = vunpack.i.h.bf16 %v7606_v60  ;;  %v7607_v34 = vunpack.i.l.bf16 %v7606_v60 }
 0x3b4   : > { %v4875_v30 = vsel %vm4842_vm11, %v4873_v41, %v4874_v1  ;;  %v4878_v50 = vsel %vm4842_vm11, %v4876_v46, %v4877_v4  ;;  %v4630_v8 = vsel %vm2645_vm2, %v4598_v62, %v7422_v22  ;;  %v4631_v27 = vsel %vm2645_vm2, %v4599_v42, %v7423_v15 }
 0x3b5   : > { %v7616_v14 = vpop.permute.xlu1 %7615  ;;  %v4976_v9 = vpack.c.bf16 %v4878_v50, %v4875_v30  ;;  %v4600_v63 = vsel %vm2580_vm1, %v4568_v20, %v7347_v29  ;;  %v4601_v17 = vsel %vm2580_vm1, %v4569_v43, %v7348_v39  ;;  %v4662_v36 = vsel %vm2710_vm3, %v4630_v8, %v7597_v21  ;;  %v15098_v20 = vld [vmem:[#allocation25_spill] sm:$0xff] }
 0x3b6   : > { %v7611_v40 = vpop.permute.xlu0 %7610  ;;  %v7618_v61 = vunpack.i.h.bf16 %v7616_v14  ;;  %v7617_v7 = vunpack.i.l.bf16 %v7616_v14  ;;  %v4663_v45 = vsel %vm2710_vm3, %v4631_v27, %v7598_v52  ;;  %v7603_v48 = vunpack.i.h.bf16 %v13199_v47  ;;  %v15100_v27 = vld [vmem:[#allocation57_spill] sm:$0xff] }
 0x3b7   : > { %5801 = vmatmul.mubr.msk.bf16.gmra.mrb[8].mxu0 %vm3286_vm9, %v4976_v9  ;;  %v7602_v6 = vunpack.i.l.bf16 %v13199_v47  ;;  %v4632_v31 = vsel %vm2645_vm2, %v4600_v63, %v7427_v33  ;;  %v4633_v46 = vsel %vm2645_vm2, %v4601_v17, %v7428_v26  ;;  %v4694_v5 = vsel %vm2775_vm5, %v4662_v36, %v7607_v34 }
 0x3b8   : > { %v4695_v38 = vsel %vm2775_vm5, %v4663_v45, %v7608_v11  ;;  %v4726_v60 = vsel %vm2840_vm6, %v4694_v5, %v7617_v7  ;;  %v7613_v41 = vunpack.i.h.bf16 %v7611_v40  ;;  %v7612_v1 = vunpack.i.l.bf16 %v7611_v40  ;;  %v15099_v11 = vld [vmem:[#allocation116_spill] sm:$0xff] }
 0x3b9   : > { %v7626_v55 = vpop.permute.xlu1 %7625  ;;  %v13232_v2 = vpop.f32.mrb[0].mxu1  ;;  %v4727_v28 = vsel %vm2840_vm6, %v4695_v38, %v7618_v61  ;;  %v4665_v3 = vsel %vm2710_vm3, %v4633_v46, %v7603_v48  ;;  %v4664_v12 = vsel %vm2710_vm3, %v4632_v31, %v7602_v6  ;;  %v7273_v62 = vunpack.i.h.bf16 %v15098_v20  ;;  %v15101_v7 = vld [vmem:[#allocation56_spill] sm:$0xff] }
 0x3ba   : > { %v7621_v16 = vpop.permute.xlu0 %7620  ;;  %v7628_v35 = vunpack.i.h.bf16 %v7626_v55  ;;  %v7627_v19 = vunpack.i.l.bf16 %v7626_v55  ;;  %v13238_v51 = vpop.f32.mrb[1].mxu1  ;;  %v4696_v22 = vsel %vm2775_vm5, %v4664_v12, %v7612_v1  ;;  %v4697_v14 = vsel %vm2775_vm5, %v4665_v3, %v7613_v41  ;;  %v15104_v5 = vld [vmem:[#allocation80_spill] sm:$0xff]  ;;  %v15106_v12 = vld [vmem:[#allocation65_spill] sm:$0xff] }
 0x3bb   : > { %v13242_v4 = vpop.f32.mrb[2].mxu1  ;;  %v7623_v57 = vunpack.i.h.bf16 %v7621_v16  ;;  %v7622_v24 = vunpack.i.l.bf16 %v7621_v16  ;;  %v4888_v34 = vrot.slane %v15099_v11, 1  ;;  %v7272_v8 = vunpack.i.l.bf16 %v15098_v20  ;;  %v15102_v16 = vld [vmem:[#allocation128_spill] sm:$0xff] }
 0x3bc   : > { %v13244_v58 = vpop.f32.mrb[3].mxu1  ;;  %v4758_v30 = vsel %vm2905_vm7, %v4726_v60, %v7627_v19  ;;  %v4759_v50 = vsel %vm2905_vm7, %v4727_v28, %v7628_v35  ;;  %v4885_v61 = vrot.slane %v15100_v27, 1  ;;  %v4894_v55 = vrot.slane %v15101_v7, 1  ;;  %v15103_v35 = vld [vmem:[#allocation41_spill] sm:$0xff]  ;;  %v8030_v60 = vld [vmem:[#allocation2 + $0x208] sm:$0xff] }
 0x3bd   : > { %v7636_v47 = vpop.permute.xlu1 %7635  ;;  %v4728_v29 = vsel %vm2840_vm6, %v4696_v22, %v7622_v24  ;;  %v4729_v52 = vsel %vm2840_vm6, %v4697_v14, %v7623_v57  ;;  %v7278_v48 = vunpack.i.h.bf16 %v15102_v16  ;;  %v7277_v6 = vunpack.i.l.bf16 %v15102_v16  ;;  %v15105_v24 = vld [vmem:[#allocation78_spill] sm:$0xff]  ;;  %v8033_v14 = vld [vmem:[#allocation2 + $0x220] sm:$0xff] }
 0x3be   : > { %v7638_v25 = vunpack.i.h.bf16 %v7636_v47  ;;  %v7637_v44 = vunpack.i.l.bf16 %v7636_v47  ;;  %v7631_v37 = vpop.permute.xlu0 %7630  ;;  %v7353_v19 = vunpack.i.h.bf16 %v15103_v35  ;;  %v7352_v31 = vunpack.i.l.bf16 %v15103_v35  ;;  %v8031_v47 = vld [vmem:[#allocation2 + $0x1f0] sm:$0xff] }
 0x3bf   : > { %v7633_v18 = vunpack.i.h.bf16 %v7631_v37  ;;  %v7632_v15 = vunpack.i.l.bf16 %v7631_v37  ;;  %v4891_v38 = vrot.slane %v15104_v5, 1  ;;  %v4571_v28 = vsel %vm367_vm0, %v8030_v60, %v7273_v62 }
 0x3c0   : > { %v4790_v32 = vsel %vm2970_vm8, %v4758_v30, %v7637_v44  ;;  %v4791_v49 = vsel %vm2970_vm8, %v4759_v50, %v7638_v25  ;;  %v4570_v57 = vsel %vm367_vm0, %v8031_v47, %v7272_v8  ;;  %v7433_v25 = vunpack.i.h.bf16 %v15105_v24 }
 0x3c1   : > { %v4880_v9 = vrot.slane %v4790_v32, 1  ;;  %v4883_v56 = vrot.slane %v4791_v49, 1  ;;  %v13254_v39 = vpop.permute.xlu1 %7645  ;;  %v4760_v42 = vsel %vm2905_vm7, %v4728_v29, %v7632_v15  ;;  %v4761_v10 = vsel %vm2905_vm7, %v4729_v52, %v7633_v18  ;;  %v8032_v15 = vld [vmem:[#allocation2 + $0x238] sm:$0xff]  ;;  %v15107_v52 = vld [vmem:[#allocation131_spill] sm:$0xff] }
 0x3c2   : > { %v7641_v21 = vpop.permute.xlu0 %7640  ;;  %v7432_v44 = vunpack.i.l.bf16 %v15105_v24  ;;  %v7358_v30 = vunpack.i.h.bf16 %v15106_v12  ;;  %v7357_v50 = vunpack.i.l.bf16 %v15106_v12  ;;  %v7648_v32 = vunpack.i.h.bf16 %v13254_v39 }
 0x3c3   : > { %v7643_v40 = vunpack.i.h.bf16 %v7641_v21  ;;  %v7642_v0 = vunpack.i.l.bf16 %v7641_v21  ;;  %v4881_v43 = vsel %vm4842_vm11, %v4879_v53, %v4880_v9  ;;  %v4884_v54 = vsel %vm4842_vm11, %v4882_v59, %v4883_v56  ;;  %v13267_v26 = vpop.f32.mrb[4].mxu1 }
 0x3c4   : > { %v4977_v33 = vpack.c.bf16 %v4884_v54, %v4881_v43  ;;  %v13273_v13 = vpop.f32.mrb[5].mxu1  ;;  %v7647_v49 = vunpack.i.l.bf16 %v13254_v39  ;;  %v4573_v22 = vsel %vm367_vm0, %v8032_v15, %v7278_v48  ;;  %v4572_v9 = vsel %vm367_vm0, %v8033_v14, %v7277_v6 }
 0x3c5   : > { %v4792_v23 = vsel %vm2970_vm8, %v4760_v42, %v7642_v0  ;;  %v4793_v53 = vsel %vm2970_vm8, %v4761_v10, %v7643_v40  ;;  %v7656_v59 = vpop.permute.xlu1 %7655  ;;  %v13277_v36 = vpop.f32.mrb[6].mxu1  ;;  %v4602_v56 = vsel %vm2580_vm1, %v4570_v57, %v7352_v31  ;;  %v4603_v29 = vsel %vm2580_vm1, %v4571_v28, %v7353_v19 }
 0x3c6   : > { %v4886_v63 = vrot.slane %v4792_v23, 1  ;;  %v4889_v17 = vrot.slane %v4793_v53, 1  ;;  %v13279_v45 = vpop.permute.xlu0 %7650  ;;  %5804 = vmatprep.mubr.msk.bf16.mxu0 %vm3286_vm9, %v4977_v33  ;;  %v13286_v46 = vpop.f32.mrb[7].mxu1  ;;  %v7438_v21 = vunpack.i.h.bf16 %v15107_v52  ;;  %v7437_v40 = vunpack.i.l.bf16 %v15107_v52 }
 0x3c7   : > { %v7658_v0 = vunpack.i.h.bf16 %v7656_v59  ;;  %v7657_v43 = vunpack.i.l.bf16 %v7656_v59  ;;  %v4634_v39 = vsel %vm2645_vm2, %v4602_v56, %v7432_v44  ;;  %v4635_v54 = vsel %vm2645_vm2, %v4603_v29, %v7433_v25 }
 0x3c8   : > { %v4887_v41 = vsel %vm4842_vm11, %v4885_v61, %v4886_v63  ;;  %v4890_v1 = vsel %vm4842_vm11, %v4888_v34, %v4889_v17  ;;  %v4604_v33 = vsel %vm2580_vm1, %v4572_v9, %v7357_v50  ;;  %v4605_v11 = vsel %vm2580_vm1, %v4573_v22, %v7358_v30 }
 0x3c9   : > { %v7666_v37 = vpop.permute.xlu1 %7665  ;;  %v4978_v3 = vpack.c.bf16 %v4890_v1, %v4887_v41  ;;  %v4666_v34 = vsel %vm2710_vm3, %v4634_v39, %v7647_v49  ;;  %v4667_v8 = vsel %vm2710_vm3, %v4635_v54, %v7648_v32  ;;  %v7653_v59 = vunpack.i.h.bf16 %v13279_v45 }
 0x3ca   : > { %v7661_v18 = vpop.permute.xlu0 %7660  ;;  %v7668_v20 = vunpack.i.h.bf16 %v7666_v37  ;;  %v7667_v62 = vunpack.i.l.bf16 %v7666_v37  ;;  %v7652_v27 = vunpack.i.l.bf16 %v13279_v45  ;;  %v4636_v16 = vsel %vm2645_vm2, %v4604_v33, %v7437_v40 }
 0x3cb   : > { %5805 = vmatmul.mubr.msk.bf16.gmra.mrb[12].mxu0 %vm3286_vm9, %v4978_v3  ;;  %v4637_v48 = vsel %vm2645_vm2, %v4605_v11, %v7438_v21  ;;  %v4698_v6 = vsel %vm2775_vm5, %v4666_v34, %v7657_v43  ;;  %v4699_v35 = vsel %vm2775_vm5, %v4667_v8, %v7658_v0  ;;  %v7663_v28 = vunpack.i.h.bf16 %v7661_v18 }
 0x3cc   : > { %v13308_v42 = vpop.f32.mrb[8].mxu1  ;;  %v4730_v31 = vsel %vm2840_vm6, %v4698_v6, %v7667_v62  ;;  %v4731_v60 = vsel %vm2840_vm6, %v4699_v35, %v7668_v20  ;;  %v7662_v45 = vunpack.i.l.bf16 %v7661_v18  ;;  %v4669_v44 = vsel %vm2710_vm3, %v4637_v48, %v7653_v59  ;;  %v15109_v59 = vld [vmem:[#allocation141_spill] sm:$0xff]  ;;  %v15111_v6 = vld [vmem:[#allocation35_spill] sm:$0xff] }
 0x3cd   : > { %v7676_v10 = vpop.permute.xlu1 %7675  ;;  %v13314_v23 = vpop.f32.mrb[9].mxu1  ;;  %v4668_v37 = vsel %vm2710_vm3, %v4636_v16, %v7652_v27  ;;  %v4701_v15 = vsel %vm2775_vm5, %v4669_v44, %v7663_v28  ;;  %v4897_v7 = vrot.slane %v15109_v59, 1  ;;  %v7283_v35 = vunpack.i.h.bf16 %v15111_v6 }
 0x3ce   : > { %v7671_v53 = vpop.permute.xlu0 %7670  ;;  %v13318_v61 = vpop.f32.mrb[10].mxu1  ;;  %v7678_v63 = vunpack.i.h.bf16 %v7676_v10  ;;  %v7677_v17 = vunpack.i.l.bf16 %v7676_v10  ;;  %v4700_v18 = vsel %vm2775_vm5, %v4668_v37, %v7662_v45  ;;  %v7282_v28 = vunpack.i.l.bf16 %v15111_v6  ;;  %v15112_v45 = vld [vmem:[#allocation68_spill] sm:$0xff] }
 0x3cf   : > { %v13324_v19 = vpop.f32.mrb[11].mxu1  ;;  %v7673_v1 = vunpack.i.h.bf16 %v7671_v53  ;;  %v7672_v47 = vunpack.i.l.bf16 %v7671_v53  ;;  %v15108_v53 = vld [vmem:[#allocation58_spill] sm:$0xff] }
 0x3d0   : > { %v4762_v3 = vsel %vm2905_vm7, %v4730_v31, %v7677_v17  ;;  %v4763_v12 = vsel %vm2905_vm7, %v4731_v60, %v7678_v63  ;;  %v15110_v17 = vld [vmem:[#allocation63_spill] sm:$0xff] }
 0x3d1   : > { %v7686_v41 = vpop.permute.xlu1 %7685  ;;  %v4732_v56 = vsel %vm2840_vm6, %v4700_v18, %v7672_v47  ;;  %v4733_v29 = vsel %vm2840_vm6, %v4701_v15, %v7673_v1  ;;  %v7288_v16 = vunpack.i.h.bf16 %v15110_v17  ;;  %v7287_v48 = vunpack.i.l.bf16 %v15110_v17  ;;  %v8034_v15 = vld [vmem:[#allocation2 + $0x298] sm:$0xff] }
 0x3d2   : > { %v7688_v57 = vunpack.i.h.bf16 %v7686_v41  ;;  %v7687_v24 = vunpack.i.l.bf16 %v7686_v41  ;;  %v7681_v25 = vpop.permute.xlu0 %7680  ;;  %v7368_v41 = vunpack.i.h.bf16 %v15112_v45  ;;  %v7367_v1 = vunpack.i.l.bf16 %v15112_v45 }
 0x3d3   : > { %v7683_v32 = vunpack.i.h.bf16 %v7681_v25  ;;  %v7682_v49 = vunpack.i.l.bf16 %v7681_v25 }
 0x3d4   : > { %v4794_v30 = vsel %vm2970_vm8, %v4762_v3, %v7687_v24  ;;  %v4795_v50 = vsel %vm2970_vm8, %v4763_v12, %v7688_v57  ;;  %v15113_v24 = vld [vmem:[#allocation33_spill] sm:$0xff]  ;;  %v15114_v3 = vld [vmem:[#allocation26_spill] sm:$0xff] }
 0x3d5   : > { %v4892_v22 = vrot.slane %v4794_v30, 1  ;;  %v4895_v14 = vrot.slane %v4795_v50, 1  ;;  %v13336_v9 = vpop.permute.xlu1 %7695  ;;  %v13340_v52 = vpop.f32.mrb[12].mxu1  ;;  %v4764_v20 = vsel %vm2905_vm7, %v4732_v56, %v7682_v49  ;;  %v4765_v62 = vsel %vm2905_vm7, %v4733_v29, %v7683_v32  ;;  %v15115_v30 = vld [vmem:[#allocation129_spill] sm:$0xff]  ;;  %v15116_v32 = vld [vmem:[#allocation48_spill] sm:$0xff] }
 0x3d6   : > { %v7691_v21 = vpop.permute.xlu0 %7690  ;;  %v13342_v40 = vpop.f32.mrb[13].mxu1  ;;  %v7363_v25 = vunpack.i.h.bf16 %v15113_v24  ;;  %v7362_v44 = vunpack.i.l.bf16 %v15113_v24  ;;  %v4912_v12 = vrot.slane %v15114_v3, 1  ;;  %v4909_v50 = vrot.slane %v15115_v30, 1 }
 0x3d7   : > { %v7693_v0 = vunpack.i.h.bf16 %v7691_v21  ;;  %v7692_v43 = vunpack.i.l.bf16 %v7691_v21  ;;  %v4893_v39 = vsel %vm4842_vm11, %v4891_v38, %v4892_v22  ;;  %v4896_v54 = vsel %vm4842_vm11, %v4894_v55, %v4895_v14  ;;  %v13352_v10 = vpop.f32.mrb[14].mxu1  ;;  %v8035_v14 = vld [vmem:[#allocation2 + $0x280] sm:$0xff] }
 0x3d8   : > { %v4979_v33 = vpack.c.bf16 %v4896_v54, %v4893_v39  ;;  %v13356_v8 = vpop.f32.mrb[15].mxu1  ;;  %v4900_v38 = vrot.slane %v15108_v53, 1  ;;  %v7443_v49 = vunpack.i.h.bf16 %v15116_v32  ;;  %v7442_v18 = vunpack.i.l.bf16 %v15116_v32  ;;  %v8037_v39 = vld [vmem:[#allocation2 + $0x250] sm:$0xff] }
 0x3d9   : > { %v4796_v11 = vsel %vm2970_vm8, %v4764_v20, %v7692_v43  ;;  %v4797_v34 = vsel %vm2970_vm8, %v4765_v62, %v7693_v0  ;;  %v7706_v5 = vpop.permute.xlu1 %7705  ;;  %v4577_v22 = vsel %vm367_vm0, %v8034_v15, %v7288_v16  ;;  %v4576_v56 = vsel %vm367_vm0, %v8035_v14, %v7287_v48  ;;  %v8036_v0 = vld [vmem:[#allocation2 + $0x268] sm:$0xff] }
 0x3da   : > { %v4898_v27 = vrot.slane %v4796_v11, 1  ;;  %v4901_v55 = vrot.slane %v4797_v34, 1  ;;  %v7701_v63 = vpop.permute.xlu0 %7700  ;;  %5808 = vmatprep.mubr.msk.bf16.mxu0 %vm3286_vm9, %v4979_v33  ;;  %v7698_v29 = vunpack.i.h.bf16 %v13336_v9  ;;  %v7697_v21 = vunpack.i.l.bf16 %v13336_v9 }
 0x3db   : > { %v4575_v43 = vsel %vm367_vm0, %v8036_v0, %v7283_v35  ;;  %v4574_v54 = vsel %vm367_vm0, %v8037_v39, %v7282_v28  ;;  %v4608_v20 = vsel %vm2580_vm1, %v4576_v56, %v7367_v1  ;;  %v4609_v62 = vsel %vm2580_vm1, %v4577_v22, %v7368_v41 }
 0x3dc   : > { %v4899_v31 = vsel %vm4842_vm11, %v4897_v7, %v4898_v27  ;;  %v4902_v60 = vsel %vm4842_vm11, %v4900_v38, %v4901_v55  ;;  %v4606_v11 = vsel %vm2580_vm1, %v4574_v54, %v7362_v44  ;;  %v4607_v34 = vsel %vm2580_vm1, %v4575_v43, %v7363_v25 }
 0x3dd   : > { %v7716_v47 = vpop.permute.xlu1 %7715  ;;  %v4980_v57 = vpack.c.bf16 %v4902_v60, %v4899_v31  ;;  %v7708_v53 = vunpack.i.h.bf16 %v7706_v5  ;;  %v7707_v38 = vunpack.i.l.bf16 %v7706_v5  ;;  %v4638_v9 = vsel %vm2645_vm2, %v4606_v11, %v7442_v18 }
 0x3de   : > { %v7711_v37 = vpop.permute.xlu0 %7710  ;;  %v4639_v7 = vsel %vm2645_vm2, %v4607_v34, %v7443_v49  ;;  %v7703_v27 = vunpack.i.h.bf16 %v7701_v63  ;;  %v7702_v55 = vunpack.i.l.bf16 %v7701_v63  ;;  %v4640_v17 = vsel %vm2645_vm2, %v4608_v20, %v7697_v21 }
 0x3df   : > { %5809 = vmatmul.mubr.msk.bf16.gmra.mrb[16].mxu0 %vm3286_vm9, %v4980_v57  ;;  %v4641_v16 = vsel %vm2645_vm2, %v4609_v62, %v7698_v29  ;;  %v7718_v48 = vunpack.i.h.bf16 %v7716_v47  ;;  %v7717_v6 = vunpack.i.l.bf16 %v7716_v47  ;;  %v7713_v35 = vunpack.i.h.bf16 %v7711_v37 }
 0x3e0   : > { %v7712_v31 = vunpack.i.l.bf16 %v7711_v37  ;;  %v4672_v5 = vsel %vm2710_vm3, %v4640_v17, %v7707_v38  ;;  %v4673_v41 = vsel %vm2710_vm3, %v4641_v16, %v7708_v53  ;;  %v4670_v63 = vsel %vm2710_vm3, %v4638_v9, %v7702_v55  ;;  %v15117_v16 = vld [vmem:[#allocation143_spill] sm:$0xff] }
 0x3e1   : > { %v7726_v33 = vpop.permute.xlu1 %7725  ;;  %v4671_v25 = vsel %vm2710_vm3, %v4639_v7, %v7703_v27  ;;  %v4704_v47 = vsel %vm2775_vm5, %v4672_v5, %v7717_v6  ;;  %v4705_v37 = vsel %vm2775_vm5, %v4673_v41, %v7718_v48  ;;  %v4906_v48 = vrot.slane %v15117_v16, 1  ;;  %v15118_v6 = vld [vmem:[#allocation82_spill] sm:$0xff] }
 0x3e2   : > { %v7721_v59 = vpop.permute.xlu0 %7720  ;;  %v7728_v60 = vunpack.i.h.bf16 %v7726_v33  ;;  %v7727_v28 = vunpack.i.l.bf16 %v7726_v33  ;;  %v4702_v15 = vsel %vm2775_vm5, %v4670_v63, %v7712_v31  ;;  %v4703_v22 = vsel %vm2775_vm5, %v4671_v25, %v7713_v35 }
 0x3e3   : > { %v7723_v1 = vunpack.i.h.bf16 %v7721_v59  ;;  %v7722_v57 = vunpack.i.l.bf16 %v7721_v59  ;;  %v4903_v35 = vrot.slane %v15118_v6, 1 }
 0x3e4   : > { %v4736_v14 = vsel %vm2840_vm6, %v4704_v47, %v7727_v28  ;;  %v4737_v56 = vsel %vm2840_vm6, %v4705_v37, %v7728_v60  ;;  %v15121_v47 = vld [vmem:[#allocation6_spill] sm:$0xff] }
 0x3e5   : > { %v7736_v45 = vpop.permute.xlu1 %7735  ;;  %v4734_v21 = vsel %vm2840_vm6, %v4702_v15, %v7722_v57  ;;  %v4735_v0 = vsel %vm2840_vm6, %v4703_v22, %v7723_v1  ;;  %v7378_v37 = vunpack.i.h.bf16 %v15121_v47  ;;  %v15122_v15 = vld [vmem:[#allocation125_spill] sm:$0xff] }
 0x3e6   : > { %v7731_v24 = vpop.permute.xlu0 %7730  ;;  %v7738_v44 = vunpack.i.h.bf16 %v7736_v45  ;;  %v7737_v32 = vunpack.i.l.bf16 %v7736_v45  ;;  %v7373_v22 = vunpack.i.h.bf16 %v15122_v15 }
 0x3e7   : > { %v7733_v49 = vunpack.i.h.bf16 %v7731_v24  ;;  %v7732_v18 = vunpack.i.l.bf16 %v7731_v24 }
 0x3e8   : > { %v4768_v20 = vsel %vm2905_vm7, %v4736_v14, %v7737_v32  ;;  %v4769_v62 = vsel %vm2905_vm7, %v4737_v56, %v7738_v44  ;;  %v15119_v44 = vld [vmem:[#allocation34_spill] sm:$0xff]  ;;  %v7372_v14 = vunpack.i.l.bf16 %v15122_v15 }
 0x3e9   : > { %v7746_v29 = vpop.permute.xlu1 %7745  ;;  %v4766_v34 = vsel %vm2905_vm7, %v4734_v21, %v7732_v18  ;;  %v4767_v53 = vsel %vm2905_vm7, %v4735_v0, %v7733_v49  ;;  %v7298_v32 = vunpack.i.h.bf16 %v15119_v44  ;;  %v7297_v30 = vunpack.i.l.bf16 %v15119_v44  ;;  %v15124_v0 = vld [vmem:[#allocation93_spill] sm:$0xff] }
 0x3ea   : > { %v7748_v43 = vunpack.i.h.bf16 %v7746_v29  ;;  %v7747_v39 = vunpack.i.l.bf16 %v7746_v29  ;;  %v7741_v54 = vpop.permute.xlu0 %7740  ;;  %v7377_v49 = vunpack.i.l.bf16 %v15121_v47  ;;  %v15123_v29 = vld [vmem:[#allocation91_spill] sm:$0xff] }
 0x3eb   : > { %v7743_v33 = vunpack.i.h.bf16 %v7741_v54  ;;  %v7742_v11 = vunpack.i.l.bf16 %v7741_v54  ;;  %v4924_v21 = vrot.slane %v15123_v29, 1 }
 0x3ec   : > { %v4800_v38 = vsel %vm2970_vm8, %v4768_v20, %v7747_v39  ;;  %v4801_v59 = vsel %vm2970_vm8, %v4769_v62, %v7748_v43  ;;  %v4921_v43 = vrot.slane %v15124_v0, 1  ;;  %v8038_v20 = vld [vmem:[#allocation2 + $0x328] sm:$0xff]  ;;  %v15127_v0 = vld [vmem:[#allocation51_spill] sm:$0xff] }
 0x3ed   : > { %v4910_v9 = vrot.slane %v4800_v38, 1  ;;  %v4913_v7 = vrot.slane %v4801_v59, 1  ;;  %v4798_v27 = vsel %vm2970_vm8, %v4766_v34, %v7742_v11  ;;  %v4799_v55 = vsel %vm2970_vm8, %v4767_v53, %v7743_v33  ;;  %v7756_v17 = vpop.permute.xlu1 %7755  ;;  %v8039_v33 = vld [vmem:[#allocation2 + $0x310] sm:$0xff]  ;;  %v8040_v38 = vld [vmem:[#allocation2 + $0x2f8] sm:$0xff] }
 0x3ee   : > { %v4904_v31 = vrot.slane %v4798_v27, 1  ;;  %v4907_v60 = vrot.slane %v4799_v55, 1  ;;  %v7751_v28 = vpop.permute.xlu0 %7750  ;;  %v7758_v39 = vunpack.i.h.bf16 %v7756_v17  ;;  %v7757_v54 = vunpack.i.l.bf16 %v7756_v17 }
 0x3ef   : > { %v4911_v45 = vsel %vm4842_vm11, %v4909_v50, %v4910_v9  ;;  %v4914_v5 = vsel %vm4842_vm11, %v4912_v12, %v4913_v7  ;;  %v15120_v50 = vld [vmem:[#allocation64_spill] sm:$0xff]  ;;  %v4581_v62 = vsel %vm367_vm0, %v8038_v20, %v7298_v32  ;;  %v4580_v11 = vsel %vm367_vm0, %v8039_v33, %v7297_v30  ;;  %v8041_v9 = vld [vmem:[#allocation2 + $0x2e0] sm:$0xff] }
 0x3f0   : > { %v4905_v41 = vsel %vm4842_vm11, %v4903_v35, %v4904_v31  ;;  %v4908_v1 = vsel %vm4842_vm11, %v4906_v48, %v4907_v60  ;;  %v4982_v63 = vpack.c.bf16 %v4914_v5, %v4911_v45  ;;  %v7293_v3 = vunpack.i.h.bf16 %v15120_v50 }
 0x3f1   : > { %v7766_v57 = vpop.permute.xlu1 %7765  ;;  %v4981_v24 = vpack.c.bf16 %v4908_v1, %v4905_v41  ;;  %v7292_v12 = vunpack.i.l.bf16 %v15120_v50  ;;  %v7753_v34 = vunpack.i.h.bf16 %v7751_v28  ;;  %v7752_v53 = vunpack.i.l.bf16 %v7751_v28 }
 0x3f2   : > { %v7761_v25 = vpop.permute.xlu0 %7760  ;;  %v4579_v59 = vsel %vm367_vm0, %v8040_v38, %v7293_v3  ;;  %v4612_v27 = vsel %vm2580_vm1, %v4580_v11, %v7377_v49  ;;  %v4613_v55 = vsel %vm2580_vm1, %v4581_v62, %v7378_v37  ;;  %v7768_v6 = vunpack.i.h.bf16 %v7766_v57 }
 0x3f3   : > { %5812 = vmatprep.mubr.msk.bf16.mxu0 %vm3286_vm9, %v4981_v24  ;;  %v4578_v7 = vsel %vm367_vm0, %v8041_v9, %v7292_v12  ;;  %v4611_v48 = vsel %vm2580_vm1, %v4579_v59, %v7373_v22  ;;  %v7767_v35 = vunpack.i.l.bf16 %v7766_v57  ;;  %v4644_v60 = vsel %vm2645_vm2, %v4612_v27, %v7757_v54 }
 0x3f4   : > { %5813 = vmatmul.mubr.msk.bf16.gmra.mrb[20].mxu0 %vm3286_vm9, %v4982_v63  ;;  %v4610_v17 = vsel %vm2580_vm1, %v4578_v7, %v7372_v14  ;;  %v4645_v28 = vsel %vm2645_vm2, %v4613_v55, %v7758_v39  ;;  %v7763_v45 = vunpack.i.h.bf16 %v7761_v25  ;;  %v7762_v5 = vunpack.i.l.bf16 %v7761_v25 }
 0x3f5   : > { %v7776_v18 = vpop.permute.xlu1 %7775  ;;  %v4642_v41 = vsel %vm2645_vm2, %v4610_v17, %v7752_v53  ;;  %v4643_v1 = vsel %vm2645_vm2, %v4611_v48, %v7753_v34  ;;  %v4676_v57 = vsel %vm2710_vm3, %v4644_v60, %v7767_v35  ;;  %v4677_v12 = vsel %vm2710_vm3, %v4645_v28, %v7768_v6 }
 0x3f6   : > { %v7771_v56 = vpop.permute.xlu0 %7770  ;;  %v7778_v24 = vunpack.i.h.bf16 %v7776_v18  ;;  %v7777_v63 = vunpack.i.l.bf16 %v7776_v18  ;;  %v4674_v15 = vsel %vm2710_vm3, %v4642_v41, %v7762_v5  ;;  %v4675_v22 = vsel %vm2710_vm3, %v4643_v1, %v7763_v45 }
 0x3f7   : > { %v7773_v44 = vunpack.i.h.bf16 %v7771_v56  ;;  %v7772_v32 = vunpack.i.l.bf16 %v7771_v56  ;;  %v7307_v29 = vunpack.i.l.bf16 %v15127_v0 }
 0x3f8   : > { %v4708_v39 = vsel %vm2775_vm5, %v4676_v57, %v7777_v63  ;;  %v4709_v54 = vsel %vm2775_vm5, %v4677_v12, %v7778_v24 }
 0x3f9   : > { %v7786_v16 = vpop.permute.xlu1 %7785  ;;  %v4706_v11 = vsel %vm2775_vm5, %v4674_v15, %v7772_v32  ;;  %v4707_v34 = vsel %vm2775_vm5, %v4675_v22, %v7773_v44  ;;  %v15125_v32 = vld [vmem:[#allocation146_spill] sm:$0xff] }
 0x3fa   : > { %v7781_v31 = vpop.permute.xlu0 %7780  ;;  %v7788_v30 = vunpack.i.h.bf16 %v7786_v16  ;;  %v7787_v50 = vunpack.i.l.bf16 %v7786_v16 }
 0x3fb   : > { %v7783_v47 = vunpack.i.h.bf16 %v7781_v31  ;;  %v7782_v37 = vunpack.i.l.bf16 %v7781_v31 }
 0x3fc   : > { %v4740_v53 = vsel %vm2840_vm6, %v4708_v39, %v7787_v50  ;;  %v4741_v38 = vsel %vm2840_vm6, %v4709_v54, %v7788_v30  ;;  %v4918_v30 = vrot.slane %v15125_v32, 1  ;;  %v15126_v50 = vld [vmem:[#allocation88_spill] sm:$0xff]  ;;  %v8043_v32 = vld [vmem:[#allocation2 + $0x370] sm:$0xff] }
 0x3fd   : > { %v7796_v3 = vpop.permute.xlu1 %7795  ;;  %v13446_v49 = vpop.f32.mrb[16].mxu1  ;;  %v4738_v7 = vsel %vm2840_vm6, %v4706_v11, %v7782_v37  ;;  %v4739_v27 = vsel %vm2840_vm6, %v4707_v34, %v7783_v47 }
 0x3fe   : > { %v7791_v25 = vpop.permute.xlu0 %7790  ;;  %v13450_v14 = vpop.f32.mrb[17].mxu1  ;;  %v7798_v18 = vunpack.i.h.bf16 %v7796_v3  ;;  %v7797_v56 = vunpack.i.l.bf16 %v7796_v3  ;;  %v4915_v3 = vrot.slane %v15126_v50, 1 }
 0x3ff   : > { %v13454_v20 = vpop.f32.mrb[18].mxu1  ;;  %v7793_v62 = vunpack.i.h.bf16 %v7791_v25  ;;  %v7792_v33 = vunpack.i.l.bf16 %v7791_v25 }
 0x400   : > { %v13460_v59 = vpop.f32.mrb[19].mxu1  ;;  %v4772_v48 = vsel %vm2905_vm7, %v4740_v53, %v7797_v56  ;;  %v4773_v6 = vsel %vm2905_vm7, %v4741_v38, %v7798_v18 }
 0x401   : > { %v7806_v9 = vpop.permute.xlu1 %7805  ;;  %v4770_v60 = vsel %vm2905_vm7, %v4738_v7, %v7792_v33  ;;  %v4771_v28 = vsel %vm2905_vm7, %v4739_v27, %v7793_v62 }
 0x402   : > { %v7808_v55 = vunpack.i.h.bf16 %v7806_v9  ;;  %v7807_v16 = vunpack.i.l.bf16 %v7806_v9  ;;  %v7801_v17 = vpop.permute.xlu0 %7800  ;;  %v15129_v9 = vld [vmem:[#allocation114_spill] sm:$0xff] }
 0x403   : > { %v7803_v35 = vunpack.i.h.bf16 %v7801_v17  ;;  %v7802_v31 = vunpack.i.l.bf16 %v7801_v17  ;;  %v7388_v7 = vunpack.i.h.bf16 %v15129_v9  ;;  %v7387_v27 = vunpack.i.l.bf16 %v15129_v9 }
 0x404   : > { %v4804_v45 = vsel %vm2970_vm8, %v4772_v48, %v7807_v16  ;;  %v4805_v5 = vsel %vm2970_vm8, %v4773_v6, %v7808_v55  ;;  %v15130_v16 = vld [vmem:[#allocation30_spill] sm:$0xff] }
 0x405   : > { %v4922_v41 = vrot.slane %v4804_v45, 1  ;;  %v4925_v1 = vrot.slane %v4805_v5, 1  ;;  %v4802_v24 = vsel %vm2970_vm8, %v4770_v60, %v7802_v31  ;;  %v4803_v63 = vsel %vm2970_vm8, %v4771_v28, %v7803_v35  ;;  %v7816_v44 = vpop.permute.xlu1 %7815  ;;  %v13474_v47 = vpop.f32.mrb[20].mxu1  ;;  %v15131_v31 = vld [vmem:[#allocation21_spill] sm:$0xff]  ;;  %v15132_v28 = vld [vmem:[#allocation100_spill] sm:$0xff] }
 0x406   : > { %v4916_v57 = vrot.slane %v4802_v24, 1  ;;  %v4919_v12 = vrot.slane %v4803_v63, 1  ;;  %v7811_v37 = vpop.permute.xlu0 %7810  ;;  %v13476_v25 = vpop.f32.mrb[21].mxu1  ;;  %v7383_v17 = vunpack.i.h.bf16 %v15130_v16  ;;  %v7382_v48 = vunpack.i.l.bf16 %v15130_v16  ;;  %v8042_v24 = vld [vmem:[#allocation2 + $0x388] sm:$0xff] }
 0x407   : > { %v4923_v15 = vsel %vm4842_vm11, %v4921_v43, %v4922_v41  ;;  %v4926_v22 = vsel %vm4842_vm11, %v4924_v21, %v4925_v1  ;;  %v13484_v18 = vpop.f32.mrb[22].mxu1  ;;  %v7308_v43 = vunpack.i.h.bf16 %v15127_v0  ;;  %v15128_v21 = vld [vmem:[#allocation36_spill] sm:$0xff]  ;;  %v4936_v60 = vrot.slane %v15131_v31, 1 }
 0x408   : > { %v4917_v56 = vsel %vm4842_vm11, %v4915_v3, %v4916_v57  ;;  %v4920_v39 = vsel %vm4842_vm11, %v4918_v30, %v4919_v12  ;;  %v13488_v54 = vpop.f32.mrb[23].mxu1  ;;  %v4984_v11 = vpack.c.bf16 %v4926_v22, %v4923_v15  ;;  %v7303_v53 = vunpack.i.h.bf16 %v15128_v21  ;;  %v8044_v12 = vld [vmem:[#allocation2 + $0x358] sm:$0xff]  ;;  %v8045_v22 = vld [vmem:[#allocation2 + $0x340] sm:$0xff] }
 0x409   : > { %v7826_v62 = vpop.permute.xlu1 %7825  ;;  %v4983_v33 = vpack.c.bf16 %v4920_v39, %v4917_v56  ;;  %v7302_v38 = vunpack.i.l.bf16 %v15128_v21  ;;  %v4933_v45 = vrot.slane %v15132_v28, 1  ;;  %v7818_v5 = vunpack.i.h.bf16 %v7816_v44 }
 0x40a   : > { %v7821_v34 = vpop.permute.xlu0 %7820  ;;  %v7817_v41 = vunpack.i.l.bf16 %v7816_v44  ;;  %v4585_v63 = vsel %vm367_vm0, %v8042_v24, %v7308_v43  ;;  %v4584_v30 = vsel %vm367_vm0, %v8043_v32, %v7307_v29  ;;  %v7813_v50 = vunpack.i.h.bf16 %v7811_v37 }
 0x40b   : > { %5816 = vmatprep.mubr.msk.bf16.mxu0 %vm3286_vm9, %v4983_v33  ;;  %v7812_v3 = vunpack.i.l.bf16 %v7811_v37  ;;  %v4583_v15 = vsel %vm367_vm0, %v8044_v12, %v7303_v53  ;;  %v4582_v56 = vsel %vm367_vm0, %v8045_v22, %v7302_v38  ;;  %v4616_v44 = vsel %vm2580_vm1, %v4584_v30, %v7387_v27 }
 0x40c   : > { %5817 = vmatmul.mubr.msk.bf16.gmra.mrb[24].mxu0 %vm3286_vm9, %v4984_v11  ;;  %v4617_v39 = vsel %vm2580_vm1, %v4585_v63, %v7388_v7  ;;  %v4614_v0 = vsel %vm2580_vm1, %v4582_v56, %v7382_v48  ;;  %v4615_v43 = vsel %vm2580_vm1, %v4583_v15, %v7383_v17  ;;  %v7828_v37 = vunpack.i.h.bf16 %v7826_v62 }
 0x40d   : > { %v7836_v55 = vpop.permute.xlu1 %7835  ;;  %v13500_v6 = vpop.f32.mrb[24].mxu1  ;;  %v7827_v29 = vunpack.i.l.bf16 %v7826_v62  ;;  %v4648_v9 = vsel %vm2645_vm2, %v4616_v44, %v7817_v41  ;;  %v4649_v53 = vsel %vm2645_vm2, %v4617_v39, %v7818_v5  ;;  %v7823_v16 = vunpack.i.h.bf16 %v7821_v34 }
 0x40e   : > { %v7831_v35 = vpop.permute.xlu0 %7830  ;;  %v13504_v1 = vpop.f32.mrb[25].mxu1  ;;  %v7822_v38 = vunpack.i.l.bf16 %v7821_v34  ;;  %v4646_v27 = vsel %vm2645_vm2, %v4614_v0, %v7812_v3  ;;  %v4647_v7 = vsel %vm2645_vm2, %v4615_v43, %v7813_v50  ;;  %v7838_v24 = vunpack.i.h.bf16 %v7836_v55 }
 0x40f   : > { %v13508_v57 = vpop.f32.mrb[26].mxu1  ;;  %v7837_v63 = vunpack.i.l.bf16 %v7836_v55  ;;  %v7833_v32 = vunpack.i.h.bf16 %v7831_v35  ;;  %v7832_v30 = vunpack.i.l.bf16 %v7831_v35  ;;  %v4680_v62 = vsel %vm2710_vm3, %v4648_v9, %v7827_v29 }
 0x410   : > { %v13514_v33 = vpop.f32.mrb[27].mxu1  ;;  %v4681_v15 = vsel %vm2710_vm3, %v4649_v53, %v7828_v37  ;;  %v4678_v3 = vsel %vm2710_vm3, %v4646_v27, %v7822_v38  ;;  %v4679_v50 = vsel %vm2710_vm3, %v4647_v7, %v7823_v16 }
 0x411   : > { %v7846_v11 = vpop.permute.xlu1 %7845  ;;  %v4712_v44 = vsel %vm2775_vm5, %v4680_v62, %v7837_v63  ;;  %v4713_v39 = vsel %vm2775_vm5, %v4681_v15, %v7838_v24  ;;  %v4710_v37 = vsel %vm2775_vm5, %v4678_v3, %v7832_v30  ;;  %v4711_v29 = vsel %vm2775_vm5, %v4679_v50, %v7833_v32 }
 0x412   : > { %v7841_v21 = vpop.permute.xlu0 %7840  ;;  %v7848_v48 = vunpack.i.h.bf16 %v7846_v11  ;;  %v7847_v12 = vunpack.i.l.bf16 %v7846_v11 }
 0x413   : > { %v7843_v41 = vunpack.i.h.bf16 %v7841_v21  ;;  %v7842_v22 = vunpack.i.l.bf16 %v7841_v21 }
 0x414   : > { %v4744_v21 = vsel %vm2840_vm6, %v4712_v44, %v7847_v12  ;;  %v4745_v9 = vsel %vm2840_vm6, %v4713_v39, %v7848_v48  ;;  %v15133_v44 = vld [vmem:[#allocation106_spill] sm:$0xff]  ;;  %v15134_v39 = vld [vmem:[#allocation29_spill] sm:$0xff] }
 0x415   : > { %v7856_v17 = vpop.permute.xlu1 %7855  ;;  %v13524_v5 = vpop.f32.mrb[28].mxu1  ;;  %v4742_v38 = vsel %vm2840_vm6, %v4710_v37, %v7842_v22  ;;  %v4743_v27 = vsel %vm2840_vm6, %v4711_v29, %v7843_v41 }
 0x416   : > { %v7851_v34 = vpop.permute.xlu0 %7850  ;;  %v13528_v56 = vpop.f32.mrb[29].mxu1  ;;  %v7858_v55 = vunpack.i.h.bf16 %v7856_v17  ;;  %v7857_v35 = vunpack.i.l.bf16 %v7856_v17 }
 0x417   : > { %v13532_v11 = vpop.f32.mrb[30].mxu1  ;;  %v7853_v0 = vunpack.i.h.bf16 %v7851_v34  ;;  %v7852_v43 = vunpack.i.l.bf16 %v7851_v34 }
 0x418   : > { %v13538_v53 = vpop.f32.mrb[31].mxu1  ;;  %v4776_v17 = vsel %vm2905_vm7, %v4744_v21, %v7857_v35  ;;  %v4777_v30 = vsel %vm2905_vm7, %v4745_v9, %v7858_v55  ;;  %v4930_v35 = vrot.slane %v15133_v44, 1  ;;  %v4927_v55 = vrot.slane %v15134_v39, 1 }
 0x419   : > { %v7866_v16 = vpop.permute.xlu1 %7865  ;;  %v4774_v12 = vsel %vm2905_vm7, %v4742_v38, %v7852_v43  ;;  %v4775_v48 = vsel %vm2905_vm7, %v4743_v27, %v7853_v0 }
 0x41a   : > { %v7868_v7 = vunpack.i.h.bf16 %v7866_v16  ;;  %v7867_v24 = vunpack.i.l.bf16 %v7866_v16  ;;  %v7861_v63 = vpop.permute.xlu0 %7860 }
 0x41b   : > { %v7863_v62 = vunpack.i.h.bf16 %v7861_v63  ;;  %v7862_v32 = vunpack.i.l.bf16 %v7861_v63 }
 0x41c   : > { %v4808_v15 = vsel %vm2970_vm8, %v4776_v17, %v7867_v24  ;;  %v4809_v34 = vsel %vm2970_vm8, %v4777_v30, %v7868_v7 }
 0x41d   : > { %v4934_v22 = vrot.slane %v4808_v15, 1  ;;  %v4937_v3 = vrot.slane %v4809_v34, 1  ;;  %v4806_v41 = vsel %vm2970_vm8, %v4774_v12, %v7862_v32  ;;  %v4807_v50 = vsel %vm2970_vm8, %v4775_v48, %v7863_v62 }
 0x41e   : > { %v4928_v37 = vrot.slane %v4806_v41, 1  ;;  %v4931_v29 = vrot.slane %v4807_v50, 1 }
 0x41f   : > { %v4935_v0 = vsel %vm4842_vm11, %v4933_v45, %v4934_v22  ;;  %v4938_v43 = vsel %vm4842_vm11, %v4936_v60, %v4937_v3 }
 0x420   : > { %v4929_v21 = vsel %vm4842_vm11, %v4927_v55, %v4928_v37  ;;  %v4932_v9 = vsel %vm4842_vm11, %v4930_v35, %v4931_v29  ;;  %v4986_v16 = vpack.c.bf16 %v4938_v43, %v4935_v0 }
 0x421   : > { %v4985_v38 = vpack.c.bf16 %v4932_v9, %v4929_v21 }
 0x423   : > { %5820 = vmatprep.mubr.msk.bf16.mxu0 %vm3286_vm9, %v4985_v38 }
 0x424   : > { %5821 = vmatmul.mubr.msk.bf16.gmra.mrb[28].mxu0 %vm3286_vm9, %v4986_v16 }
 0x461   : > { %v5794_v28 = vpop.f32.mrb[0].mxu0 }
 0x462   : > { %v5830_v45 = vadd.f32 %v5794_v28, %v13232_v2  ;;  %v5093_v31 = vpop.f32.mrb[1].mxu0 }
 0x463   : > { %v5831_v27 = vadd.f32 %v5093_v31, %v13238_v51  ;;  %v5795_v60 = vpop.f32.mrb[2].mxu0 }
 0x464   : > { %5254 = vst.msk [vmem:[%s8479_s13 + $0x10] sm:$0xff] %vm2580_vm1, %v5830_v45  ;;  %v5832_v7 = vadd.f32 %v5795_v60, %v13242_v4  ;;  %v5096_v24 = vpop.f32.mrb[3].mxu0 }
 0x465   : > { %5252 = vst.msk [vmem:[%s8479_s13] sm:$0xff] %vm2580_vm1, %v5831_v27  ;;  %v5833_v63 = vadd.f32 %v5096_v24, %v13244_v58 }
 0x466   : > { %5255 = vst.msk [vmem:[%s8479_s13 + $0x18] sm:$0xff] %vm2580_vm1, %v5832_v7 }
 0x467   : > { %5253 = vst.msk [vmem:[%s8479_s13 + $0x8] sm:$0xff] %vm2580_vm1, %v5833_v63 }
 0x476   : > { %v5798_v2 = vpop.f32.mrb[4].mxu0 }
 0x477   : > { %v5834_v51 = vadd.f32 %v5798_v2, %v13267_v26  ;;  %v5109_v17 = vpop.f32.mrb[5].mxu0 }
 0x478   : > { %v5835_v30 = vadd.f32 %v5109_v17, %v13273_v13  ;;  %v5799_v62 = vpop.f32.mrb[6].mxu0 }
 0x479   : > { %5258 = vst.msk [vmem:[%s8479_s13 + $0x30] sm:$0xff] %vm2580_vm1, %v5834_v51  ;;  %v5836_v4 = vadd.f32 %v5799_v62, %v13277_v36  ;;  %v5112_v32 = vpop.f32.mrb[7].mxu0 }
 0x47a   : > { %5256 = vst.msk [vmem:[%s8479_s13 + $0x20] sm:$0xff] %vm2580_vm1, %v5835_v30  ;;  %v5837_v58 = vadd.f32 %v5112_v32, %v13286_v46 }
 0x47b   : > { %5259 = vst.msk [vmem:[%s8479_s13 + $0x38] sm:$0xff] %vm2580_vm1, %v5836_v4 }
 0x47c   : > { %5257 = vst.msk [vmem:[%s8479_s13 + $0x28] sm:$0xff] %vm2580_vm1, %v5837_v58 }
 0x48a   : > { %v5802_v26 = vpop.f32.mrb[8].mxu0 }
 0x48b   : > { %v5838_v13 = vadd.f32 %v5802_v26, %v13308_v42  ;;  %v5125_v12 = vpop.f32.mrb[9].mxu0 }
 0x48c   : > { %v5839_v48 = vadd.f32 %v5125_v12, %v13314_v23  ;;  %v5803_v15 = vpop.f32.mrb[10].mxu0 }
 0x48d   : > { %5262 = vst.msk [vmem:[%s8479_s13 + $0x50] sm:$0xff] %vm2580_vm1, %v5838_v13  ;;  %v5840_v36 = vadd.f32 %v5803_v15, %v13318_v61  ;;  %v5128_v34 = vpop.f32.mrb[11].mxu0 }
 0x48e   : > { %5260 = vst.msk [vmem:[%s8479_s13 + $0x40] sm:$0xff] %vm2580_vm1, %v5839_v48  ;;  %v5841_v46 = vadd.f32 %v5128_v34, %v13324_v19 }
 0x48f   : > { %5263 = vst.msk [vmem:[%s8479_s13 + $0x58] sm:$0xff] %vm2580_vm1, %v5840_v36 }
 0x490   : > { %5261 = vst.msk [vmem:[%s8479_s13 + $0x48] sm:$0xff] %vm2580_vm1, %v5841_v46 }
 0x49e   : > { %v5806_v42 = vpop.f32.mrb[12].mxu0 }
 0x49f   : > { %v5842_v23 = vadd.f32 %v5806_v42, %v13340_v52  ;;  %v5141_v22 = vpop.f32.mrb[13].mxu0 }
 0x4a0   : > { %v5843_v3 = vadd.f32 %v5141_v22, %v13342_v40  ;;  %v5807_v41 = vpop.f32.mrb[14].mxu0 }
 0x4a1   : > { %5266 = vst.msk [vmem:[%s8479_s13 + $0x70] sm:$0xff] %vm2580_vm1, %v5842_v23  ;;  %v5844_v61 = vadd.f32 %v5807_v41, %v13352_v10  ;;  %v5144_v50 = vpop.f32.mrb[15].mxu0 }
 0x4a2   : > { %5264 = vst.msk [vmem:[%s8479_s13 + $0x60] sm:$0xff] %vm2580_vm1, %v5843_v3  ;;  %v5845_v19 = vadd.f32 %v5144_v50, %v13356_v8 }
 0x4a3   : > { %5267 = vst.msk [vmem:[%s8479_s13 + $0x78] sm:$0xff] %vm2580_vm1, %v5844_v61 }
 0x4a4   : > { %5265 = vst.msk [vmem:[%s8479_s13 + $0x68] sm:$0xff] %vm2580_vm1, %v5845_v19 }
 0x4b2   : > { %v5810_v52 = vpop.f32.mrb[16].mxu0 }
 0x4b3   : > { %v5846_v40 = vadd.f32 %v5810_v52, %v13446_v49  ;;  %v5157_v44 = vpop.f32.mrb[17].mxu0 }
 0x4b4   : > { %v5847_v35 = vadd.f32 %v5157_v44, %v13450_v14  ;;  %v5811_v39 = vpop.f32.mrb[18].mxu0 }
 0x4b5   : > { %5270 = vst.msk [vmem:[%s8479_s13 + $0x90] sm:$0xff] %vm2580_vm1, %v5846_v40  ;;  %v5848_v10 = vadd.f32 %v5811_v39, %v13454_v20  ;;  %v5160_v55 = vpop.f32.mrb[19].mxu0 }
 0x4b6   : > { %5268 = vst.msk [vmem:[%s8479_s13 + $0x80] sm:$0xff] %vm2580_vm1, %v5847_v35  ;;  %v5849_v8 = vadd.f32 %v5160_v55, %v13460_v59 }
 0x4b7   : > { %5271 = vst.msk [vmem:[%s8479_s13 + $0x98] sm:$0xff] %vm2580_vm1, %v5848_v10 }
 0x4b8   : > { %5269 = vst.msk [vmem:[%s8479_s13 + $0x88] sm:$0xff] %vm2580_vm1, %v5849_v8 }
 0x4c7   : > { %v5814_v49 = vpop.f32.mrb[20].mxu0 }
 0x4c8   : > { %v5850_v14 = vadd.f32 %v5814_v49, %v13474_v47  ;;  %v5173_v37 = vpop.f32.mrb[21].mxu0 }
 0x4c9   : > { %v5851_v29 = vadd.f32 %v5173_v37, %v13476_v25  ;;  %v5815_v0 = vpop.f32.mrb[22].mxu0 }
 0x4ca   : > { %5274 = vst.msk [vmem:[%s8479_s13 + $0xb0] sm:$0xff] %vm2580_vm1, %v5850_v14  ;;  %v5852_v20 = vadd.f32 %v5815_v0, %v13484_v18  ;;  %v5176_v43 = vpop.f32.mrb[23].mxu0 }
 0x4cb   : > { %5272 = vst.msk [vmem:[%s8479_s13 + $0xa0] sm:$0xff] %vm2580_vm1, %v5851_v29  ;;  %v5853_v59 = vadd.f32 %v5176_v43, %v13488_v54 }
 0x4cc   : > { %5275 = vst.msk [vmem:[%s8479_s13 + $0xb8] sm:$0xff] %vm2580_vm1, %v5852_v20 }
 0x4cd   : > { %5273 = vst.msk [vmem:[%s8479_s13 + $0xa8] sm:$0xff] %vm2580_vm1, %v5853_v59 }
 0x4df   : > { %v5818_v47 = vpop.f32.mrb[24].mxu0 }
 0x4e0   : > { %v5854_v25 = vadd.f32 %v5818_v47, %v13500_v6  ;;  %v5189_v21 = vpop.f32.mrb[25].mxu0 }
 0x4e1   : > { %v5855_v9 = vadd.f32 %v5189_v21, %v13504_v1  ;;  %v5819_v16 = vpop.f32.mrb[26].mxu0 }
 0x4e2   : > { %5278 = vst.msk [vmem:[%s8479_s13 + $0xd0] sm:$0xff] %vm2580_vm1, %v5854_v25  ;;  %v5856_v18 = vadd.f32 %v5819_v16, %v13508_v57  ;;  %v5192_v38 = vpop.f32.mrb[27].mxu0 }
 0x4e3   : > { %5276 = vst.msk [vmem:[%s8479_s13 + $0xc0] sm:$0xff] %vm2580_vm1, %v5855_v9  ;;  %v5857_v54 = vadd.f32 %v5192_v38, %v13514_v33 }
 0x4e4   : > { %5279 = vst.msk [vmem:[%s8479_s13 + $0xd8] sm:$0xff] %vm2580_vm1, %v5856_v18 }
 0x4e5   : > { %5277 = vst.msk [vmem:[%s8479_s13 + $0xc8] sm:$0xff] %vm2580_vm1, %v5857_v54 }
 0x4f7   : > { %v5822_v6 = vpop.f32.mrb[28].mxu0 }
 0x4f8   : > { %v5858_v1 = vadd.f32 %v5822_v6, %v13524_v5  ;;  %v5205_v28 = vpop.f32.mrb[29].mxu0 }
 0x4f9   : > { %v5859_v45 = vadd.f32 %v5205_v28, %v13528_v56  ;;  %v5823_v31 = vpop.f32.mrb[30].mxu0 }
 0x4fa   : > { %5282 = vst.msk [vmem:[%s8479_s13 + $0xf0] sm:$0xff] %vm2580_vm1, %v5858_v1  ;;  %v5860_v57 = vadd.f32 %v5823_v31, %v13532_v11  ;;  %v5208_v27 = vpop.f32.mrb[31].mxu0 }
 0x4fb   : > { %5280 = vst.msk [vmem:[%s8479_s13 + $0xe0] sm:$0xff] %vm2580_vm1, %v5859_v45  ;;  %v5861_v33 = vadd.f32 %v5208_v27, %v13538_v53 }
 0x4fc   : > { %5283 = vst.msk [vmem:[%s8479_s13 + $0xf8] sm:$0xff] %vm2580_vm1, %v5860_v57 }
 0x4fd   : > { %5281 = vst.msk [vmem:[%s8479_s13 + $0xe8] sm:$0xff] %vm2580_vm1, %v5861_v33 }
 0x4fe PF: > { %s14_s19 = sadd.s32 1, %s8084_s19   ;;  %s15135_s15 = smov %s8076_s17 }
 0x4ff   : > { %p11_p0 = scmp.ge.s32.totalorder %s14_s19, 6   ;;  %s15136_s16 = smov %s8080_s18 }
 0x500   : > { %s15137_s17 = smov %s15140_s20  ;;  %s15138_s18 = smov %s15144_s21 }
 0x501   :  { %13 = sbr.rel (!%p11_p0) target bundleno = 3 (0x3), region = 96 }

</bundles_post_ra>
